<compile_context>
chip_gen: v5e
topology: v5e:2x2
jax: 0.10.0
libtpu: 0.0.40
codegen_flags: <defaults>
</compile_context>

<pallas_src>
import math

import jax
import jax.numpy as jnp
from jax.experimental import pallas as pl
from jax.experimental.pallas import tpu as pltpu

F32 = jnp.float32
BF16 = jnp.bfloat16
BN_EPS = 1e-5

TM_MATMUL_MAX = 512               # max row tile for the dense matmul kernel
MIN_GRID_STEPS = 8                # >= 4 steps per TensorCore on v7x (2 TCs)
BAND_BYTES = 8 * 1024 * 1024      # in-kernel working-set budget for 3x3 bands
VMEM_LIMIT = 32 * 1024 * 1024     # scoped VMEM limit (<= physical on all gens)


def _round_up(x, m):
    return (x + m - 1) // m * m


def _cparams(*sem):
    return pltpu.CompilerParams(dimension_semantics=tuple(sem),
                                vmem_limit_bytes=VMEM_LIMIT)


# ----------------------------------------------------------------------------
# Kernel 1: dense matmul + shift (+ ReLU)  ->  1x1 convs / convT / heads
# ----------------------------------------------------------------------------
def _make_matmul_kernel(relu):
    def kernel(x_ref, w_ref, shift_ref, o_ref):
        y = jnp.dot(x_ref[...], w_ref[...], preferred_element_type=jnp.float32)
        y = y + shift_ref[...]
        if relu:
            y = jnp.maximum(y, 0.0)
        o_ref[...] = y.astype(o_ref.dtype)
    return kernel


def _pick_row_tile(M, max_tm=TM_MATMUL_MAX, min_steps=MIN_GRID_STEPS):
    if M <= 256:
        return M                               # full-extent block
    tm = _round_up(pl.cdiv(M, min_steps), 128)  # multiple of 128 rows
    return max(128, min(max_tm, tm))


def fused_matmul(x, w, shift, relu, out_dtype=BF16):
    """x: (M, K); w: (K, N); shift: (N,).  out = relu?(x @ w + shift)."""
    M, K = x.shape
    K2, N = w.shape
    assert K == K2
    tm = _pick_row_tile(M)
    grid = (pl.cdiv(M, tm),)
    return pl.pallas_call(
        _make_matmul_kernel(relu),
        out_shape=jax.ShapeDtypeStruct((M, N), out_dtype),
        grid=grid,
        in_specs=[
            pl.BlockSpec((tm, K), lambda i: (i, 0)),
            pl.BlockSpec((K, N), lambda i: (0, 0)),
            pl.BlockSpec((1, N), lambda i: (0, 0)),
        ],
        out_specs=pl.BlockSpec((tm, N), lambda i: (i, 0)),
        compiler_params=_cparams("parallel"),
    )(x.astype(BF16), w.astype(BF16), shift.reshape(1, N).astype(F32))


def conv1x1_fused(x, w, bias=None, relu=False, out_dtype=BF16):
    """1x1 conv (stride 1) via the matmul kernel.  x: NHWC, w: (Cout,Cin,1,1)."""
    B, H, W, Cin = x.shape
    Cout = w.shape[0]
    wm = w.reshape(Cout, Cin).T
    shift = jnp.zeros((Cout,), F32) if bias is None else bias.astype(F32)
    y = fused_matmul(x.reshape(B * H * W, Cin), wm, shift, relu, out_dtype)
    return y.reshape(B, H, W, Cout)


# ----------------------------------------------------------------------------
# Kernel 2: 1x1 conv with spatial stride folded into the BlockSpec index_map
# ----------------------------------------------------------------------------
def _make_strided_conv1x1_kernel(stride, w_out, cin):
    def kernel(x_ref, w_ref, b_ref, o_ref):
        row = x_ref[0, 0]                                 # (W, Cin): one strided row
        row = row.reshape(w_out, stride, cin)[:, 0, :]    # column subsampling
        y = jnp.dot(row, w_ref[...], preferred_element_type=jnp.float32)
        y = y + b_ref[...]
        o_ref[0, 0] = y.astype(o_ref.dtype)
    return kernel


def conv1x1_strided(x, w, bias, stride, out_dtype=BF16):
    """1x1 conv with stride; the DMA only fetches every `stride`-th input row."""
    B, H, W, Cin = x.shape
    Cout = w.shape[0]
    Ho, Wo = H // stride, W // stride
    wm = w.reshape(Cout, Cin).T.astype(BF16)
    b2 = bias.reshape(1, Cout).astype(F32)
    return pl.pallas_call(
        _make_strided_conv1x1_kernel(stride, Wo, Cin),
        out_shape=jax.ShapeDtypeStruct((B, Ho, Wo, Cout), out_dtype),
        grid=(B, Ho),
        in_specs=[
            pl.BlockSpec((1, 1, W, Cin), lambda b, i: (b, stride * i, 0, 0)),
            pl.BlockSpec((Cin, Cout), lambda b, i: (0, 0)),
            pl.BlockSpec((1, Cout), lambda b, i: (0, 0)),
        ],
        out_specs=pl.BlockSpec((1, 1, Wo, Cout), lambda b, i: (b, i, 0, 0)),
        compiler_params=_cparams("parallel", "parallel"),
    )(x.astype(BF16), wm, b2)


# ----------------------------------------------------------------------------
# Kernel 3: conv1 (1x1 + ReLU) with the scores head fused as a lane reduction
# ----------------------------------------------------------------------------
def _conv1_score_kernel(x_ref, w1_ref, ws_ref, bs_ref, y_ref, s_ref):
    y = jnp.dot(x_ref[...], w1_ref[...], preferred_element_type=jnp.float32)
    y = jnp.maximum(y, 0.0)                                   # gate(conv1(x))
    s = jnp.sum(y * ws_ref[...], axis=-1, keepdims=True) + bs_ref[...]
    y_ref[...] = y.astype(y_ref.dtype)
    s_ref[...] = s.astype(s_ref.dtype)


def conv1_with_score(x, w1, w_score, b_score):
    """y = relu(conv1(x)); scores = conv_score(y) — one pallas_call, two outputs."""
    B, H, W, Cin = x.shape
    Cout = w1.shape[0]
    M = B * H * W
    tm = _pick_row_tile(M)
    grid = (pl.cdiv(M, tm),)
    wm = w1.reshape(Cout, Cin).T.astype(BF16)
    ws = w_score.reshape(1, Cout).astype(F32)
    bs = b_score.reshape(1, 1).astype(F32)
    y, s = pl.pallas_call(
        _conv1_score_kernel,
        out_shape=(jax.ShapeDtypeStruct((M, Cout), BF16),
                   jax.ShapeDtypeStruct((M, 1), F32)),
        grid=grid,
        in_specs=[
            pl.BlockSpec((tm, Cin), lambda i: (i, 0)),
            pl.BlockSpec((Cin, Cout), lambda i: (0, 0)),
            pl.BlockSpec((1, Cout), lambda i: (0, 0)),
            pl.BlockSpec((1, 1), lambda i: (0, 0)),
        ],
        out_specs=(pl.BlockSpec((tm, Cout), lambda i: (i, 0)),
                   pl.BlockSpec((tm, 1), lambda i: (i, 0))),
        compiler_params=_cparams("parallel"),
    )(x.reshape(M, Cin).astype(BF16), wm, ws, bs)
    return y.reshape(B, H, W, Cout), s.reshape(B, H, W, 1)


# ----------------------------------------------------------------------------
# Kernel 4: 3x3 conv on a row band — single K=9*Cin MXU contraction,
#           fused BN shift (+ residual) (+ ReLU), valid-only output.
# ----------------------------------------------------------------------------
def _make_conv3x3_kernel(TH, W, Cin, Cout, relu, has_res):
    def kernel(*refs):
        if has_res:
            core_ref, h1_ref, h2_ref, w_ref, shift_ref, id_ref, o_ref = refs
        else:
            core_ref, h1_ref, h2_ref, w_ref, shift_ref, o_ref = refs
            id_ref = None
        # (TH+2, W+2, Cin) window: core band + 2 halo rows (fetched by their own
        # size-1 blocked specs so overlapping windows need no HBM copy).
        x = jnp.concatenate([core_ref[0], h1_ref[0], h2_ref[0]], axis=0)
        # 3 column-shifted views (one sublane shift per kw); kh taps are free
        # leading-dim slices.  All slices are statically in-bounds.
        shifted = [x[:, kw:kw + W, :] for kw in range(3)]
        taps = [shifted[kw][kh:kh + TH] for kh in range(3) for kw in range(3)]
        xcol = jnp.concatenate(taps, axis=-1).reshape(TH * W, 9 * Cin)
        y = jnp.dot(xcol, w_ref[...], preferred_element_type=jnp.float32)
        y = y + shift_ref[...]
        if has_res:
            y = y + id_ref[0].reshape(TH * W, Cout).astype(jnp.float32)
        if relu:
            y = jnp.maximum(y, 0.0)
        o_ref[0] = y.reshape(TH, W, Cout).astype(o_ref.dtype)
    return kernel


def _pick_band_height(H, W, Cin, Cout, B,
                      budget=BAND_BYTES, min_steps=MIN_GRID_STEPS):
    wp = W + 2

    def est(th):
        band = 2 * (th + 2) * wp * Cin * 2        # double-buffered input band
        shifted = 3 * (th + 2) * W * Cin * 2      # 3 column-shifted copies
        col = th * W * 9 * Cin * 2                # im2col tile (bf16)
        acc = th * W * Cout * 4                   # f32 accumulator
        outb = 2 * th * W * Cout * 2              # double-buffered output
        resb = 2 * th * W * Cout * 2              # optional residual band
        return band + shifted + col + acc + outb + resb

    divisors = [d for d in range(1, H + 1) if H % d == 0]
    fitting = [d for d in divisors if est(d) <= budget] or [1]
    # Prefer >= min_steps grid steps (keeps both v7x TCs pipelined) as long as
    # each band still has a non-trivial amount of work.
    stepped = [d for d in fitting if B * (H // d) >= min_steps and d * W >= 64]
    return max(stepped) if stepped else max(fitting)


def conv3x3_fused(x, w, scale, shift, relu=True, residual=None):
    """3x3 conv (stride 1, pad 1, no bias) with folded BN, optional fused
    residual add and ReLU.  x: NHWC; w: PyTorch layout (Cout, Cin, 3, 3)."""
    B, H, W, Cin = x.shape
    Cout = w.shape[0]
    TH = _pick_band_height(H, W, Cin, Cout, B)
    nb = H // TH
    Wp = W + 2

    xp = jnp.pad(x.astype(BF16), ((0, 0), (1, 1), (1, 1), (0, 0)))
    # fold BN scale into the weights; (Cout,Cin,3,3) -> (kh,kw,Cin,Cout) -> (9*Cin,Cout)
    wf = (jnp.transpose(w, (2, 3, 1, 0)).astype(F32)
          * scale.astype(F32)[None, None, None, :])
    wf = wf.reshape(9 * Cin, Cout).astype(BF16)
    shift2 = shift.reshape(1, Cout).astype(F32)

    in_specs = [
        pl.BlockSpec((1, TH, Wp, Cin), lambda b, i: (b, i, 0, 0)),
        pl.BlockSpec((1, 1, Wp, Cin), lambda b, i: (b, (i + 1) * TH, 0, 0)),
        pl.BlockSpec((1, 1, Wp, Cin), lambda b, i: (b, (i + 1) * TH + 1, 0, 0)),
        pl.BlockSpec((9 * Cin, Cout), lambda b, i: (0, 0)),
        pl.BlockSpec((1, Cout), lambda b, i: (0, 0)),
    ]
    args = [xp, xp, xp, wf, shift2]
    if residual is not None:
        in_specs.append(pl.BlockSpec((1, TH, W, Cout), lambda b, i: (b, i, 0, 0)))
        args.append(residual.astype(BF16))

    out = pl.pallas_call(
        _make_conv3x3_kernel(TH, W, Cin, Cout, relu, residual is not None),
        out_shape=jax.ShapeDtypeStruct((B, H, W, Cout), BF16),
        grid=(B, nb),
        in_specs=in_specs,
        out_specs=pl.BlockSpec((1, TH, W, Cout), lambda b, i: (b, i, 0, 0)),
        compiler_params=_cparams("parallel", "parallel"),
    )(*args)
    return out


# ----------------------------------------------------------------------------
# Other wrappers
# ----------------------------------------------------------------------------
def conv_transpose4_fused(x, w, bias):
    """ConvTranspose2d(kernel=4, stride=4, pad=0) as a single matmul.
    x: NHWC (B,h,w,Cin), w: PyTorch layout (Cin, Cout, 4, 4), bias: (Cout,)."""
    B, h, wd, Cin = x.shape
    Cout = w.shape[1]
    wr = jnp.transpose(w, (0, 2, 3, 1)).reshape(Cin, 16 * Cout)
    shift = jnp.tile(bias.astype(F32), 16)
    y = fused_matmul(x.reshape(B * h * wd, Cin), wr, shift, relu=False,
                     out_dtype=BF16)
    y = y.reshape(B, h, wd, 4, 4, Cout)
    y = jnp.transpose(y, (0, 1, 3, 2, 4, 5)).reshape(B, 4 * h, 4 * wd, Cout)
    return y


def maxpool(x, k):
    B, H, W, C = x.shape
    return x.reshape(B, H // k, k, W // k, k, C).max(axis=(2, 4))


# ----------------------------------------------------------------------------
# Blocks
# ----------------------------------------------------------------------------
def conv_block(x, p):
    x = conv3x3_fused(x, p["w1"], p["s1"], p["b1"], relu=True)
    x = conv3x3_fused(x, p["w2"], p["s2"], p["b2"], relu=True)
    return x


def res_block(x, p):
    identity = conv1x1_fused(x, p["dw"], bias=p["db"], relu=False)
    out = conv3x3_fused(x, p["w1"], p["s1"], p["b1"], relu=True)
    # BN shift + residual add + ReLU fused into the second conv's epilogue
    out = conv3x3_fused(out, p["w2"], p["s2"], p["b2"], relu=True,
                        residual=identity)
    return out


# ----------------------------------------------------------------------------
# EdgePoint forward
# ----------------------------------------------------------------------------
def edgepoint_forward(params, image_nchw):
    x = jnp.transpose(image_nchw, (0, 2, 3, 1))  # NCHW -> NHWC

    x1 = conv_block(x, params["block1"])
    x2 = maxpool(x1, 2)
    x2 = res_block(x2, params["block2"])
    x3 = maxpool(x2, 4)
    x3 = res_block(x3, params["block3"])
    x4 = maxpool(x3, 4)
    x4 = res_block(x4, params["block4"])

    # conv1 + ReLU with the scores head fused into the same kernel
    x1, scores = conv1_with_score(x1, params["conv1_w"],
                                  params["conv_score_w"], params["conv_score_b"])
    x2 = conv1x1_fused(x2, params["conv2_w"], relu=True)
    x3 = conv1x1_fused(x3, params["conv3_w"], relu=True)
    x4 = conv1x1_fused(x4, params["conv4_w"], relu=True)

    x1_desc = conv1x1_strided(x1, params["conv_8_w"], params["conv_8_b"], stride=8)
    x2_desc = conv1x1_strided(x2, params["conv_4_w"], params["conv_4_b"], stride=4)
    x4_desc = conv_transpose4_fused(x4, params["convT_w"], params["convT_b"])

    x1234 = jnp.concatenate([x1_desc, x2_desc, x3, x4_desc], axis=-1)
    descriptor_map = conv1x1_fused(x1234, params["convhead2_w"], relu=False,
                                   out_dtype=F32)

    scores_map = jnp.transpose(scores, (0, 3, 1, 2))           # NCHW, f32
    descriptor_map = jnp.transpose(descriptor_map, (0, 3, 1, 2))
    return scores_map, descriptor_map


# ----------------------------------------------------------------------------
# Deterministic parameter initialization (synthetic weights)
# ----------------------------------------------------------------------------
def _conv_w(key, cout, cin, kh, kw):
    fan_in = cin * kh * kw
    return (jax.random.normal(key, (cout, cin, kh, kw), F32)
            / math.sqrt(float(fan_in)))


def _bias(key, c):
    return 0.01 * jax.random.normal(key, (c,), F32)


def _bn_fold(key, c):
    k1, k2, k3, k4 = jax.random.split(key, 4)
    gamma = 1.0 + 0.1 * jax.random.normal(k1, (c,), F32)
    beta = 0.1 * jax.random.normal(k2, (c,), F32)
    mean = 0.1 * jax.random.normal(k3, (c,), F32)
    var = 1.0 + 0.1 * jnp.abs(jax.random.normal(k4, (c,), F32))
    scale = gamma * jax.lax.rsqrt(var + BN_EPS)
    shift = beta - mean * scale
    return scale, shift


def init_params(key):
    keys = iter(jax.random.split(key, 64))
    nk = lambda: next(keys)
    c1, c2, c3, c4, dim = 32, 64, 128, 128, 128

    def conv_block_params(cin, cout):
        s1, b1 = _bn_fold(nk(), cout)
        s2, b2 = _bn_fold(nk(), cout)
        return dict(w1=_conv_w(nk(), cout, cin, 3, 3), s1=s1, b1=b1,
                    w2=_conv_w(nk(), cout, cout, 3, 3), s2=s2, b2=b2)

    def res_block_params(cin, cout):
        p = conv_block_params(cin, cout)
        p["dw"] = _conv_w(nk(), cout, cin, 1, 1)
        p["db"] = _bias(nk(), cout)
        return p

    params = {
        "block1": conv_block_params(3, c1),
        "block2": res_block_params(c1, c2),
        "block3": res_block_params(c2, c3),
        "block4": res_block_params(c3, c4),
        "conv1_w": _conv_w(nk(), dim // 4, c1, 1, 1),
        "conv2_w": _conv_w(nk(), dim // 4, c2, 1, 1),
        "conv3_w": _conv_w(nk(), dim // 4, c3, 1, 1),
        "conv4_w": _conv_w(nk(), dim // 4, dim, 1, 1),
        "conv_8_w": _conv_w(nk(), dim // 4, dim // 4, 1, 1),
        "conv_8_b": _bias(nk(), dim // 4),
        "conv_4_w": _conv_w(nk(), dim // 4, dim // 4, 1, 1),
        "conv_4_b": _bias(nk(), dim // 4),
        # ConvTranspose2d weight layout (Cin, Cout, kh, kw)
        "convT_w": (jax.random.normal(nk(), (dim // 4, dim // 4, 4, 4), F32)
                    / math.sqrt(float(dim // 4 * 16))),
        "convT_b": _bias(nk(), dim // 4),
        "convhead2_w": _conv_w(nk(), dim, dim, 1, 1),
        "conv_score_w": _conv_w(nk(), 1, dim // 4, 1, 1),
        "conv_score_b": _bias(nk(), 1),
    }
    return params


# ----------------------------------------------------------------------------
if __name__ == "__main__":
    key = jax.random.PRNGKey(0)
    pkey, ikey = jax.random.split(key)
    params = init_params(pkey)

    # smallest spatial size compatible with the /32 pyramid
    B, C, H, W = 2, 3, 32, 32
    image = jax.random.normal(ikey, (B, C, H, W), F32)

    fwd = jax.jit(edgepoint_forward)
    scores_map, descriptor_map = fwd(params, image)
    jax.block_until_ready((scores_map, descriptor_map))

    assert scores_map.shape == (B, 1, H, W), scores_map.shape
    assert descriptor_map.shape == (B, 128, H // 8, W // 8), descriptor_map.shape
    assert jnp.all(jnp.isfinite(scores_map)) and jnp.all(jnp.isfinite(descriptor_map))
    print("KERNEL_OK")
</pallas_src>

<mosaic_0001>
module attributes {stable_mosaic.version = 11 : i64} {
  func.func @kernel(%arg0: i32, %arg1: i32, %arg2: memref<1x8x34x3xbf16, #tpu.memory_space<vmem>>, %arg3: memref<1x1x34x3xbf16, #tpu.memory_space<vmem>>, %arg4: memref<1x1x34x3xbf16, #tpu.memory_space<vmem>>, %arg5: memref<27x32xbf16, #tpu.memory_space<vmem>>, %arg6: memref<1x32xf32, #tpu.memory_space<vmem>>, %arg7: memref<1x8x32x32xbf16, #tpu.memory_space<vmem>>) attributes {dimension_semantics = [#tpu.dimension_semantics<parallel>, #tpu.dimension_semantics<parallel>], iteration_bounds = array<i64: 2, 4>, scalar_prefetch = 0 : i64, scratch_operands = 0 : i64, tpu.core_type = #tpu.core_type<tc>, window_params = [{transform_indices = @transform_0, window_bounds = array<i64: 1, 8, 34, 3>}, {transform_indices = @transform_1, window_bounds = array<i64: 1, 1, 34, 3>}, {transform_indices = @transform_2, window_bounds = array<i64: 1, 1, 34, 3>}, {pipeline_mode = #tpu.pipeline_mode<synchronous>, transform_indices = @transform_3, window_bounds = array<i64: 27, 32>}, {pipeline_mode = #tpu.pipeline_mode<synchronous>, transform_indices = @transform_4, window_bounds = array<i64: 1, 32>}, {transform_indices = @transform_5, window_bounds = array<i64: 1, 8, 32, 32>}]} {
    %c0 = arith.constant 0 : index
    %c0_0 = arith.constant 0 : index
    %c0_1 = arith.constant 0 : index
    %c0_2 = arith.constant 0 : index
    %0 = vector.load %arg2[%c0, %c0_0, %c0_1, %c0_2] : memref<1x8x34x3xbf16, #tpu.memory_space<vmem>>, vector<1x8x34x3xbf16>
    %1 = vector.shape_cast %0 : vector<1x8x34x3xbf16> to vector<8x34x3xbf16>
    %c0_3 = arith.constant 0 : index
    %c0_4 = arith.constant 0 : index
    %c0_5 = arith.constant 0 : index
    %c0_6 = arith.constant 0 : index
    %2 = vector.load %arg3[%c0_3, %c0_4, %c0_5, %c0_6] : memref<1x1x34x3xbf16, #tpu.memory_space<vmem>>, vector<1x1x34x3xbf16>
    %3 = vector.shape_cast %2 : vector<1x1x34x3xbf16> to vector<1x34x3xbf16>
    %c0_7 = arith.constant 0 : index
    %c0_8 = arith.constant 0 : index
    %c0_9 = arith.constant 0 : index
    %c0_10 = arith.constant 0 : index
    %4 = vector.load %arg4[%c0_7, %c0_8, %c0_9, %c0_10] : memref<1x1x34x3xbf16, #tpu.memory_space<vmem>>, vector<1x1x34x3xbf16>
    %5 = vector.shape_cast %4 : vector<1x1x34x3xbf16> to vector<1x34x3xbf16>
    %6 = tpu.concatenate %1, %3, %5 in 0 : vector<8x34x3xbf16>, vector<1x34x3xbf16>, vector<1x34x3xbf16> -> vector<10x34x3xbf16>
    %7 = vector.extract_strided_slice %6 {offsets = [0, 0, 0], sizes = [10, 32, 3], strides = [1, 1, 1]} : vector<10x34x3xbf16> to vector<10x32x3xbf16>
    %8 = vector.extract_strided_slice %6 {offsets = [0, 1, 0], sizes = [10, 32, 3], strides = [1, 1, 1]} : vector<10x34x3xbf16> to vector<10x32x3xbf16>
    %9 = vector.extract_strided_slice %6 {offsets = [0, 2, 0], sizes = [10, 32, 3], strides = [1, 1, 1]} : vector<10x34x3xbf16> to vector<10x32x3xbf16>
    %10 = vector.extract_strided_slice %7 {offsets = [0, 0, 0], sizes = [8, 32, 3], strides = [1, 1, 1]} : vector<10x32x3xbf16> to vector<8x32x3xbf16>
    %11 = vector.extract_strided_slice %8 {offsets = [0, 0, 0], sizes = [8, 32, 3], strides = [1, 1, 1]} : vector<10x32x3xbf16> to vector<8x32x3xbf16>
    %12 = vector.extract_strided_slice %9 {offsets = [0, 0, 0], sizes = [8, 32, 3], strides = [1, 1, 1]} : vector<10x32x3xbf16> to vector<8x32x3xbf16>
    %13 = vector.extract_strided_slice %7 {offsets = [1, 0, 0], sizes = [8, 32, 3], strides = [1, 1, 1]} : vector<10x32x3xbf16> to vector<8x32x3xbf16>
    %14 = vector.extract_strided_slice %8 {offsets = [1, 0, 0], sizes = [8, 32, 3], strides = [1, 1, 1]} : vector<10x32x3xbf16> to vector<8x32x3xbf16>
    %15 = vector.extract_strided_slice %9 {offsets = [1, 0, 0], sizes = [8, 32, 3], strides = [1, 1, 1]} : vector<10x32x3xbf16> to vector<8x32x3xbf16>
    %16 = vector.extract_strided_slice %7 {offsets = [2, 0, 0], sizes = [8, 32, 3], strides = [1, 1, 1]} : vector<10x32x3xbf16> to vector<8x32x3xbf16>
    %17 = vector.extract_strided_slice %8 {offsets = [2, 0, 0], sizes = [8, 32, 3], strides = [1, 1, 1]} : vector<10x32x3xbf16> to vector<8x32x3xbf16>
    %18 = vector.extract_strided_slice %9 {offsets = [2, 0, 0], sizes = [8, 32, 3], strides = [1, 1, 1]} : vector<10x32x3xbf16> to vector<8x32x3xbf16>
    %19 = tpu.concatenate %10, %11, %12, %13, %14, %15, %16, %17, %18 in 2 : vector<8x32x3xbf16>, vector<8x32x3xbf16>, vector<8x32x3xbf16>, vector<8x32x3xbf16>, vector<8x32x3xbf16>, vector<8x32x3xbf16>, vector<8x32x3xbf16>, vector<8x32x3xbf16>, vector<8x32x3xbf16> -> vector<8x32x27xbf16>
    %20 = vector.shape_cast %19 : vector<8x32x27xbf16> to vector<256x27xbf16>
    %c0_11 = arith.constant 0 : index
    %c0_12 = arith.constant 0 : index
    %21 = vector.load %arg5[%c0_11, %c0_12] : memref<27x32xbf16, #tpu.memory_space<vmem>>, vector<27x32xbf16>
    %cst = arith.constant dense<0.000000e+00> : vector<256x32xf32>
    %22 = tpu.matmul %20, %21, %cst {dimension_numbers = #tpu.dot_dimension_numbers<[1], [0], [0], [1], [0, 0, 1, 1], [], []>} : vector<256x27xbf16>, vector<27x32xbf16>, vector<256x32xf32> -> vector<256x32xf32>
    %c0_13 = arith.constant 0 : index
    %c0_14 = arith.constant 0 : index
    %23 = vector.load %arg6[%c0_13, %c0_14] : memref<1x32xf32, #tpu.memory_space<vmem>>, vector<1x32xf32>
    %24 = vector.broadcast %23 : vector<1x32xf32> to vector<256x32xf32>
    %25 = arith.addf %22, %24 : vector<256x32xf32>
    %cst_15 = arith.constant 0.000000e+00 : f32
    %26 = vector.broadcast %cst_15 : f32 to vector<256x32xf32>
    %27 = arith.maximumf %25, %26 : vector<256x32xf32>
    %28 = vector.shape_cast %27 : vector<256x32xf32> to vector<8x32x32xf32>
    %29 = arith.truncf %28 : vector<8x32x32xf32> to vector<8x32x32xbf16>
    %c0_16 = arith.constant 0 : index
    %c0_17 = arith.constant 0 : index
    %c0_18 = arith.constant 0 : index
    %c0_19 = arith.constant 0 : index
    %30 = vector.load %arg7[%c0_16, %c0_17, %c0_18, %c0_19] : memref<1x8x32x32xbf16, #tpu.memory_space<vmem>>, vector<1x8x32x32xbf16>
    %31 = vector.shape_cast %30 : vector<1x8x32x32xbf16> to vector<8x32x32xbf16>
    %32 = vector.shape_cast %29 : vector<8x32x32xbf16> to vector<1x8x32x32xbf16>
    tpu.vector_store %arg7[%c0_16, %c0_17, %c0_18, %c0_19], %32 {strides = array<i32>} : memref<1x8x32x32xbf16, #tpu.memory_space<vmem>>, vector<1x8x32x32xbf16>,
    return
  }
  func.func @transform_0(%arg0: i32, %arg1: i32) -> (i32, i32, i32, i32) {
    %c0_i32 = arith.constant 0 : i32
    %c0_i32_0 = arith.constant 0 : i32
    %c0_i32_1 = arith.constant 0 : i32
    return %arg0, %arg1, %c0_i32, %c0_i32_0 : i32, i32, i32, i32
  }
  func.func @transform_1(%arg0: i32, %arg1: i32) -> (i32, i32, i32, i32) {
    %c1_i32 = arith.constant 1 : i32
    %0 = arith.addi %arg1, %c1_i32 : i32
    %c8_i32 = arith.constant 8 : i32
    %1 = arith.muli %0, %c8_i32 : i32
    %c0_i32 = arith.constant 0 : i32
    %c0_i32_0 = arith.constant 0 : i32
    %c0_i32_1 = arith.constant 0 : i32
    return %arg0, %1, %c0_i32, %c0_i32_0 : i32, i32, i32, i32
  }
  func.func @transform_2(%arg0: i32, %arg1: i32) -> (i32, i32, i32, i32) {
    %c1_i32 = arith.constant 1 : i32
    %0 = arith.addi %arg1, %c1_i32 : i32
    %c8_i32 = arith.constant 8 : i32
    %1 = arith.muli %0, %c8_i32 : i32
    %c1_i32_0 = arith.constant 1 : i32
    %2 = arith.addi %1, %c1_i32_0 : i32
    %c0_i32 = arith.constant 0 : i32
    %c0_i32_1 = arith.constant 0 : i32
    %c0_i32_2 = arith.constant 0 : i32
    return %arg0, %2, %c0_i32, %c0_i32_1 : i32, i32, i32, i32
  }
  func.func @transform_3(%arg0: i32, %arg1: i32) -> (i32, i32) {
    %c0_i32 = arith.constant 0 : i32
    %c0_i32_0 = arith.constant 0 : i32
    %c0_i32_1 = arith.constant 0 : i32
    return %c0_i32, %c0_i32_0 : i32, i32
  }
  func.func @transform_4(%arg0: i32, %arg1: i32) -> (i32, i32) {
    %c0_i32 = arith.constant 0 : i32
    %c0_i32_0 = arith.constant 0 : i32
    %c0_i32_1 = arith.constant 0 : i32
    return %c0_i32, %c0_i32_0 : i32, i32
  }
  func.func @transform_5(%arg0: i32, %arg1: i32) -> (i32, i32, i32, i32) {
    %c0_i32 = arith.constant 0 : i32
    %c0_i32_0 = arith.constant 0 : i32
    %c0_i32_1 = arith.constant 0 : i32
    return %arg0, %arg1, %c0_i32, %c0_i32_0 : i32, i32, i32, i32
  }
}

module attributes {stable_mosaic.version = 11 : i64} {
  func.func @kernel(%arg0: i32, %arg1: i32, %arg2: memref<1x8x34x32xbf16, #tpu.memory_space<vmem>>, %arg3: memref<1x1x34x32xbf16, #tpu.memory_space<vmem>>, %arg4: memref<1x1x34x32xbf16, #tpu.memory_space<vmem>>, %arg5: memref<288x32xbf16, #tpu.memory_space<vmem>>, %arg6: memref<1x32xf32, #tpu.memory_space<vmem>>, %arg7: memref<1x8x32x32xbf16, #tpu.memory_space<vmem>>) attributes {dimension_semantics = [#tpu.dimension_semantics<parallel>, #tpu.dimension_semantics<parallel>], iteration_bounds = array<i64: 2, 4>, scalar_prefetch = 0 : i64, scratch_operands = 0 : i64, tpu.core_type = #tpu.core_type<tc>, window_params = [{transform_indices = @transform_0, window_bounds = array<i64: 1, 8, 34, 32>}, {transform_indices = @transform_1, window_bounds = array<i64: 1, 1, 34, 32>}, {transform_indices = @transform_2, window_bounds = array<i64: 1, 1, 34, 32>}, {pipeline_mode = #tpu.pipeline_mode<synchronous>, transform_indices = @transform_3, window_bounds = array<i64: 288, 32>}, {pipeline_mode = #tpu.pipeline_mode<synchronous>, transform_indices = @transform_4, window_bounds = array<i64: 1, 32>}, {transform_indices = @transform_5, window_bounds = array<i64: 1, 8, 32, 32>}]} {
    %c0 = arith.constant 0 : index
    %c0_0 = arith.constant 0 : index
    %c0_1 = arith.constant 0 : index
    %c0_2 = arith.constant 0 : index
    %0 = vector.load %arg2[%c0, %c0_0, %c0_1, %c0_2] : memref<1x8x34x32xbf16, #tpu.memory_space<vmem>>, vector<1x8x34x32xbf16>
    %1 = vector.shape_cast %0 : vector<1x8x34x32xbf16> to vector<8x34x32xbf16>
    %c0_3 = arith.constant 0 : index
    %c0_4 = arith.constant 0 : index
    %c0_5 = arith.constant 0 : index
    %c0_6 = arith.constant 0 : index
    %2 = vector.load %arg3[%c0_3, %c0_4, %c0_5, %c0_6] : memref<1x1x34x32xbf16, #tpu.memory_space<vmem>>, vector<1x1x34x32xbf16>
    %3 = vector.shape_cast %2 : vector<1x1x34x32xbf16> to vector<1x34x32xbf16>
    %c0_7 = arith.constant 0 : index
    %c0_8 = arith.constant 0 : index
    %c0_9 = arith.constant 0 : index
    %c0_10 = arith.constant 0 : index
    %4 = vector.load %arg4[%c0_7, %c0_8, %c0_9, %c0_10] : memref<1x1x34x32xbf16, #tpu.memory_space<vmem>>, vector<1x1x34x32xbf16>
    %5 = vector.shape_cast %4 : vector<1x1x34x32xbf16> to vector<1x34x32xbf16>
    %6 = tpu.concatenate %1, %3, %5 in 0 : vector<8x34x32xbf16>, vector<1x34x32xbf16>, vector<1x34x32xbf16> -> vector<10x34x32xbf16>
    %7 = vector.extract_strided_slice %6 {offsets = [0, 0, 0], sizes = [10, 32, 32], strides = [1, 1, 1]} : vector<10x34x32xbf16> to vector<10x32x32xbf16>
    %8 = vector.extract_strided_slice %6 {offsets = [0, 1, 0], sizes = [10, 32, 32], strides = [1, 1, 1]} : vector<10x34x32xbf16> to vector<10x32x32xbf16>
    %9 = vector.extract_strided_slice %6 {offsets = [0, 2, 0], sizes = [10, 32, 32], strides = [1, 1, 1]} : vector<10x34x32xbf16> to vector<10x32x32xbf16>
    %10 = vector.extract_strided_slice %7 {offsets = [0, 0, 0], sizes = [8, 32, 32], strides = [1, 1, 1]} : vector<10x32x32xbf16> to vector<8x32x32xbf16>
    %11 = vector.extract_strided_slice %8 {offsets = [0, 0, 0], sizes = [8, 32, 32], strides = [1, 1, 1]} : vector<10x32x32xbf16> to vector<8x32x32xbf16>
    %12 = vector.extract_strided_slice %9 {offsets = [0, 0, 0], sizes = [8, 32, 32], strides = [1, 1, 1]} : vector<10x32x32xbf16> to vector<8x32x32xbf16>
    %13 = vector.extract_strided_slice %7 {offsets = [1, 0, 0], sizes = [8, 32, 32], strides = [1, 1, 1]} : vector<10x32x32xbf16> to vector<8x32x32xbf16>
    %14 = vector.extract_strided_slice %8 {offsets = [1, 0, 0], sizes = [8, 32, 32], strides = [1, 1, 1]} : vector<10x32x32xbf16> to vector<8x32x32xbf16>
    %15 = vector.extract_strided_slice %9 {offsets = [1, 0, 0], sizes = [8, 32, 32], strides = [1, 1, 1]} : vector<10x32x32xbf16> to vector<8x32x32xbf16>
    %16 = vector.extract_strided_slice %7 {offsets = [2, 0, 0], sizes = [8, 32, 32], strides = [1, 1, 1]} : vector<10x32x32xbf16> to vector<8x32x32xbf16>
    %17 = vector.extract_strided_slice %8 {offsets = [2, 0, 0], sizes = [8, 32, 32], strides = [1, 1, 1]} : vector<10x32x32xbf16> to vector<8x32x32xbf16>
    %18 = vector.extract_strided_slice %9 {offsets = [2, 0, 0], sizes = [8, 32, 32], strides = [1, 1, 1]} : vector<10x32x32xbf16> to vector<8x32x32xbf16>
    %19 = tpu.concatenate %10, %11, %12, %13, %14, %15, %16, %17, %18 in 2 : vector<8x32x32xbf16>, vector<8x32x32xbf16>, vector<8x32x32xbf16>, vector<8x32x32xbf16>, vector<8x32x32xbf16>, vector<8x32x32xbf16>, vector<8x32x32xbf16>, vector<8x32x32xbf16>, vector<8x32x32xbf16> -> vector<8x32x288xbf16>
    %20 = vector.shape_cast %19 : vector<8x32x288xbf16> to vector<256x288xbf16>
    %c0_11 = arith.constant 0 : index
    %c0_12 = arith.constant 0 : index
    %21 = vector.load %arg5[%c0_11, %c0_12] : memref<288x32xbf16, #tpu.memory_space<vmem>>, vector<288x32xbf16>
    %cst = arith.constant dense<0.000000e+00> : vector<256x32xf32>
    %22 = tpu.matmul %20, %21, %cst {dimension_numbers = #tpu.dot_dimension_numbers<[1], [0], [0], [1], [0, 0, 1, 1], [], []>} : vector<256x288xbf16>, vector<288x32xbf16>, vector<256x32xf32> -> vector<256x32xf32>
    %c0_13 = arith.constant 0 : index
    %c0_14 = arith.constant 0 : index
    %23 = vector.load %arg6[%c0_13, %c0_14] : memref<1x32xf32, #tpu.memory_space<vmem>>, vector<1x32xf32>
    %24 = vector.broadcast %23 : vector<1x32xf32> to vector<256x32xf32>
    %25 = arith.addf %22, %24 : vector<256x32xf32>
    %cst_15 = arith.constant 0.000000e+00 : f32
    %26 = vector.broadcast %cst_15 : f32 to vector<256x32xf32>
    %27 = arith.maximumf %25, %26 : vector<256x32xf32>
    %28 = vector.shape_cast %27 : vector<256x32xf32> to vector<8x32x32xf32>
    %29 = arith.truncf %28 : vector<8x32x32xf32> to vector<8x32x32xbf16>
    %c0_16 = arith.constant 0 : index
    %c0_17 = arith.constant 0 : index
    %c0_18 = arith.constant 0 : index
    %c0_19 = arith.constant 0 : index
    %30 = vector.load %arg7[%c0_16, %c0_17, %c0_18, %c0_19] : memref<1x8x32x32xbf16, #tpu.memory_space<vmem>>, vector<1x8x32x32xbf16>
    %31 = vector.shape_cast %30 : vector<1x8x32x32xbf16> to vector<8x32x32xbf16>
    %32 = vector.shape_cast %29 : vector<8x32x32xbf16> to vector<1x8x32x32xbf16>
    tpu.vector_store %arg7[%c0_16, %c0_17, %c0_18, %c0_19], %32 {strides = array<i32>} : memref<1x8x32x32xbf16, #tpu.memory_space<vmem>>, vector<1x8x32x32xbf16>,
    return
  }
  func.func @transform_0(%arg0: i32, %arg1: i32) -> (i32, i32, i32, i32) {
    %c0_i32 = arith.constant 0 : i32
    %c0_i32_0 = arith.constant 0 : i32
    %c0_i32_1 = arith.constant 0 : i32
    return %arg0, %arg1, %c0_i32, %c0_i32_0 : i32, i32, i32, i32
  }
  func.func @transform_1(%arg0: i32, %arg1: i32) -> (i32, i32, i32, i32) {
    %c1_i32 = arith.constant 1 : i32
    %0 = arith.addi %arg1, %c1_i32 : i32
    %c8_i32 = arith.constant 8 : i32
    %1 = arith.muli %0, %c8_i32 : i32
    %c0_i32 = arith.constant 0 : i32
    %c0_i32_0 = arith.constant 0 : i32
    %c0_i32_1 = arith.constant 0 : i32
    return %arg0, %1, %c0_i32, %c0_i32_0 : i32, i32, i32, i32
  }
  func.func @transform_2(%arg0: i32, %arg1: i32) -> (i32, i32, i32, i32) {
    %c1_i32 = arith.constant 1 : i32
    %0 = arith.addi %arg1, %c1_i32 : i32
    %c8_i32 = arith.constant 8 : i32
    %1 = arith.muli %0, %c8_i32 : i32
    %c1_i32_0 = arith.constant 1 : i32
    %2 = arith.addi %1, %c1_i32_0 : i32
    %c0_i32 = arith.constant 0 : i32
    %c0_i32_1 = arith.constant 0 : i32
    %c0_i32_2 = arith.constant 0 : i32
    return %arg0, %2, %c0_i32, %c0_i32_1 : i32, i32, i32, i32
  }
  func.func @transform_3(%arg0: i32, %arg1: i32) -> (i32, i32) {
    %c0_i32 = arith.constant 0 : i32
    %c0_i32_0 = arith.constant 0 : i32
    %c0_i32_1 = arith.constant 0 : i32
    return %c0_i32, %c0_i32_0 : i32, i32
  }
  func.func @transform_4(%arg0: i32, %arg1: i32) -> (i32, i32) {
    %c0_i32 = arith.constant 0 : i32
    %c0_i32_0 = arith.constant 0 : i32
    %c0_i32_1 = arith.constant 0 : i32
    return %c0_i32, %c0_i32_0 : i32, i32
  }
  func.func @transform_5(%arg0: i32, %arg1: i32) -> (i32, i32, i32, i32) {
    %c0_i32 = arith.constant 0 : i32
    %c0_i32_0 = arith.constant 0 : i32
    %c0_i32_1 = arith.constant 0 : i32
    return %arg0, %arg1, %c0_i32, %c0_i32_0 : i32, i32, i32, i32
  }
}

module attributes {stable_mosaic.version = 11 : i64} {
  func.func @_conv1_score_kernel(%arg0: i32, %arg1: memref<256x32xbf16, #tpu.memory_space<vmem>>, %arg2: memref<32x32xbf16, #tpu.memory_space<vmem>>, %arg3: memref<1x32xf32, #tpu.memory_space<vmem>>, %arg4: memref<1x1xf32, #tpu.memory_space<vmem>>, %arg5: memref<256x32xbf16, #tpu.memory_space<vmem>>, %arg6: memref<256x1xf32, #tpu.memory_space<vmem>>) attributes {dimension_semantics = [#tpu.dimension_semantics<parallel>], iteration_bounds = array<i64: 8>, scalar_prefetch = 0 : i64, scratch_operands = 0 : i64, tpu.core_type = #tpu.core_type<tc>, window_params = [{transform_indices = @transform_0, window_bounds = array<i64: 256, 32>}, {pipeline_mode = #tpu.pipeline_mode<synchronous>, transform_indices = @transform_1, window_bounds = array<i64: 32, 32>}, {pipeline_mode = #tpu.pipeline_mode<synchronous>, transform_indices = @transform_2, window_bounds = array<i64: 1, 32>}, {pipeline_mode = #tpu.pipeline_mode<synchronous>, transform_indices = @transform_3, window_bounds = array<i64: 1, 1>}, {transform_indices = @transform_4, window_bounds = array<i64: 256, 32>}, {transform_indices = @transform_5, window_bounds = array<i64: 256, 1>}]} {
    %c0 = arith.constant 0 : index
    %c0_0 = arith.constant 0 : index
    %0 = vector.load %arg1[%c0, %c0_0] : memref<256x32xbf16, #tpu.memory_space<vmem>>, vector<256x32xbf16>
    %c0_1 = arith.constant 0 : index
    %c0_2 = arith.constant 0 : index
    %1 = vector.load %arg2[%c0_1, %c0_2] : memref<32x32xbf16, #tpu.memory_space<vmem>>, vector<32x32xbf16>
    %cst = arith.constant dense<0.000000e+00> : vector<256x32xf32>
    %2 = tpu.matmul %0, %1, %cst {dimension_numbers = #tpu.dot_dimension_numbers<[1], [0], [0], [1], [0, 0, 1, 1], [], []>} : vector<256x32xbf16>, vector<32x32xbf16>, vector<256x32xf32> -> vector<256x32xf32>
    %cst_3 = arith.constant 0.000000e+00 : f32
    %3 = vector.broadcast %cst_3 : f32 to vector<256x32xf32>
    %4 = arith.maximumf %2, %3 : vector<256x32xf32>
    %c0_4 = arith.constant 0 : index
    %c0_5 = arith.constant 0 : index
    %5 = vector.load %arg3[%c0_4, %c0_5] : memref<1x32xf32, #tpu.memory_space<vmem>>, vector<1x32xf32>
    %6 = vector.broadcast %5 : vector<1x32xf32> to vector<256x32xf32>
    %7 = arith.mulf %4, %6 : vector<256x32xf32>
    %cst_6 = arith.constant dense<0.000000e+00> : vector<256xf32>
    %8 = vector.multi_reduction <add>, %7, %cst_6 [1] : vector<256x32xf32> to vector<256xf32>
    %9 = vector.shape_cast %8 : vector<256xf32> to vector<256x1xf32>
    %c0_7 = arith.constant 0 : index
    %c0_8 = arith.constant 0 : index
    %10 = vector.load %arg4[%c0_7, %c0_8] : memref<1x1xf32, #tpu.memory_space<vmem>>, vector<1x1xf32>
    %11 = vector.broadcast %10 : vector<1x1xf32> to vector<256x1xf32>
    %12 = arith.addf %9, %11 : vector<256x1xf32>
    %13 = arith.truncf %4 : vector<256x32xf32> to vector<256x32xbf16>
    %c0_9 = arith.constant 0 : index
    %c0_10 = arith.constant 0 : index
    %14 = vector.load %arg5[%c0_9, %c0_10] : memref<256x32xbf16, #tpu.memory_space<vmem>>, vector<256x32xbf16>
    tpu.vector_store %arg5[%c0_9, %c0_10], %13 {strides = array<i32>} : memref<256x32xbf16, #tpu.memory_space<vmem>>, vector<256x32xbf16>,
    %c0_11 = arith.constant 0 : index
    %c0_12 = arith.constant 0 : index
    %15 = vector.load %arg6[%c0_11, %c0_12] : memref<256x1xf32, #tpu.memory_space<vmem>>, vector<256x1xf32>
    tpu.vector_store %arg6[%c0_11, %c0_12], %12 {strides = array<i32>} : memref<256x1xf32, #tpu.memory_space<vmem>>, vector<256x1xf32>,
    return
  }
  func.func @transform_0(%arg0: i32) -> (i32, i32) {
    %c0_i32 = arith.constant 0 : i32
    %c0_i32_0 = arith.constant 0 : i32
    return %arg0, %c0_i32 : i32, i32
  }
  func.func @transform_1(%arg0: i32) -> (i32, i32) {
    %c0_i32 = arith.constant 0 : i32
    %c0_i32_0 = arith.constant 0 : i32
    %c0_i32_1 = arith.constant 0 : i32
    return %c0_i32, %c0_i32_0 : i32, i32
  }
  func.func @transform_2(%arg0: i32) -> (i32, i32) {
    %c0_i32 = arith.constant 0 : i32
    %c0_i32_0 = arith.constant 0 : i32
    %c0_i32_1 = arith.constant 0 : i32
    return %c0_i32, %c0_i32_0 : i32, i32
  }
  func.func @transform_3(%arg0: i32) -> (i32, i32) {
    %c0_i32 = arith.constant 0 : i32
    %c0_i32_0 = arith.constant 0 : i32
    %c0_i32_1 = arith.constant 0 : i32
    return %c0_i32, %c0_i32_0 : i32, i32
  }
  func.func @transform_4(%arg0: i32) -> (i32, i32) {
    %c0_i32 = arith.constant 0 : i32
    %c0_i32_0 = arith.constant 0 : i32
    return %arg0, %c0_i32 : i32, i32
  }
  func.func @transform_5(%arg0: i32) -> (i32, i32) {
    %c0_i32 = arith.constant 0 : i32
    %c0_i32_0 = arith.constant 0 : i32
    return %arg0, %c0_i32 : i32, i32
  }
}

module attributes {stable_mosaic.version = 11 : i64} {
  func.func @kernel(%arg0: i32, %arg1: i32, %arg2: memref<1x4x18x32xbf16, #tpu.memory_space<vmem>>, %arg3: memref<1x1x18x32xbf16, #tpu.memory_space<vmem>>, %arg4: memref<1x1x18x32xbf16, #tpu.memory_space<vmem>>, %arg5: memref<288x64xbf16, #tpu.memory_space<vmem>>, %arg6: memref<1x64xf32, #tpu.memory_space<vmem>>, %arg7: memref<1x4x16x64xbf16, #tpu.memory_space<vmem>>) attributes {dimension_semantics = [#tpu.dimension_semantics<parallel>, #tpu.dimension_semantics<parallel>], iteration_bounds = array<i64: 2, 4>, scalar_prefetch = 0 : i64, scratch_operands = 0 : i64, tpu.core_type = #tpu.core_type<tc>, window_params = [{transform_indices = @transform_0, window_bounds = array<i64: 1, 4, 18, 32>}, {transform_indices = @transform_1, window_bounds = array<i64: 1, 1, 18, 32>}, {transform_indices = @transform_2, window_bounds = array<i64: 1, 1, 18, 32>}, {pipeline_mode = #tpu.pipeline_mode<synchronous>, transform_indices = @transform_3, window_bounds = array<i64: 288, 64>}, {pipeline_mode = #tpu.pipeline_mode<synchronous>, transform_indices = @transform_4, window_bounds = array<i64: 1, 64>}, {transform_indices = @transform_5, window_bounds = array<i64: 1, 4, 16, 64>}]} {
    %c0 = arith.constant 0 : index
    %c0_0 = arith.constant 0 : index
    %c0_1 = arith.constant 0 : index
    %c0_2 = arith.constant 0 : index
    %0 = vector.load %arg2[%c0, %c0_0, %c0_1, %c0_2] : memref<1x4x18x32xbf16, #tpu.memory_space<vmem>>, vector<1x4x18x32xbf16>
    %1 = vector.shape_cast %0 : vector<1x4x18x32xbf16> to vector<4x18x32xbf16>
    %c0_3 = arith.constant 0 : index
    %c0_4 = arith.constant 0 : index
    %c0_5 = arith.constant 0 : index
    %c0_6 = arith.constant 0 : index
    %2 = vector.load %arg3[%c0_3, %c0_4, %c0_5, %c0_6] : memref<1x1x18x32xbf16, #tpu.memory_space<vmem>>, vector<1x1x18x32xbf16>
    %3 = vector.shape_cast %2 : vector<1x1x18x32xbf16> to vector<1x18x32xbf16>
    %c0_7 = arith.constant 0 : index
    %c0_8 = arith.constant 0 : index
    %c0_9 = arith.constant 0 : index
    %c0_10 = arith.constant 0 : index
    %4 = vector.load %arg4[%c0_7, %c0_8, %c0_9, %c0_10] : memref<1x1x18x32xbf16, #tpu.memory_space<vmem>>, vector<1x1x18x32xbf16>
    %5 = vector.shape_cast %4 : vector<1x1x18x32xbf16> to vector<1x18x32xbf16>
    %6 = tpu.concatenate %1, %3, %5 in 0 : vector<4x18x32xbf16>, vector<1x18x32xbf16>, vector<1x18x32xbf16> -> vector<6x18x32xbf16>
    %7 = vector.extract_strided_slice %6 {offsets = [0, 0, 0], sizes = [6, 16, 32], strides = [1, 1, 1]} : vector<6x18x32xbf16> to vector<6x16x32xbf16>
    %8 = vector.extract_strided_slice %6 {offsets = [0, 1, 0], sizes = [6, 16, 32], strides = [1, 1, 1]} : vector<6x18x32xbf16> to vector<6x16x32xbf16>
    %9 = vector.extract_strided_slice %6 {offsets = [0, 2, 0], sizes = [6, 16, 32], strides = [1, 1, 1]} : vector<6x18x32xbf16> to vector<6x16x32xbf16>
    %10 = vector.extract_strided_slice %7 {offsets = [0, 0, 0], sizes = [4, 16, 32], strides = [1, 1, 1]} : vector<6x16x32xbf16> to vector<4x16x32xbf16>
    %11 = vector.extract_strided_slice %8 {offsets = [0, 0, 0], sizes = [4, 16, 32], strides = [1, 1, 1]} : vector<6x16x32xbf16> to vector<4x16x32xbf16>
    %12 = vector.extract_strided_slice %9 {offsets = [0, 0, 0], sizes = [4, 16, 32], strides = [1, 1, 1]} : vector<6x16x32xbf16> to vector<4x16x32xbf16>
    %13 = vector.extract_strided_slice %7 {offsets = [1, 0, 0], sizes = [4, 16, 32], strides = [1, 1, 1]} : vector<6x16x32xbf16> to vector<4x16x32xbf16>
    %14 = vector.extract_strided_slice %8 {offsets = [1, 0, 0], sizes = [4, 16, 32], strides = [1, 1, 1]} : vector<6x16x32xbf16> to vector<4x16x32xbf16>
    %15 = vector.extract_strided_slice %9 {offsets = [1, 0, 0], sizes = [4, 16, 32], strides = [1, 1, 1]} : vector<6x16x32xbf16> to vector<4x16x32xbf16>
    %16 = vector.extract_strided_slice %7 {offsets = [2, 0, 0], sizes = [4, 16, 32], strides = [1, 1, 1]} : vector<6x16x32xbf16> to vector<4x16x32xbf16>
    %17 = vector.extract_strided_slice %8 {offsets = [2, 0, 0], sizes = [4, 16, 32], strides = [1, 1, 1]} : vector<6x16x32xbf16> to vector<4x16x32xbf16>
    %18 = vector.extract_strided_slice %9 {offsets = [2, 0, 0], sizes = [4, 16, 32], strides = [1, 1, 1]} : vector<6x16x32xbf16> to vector<4x16x32xbf16>
    %19 = tpu.concatenate %10, %11, %12, %13, %14, %15, %16, %17, %18 in 2 : vector<4x16x32xbf16>, vector<4x16x32xbf16>, vector<4x16x32xbf16>, vector<4x16x32xbf16>, vector<4x16x32xbf16>, vector<4x16x32xbf16>, vector<4x16x32xbf16>, vector<4x16x32xbf16>, vector<4x16x32xbf16> -> vector<4x16x288xbf16>
    %20 = vector.shape_cast %19 : vector<4x16x288xbf16> to vector<64x288xbf16>
    %c0_11 = arith.constant 0 : index
    %c0_12 = arith.constant 0 : index
    %21 = vector.load %arg5[%c0_11, %c0_12] : memref<288x64xbf16, #tpu.memory_space<vmem>>, vector<288x64xbf16>
    %cst = arith.constant dense<0.000000e+00> : vector<64x64xf32>
    %22 = tpu.matmul %20, %21, %cst {dimension_numbers = #tpu.dot_dimension_numbers<[1], [0], [0], [1], [0, 0, 1, 1], [], []>} : vector<64x288xbf16>, vector<288x64xbf16>, vector<64x64xf32> -> vector<64x64xf32>
    %c0_13 = arith.constant 0 : index
    %c0_14 = arith.constant 0 : index
    %23 = vector.load %arg6[%c0_13, %c0_14] : memref<1x64xf32, #tpu.memory_space<vmem>>, vector<1x64xf32>
    %24 = vector.broadcast %23 : vector<1x64xf32> to vector<64x64xf32>
    %25 = arith.addf %22, %24 : vector<64x64xf32>
    %cst_15 = arith.constant 0.000000e+00 : f32
    %26 = vector.broadcast %cst_15 : f32 to vector<64x64xf32>
    %27 = arith.maximumf %25, %26 : vector<64x64xf32>
    %28 = vector.shape_cast %27 : vector<64x64xf32> to vector<4x16x64xf32>
    %29 = arith.truncf %28 : vector<4x16x64xf32> to vector<4x16x64xbf16>
    %c0_16 = arith.constant 0 : index
    %c0_17 = arith.constant 0 : index
    %c0_18 = arith.constant 0 : index
    %c0_19 = arith.constant 0 : index
    %30 = vector.load %arg7[%c0_16, %c0_17, %c0_18, %c0_19] : memref<1x4x16x64xbf16, #tpu.memory_space<vmem>>, vector<1x4x16x64xbf16>
    %31 = vector.shape_cast %30 : vector<1x4x16x64xbf16> to vector<4x16x64xbf16>
    %32 = vector.shape_cast %29 : vector<4x16x64xbf16> to vector<1x4x16x64xbf16>
    tpu.vector_store %arg7[%c0_16, %c0_17, %c0_18, %c0_19], %32 {strides = array<i32>} : memref<1x4x16x64xbf16, #tpu.memory_space<vmem>>, vector<1x4x16x64xbf16>,
    return
  }
  func.func @transform_0(%arg0: i32, %arg1: i32) -> (i32, i32, i32, i32) {
    %c0_i32 = arith.constant 0 : i32
    %c0_i32_0 = arith.constant 0 : i32
    %c0_i32_1 = arith.constant 0 : i32
    return %arg0, %arg1, %c0_i32, %c0_i32_0 : i32, i32, i32, i32
  }
  func.func @transform_1(%arg0: i32, %arg1: i32) -> (i32, i32, i32, i32) {
    %c1_i32 = arith.constant 1 : i32
    %0 = arith.addi %arg1, %c1_i32 : i32
    %c4_i32 = arith.constant 4 : i32
    %1 = arith.muli %0, %c4_i32 : i32
    %c0_i32 = arith.constant 0 : i32
    %c0_i32_0 = arith.constant 0 : i32
    %c0_i32_1 = arith.constant 0 : i32
    return %arg0, %1, %c0_i32, %c0_i32_0 : i32, i32, i32, i32
  }
  func.func @transform_2(%arg0: i32, %arg1: i32) -> (i32, i32, i32, i32) {
    %c1_i32 = arith.constant 1 : i32
    %0 = arith.addi %arg1, %c1_i32 : i32
    %c4_i32 = arith.constant 4 : i32
    %1 = arith.muli %0, %c4_i32 : i32
    %c1_i32_0 = arith.constant 1 : i32
    %2 = arith.addi %1, %c1_i32_0 : i32
    %c0_i32 = arith.constant 0 : i32
    %c0_i32_1 = arith.constant 0 : i32
    %c0_i32_2 = arith.constant 0 : i32
    return %arg0, %2, %c0_i32, %c0_i32_1 : i32, i32, i32, i32
  }
  func.func @transform_3(%arg0: i32, %arg1: i32) -> (i32, i32) {
    %c0_i32 = arith.constant 0 : i32
    %c0_i32_0 = arith.constant 0 : i32
    %c0_i32_1 = arith.constant 0 : i32
    return %c0_i32, %c0_i32_0 : i32, i32
  }
  func.func @transform_4(%arg0: i32, %arg1: i32) -> (i32, i32) {
    %c0_i32 = arith.constant 0 : i32
    %c0_i32_0 = arith.constant 0 : i32
    %c0_i32_1 = arith.constant 0 : i32
    return %c0_i32, %c0_i32_0 : i32, i32
  }
  func.func @transform_5(%arg0: i32, %arg1: i32) -> (i32, i32, i32, i32) {
    %c0_i32 = arith.constant 0 : i32
    %c0_i32_0 = arith.constant 0 : i32
    %c0_i32_1 = arith.constant 0 : i32
    return %arg0, %arg1, %c0_i32, %c0_i32_0 : i32, i32, i32, i32
  }
}

module attributes {stable_mosaic.version = 11 : i64} {
  func.func @kernel(%arg0: i32, %arg1: memref<128x32xbf16, #tpu.memory_space<vmem>>, %arg2: memref<32x64xbf16, #tpu.memory_space<vmem>>, %arg3: memref<1x64xf32, #tpu.memory_space<vmem>>, %arg4: memref<128x64xbf16, #tpu.memory_space<vmem>>) attributes {dimension_semantics = [#tpu.dimension_semantics<parallel>], iteration_bounds = array<i64: 4>, scalar_prefetch = 0 : i64, scratch_operands = 0 : i64, tpu.core_type = #tpu.core_type<tc>, window_params = [{transform_indices = @transform_0, window_bounds = array<i64: 128, 32>}, {pipeline_mode = #tpu.pipeline_mode<synchronous>, transform_indices = @transform_1, window_bounds = array<i64: 32, 64>}, {pipeline_mode = #tpu.pipeline_mode<synchronous>, transform_indices = @transform_2, window_bounds = array<i64: 1, 64>}, {transform_indices = @transform_3, window_bounds = array<i64: 128, 64>}]} {
    %c0 = arith.constant 0 : index
    %c0_0 = arith.constant 0 : index
    %0 = vector.load %arg1[%c0, %c0_0] : memref<128x32xbf16, #tpu.memory_space<vmem>>, vector<128x32xbf16>
    %c0_1 = arith.constant 0 : index
    %c0_2 = arith.constant 0 : index
    %1 = vector.load %arg2[%c0_1, %c0_2] : memref<32x64xbf16, #tpu.memory_space<vmem>>, vector<32x64xbf16>
    %cst = arith.constant dense<0.000000e+00> : vector<128x64xf32>
    %2 = tpu.matmul %0, %1, %cst {dimension_numbers = #tpu.dot_dimension_numbers<[1], [0], [0], [1], [0, 0, 1, 1], [], []>} : vector<128x32xbf16>, vector<32x64xbf16>, vector<128x64xf32> -> vector<128x64xf32>
    %c0_3 = arith.constant 0 : index
    %c0_4 = arith.constant 0 : index
    %3 = vector.load %arg3[%c0_3, %c0_4] : memref<1x64xf32, #tpu.memory_space<vmem>>, vector<1x64xf32>
    %4 = vector.broadcast %3 : vector<1x64xf32> to vector<128x64xf32>
    %5 = arith.addf %2, %4 : vector<128x64xf32>
    %6 = arith.truncf %5 : vector<128x64xf32> to vector<128x64xbf16>
    %c0_5 = arith.constant 0 : index
    %c0_6 = arith.constant 0 : index
    %7 = vector.load %arg4[%c0_5, %c0_6] : memref<128x64xbf16, #tpu.memory_space<vmem>>, vector<128x64xbf16>
    tpu.vector_store %arg4[%c0_5, %c0_6], %6 {strides = array<i32>} : memref<128x64xbf16, #tpu.memory_space<vmem>>, vector<128x64xbf16>,
    return
  }
  func.func @transform_0(%arg0: i32) -> (i32, i32) {
    %c0_i32 = arith.constant 0 : i32
    %c0_i32_0 = arith.constant 0 : i32
    return %arg0, %c0_i32 : i32, i32
  }
  func.func @transform_1(%arg0: i32) -> (i32, i32) {
    %c0_i32 = arith.constant 0 : i32
    %c0_i32_0 = arith.constant 0 : i32
    %c0_i32_1 = arith.constant 0 : i32
    return %c0_i32, %c0_i32_0 : i32, i32
  }
  func.func @transform_2(%arg0: i32) -> (i32, i32) {
    %c0_i32 = arith.constant 0 : i32
    %c0_i32_0 = arith.constant 0 : i32
    %c0_i32_1 = arith.constant 0 : i32
    return %c0_i32, %c0_i32_0 : i32, i32
  }
  func.func @transform_3(%arg0: i32) -> (i32, i32) {
    %c0_i32 = arith.constant 0 : i32
    %c0_i32_0 = arith.constant 0 : i32
    return %arg0, %c0_i32 : i32, i32
  }
}

module attributes {stable_mosaic.version = 11 : i64} {
  func.func @kernel(%arg0: i32, %arg1: i32, %arg2: memref<1x4x18x64xbf16, #tpu.memory_space<vmem>>, %arg3: memref<1x1x18x64xbf16, #tpu.memory_space<vmem>>, %arg4: memref<1x1x18x64xbf16, #tpu.memory_space<vmem>>, %arg5: memref<576x64xbf16, #tpu.memory_space<vmem>>, %arg6: memref<1x64xf32, #tpu.memory_space<vmem>>, %arg7: memref<1x4x16x64xbf16, #tpu.memory_space<vmem>>, %arg8: memref<1x4x16x64xbf16, #tpu.memory_space<vmem>>) attributes {dimension_semantics = [#tpu.dimension_semantics<parallel>, #tpu.dimension_semantics<parallel>], iteration_bounds = array<i64: 2, 4>, scalar_prefetch = 0 : i64, scratch_operands = 0 : i64, tpu.core_type = #tpu.core_type<tc>, window_params = [{transform_indices = @transform_0, window_bounds = array<i64: 1, 4, 18, 64>}, {transform_indices = @transform_1, window_bounds = array<i64: 1, 1, 18, 64>}, {transform_indices = @transform_2, window_bounds = array<i64: 1, 1, 18, 64>}, {pipeline_mode = #tpu.pipeline_mode<synchronous>, transform_indices = @transform_3, window_bounds = array<i64: 576, 64>}, {pipeline_mode = #tpu.pipeline_mode<synchronous>, transform_indices = @transform_4, window_bounds = array<i64: 1, 64>}, {transform_indices = @transform_5, window_bounds = array<i64: 1, 4, 16, 64>}, {transform_indices = @transform_6, window_bounds = array<i64: 1, 4, 16, 64>}]} {
    %c0 = arith.constant 0 : index
    %c0_0 = arith.constant 0 : index
    %c0_1 = arith.constant 0 : index
    %c0_2 = arith.constant 0 : index
    %0 = vector.load %arg2[%c0, %c0_0, %c0_1, %c0_2] : memref<1x4x18x64xbf16, #tpu.memory_space<vmem>>, vector<1x4x18x64xbf16>
    %1 = vector.shape_cast %0 : vector<1x4x18x64xbf16> to vector<4x18x64xbf16>
    %c0_3 = arith.constant 0 : index
    %c0_4 = arith.constant 0 : index
    %c0_5 = arith.constant 0 : index
    %c0_6 = arith.constant 0 : index
    %2 = vector.load %arg3[%c0_3, %c0_4, %c0_5, %c0_6] : memref<1x1x18x64xbf16, #tpu.memory_space<vmem>>, vector<1x1x18x64xbf16>
    %3 = vector.shape_cast %2 : vector<1x1x18x64xbf16> to vector<1x18x64xbf16>
    %c0_7 = arith.constant 0 : index
    %c0_8 = arith.constant 0 : index
    %c0_9 = arith.constant 0 : index
    %c0_10 = arith.constant 0 : index
    %4 = vector.load %arg4[%c0_7, %c0_8, %c0_9, %c0_10] : memref<1x1x18x64xbf16, #tpu.memory_space<vmem>>, vector<1x1x18x64xbf16>
    %5 = vector.shape_cast %4 : vector<1x1x18x64xbf16> to vector<1x18x64xbf16>
    %6 = tpu.concatenate %1, %3, %5 in 0 : vector<4x18x64xbf16>, vector<1x18x64xbf16>, vector<1x18x64xbf16> -> vector<6x18x64xbf16>
    %7 = vector.extract_strided_slice %6 {offsets = [0, 0, 0], sizes = [6, 16, 64], strides = [1, 1, 1]} : vector<6x18x64xbf16> to vector<6x16x64xbf16>
    %8 = vector.extract_strided_slice %6 {offsets = [0, 1, 0], sizes = [6, 16, 64], strides = [1, 1, 1]} : vector<6x18x64xbf16> to vector<6x16x64xbf16>
    %9 = vector.extract_strided_slice %6 {offsets = [0, 2, 0], sizes = [6, 16, 64], strides = [1, 1, 1]} : vector<6x18x64xbf16> to vector<6x16x64xbf16>
    %10 = vector.extract_strided_slice %7 {offsets = [0, 0, 0], sizes = [4, 16, 64], strides = [1, 1, 1]} : vector<6x16x64xbf16> to vector<4x16x64xbf16>
    %11 = vector.extract_strided_slice %8 {offsets = [0, 0, 0], sizes = [4, 16, 64], strides = [1, 1, 1]} : vector<6x16x64xbf16> to vector<4x16x64xbf16>
    %12 = vector.extract_strided_slice %9 {offsets = [0, 0, 0], sizes = [4, 16, 64], strides = [1, 1, 1]} : vector<6x16x64xbf16> to vector<4x16x64xbf16>
    %13 = vector.extract_strided_slice %7 {offsets = [1, 0, 0], sizes = [4, 16, 64], strides = [1, 1, 1]} : vector<6x16x64xbf16> to vector<4x16x64xbf16>
    %14 = vector.extract_strided_slice %8 {offsets = [1, 0, 0], sizes = [4, 16, 64], strides = [1, 1, 1]} : vector<6x16x64xbf16> to vector<4x16x64xbf16>
    %15 = vector.extract_strided_slice %9 {offsets = [1, 0, 0], sizes = [4, 16, 64], strides = [1, 1, 1]} : vector<6x16x64xbf16> to vector<4x16x64xbf16>
    %16 = vector.extract_strided_slice %7 {offsets = [2, 0, 0], sizes = [4, 16, 64], strides = [1, 1, 1]} : vector<6x16x64xbf16> to vector<4x16x64xbf16>
    %17 = vector.extract_strided_slice %8 {offsets = [2, 0, 0], sizes = [4, 16, 64], strides = [1, 1, 1]} : vector<6x16x64xbf16> to vector<4x16x64xbf16>
    %18 = vector.extract_strided_slice %9 {offsets = [2, 0, 0], sizes = [4, 16, 64], strides = [1, 1, 1]} : vector<6x16x64xbf16> to vector<4x16x64xbf16>
    %19 = tpu.concatenate %10, %11, %12, %13, %14, %15, %16, %17, %18 in 2 : vector<4x16x64xbf16>, vector<4x16x64xbf16>, vector<4x16x64xbf16>, vector<4x16x64xbf16>, vector<4x16x64xbf16>, vector<4x16x64xbf16>, vector<4x16x64xbf16>, vector<4x16x64xbf16>, vector<4x16x64xbf16> -> vector<4x16x576xbf16>
    %20 = vector.shape_cast %19 : vector<4x16x576xbf16> to vector<64x576xbf16>
    %c0_11 = arith.constant 0 : index
    %c0_12 = arith.constant 0 : index
    %21 = vector.load %arg5[%c0_11, %c0_12] : memref<576x64xbf16, #tpu.memory_space<vmem>>, vector<576x64xbf16>
    %cst = arith.constant dense<0.000000e+00> : vector<64x64xf32>
    %22 = tpu.matmul %20, %21, %cst {dimension_numbers = #tpu.dot_dimension_numbers<[1], [0], [0], [1], [0, 0, 1, 1], [], []>} : vector<64x576xbf16>, vector<576x64xbf16>, vector<64x64xf32> -> vector<64x64xf32>
    %c0_13 = arith.constant 0 : index
    %c0_14 = arith.constant 0 : index
    %23 = vector.load %arg6[%c0_13, %c0_14] : memref<1x64xf32, #tpu.memory_space<vmem>>, vector<1x64xf32>
    %24 = vector.broadcast %23 : vector<1x64xf32> to vector<64x64xf32>
    %25 = arith.addf %22, %24 : vector<64x64xf32>
    %c0_15 = arith.constant 0 : index
    %c0_16 = arith.constant 0 : index
    %c0_17 = arith.constant 0 : index
    %c0_18 = arith.constant 0 : index
    %26 = vector.load %arg7[%c0_15, %c0_16, %c0_17, %c0_18] : memref<1x4x16x64xbf16, #tpu.memory_space<vmem>>, vector<1x4x16x64xbf16>
    %27 = vector.shape_cast %26 : vector<1x4x16x64xbf16> to vector<4x16x64xbf16>
    %28 = vector.shape_cast %27 : vector<4x16x64xbf16> to vector<64x64xbf16>
    %29 = arith.extf %28 : vector<64x64xbf16> to vector<64x64xf32>
    %30 = arith.addf %25, %29 : vector<64x64xf32>
    %cst_19 = arith.constant 0.000000e+00 : f32
    %31 = vector.broadcast %cst_19 : f32 to vector<64x64xf32>
    %32 = arith.maximumf %30, %31 : vector<64x64xf32>
    %33 = vector.shape_cast %32 : vector<64x64xf32> to vector<4x16x64xf32>
    %34 = arith.truncf %33 : vector<4x16x64xf32> to vector<4x16x64xbf16>
    %c0_20 = arith.constant 0 : index
    %c0_21 = arith.constant 0 : index
    %c0_22 = arith.constant 0 : index
    %c0_23 = arith.constant 0 : index
    %35 = vector.load %arg8[%c0_20, %c0_21, %c0_22, %c0_23] : memref<1x4x16x64xbf16, #tpu.memory_space<vmem>>, vector<1x4x16x64xbf16>
    %36 = vector.shape_cast %35 : vector<1x4x16x64xbf16> to vector<4x16x64xbf16>
    %37 = vector.shape_cast %34 : vector<4x16x64xbf16> to vector<1x4x16x64xbf16>
    tpu.vector_store %arg8[%c0_20, %c0_21, %c0_22, %c0_23], %37 {strides = array<i32>} : memref<1x4x16x64xbf16, #tpu.memory_space<vmem>>, vector<1x4x16x64xbf16>,
    return
  }
  func.func @transform_0(%arg0: i32, %arg1: i32) -> (i32, i32, i32, i32) {
    %c0_i32 = arith.constant 0 : i32
    %c0_i32_0 = arith.constant 0 : i32
    %c0_i32_1 = arith.constant 0 : i32
    return %arg0, %arg1, %c0_i32, %c0_i32_0 : i32, i32, i32, i32
  }
  func.func @transform_1(%arg0: i32, %arg1: i32) -> (i32, i32, i32, i32) {
    %c1_i32 = arith.constant 1 : i32
    %0 = arith.addi %arg1, %c1_i32 : i32
    %c4_i32 = arith.constant 4 : i32
    %1 = arith.muli %0, %c4_i32 : i32
    %c0_i32 = arith.constant 0 : i32
    %c0_i32_0 = arith.constant 0 : i32
    %c0_i32_1 = arith.constant 0 : i32
    return %arg0, %1, %c0_i32, %c0_i32_0 : i32, i32, i32, i32
  }
  func.func @transform_2(%arg0: i32, %arg1: i32) -> (i32, i32, i32, i32) {
    %c1_i32 = arith.constant 1 : i32
    %0 = arith.addi %arg1, %c1_i32 : i32
    %c4_i32 = arith.constant 4 : i32
    %1 = arith.muli %0, %c4_i32 : i32
    %c1_i32_0 = arith.constant 1 : i32
    %2 = arith.addi %1, %c1_i32_0 : i32
    %c0_i32 = arith.constant 0 : i32
    %c0_i32_1 = arith.constant 0 : i32
    %c0_i32_2 = arith.constant 0 : i32
    return %arg0, %2, %c0_i32, %c0_i32_1 : i32, i32, i32, i32
  }
  func.func @transform_3(%arg0: i32, %arg1: i32) -> (i32, i32) {
    %c0_i32 = arith.constant 0 : i32
    %c0_i32_0 = arith.constant 0 : i32
    %c0_i32_1 = arith.constant 0 : i32
    return %c0_i32, %c0_i32_0 : i32, i32
  }
  func.func @transform_4(%arg0: i32, %arg1: i32) -> (i32, i32) {
    %c0_i32 = arith.constant 0 : i32
    %c0_i32_0 = arith.constant 0 : i32
    %c0_i32_1 = arith.constant 0 : i32
    return %c0_i32, %c0_i32_0 : i32, i32
  }
  func.func @transform_5(%arg0: i32, %arg1: i32) -> (i32, i32, i32, i32) {
    %c0_i32 = arith.constant 0 : i32
    %c0_i32_0 = arith.constant 0 : i32
    %c0_i32_1 = arith.constant 0 : i32
    return %arg0, %arg1, %c0_i32, %c0_i32_0 : i32, i32, i32, i32
  }
  func.func @transform_6(%arg0: i32, %arg1: i32) -> (i32, i32, i32, i32) {
    %c0_i32 = arith.constant 0 : i32
    %c0_i32_0 = arith.constant 0 : i32
    %c0_i32_1 = arith.constant 0 : i32
    return %arg0, %arg1, %c0_i32, %c0_i32_0 : i32, i32, i32, i32
  }
}

module attributes {stable_mosaic.version = 11 : i64} {
  func.func @kernel(%arg0: i32, %arg1: i32, %arg2: memref<1x4x6x64xbf16, #tpu.memory_space<vmem>>, %arg3: memref<1x1x6x64xbf16, #tpu.memory_space<vmem>>, %arg4: memref<1x1x6x64xbf16, #tpu.memory_space<vmem>>, %arg5: memref<576x128xbf16, #tpu.memory_space<vmem>>, %arg6: memref<1x128xf32, #tpu.memory_space<vmem>>, %arg7: memref<1x4x4x128xbf16, #tpu.memory_space<vmem>>) attributes {dimension_semantics = [#tpu.dimension_semantics<parallel>, #tpu.dimension_semantics<parallel>], iteration_bounds = array<i64: 2, 1>, scalar_prefetch = 0 : i64, scratch_operands = 0 : i64, tpu.core_type = #tpu.core_type<tc>, window_params = [{transform_indices = @transform_0, window_bounds = array<i64: 1, 4, 6, 64>}, {transform_indices = @transform_1, window_bounds = array<i64: 1, 1, 6, 64>}, {transform_indices = @transform_2, window_bounds = array<i64: 1, 1, 6, 64>}, {pipeline_mode = #tpu.pipeline_mode<synchronous>, transform_indices = @transform_3, window_bounds = array<i64: 576, 128>}, {pipeline_mode = #tpu.pipeline_mode<synchronous>, transform_indices = @transform_4, window_bounds = array<i64: 1, 128>}, {transform_indices = @transform_5, window_bounds = array<i64: 1, 4, 4, 128>}]} {
    %c0 = arith.constant 0 : index
    %c0_0 = arith.constant 0 : index
    %c0_1 = arith.constant 0 : index
    %c0_2 = arith.constant 0 : index
    %0 = vector.load %arg2[%c0, %c0_0, %c0_1, %c0_2] : memref<1x4x6x64xbf16, #tpu.memory_space<vmem>>, vector<1x4x6x64xbf16>
    %1 = vector.shape_cast %0 : vector<1x4x6x64xbf16> to vector<4x6x64xbf16>
    %c0_3 = arith.constant 0 : index
    %c0_4 = arith.constant 0 : index
    %c0_5 = arith.constant 0 : index
    %c0_6 = arith.constant 0 : index
    %2 = vector.load %arg3[%c0_3, %c0_4, %c0_5, %c0_6] : memref<1x1x6x64xbf16, #tpu.memory_space<vmem>>, vector<1x1x6x64xbf16>
    %3 = vector.shape_cast %2 : vector<1x1x6x64xbf16> to vector<1x6x64xbf16>
    %c0_7 = arith.constant 0 : index
    %c0_8 = arith.constant 0 : index
    %c0_9 = arith.constant 0 : index
    %c0_10 = arith.constant 0 : index
    %4 = vector.load %arg4[%c0_7, %c0_8, %c0_9, %c0_10] : memref<1x1x6x64xbf16, #tpu.memory_space<vmem>>, vector<1x1x6x64xbf16>
    %5 = vector.shape_cast %4 : vector<1x1x6x64xbf16> to vector<1x6x64xbf16>
    %6 = tpu.concatenate %1, %3, %5 in 0 : vector<4x6x64xbf16>, vector<1x6x64xbf16>, vector<1x6x64xbf16> -> vector<6x6x64xbf16>
    %7 = vector.extract_strided_slice %6 {offsets = [0, 0, 0], sizes = [6, 4, 64], strides = [1, 1, 1]} : vector<6x6x64xbf16> to vector<6x4x64xbf16>
    %8 = vector.extract_strided_slice %6 {offsets = [0, 1, 0], sizes = [6, 4, 64], strides = [1, 1, 1]} : vector<6x6x64xbf16> to vector<6x4x64xbf16>
    %9 = vector.extract_strided_slice %6 {offsets = [0, 2, 0], sizes = [6, 4, 64], strides = [1, 1, 1]} : vector<6x6x64xbf16> to vector<6x4x64xbf16>
    %10 = vector.extract_strided_slice %7 {offsets = [0, 0, 0], sizes = [4, 4, 64], strides = [1, 1, 1]} : vector<6x4x64xbf16> to vector<4x4x64xbf16>
    %11 = vector.extract_strided_slice %8 {offsets = [0, 0, 0], sizes = [4, 4, 64], strides = [1, 1, 1]} : vector<6x4x64xbf16> to vector<4x4x64xbf16>
    %12 = vector.extract_strided_slice %9 {offsets = [0, 0, 0], sizes = [4, 4, 64], strides = [1, 1, 1]} : vector<6x4x64xbf16> to vector<4x4x64xbf16>
    %13 = vector.extract_strided_slice %7 {offsets = [1, 0, 0], sizes = [4, 4, 64], strides = [1, 1, 1]} : vector<6x4x64xbf16> to vector<4x4x64xbf16>
    %14 = vector.extract_strided_slice %8 {offsets = [1, 0, 0], sizes = [4, 4, 64], strides = [1, 1, 1]} : vector<6x4x64xbf16> to vector<4x4x64xbf16>
    %15 = vector.extract_strided_slice %9 {offsets = [1, 0, 0], sizes = [4, 4, 64], strides = [1, 1, 1]} : vector<6x4x64xbf16> to vector<4x4x64xbf16>
    %16 = vector.extract_strided_slice %7 {offsets = [2, 0, 0], sizes = [4, 4, 64], strides = [1, 1, 1]} : vector<6x4x64xbf16> to vector<4x4x64xbf16>
    %17 = vector.extract_strided_slice %8 {offsets = [2, 0, 0], sizes = [4, 4, 64], strides = [1, 1, 1]} : vector<6x4x64xbf16> to vector<4x4x64xbf16>
    %18 = vector.extract_strided_slice %9 {offsets = [2, 0, 0], sizes = [4, 4, 64], strides = [1, 1, 1]} : vector<6x4x64xbf16> to vector<4x4x64xbf16>
    %19 = tpu.concatenate %10, %11, %12, %13, %14, %15, %16, %17, %18 in 2 : vector<4x4x64xbf16>, vector<4x4x64xbf16>, vector<4x4x64xbf16>, vector<4x4x64xbf16>, vector<4x4x64xbf16>, vector<4x4x64xbf16>, vector<4x4x64xbf16>, vector<4x4x64xbf16>, vector<4x4x64xbf16> -> vector<4x4x576xbf16>
    %20 = vector.shape_cast %19 : vector<4x4x576xbf16> to vector<16x576xbf16>
    %c0_11 = arith.constant 0 : index
    %c0_12 = arith.constant 0 : index
    %21 = vector.load %arg5[%c0_11, %c0_12] : memref<576x128xbf16, #tpu.memory_space<vmem>>, vector<576x128xbf16>
    %cst = arith.constant dense<0.000000e+00> : vector<16x128xf32>
    %22 = tpu.matmul %20, %21, %cst {dimension_numbers = #tpu.dot_dimension_numbers<[1], [0], [0], [1], [0, 0, 1, 1], [], []>} : vector<16x576xbf16>, vector<576x128xbf16>, vector<16x128xf32> -> vector<16x128xf32>
    %c0_13 = arith.constant 0 : index
    %c0_14 = arith.constant 0 : index
    %23 = vector.load %arg6[%c0_13, %c0_14] : memref<1x128xf32, #tpu.memory_space<vmem>>, vector<1x128xf32>
    %24 = vector.broadcast %23 : vector<1x128xf32> to vector<16x128xf32>
    %25 = arith.addf %22, %24 : vector<16x128xf32>
    %cst_15 = arith.constant 0.000000e+00 : f32
    %26 = vector.broadcast %cst_15 : f32 to vector<16x128xf32>
    %27 = arith.maximumf %25, %26 : vector<16x128xf32>
    %28 = vector.shape_cast %27 : vector<16x128xf32> to vector<4x4x128xf32>
    %29 = arith.truncf %28 : vector<4x4x128xf32> to vector<4x4x128xbf16>
    %c0_16 = arith.constant 0 : index
    %c0_17 = arith.constant 0 : index
    %c0_18 = arith.constant 0 : index
    %c0_19 = arith.constant 0 : index
    %30 = vector.load %arg7[%c0_16, %c0_17, %c0_18, %c0_19] : memref<1x4x4x128xbf16, #tpu.memory_space<vmem>>, vector<1x4x4x128xbf16>
    %31 = vector.shape_cast %30 : vector<1x4x4x128xbf16> to vector<4x4x128xbf16>
    %32 = vector.shape_cast %29 : vector<4x4x128xbf16> to vector<1x4x4x128xbf16>
    tpu.vector_store %arg7[%c0_16, %c0_17, %c0_18, %c0_19], %32 {strides = array<i32>} : memref<1x4x4x128xbf16, #tpu.memory_space<vmem>>, vector<1x4x4x128xbf16>,
    return
  }
  func.func @transform_0(%arg0: i32, %arg1: i32) -> (i32, i32, i32, i32) {
    %c0_i32 = arith.constant 0 : i32
    %c0_i32_0 = arith.constant 0 : i32
    %c0_i32_1 = arith.constant 0 : i32
    return %arg0, %arg1, %c0_i32, %c0_i32_0 : i32, i32, i32, i32
  }
  func.func @transform_1(%arg0: i32, %arg1: i32) -> (i32, i32, i32, i32) {
    %c1_i32 = arith.constant 1 : i32
    %0 = arith.addi %arg1, %c1_i32 : i32
    %c4_i32 = arith.constant 4 : i32
    %1 = arith.muli %0, %c4_i32 : i32
    %c0_i32 = arith.constant 0 : i32
    %c0_i32_0 = arith.constant 0 : i32
    %c0_i32_1 = arith.constant 0 : i32
    return %arg0, %1, %c0_i32, %c0_i32_0 : i32, i32, i32, i32
  }
  func.func @transform_2(%arg0: i32, %arg1: i32) -> (i32, i32, i32, i32) {
    %c1_i32 = arith.constant 1 : i32
    %0 = arith.addi %arg1, %c1_i32 : i32
    %c4_i32 = arith.constant 4 : i32
    %1 = arith.muli %0, %c4_i32 : i32
    %c1_i32_0 = arith.constant 1 : i32
    %2 = arith.addi %1, %c1_i32_0 : i32
    %c0_i32 = arith.constant 0 : i32
    %c0_i32_1 = arith.constant 0 : i32
    %c0_i32_2 = arith.constant 0 : i32
    return %arg0, %2, %c0_i32, %c0_i32_1 : i32, i32, i32, i32
  }
  func.func @transform_3(%arg0: i32, %arg1: i32) -> (i32, i32) {
    %c0_i32 = arith.constant 0 : i32
    %c0_i32_0 = arith.constant 0 : i32
    %c0_i32_1 = arith.constant 0 : i32
    return %c0_i32, %c0_i32_0 : i32, i32
  }
  func.func @transform_4(%arg0: i32, %arg1: i32) -> (i32, i32) {
    %c0_i32 = arith.constant 0 : i32
    %c0_i32_0 = arith.constant 0 : i32
    %c0_i32_1 = arith.constant 0 : i32
    return %c0_i32, %c0_i32_0 : i32, i32
  }
  func.func @transform_5(%arg0: i32, %arg1: i32) -> (i32, i32, i32, i32) {
    %c0_i32 = arith.constant 0 : i32
    %c0_i32_0 = arith.constant 0 : i32
    %c0_i32_1 = arith.constant 0 : i32
    return %arg0, %arg1, %c0_i32, %c0_i32_0 : i32, i32, i32, i32
  }
}

module attributes {stable_mosaic.version = 11 : i64} {
  func.func @kernel(%arg0: i32, %arg1: memref<32x64xbf16, #tpu.memory_space<vmem>>, %arg2: memref<64x128xbf16, #tpu.memory_space<vmem>>, %arg3: memref<1x128xf32, #tpu.memory_space<vmem>>, %arg4: memref<32x128xbf16, #tpu.memory_space<vmem>>) attributes {dimension_semantics = [#tpu.dimension_semantics<parallel>], iteration_bounds = array<i64: 1>, scalar_prefetch = 0 : i64, scratch_operands = 0 : i64, tpu.core_type = #tpu.core_type<tc>, window_params = [{transform_indices = @transform_0, window_bounds = array<i64: 32, 64>}, {pipeline_mode = #tpu.pipeline_mode<synchronous>, transform_indices = @transform_1, window_bounds = array<i64: 64, 128>}, {pipeline_mode = #tpu.pipeline_mode<synchronous>, transform_indices = @transform_2, window_bounds = array<i64: 1, 128>}, {transform_indices = @transform_3, window_bounds = array<i64: 32, 128>}]} {
    %c0 = arith.constant 0 : index
    %c0_0 = arith.constant 0 : index
    %0 = vector.load %arg1[%c0, %c0_0] : memref<32x64xbf16, #tpu.memory_space<vmem>>, vector<32x64xbf16>
    %c0_1 = arith.constant 0 : index
    %c0_2 = arith.constant 0 : index
    %1 = vector.load %arg2[%c0_1, %c0_2] : memref<64x128xbf16, #tpu.memory_space<vmem>>, vector<64x128xbf16>
    %cst = arith.constant dense<0.000000e+00> : vector<32x128xf32>
    %2 = tpu.matmul %0, %1, %cst {dimension_numbers = #tpu.dot_dimension_numbers<[1], [0], [0], [1], [0, 0, 1, 1], [], []>} : vector<32x64xbf16>, vector<64x128xbf16>, vector<32x128xf32> -> vector<32x128xf32>
    %c0_3 = arith.constant 0 : index
    %c0_4 = arith.constant 0 : index
    %3 = vector.load %arg3[%c0_3, %c0_4] : memref<1x128xf32, #tpu.memory_space<vmem>>, vector<1x128xf32>
    %4 = vector.broadcast %3 : vector<1x128xf32> to vector<32x128xf32>
    %5 = arith.addf %2, %4 : vector<32x128xf32>
    %6 = arith.truncf %5 : vector<32x128xf32> to vector<32x128xbf16>
    %c0_5 = arith.constant 0 : index
    %c0_6 = arith.constant 0 : index
    %7 = vector.load %arg4[%c0_5, %c0_6] : memref<32x128xbf16, #tpu.memory_space<vmem>>, vector<32x128xbf16>
    tpu.vector_store %arg4[%c0_5, %c0_6], %6 {strides = array<i32>} : memref<32x128xbf16, #tpu.memory_space<vmem>>, vector<32x128xbf16>,
    return
  }
  func.func @transform_0(%arg0: i32) -> (i32, i32) {
    %c0_i32 = arith.constant 0 : i32
    %c0_i32_0 = arith.constant 0 : i32
    return %arg0, %c0_i32 : i32, i32
  }
  func.func @transform_1(%arg0: i32) -> (i32, i32) {
    %c0_i32 = arith.constant 0 : i32
    %c0_i32_0 = arith.constant 0 : i32
    %c0_i32_1 = arith.constant 0 : i32
    return %c0_i32, %c0_i32_0 : i32, i32
  }
  func.func @transform_2(%arg0: i32) -> (i32, i32) {
    %c0_i32 = arith.constant 0 : i32
    %c0_i32_0 = arith.constant 0 : i32
    %c0_i32_1 = arith.constant 0 : i32
    return %c0_i32, %c0_i32_0 : i32, i32
  }
  func.func @transform_3(%arg0: i32) -> (i32, i32) {
    %c0_i32 = arith.constant 0 : i32
    %c0_i32_0 = arith.constant 0 : i32
    return %arg0, %c0_i32 : i32, i32
  }
}

module attributes {stable_mosaic.version = 11 : i64} {
  func.func @kernel(%arg0: i32, %arg1: i32, %arg2: memref<1x4x6x128xbf16, #tpu.memory_space<vmem>>, %arg3: memref<1x1x6x128xbf16, #tpu.memory_space<vmem>>, %arg4: memref<1x1x6x128xbf16, #tpu.memory_space<vmem>>, %arg5: memref<1152x128xbf16, #tpu.memory_space<vmem>>, %arg6: memref<1x128xf32, #tpu.memory_space<vmem>>, %arg7: memref<1x4x4x128xbf16, #tpu.memory_space<vmem>>, %arg8: memref<1x4x4x128xbf16, #tpu.memory_space<vmem>>) attributes {dimension_semantics = [#tpu.dimension_semantics<parallel>, #tpu.dimension_semantics<parallel>], iteration_bounds = array<i64: 2, 1>, scalar_prefetch = 0 : i64, scratch_operands = 0 : i64, tpu.core_type = #tpu.core_type<tc>, window_params = [{transform_indices = @transform_0, window_bounds = array<i64: 1, 4, 6, 128>}, {transform_indices = @transform_1, window_bounds = array<i64: 1, 1, 6, 128>}, {transform_indices = @transform_2, window_bounds = array<i64: 1, 1, 6, 128>}, {pipeline_mode = #tpu.pipeline_mode<synchronous>, transform_indices = @transform_3, window_bounds = array<i64: 1152, 128>}, {pipeline_mode = #tpu.pipeline_mode<synchronous>, transform_indices = @transform_4, window_bounds = array<i64: 1, 128>}, {transform_indices = @transform_5, window_bounds = array<i64: 1, 4, 4, 128>}, {transform_indices = @transform_6, window_bounds = array<i64: 1, 4, 4, 128>}]} {
    %c0 = arith.constant 0 : index
    %c0_0 = arith.constant 0 : index
    %c0_1 = arith.constant 0 : index
    %c0_2 = arith.constant 0 : index
    %0 = vector.load %arg2[%c0, %c0_0, %c0_1, %c0_2] : memref<1x4x6x128xbf16, #tpu.memory_space<vmem>>, vector<1x4x6x128xbf16>
    %1 = vector.shape_cast %0 : vector<1x4x6x128xbf16> to vector<4x6x128xbf16>
    %c0_3 = arith.constant 0 : index
    %c0_4 = arith.constant 0 : index
    %c0_5 = arith.constant 0 : index
    %c0_6 = arith.constant 0 : index
    %2 = vector.load %arg3[%c0_3, %c0_4, %c0_5, %c0_6] : memref<1x1x6x128xbf16, #tpu.memory_space<vmem>>, vector<1x1x6x128xbf16>
    %3 = vector.shape_cast %2 : vector<1x1x6x128xbf16> to vector<1x6x128xbf16>
    %c0_7 = arith.constant 0 : index
    %c0_8 = arith.constant 0 : index
    %c0_9 = arith.constant 0 : index
    %c0_10 = arith.constant 0 : index
    %4 = vector.load %arg4[%c0_7, %c0_8, %c0_9, %c0_10] : memref<1x1x6x128xbf16, #tpu.memory_space<vmem>>, vector<1x1x6x128xbf16>
    %5 = vector.shape_cast %4 : vector<1x1x6x128xbf16> to vector<1x6x128xbf16>
    %6 = tpu.concatenate %1, %3, %5 in 0 : vector<4x6x128xbf16>, vector<1x6x128xbf16>, vector<1x6x128xbf16> -> vector<6x6x128xbf16>
    %7 = vector.extract_strided_slice %6 {offsets = [0, 0, 0], sizes = [6, 4, 128], strides = [1, 1, 1]} : vector<6x6x128xbf16> to vector<6x4x128xbf16>
    %8 = vector.extract_strided_slice %6 {offsets = [0, 1, 0], sizes = [6, 4, 128], strides = [1, 1, 1]} : vector<6x6x128xbf16> to vector<6x4x128xbf16>
    %9 = vector.extract_strided_slice %6 {offsets = [0, 2, 0], sizes = [6, 4, 128], strides = [1, 1, 1]} : vector<6x6x128xbf16> to vector<6x4x128xbf16>
    %10 = vector.extract_strided_slice %7 {offsets = [0, 0, 0], sizes = [4, 4, 128], strides = [1, 1, 1]} : vector<6x4x128xbf16> to vector<4x4x128xbf16>
    %11 = vector.extract_strided_slice %8 {offsets = [0, 0, 0], sizes = [4, 4, 128], strides = [1, 1, 1]} : vector<6x4x128xbf16> to vector<4x4x128xbf16>
    %12 = vector.extract_strided_slice %9 {offsets = [0, 0, 0], sizes = [4, 4, 128], strides = [1, 1, 1]} : vector<6x4x128xbf16> to vector<4x4x128xbf16>
    %13 = vector.extract_strided_slice %7 {offsets = [1, 0, 0], sizes = [4, 4, 128], strides = [1, 1, 1]} : vector<6x4x128xbf16> to vector<4x4x128xbf16>
    %14 = vector.extract_strided_slice %8 {offsets = [1, 0, 0], sizes = [4, 4, 128], strides = [1, 1, 1]} : vector<6x4x128xbf16> to vector<4x4x128xbf16>
    %15 = vector.extract_strided_slice %9 {offsets = [1, 0, 0], sizes = [4, 4, 128], strides = [1, 1, 1]} : vector<6x4x128xbf16> to vector<4x4x128xbf16>
    %16 = vector.extract_strided_slice %7 {offsets = [2, 0, 0], sizes = [4, 4, 128], strides = [1, 1, 1]} : vector<6x4x128xbf16> to vector<4x4x128xbf16>
    %17 = vector.extract_strided_slice %8 {offsets = [2, 0, 0], sizes = [4, 4, 128], strides = [1, 1, 1]} : vector<6x4x128xbf16> to vector<4x4x128xbf16>
    %18 = vector.extract_strided_slice %9 {offsets = [2, 0, 0], sizes = [4, 4, 128], strides = [1, 1, 1]} : vector<6x4x128xbf16> to vector<4x4x128xbf16>
    %19 = tpu.concatenate %10, %11, %12, %13, %14, %15, %16, %17, %18 in 2 : vector<4x4x128xbf16>, vector<4x4x128xbf16>, vector<4x4x128xbf16>, vector<4x4x128xbf16>, vector<4x4x128xbf16>, vector<4x4x128xbf16>, vector<4x4x128xbf16>, vector<4x4x128xbf16>, vector<4x4x128xbf16> -> vector<4x4x1152xbf16>
    %20 = vector.shape_cast %19 : vector<4x4x1152xbf16> to vector<16x1152xbf16>
    %c0_11 = arith.constant 0 : index
    %c0_12 = arith.constant 0 : index
    %21 = vector.load %arg5[%c0_11, %c0_12] : memref<1152x128xbf16, #tpu.memory_space<vmem>>, vector<1152x128xbf16>
    %cst = arith.constant dense<0.000000e+00> : vector<16x128xf32>
    %22 = tpu.matmul %20, %21, %cst {dimension_numbers = #tpu.dot_dimension_numbers<[1], [0], [0], [1], [0, 0, 1, 1], [], []>} : vector<16x1152xbf16>, vector<1152x128xbf16>, vector<16x128xf32> -> vector<16x128xf32>
    %c0_13 = arith.constant 0 : index
    %c0_14 = arith.constant 0 : index
    %23 = vector.load %arg6[%c0_13, %c0_14] : memref<1x128xf32, #tpu.memory_space<vmem>>, vector<1x128xf32>
    %24 = vector.broadcast %23 : vector<1x128xf32> to vector<16x128xf32>
    %25 = arith.addf %22, %24 : vector<16x128xf32>
    %c0_15 = arith.constant 0 : index
    %c0_16 = arith.constant 0 : index
    %c0_17 = arith.constant 0 : index
    %c0_18 = arith.constant 0 : index
    %26 = vector.load %arg7[%c0_15, %c0_16, %c0_17, %c0_18] : memref<1x4x4x128xbf16, #tpu.memory_space<vmem>>, vector<1x4x4x128xbf16>
    %27 = vector.shape_cast %26 : vector<1x4x4x128xbf16> to vector<4x4x128xbf16>
    %28 = vector.shape_cast %27 : vector<4x4x128xbf16> to vector<16x128xbf16>
    %29 = arith.extf %28 : vector<16x128xbf16> to vector<16x128xf32>
    %30 = arith.addf %25, %29 : vector<16x128xf32>
    %cst_19 = arith.constant 0.000000e+00 : f32
    %31 = vector.broadcast %cst_19 : f32 to vector<16x128xf32>
    %32 = arith.maximumf %30, %31 : vector<16x128xf32>
    %33 = vector.shape_cast %32 : vector<16x128xf32> to vector<4x4x128xf32>
    %34 = arith.truncf %33 : vector<4x4x128xf32> to vector<4x4x128xbf16>
    %c0_20 = arith.constant 0 : index
    %c0_21 = arith.constant 0 : index
    %c0_22 = arith.constant 0 : index
    %c0_23 = arith.constant 0 : index
    %35 = vector.load %arg8[%c0_20, %c0_21, %c0_22, %c0_23] : memref<1x4x4x128xbf16, #tpu.memory_space<vmem>>, vector<1x4x4x128xbf16>
    %36 = vector.shape_cast %35 : vector<1x4x4x128xbf16> to vector<4x4x128xbf16>
    %37 = vector.shape_cast %34 : vector<4x4x128xbf16> to vector<1x4x4x128xbf16>
    tpu.vector_store %arg8[%c0_20, %c0_21, %c0_22, %c0_23], %37 {strides = array<i32>} : memref<1x4x4x128xbf16, #tpu.memory_space<vmem>>, vector<1x4x4x128xbf16>,
    return
  }
  func.func @transform_0(%arg0: i32, %arg1: i32) -> (i32, i32, i32, i32) {
    %c0_i32 = arith.constant 0 : i32
    %c0_i32_0 = arith.constant 0 : i32
    %c0_i32_1 = arith.constant 0 : i32
    return %arg0, %arg1, %c0_i32, %c0_i32_0 : i32, i32, i32, i32
  }
  func.func @transform_1(%arg0: i32, %arg1: i32) -> (i32, i32, i32, i32) {
    %c1_i32 = arith.constant 1 : i32
    %0 = arith.addi %arg1, %c1_i32 : i32
    %c4_i32 = arith.constant 4 : i32
    %1 = arith.muli %0, %c4_i32 : i32
    %c0_i32 = arith.constant 0 : i32
    %c0_i32_0 = arith.constant 0 : i32
    %c0_i32_1 = arith.constant 0 : i32
    return %arg0, %1, %c0_i32, %c0_i32_0 : i32, i32, i32, i32
  }
  func.func @transform_2(%arg0: i32, %arg1: i32) -> (i32, i32, i32, i32) {
    %c1_i32 = arith.constant 1 : i32
    %0 = arith.addi %arg1, %c1_i32 : i32
    %c4_i32 = arith.constant 4 : i32
    %1 = arith.muli %0, %c4_i32 : i32
    %c1_i32_0 = arith.constant 1 : i32
    %2 = arith.addi %1, %c1_i32_0 : i32
    %c0_i32 = arith.constant 0 : i32
    %c0_i32_1 = arith.constant 0 : i32
    %c0_i32_2 = arith.constant 0 : i32
    return %arg0, %2, %c0_i32, %c0_i32_1 : i32, i32, i32, i32
  }
  func.func @transform_3(%arg0: i32, %arg1: i32) -> (i32, i32) {
    %c0_i32 = arith.constant 0 : i32
    %c0_i32_0 = arith.constant 0 : i32
    %c0_i32_1 = arith.constant 0 : i32
    return %c0_i32, %c0_i32_0 : i32, i32
  }
  func.func @transform_4(%arg0: i32, %arg1: i32) -> (i32, i32) {
    %c0_i32 = arith.constant 0 : i32
    %c0_i32_0 = arith.constant 0 : i32
    %c0_i32_1 = arith.constant 0 : i32
    return %c0_i32, %c0_i32_0 : i32, i32
  }
  func.func @transform_5(%arg0: i32, %arg1: i32) -> (i32, i32, i32, i32) {
    %c0_i32 = arith.constant 0 : i32
    %c0_i32_0 = arith.constant 0 : i32
    %c0_i32_1 = arith.constant 0 : i32
    return %arg0, %arg1, %c0_i32, %c0_i32_0 : i32, i32, i32, i32
  }
  func.func @transform_6(%arg0: i32, %arg1: i32) -> (i32, i32, i32, i32) {
    %c0_i32 = arith.constant 0 : i32
    %c0_i32_0 = arith.constant 0 : i32
    %c0_i32_1 = arith.constant 0 : i32
    return %arg0, %arg1, %c0_i32, %c0_i32_0 : i32, i32, i32, i32
  }
}

module attributes {stable_mosaic.version = 11 : i64} {
  func.func @kernel(%arg0: i32, %arg1: i32, %arg2: memref<1x1x3x128xbf16, #tpu.memory_space<vmem>>, %arg3: memref<1x1x3x128xbf16, #tpu.memory_space<vmem>>, %arg4: memref<1x1x3x128xbf16, #tpu.memory_space<vmem>>, %arg5: memref<1152x128xbf16, #tpu.memory_space<vmem>>, %arg6: memref<1x128xf32, #tpu.memory_space<vmem>>, %arg7: memref<1x1x1x128xbf16, #tpu.memory_space<vmem>>) attributes {dimension_semantics = [#tpu.dimension_semantics<parallel>, #tpu.dimension_semantics<parallel>], iteration_bounds = array<i64: 2, 1>, scalar_prefetch = 0 : i64, scratch_operands = 0 : i64, tpu.core_type = #tpu.core_type<tc>, window_params = [{transform_indices = @transform_0, window_bounds = array<i64: 1, 1, 3, 128>}, {transform_indices = @transform_1, window_bounds = array<i64: 1, 1, 3, 128>}, {transform_indices = @transform_2, window_bounds = array<i64: 1, 1, 3, 128>}, {pipeline_mode = #tpu.pipeline_mode<synchronous>, transform_indices = @transform_3, window_bounds = array<i64: 1152, 128>}, {pipeline_mode = #tpu.pipeline_mode<synchronous>, transform_indices = @transform_4, window_bounds = array<i64: 1, 128>}, {transform_indices = @transform_5, window_bounds = array<i64: 1, 1, 1, 128>}]} {
    %c0 = arith.constant 0 : index
    %c0_0 = arith.constant 0 : index
    %c0_1 = arith.constant 0 : index
    %c0_2 = arith.constant 0 : index
    %0 = vector.load %arg2[%c0, %c0_0, %c0_1, %c0_2] : memref<1x1x3x128xbf16, #tpu.memory_space<vmem>>, vector<1x1x3x128xbf16>
    %1 = vector.shape_cast %0 : vector<1x1x3x128xbf16> to vector<1x3x128xbf16>
    %c0_3 = arith.constant 0 : index
    %c0_4 = arith.constant 0 : index
    %c0_5 = arith.constant 0 : index
    %c0_6 = arith.constant 0 : index
    %2 = vector.load %arg3[%c0_3, %c0_4, %c0_5, %c0_6] : memref<1x1x3x128xbf16, #tpu.memory_space<vmem>>, vector<1x1x3x128xbf16>
    %3 = vector.shape_cast %2 : vector<1x1x3x128xbf16> to vector<1x3x128xbf16>
    %c0_7 = arith.constant 0 : index
    %c0_8 = arith.constant 0 : index
    %c0_9 = arith.constant 0 : index
    %c0_10 = arith.constant 0 : index
    %4 = vector.load %arg4[%c0_7, %c0_8, %c0_9, %c0_10] : memref<1x1x3x128xbf16, #tpu.memory_space<vmem>>, vector<1x1x3x128xbf16>
    %5 = vector.shape_cast %4 : vector<1x1x3x128xbf16> to vector<1x3x128xbf16>
    %6 = tpu.concatenate %1, %3, %5 in 0 : vector<1x3x128xbf16>, vector<1x3x128xbf16>, vector<1x3x128xbf16> -> vector<3x3x128xbf16>
    %7 = vector.extract_strided_slice %6 {offsets = [0, 0, 0], sizes = [3, 1, 128], strides = [1, 1, 1]} : vector<3x3x128xbf16> to vector<3x1x128xbf16>
    %8 = vector.extract_strided_slice %6 {offsets = [0, 1, 0], sizes = [3, 1, 128], strides = [1, 1, 1]} : vector<3x3x128xbf16> to vector<3x1x128xbf16>
    %9 = vector.extract_strided_slice %6 {offsets = [0, 2, 0], sizes = [3, 1, 128], strides = [1, 1, 1]} : vector<3x3x128xbf16> to vector<3x1x128xbf16>
    %10 = vector.extract_strided_slice %7 {offsets = [0, 0, 0], sizes = [1, 1, 128], strides = [1, 1, 1]} : vector<3x1x128xbf16> to vector<1x1x128xbf16>
    %11 = vector.extract_strided_slice %8 {offsets = [0, 0, 0], sizes = [1, 1, 128], strides = [1, 1, 1]} : vector<3x1x128xbf16> to vector<1x1x128xbf16>
    %12 = vector.extract_strided_slice %9 {offsets = [0, 0, 0], sizes = [1, 1, 128], strides = [1, 1, 1]} : vector<3x1x128xbf16> to vector<1x1x128xbf16>
    %13 = vector.extract_strided_slice %7 {offsets = [1, 0, 0], sizes = [1, 1, 128], strides = [1, 1, 1]} : vector<3x1x128xbf16> to vector<1x1x128xbf16>
    %14 = vector.extract_strided_slice %8 {offsets = [1, 0, 0], sizes = [1, 1, 128], strides = [1, 1, 1]} : vector<3x1x128xbf16> to vector<1x1x128xbf16>
    %15 = vector.extract_strided_slice %9 {offsets = [1, 0, 0], sizes = [1, 1, 128], strides = [1, 1, 1]} : vector<3x1x128xbf16> to vector<1x1x128xbf16>
    %16 = vector.extract_strided_slice %7 {offsets = [2, 0, 0], sizes = [1, 1, 128], strides = [1, 1, 1]} : vector<3x1x128xbf16> to vector<1x1x128xbf16>
    %17 = vector.extract_strided_slice %8 {offsets = [2, 0, 0], sizes = [1, 1, 128], strides = [1, 1, 1]} : vector<3x1x128xbf16> to vector<1x1x128xbf16>
    %18 = vector.extract_strided_slice %9 {offsets = [2, 0, 0], sizes = [1, 1, 128], strides = [1, 1, 1]} : vector<3x1x128xbf16> to vector<1x1x128xbf16>
    %19 = tpu.concatenate %10, %11, %12, %13, %14, %15, %16, %17, %18 in 2 : vector<1x1x128xbf16>, vector<1x1x128xbf16>, vector<1x1x128xbf16>, vector<1x1x128xbf16>, vector<1x1x128xbf16>, vector<1x1x128xbf16>, vector<1x1x128xbf16>, vector<1x1x128xbf16>, vector<1x1x128xbf16> -> vector<1x1x1152xbf16>
    %20 = vector.shape_cast %19 : vector<1x1x1152xbf16> to vector<1x1152xbf16>
    %c0_11 = arith.constant 0 : index
    %c0_12 = arith.constant 0 : index
    %21 = vector.load %arg5[%c0_11, %c0_12] : memref<1152x128xbf16, #tpu.memory_space<vmem>>, vector<1152x128xbf16>
    %cst = arith.constant dense<0.000000e+00> : vector<1x128xf32>
    %22 = tpu.matmul %20, %21, %cst {dimension_numbers = #tpu.dot_dimension_numbers<[1], [0], [0], [1], [0, 0, 1, 1], [], []>} : vector<1x1152xbf16>, vector<1152x128xbf16>, vector<1x128xf32> -> vector<1x128xf32>
    %c0_13 = arith.constant 0 : index
    %c0_14 = arith.constant 0 : index
    %23 = vector.load %arg6[%c0_13, %c0_14] : memref<1x128xf32, #tpu.memory_space<vmem>>, vector<1x128xf32>
    %24 = arith.addf %22, %23 : vector<1x128xf32>
    %cst_15 = arith.constant 0.000000e+00 : f32
    %25 = vector.broadcast %cst_15 : f32 to vector<1x128xf32>
    %26 = arith.maximumf %24, %25 : vector<1x128xf32>
    %27 = vector.shape_cast %26 : vector<1x128xf32> to vector<1x1x128xf32>
    %28 = arith.truncf %27 : vector<1x1x128xf32> to vector<1x1x128xbf16>
    %c0_16 = arith.constant 0 : index
    %c0_17 = arith.constant 0 : index
    %c0_18 = arith.constant 0 : index
    %c0_19 = arith.constant 0 : index
    %29 = vector.load %arg7[%c0_16, %c0_17, %c0_18, %c0_19] : memref<1x1x1x128xbf16, #tpu.memory_space<vmem>>, vector<1x1x1x128xbf16>
    %30 = vector.shape_cast %29 : vector<1x1x1x128xbf16> to vector<1x1x128xbf16>
    %31 = vector.shape_cast %28 : vector<1x1x128xbf16> to vector<1x1x1x128xbf16>
    tpu.vector_store %arg7[%c0_16, %c0_17, %c0_18, %c0_19], %31 {strides = array<i32>} : memref<1x1x1x128xbf16, #tpu.memory_space<vmem>>, vector<1x1x1x128xbf16>,
    return
  }
  func.func @transform_0(%arg0: i32, %arg1: i32) -> (i32, i32, i32, i32) {
    %c0_i32 = arith.constant 0 : i32
    %c0_i32_0 = arith.constant 0 : i32
    %c0_i32_1 = arith.constant 0 : i32
    return %arg0, %arg1, %c0_i32, %c0_i32_0 : i32, i32, i32, i32
  }
  func.func @transform_1(%arg0: i32, %arg1: i32) -> (i32, i32, i32, i32) {
    %c1_i32 = arith.constant 1 : i32
    %0 = arith.addi %arg1, %c1_i32 : i32
    %c1_i32_0 = arith.constant 1 : i32
    %1 = arith.muli %0, %c1_i32_0 : i32
    %c0_i32 = arith.constant 0 : i32
    %c0_i32_1 = arith.constant 0 : i32
    %c0_i32_2 = arith.constant 0 : i32
    return %arg0, %1, %c0_i32, %c0_i32_1 : i32, i32, i32, i32
  }
  func.func @transform_2(%arg0: i32, %arg1: i32) -> (i32, i32, i32, i32) {
    %c1_i32 = arith.constant 1 : i32
    %0 = arith.addi %arg1, %c1_i32 : i32
    %c1_i32_0 = arith.constant 1 : i32
    %1 = arith.muli %0, %c1_i32_0 : i32
    %c1_i32_1 = arith.constant 1 : i32
    %2 = arith.addi %1, %c1_i32_1 : i32
    %c0_i32 = arith.constant 0 : i32
    %c0_i32_2 = arith.constant 0 : i32
    %c0_i32_3 = arith.constant 0 : i32
    return %arg0, %2, %c0_i32, %c0_i32_2 : i32, i32, i32, i32
  }
  func.func @transform_3(%arg0: i32, %arg1: i32) -> (i32, i32) {
    %c0_i32 = arith.constant 0 : i32
    %c0_i32_0 = arith.constant 0 : i32
    %c0_i32_1 = arith.constant 0 : i32
    return %c0_i32, %c0_i32_0 : i32, i32
  }
  func.func @transform_4(%arg0: i32, %arg1: i32) -> (i32, i32) {
    %c0_i32 = arith.constant 0 : i32
    %c0_i32_0 = arith.constant 0 : i32
    %c0_i32_1 = arith.constant 0 : i32
    return %c0_i32, %c0_i32_0 : i32, i32
  }
  func.func @transform_5(%arg0: i32, %arg1: i32) -> (i32, i32, i32, i32) {
    %c0_i32 = arith.constant 0 : i32
    %c0_i32_0 = arith.constant 0 : i32
    %c0_i32_1 = arith.constant 0 : i32
    return %arg0, %arg1, %c0_i32, %c0_i32_0 : i32, i32, i32, i32
  }
}

module attributes {stable_mosaic.version = 11 : i64} {
  func.func @kernel(%arg0: i32, %arg1: memref<2x128xbf16, #tpu.memory_space<vmem>>, %arg2: memref<128x128xbf16, #tpu.memory_space<vmem>>, %arg3: memref<1x128xf32, #tpu.memory_space<vmem>>, %arg4: memref<2x128xbf16, #tpu.memory_space<vmem>>) attributes {dimension_semantics = [#tpu.dimension_semantics<parallel>], iteration_bounds = array<i64: 1>, scalar_prefetch = 0 : i64, scratch_operands = 0 : i64, tpu.core_type = #tpu.core_type<tc>, window_params = [{transform_indices = @transform_0, window_bounds = array<i64: 2, 128>}, {pipeline_mode = #tpu.pipeline_mode<synchronous>, transform_indices = @transform_1, window_bounds = array<i64: 128, 128>}, {pipeline_mode = #tpu.pipeline_mode<synchronous>, transform_indices = @transform_2, window_bounds = array<i64: 1, 128>}, {transform_indices = @transform_3, window_bounds = array<i64: 2, 128>}]} {
    %c0 = arith.constant 0 : index
    %c0_0 = arith.constant 0 : index
    %0 = vector.load %arg1[%c0, %c0_0] : memref<2x128xbf16, #tpu.memory_space<vmem>>, vector<2x128xbf16>
    %c0_1 = arith.constant 0 : index
    %c0_2 = arith.constant 0 : index
    %1 = vector.load %arg2[%c0_1, %c0_2] : memref<128x128xbf16, #tpu.memory_space<vmem>>, vector<128x128xbf16>
    %cst = arith.constant dense<0.000000e+00> : vector<2x128xf32>
    %2 = tpu.matmul %0, %1, %cst {dimension_numbers = #tpu.dot_dimension_numbers<[1], [0], [0], [1], [0, 0, 1, 1], [], []>} : vector<2x128xbf16>, vector<128x128xbf16>, vector<2x128xf32> -> vector<2x128xf32>
    %c0_3 = arith.constant 0 : index
    %c0_4 = arith.constant 0 : index
    %3 = vector.load %arg3[%c0_3, %c0_4] : memref<1x128xf32, #tpu.memory_space<vmem>>, vector<1x128xf32>
    %4 = vector.broadcast %3 : vector<1x128xf32> to vector<2x128xf32>
    %5 = arith.addf %2, %4 : vector<2x128xf32>
    %6 = arith.truncf %5 : vector<2x128xf32> to vector<2x128xbf16>
    %c0_5 = arith.constant 0 : index
    %c0_6 = arith.constant 0 : index
    %7 = vector.load %arg4[%c0_5, %c0_6] : memref<2x128xbf16, #tpu.memory_space<vmem>>, vector<2x128xbf16>
    tpu.vector_store %arg4[%c0_5, %c0_6], %6 {strides = array<i32>} : memref<2x128xbf16, #tpu.memory_space<vmem>>, vector<2x128xbf16>,
    return
  }
  func.func @transform_0(%arg0: i32) -> (i32, i32) {
    %c0_i32 = arith.constant 0 : i32
    %c0_i32_0 = arith.constant 0 : i32
    return %arg0, %c0_i32 : i32, i32
  }
  func.func @transform_1(%arg0: i32) -> (i32, i32) {
    %c0_i32 = arith.constant 0 : i32
    %c0_i32_0 = arith.constant 0 : i32
    %c0_i32_1 = arith.constant 0 : i32
    return %c0_i32, %c0_i32_0 : i32, i32
  }
  func.func @transform_2(%arg0: i32) -> (i32, i32) {
    %c0_i32 = arith.constant 0 : i32
    %c0_i32_0 = arith.constant 0 : i32
    %c0_i32_1 = arith.constant 0 : i32
    return %c0_i32, %c0_i32_0 : i32, i32
  }
  func.func @transform_3(%arg0: i32) -> (i32, i32) {
    %c0_i32 = arith.constant 0 : i32
    %c0_i32_0 = arith.constant 0 : i32
    return %arg0, %c0_i32 : i32, i32
  }
}

module attributes {stable_mosaic.version = 11 : i64} {
  func.func @kernel(%arg0: i32, %arg1: i32, %arg2: memref<1x1x3x128xbf16, #tpu.memory_space<vmem>>, %arg3: memref<1x1x3x128xbf16, #tpu.memory_space<vmem>>, %arg4: memref<1x1x3x128xbf16, #tpu.memory_space<vmem>>, %arg5: memref<1152x128xbf16, #tpu.memory_space<vmem>>, %arg6: memref<1x128xf32, #tpu.memory_space<vmem>>, %arg7: memref<1x1x1x128xbf16, #tpu.memory_space<vmem>>, %arg8: memref<1x1x1x128xbf16, #tpu.memory_space<vmem>>) attributes {dimension_semantics = [#tpu.dimension_semantics<parallel>, #tpu.dimension_semantics<parallel>], iteration_bounds = array<i64: 2, 1>, scalar_prefetch = 0 : i64, scratch_operands = 0 : i64, tpu.core_type = #tpu.core_type<tc>, window_params = [{transform_indices = @transform_0, window_bounds = array<i64: 1, 1, 3, 128>}, {transform_indices = @transform_1, window_bounds = array<i64: 1, 1, 3, 128>}, {transform_indices = @transform_2, window_bounds = array<i64: 1, 1, 3, 128>}, {pipeline_mode = #tpu.pipeline_mode<synchronous>, transform_indices = @transform_3, window_bounds = array<i64: 1152, 128>}, {pipeline_mode = #tpu.pipeline_mode<synchronous>, transform_indices = @transform_4, window_bounds = array<i64: 1, 128>}, {transform_indices = @transform_5, window_bounds = array<i64: 1, 1, 1, 128>}, {transform_indices = @transform_6, window_bounds = array<i64: 1, 1, 1, 128>}]} {
    %c0 = arith.constant 0 : index
    %c0_0 = arith.constant 0 : index
    %c0_1 = arith.constant 0 : index
    %c0_2 = arith.constant 0 : index
    %0 = vector.load %arg2[%c0, %c0_0, %c0_1, %c0_2] : memref<1x1x3x128xbf16, #tpu.memory_space<vmem>>, vector<1x1x3x128xbf16>
    %1 = vector.shape_cast %0 : vector<1x1x3x128xbf16> to vector<1x3x128xbf16>
    %c0_3 = arith.constant 0 : index
    %c0_4 = arith.constant 0 : index
    %c0_5 = arith.constant 0 : index
    %c0_6 = arith.constant 0 : index
    %2 = vector.load %arg3[%c0_3, %c0_4, %c0_5, %c0_6] : memref<1x1x3x128xbf16, #tpu.memory_space<vmem>>, vector<1x1x3x128xbf16>
    %3 = vector.shape_cast %2 : vector<1x1x3x128xbf16> to vector<1x3x128xbf16>
    %c0_7 = arith.constant 0 : index
    %c0_8 = arith.constant 0 : index
    %c0_9 = arith.constant 0 : index
    %c0_10 = arith.constant 0 : index
    %4 = vector.load %arg4[%c0_7, %c0_8, %c0_9, %c0_10] : memref<1x1x3x128xbf16, #tpu.memory_space<vmem>>, vector<1x1x3x128xbf16>
    %5 = vector.shape_cast %4 : vector<1x1x3x128xbf16> to vector<1x3x128xbf16>
    %6 = tpu.concatenate %1, %3, %5 in 0 : vector<1x3x128xbf16>, vector<1x3x128xbf16>, vector<1x3x128xbf16> -> vector<3x3x128xbf16>
    %7 = vector.extract_strided_slice %6 {offsets = [0, 0, 0], sizes = [3, 1, 128], strides = [1, 1, 1]} : vector<3x3x128xbf16> to vector<3x1x128xbf16>
    %8 = vector.extract_strided_slice %6 {offsets = [0, 1, 0], sizes = [3, 1, 128], strides = [1, 1, 1]} : vector<3x3x128xbf16> to vector<3x1x128xbf16>
    %9 = vector.extract_strided_slice %6 {offsets = [0, 2, 0], sizes = [3, 1, 128], strides = [1, 1, 1]} : vector<3x3x128xbf16> to vector<3x1x128xbf16>
    %10 = vector.extract_strided_slice %7 {offsets = [0, 0, 0], sizes = [1, 1, 128], strides = [1, 1, 1]} : vector<3x1x128xbf16> to vector<1x1x128xbf16>
    %11 = vector.extract_strided_slice %8 {offsets = [0, 0, 0], sizes = [1, 1, 128], strides = [1, 1, 1]} : vector<3x1x128xbf16> to vector<1x1x128xbf16>
    %12 = vector.extract_strided_slice %9 {offsets = [0, 0, 0], sizes = [1, 1, 128], strides = [1, 1, 1]} : vector<3x1x128xbf16> to vector<1x1x128xbf16>
    %13 = vector.extract_strided_slice %7 {offsets = [1, 0, 0], sizes = [1, 1, 128], strides = [1, 1, 1]} : vector<3x1x128xbf16> to vector<1x1x128xbf16>
    %14 = vector.extract_strided_slice %8 {offsets = [1, 0, 0], sizes = [1, 1, 128], strides = [1, 1, 1]} : vector<3x1x128xbf16> to vector<1x1x128xbf16>
    %15 = vector.extract_strided_slice %9 {offsets = [1, 0, 0], sizes = [1, 1, 128], strides = [1, 1, 1]} : vector<3x1x128xbf16> to vector<1x1x128xbf16>
    %16 = vector.extract_strided_slice %7 {offsets = [2, 0, 0], sizes = [1, 1, 128], strides = [1, 1, 1]} : vector<3x1x128xbf16> to vector<1x1x128xbf16>
    %17 = vector.extract_strided_slice %8 {offsets = [2, 0, 0], sizes = [1, 1, 128], strides = [1, 1, 1]} : vector<3x1x128xbf16> to vector<1x1x128xbf16>
    %18 = vector.extract_strided_slice %9 {offsets = [2, 0, 0], sizes = [1, 1, 128], strides = [1, 1, 1]} : vector<3x1x128xbf16> to vector<1x1x128xbf16>
    %19 = tpu.concatenate %10, %11, %12, %13, %14, %15, %16, %17, %18 in 2 : vector<1x1x128xbf16>, vector<1x1x128xbf16>, vector<1x1x128xbf16>, vector<1x1x128xbf16>, vector<1x1x128xbf16>, vector<1x1x128xbf16>, vector<1x1x128xbf16>, vector<1x1x128xbf16>, vector<1x1x128xbf16> -> vector<1x1x1152xbf16>
    %20 = vector.shape_cast %19 : vector<1x1x1152xbf16> to vector<1x1152xbf16>
    %c0_11 = arith.constant 0 : index
    %c0_12 = arith.constant 0 : index
    %21 = vector.load %arg5[%c0_11, %c0_12] : memref<1152x128xbf16, #tpu.memory_space<vmem>>, vector<1152x128xbf16>
    %cst = arith.constant dense<0.000000e+00> : vector<1x128xf32>
    %22 = tpu.matmul %20, %21, %cst {dimension_numbers = #tpu.dot_dimension_numbers<[1], [0], [0], [1], [0, 0, 1, 1], [], []>} : vector<1x1152xbf16>, vector<1152x128xbf16>, vector<1x128xf32> -> vector<1x128xf32>
    %c0_13 = arith.constant 0 : index
    %c0_14 = arith.constant 0 : index
    %23 = vector.load %arg6[%c0_13, %c0_14] : memref<1x128xf32, #tpu.memory_space<vmem>>, vector<1x128xf32>
    %24 = arith.addf %22, %23 : vector<1x128xf32>
    %c0_15 = arith.constant 0 : index
    %c0_16 = arith.constant 0 : index
    %c0_17 = arith.constant 0 : index
    %c0_18 = arith.constant 0 : index
    %25 = vector.load %arg7[%c0_15, %c0_16, %c0_17, %c0_18] : memref<1x1x1x128xbf16, #tpu.memory_space<vmem>>, vector<1x1x1x128xbf16>
    %26 = vector.shape_cast %25 : vector<1x1x1x128xbf16> to vector<1x1x128xbf16>
    %27 = vector.shape_cast %26 : vector<1x1x128xbf16> to vector<1x128xbf16>
    %28 = arith.extf %27 : vector<1x128xbf16> to vector<1x128xf32>
    %29 = arith.addf %24, %28 : vector<1x128xf32>
    %cst_19 = arith.constant 0.000000e+00 : f32
    %30 = vector.broadcast %cst_19 : f32 to vector<1x128xf32>
    %31 = arith.maximumf %29, %30 : vector<1x128xf32>
    %32 = vector.shape_cast %31 : vector<1x128xf32> to vector<1x1x128xf32>
    %33 = arith.truncf %32 : vector<1x1x128xf32> to vector<1x1x128xbf16>
    %c0_20 = arith.constant 0 : index
    %c0_21 = arith.constant 0 : index
    %c0_22 = arith.constant 0 : index
    %c0_23 = arith.constant 0 : index
    %34 = vector.load %arg8[%c0_20, %c0_21, %c0_22, %c0_23] : memref<1x1x1x128xbf16, #tpu.memory_space<vmem>>, vector<1x1x1x128xbf16>
    %35 = vector.shape_cast %34 : vector<1x1x1x128xbf16> to vector<1x1x128xbf16>
    %36 = vector.shape_cast %33 : vector<1x1x128xbf16> to vector<1x1x1x128xbf16>
    tpu.vector_store %arg8[%c0_20, %c0_21, %c0_22, %c0_23], %36 {strides = array<i32>} : memref<1x1x1x128xbf16, #tpu.memory_space<vmem>>, vector<1x1x1x128xbf16>,
    return
  }
  func.func @transform_0(%arg0: i32, %arg1: i32) -> (i32, i32, i32, i32) {
    %c0_i32 = arith.constant 0 : i32
    %c0_i32_0 = arith.constant 0 : i32
    %c0_i32_1 = arith.constant 0 : i32
    return %arg0, %arg1, %c0_i32, %c0_i32_0 : i32, i32, i32, i32
  }
  func.func @transform_1(%arg0: i32, %arg1: i32) -> (i32, i32, i32, i32) {
    %c1_i32 = arith.constant 1 : i32
    %0 = arith.addi %arg1, %c1_i32 : i32
    %c1_i32_0 = arith.constant 1 : i32
    %1 = arith.muli %0, %c1_i32_0 : i32
    %c0_i32 = arith.constant 0 : i32
    %c0_i32_1 = arith.constant 0 : i32
    %c0_i32_2 = arith.constant 0 : i32
    return %arg0, %1, %c0_i32, %c0_i32_1 : i32, i32, i32, i32
  }
  func.func @transform_2(%arg0: i32, %arg1: i32) -> (i32, i32, i32, i32) {
    %c1_i32 = arith.constant 1 : i32
    %0 = arith.addi %arg1, %c1_i32 : i32
    %c1_i32_0 = arith.constant 1 : i32
    %1 = arith.muli %0, %c1_i32_0 : i32
    %c1_i32_1 = arith.constant 1 : i32
    %2 = arith.addi %1, %c1_i32_1 : i32
    %c0_i32 = arith.constant 0 : i32
    %c0_i32_2 = arith.constant 0 : i32
    %c0_i32_3 = arith.constant 0 : i32
    return %arg0, %2, %c0_i32, %c0_i32_2 : i32, i32, i32, i32
  }
  func.func @transform_3(%arg0: i32, %arg1: i32) -> (i32, i32) {
    %c0_i32 = arith.constant 0 : i32
    %c0_i32_0 = arith.constant 0 : i32
    %c0_i32_1 = arith.constant 0 : i32
    return %c0_i32, %c0_i32_0 : i32, i32
  }
  func.func @transform_4(%arg0: i32, %arg1: i32) -> (i32, i32) {
    %c0_i32 = arith.constant 0 : i32
    %c0_i32_0 = arith.constant 0 : i32
    %c0_i32_1 = arith.constant 0 : i32
    return %c0_i32, %c0_i32_0 : i32, i32
  }
  func.func @transform_5(%arg0: i32, %arg1: i32) -> (i32, i32, i32, i32) {
    %c0_i32 = arith.constant 0 : i32
    %c0_i32_0 = arith.constant 0 : i32
    %c0_i32_1 = arith.constant 0 : i32
    return %arg0, %arg1, %c0_i32, %c0_i32_0 : i32, i32, i32, i32
  }
  func.func @transform_6(%arg0: i32, %arg1: i32) -> (i32, i32, i32, i32) {
    %c0_i32 = arith.constant 0 : i32
    %c0_i32_0 = arith.constant 0 : i32
    %c0_i32_1 = arith.constant 0 : i32
    return %arg0, %arg1, %c0_i32, %c0_i32_0 : i32, i32, i32, i32
  }
}

module attributes {stable_mosaic.version = 11 : i64} {
  func.func @kernel(%arg0: i32, %arg1: memref<2x128xbf16, #tpu.memory_space<vmem>>, %arg2: memref<128x32xbf16, #tpu.memory_space<vmem>>, %arg3: memref<1x32xf32, #tpu.memory_space<vmem>>, %arg4: memref<2x32xbf16, #tpu.memory_space<vmem>>) attributes {dimension_semantics = [#tpu.dimension_semantics<parallel>], iteration_bounds = array<i64: 1>, scalar_prefetch = 0 : i64, scratch_operands = 0 : i64, tpu.core_type = #tpu.core_type<tc>, window_params = [{transform_indices = @transform_0, window_bounds = array<i64: 2, 128>}, {pipeline_mode = #tpu.pipeline_mode<synchronous>, transform_indices = @transform_1, window_bounds = array<i64: 128, 32>}, {pipeline_mode = #tpu.pipeline_mode<synchronous>, transform_indices = @transform_2, window_bounds = array<i64: 1, 32>}, {transform_indices = @transform_3, window_bounds = array<i64: 2, 32>}]} {
    %c0 = arith.constant 0 : index
    %c0_0 = arith.constant 0 : index
    %0 = vector.load %arg1[%c0, %c0_0] : memref<2x128xbf16, #tpu.memory_space<vmem>>, vector<2x128xbf16>
    %c0_1 = arith.constant 0 : index
    %c0_2 = arith.constant 0 : index
    %1 = vector.load %arg2[%c0_1, %c0_2] : memref<128x32xbf16, #tpu.memory_space<vmem>>, vector<128x32xbf16>
    %cst = arith.constant dense<0.000000e+00> : vector<2x32xf32>
    %2 = tpu.matmul %0, %1, %cst {dimension_numbers = #tpu.dot_dimension_numbers<[1], [0], [0], [1], [0, 0, 1, 1], [], []>} : vector<2x128xbf16>, vector<128x32xbf16>, vector<2x32xf32> -> vector<2x32xf32>
    %c0_3 = arith.constant 0 : index
    %c0_4 = arith.constant 0 : index
    %3 = vector.load %arg3[%c0_3, %c0_4] : memref<1x32xf32, #tpu.memory_space<vmem>>, vector<1x32xf32>
    %4 = vector.broadcast %3 : vector<1x32xf32> to vector<2x32xf32>
    %5 = arith.addf %2, %4 : vector<2x32xf32>
    %cst_5 = arith.constant 0.000000e+00 : f32
    %6 = vector.broadcast %cst_5 : f32 to vector<2x32xf32>
    %7 = arith.maximumf %5, %6 : vector<2x32xf32>
    %8 = arith.truncf %7 : vector<2x32xf32> to vector<2x32xbf16>
    %c0_6 = arith.constant 0 : index
    %c0_7 = arith.constant 0 : index
    %9 = vector.load %arg4[%c0_6, %c0_7] : memref<2x32xbf16, #tpu.memory_space<vmem>>, vector<2x32xbf16>
    tpu.vector_store %arg4[%c0_6, %c0_7], %8 {strides = array<i32>} : memref<2x32xbf16, #tpu.memory_space<vmem>>, vector<2x32xbf16>,
    return
  }
  func.func @transform_0(%arg0: i32) -> (i32, i32) {
    %c0_i32 = arith.constant 0 : i32
    %c0_i32_0 = arith.constant 0 : i32
    return %arg0, %c0_i32 : i32, i32
  }
  func.func @transform_1(%arg0: i32) -> (i32, i32) {
    %c0_i32 = arith.constant 0 : i32
    %c0_i32_0 = arith.constant 0 : i32
    %c0_i32_1 = arith.constant 0 : i32
    return %c0_i32, %c0_i32_0 : i32, i32
  }
  func.func @transform_2(%arg0: i32) -> (i32, i32) {
    %c0_i32 = arith.constant 0 : i32
    %c0_i32_0 = arith.constant 0 : i32
    %c0_i32_1 = arith.constant 0 : i32
    return %c0_i32, %c0_i32_0 : i32, i32
  }
  func.func @transform_3(%arg0: i32) -> (i32, i32) {
    %c0_i32 = arith.constant 0 : i32
    %c0_i32_0 = arith.constant 0 : i32
    return %arg0, %c0_i32 : i32, i32
  }
}

module attributes {stable_mosaic.version = 11 : i64} {
  func.func @kernel(%arg0: i32, %arg1: memref<2x32xbf16, #tpu.memory_space<vmem>>, %arg2: memref<32x512xbf16, #tpu.memory_space<vmem>>, %arg3: memref<1x512xf32, #tpu.memory_space<vmem>>, %arg4: memref<2x512xbf16, #tpu.memory_space<vmem>>) attributes {dimension_semantics = [#tpu.dimension_semantics<parallel>], iteration_bounds = array<i64: 1>, scalar_prefetch = 0 : i64, scratch_operands = 0 : i64, tpu.core_type = #tpu.core_type<tc>, window_params = [{transform_indices = @transform_0, window_bounds = array<i64: 2, 32>}, {pipeline_mode = #tpu.pipeline_mode<synchronous>, transform_indices = @transform_1, window_bounds = array<i64: 32, 512>}, {pipeline_mode = #tpu.pipeline_mode<synchronous>, transform_indices = @transform_2, window_bounds = array<i64: 1, 512>}, {transform_indices = @transform_3, window_bounds = array<i64: 2, 512>}]} {
    %c0 = arith.constant 0 : index
    %c0_0 = arith.constant 0 : index
    %0 = vector.load %arg1[%c0, %c0_0] : memref<2x32xbf16, #tpu.memory_space<vmem>>, vector<2x32xbf16>
    %c0_1 = arith.constant 0 : index
    %c0_2 = arith.constant 0 : index
    %1 = vector.load %arg2[%c0_1, %c0_2] : memref<32x512xbf16, #tpu.memory_space<vmem>>, vector<32x512xbf16>
    %cst = arith.constant dense<0.000000e+00> : vector<2x512xf32>
    %2 = tpu.matmul %0, %1, %cst {dimension_numbers = #tpu.dot_dimension_numbers<[1], [0], [0], [1], [0, 0, 1, 1], [], []>} : vector<2x32xbf16>, vector<32x512xbf16>, vector<2x512xf32> -> vector<2x512xf32>
    %c0_3 = arith.constant 0 : index
    %c0_4 = arith.constant 0 : index
    %3 = vector.load %arg3[%c0_3, %c0_4] : memref<1x512xf32, #tpu.memory_space<vmem>>, vector<1x512xf32>
    %4 = vector.broadcast %3 : vector<1x512xf32> to vector<2x512xf32>
    %5 = arith.addf %2, %4 : vector<2x512xf32>
    %6 = arith.truncf %5 : vector<2x512xf32> to vector<2x512xbf16>
    %c0_5 = arith.constant 0 : index
    %c0_6 = arith.constant 0 : index
    %7 = vector.load %arg4[%c0_5, %c0_6] : memref<2x512xbf16, #tpu.memory_space<vmem>>, vector<2x512xbf16>
    tpu.vector_store %arg4[%c0_5, %c0_6], %6 {strides = array<i32>} : memref<2x512xbf16, #tpu.memory_space<vmem>>, vector<2x512xbf16>,
    return
  }
  func.func @transform_0(%arg0: i32) -> (i32, i32) {
    %c0_i32 = arith.constant 0 : i32
    %c0_i32_0 = arith.constant 0 : i32
    return %arg0, %c0_i32 : i32, i32
  }
  func.func @transform_1(%arg0: i32) -> (i32, i32) {
    %c0_i32 = arith.constant 0 : i32
    %c0_i32_0 = arith.constant 0 : i32
    %c0_i32_1 = arith.constant 0 : i32
    return %c0_i32, %c0_i32_0 : i32, i32
  }
  func.func @transform_2(%arg0: i32) -> (i32, i32) {
    %c0_i32 = arith.constant 0 : i32
    %c0_i32_0 = arith.constant 0 : i32
    %c0_i32_1 = arith.constant 0 : i32
    return %c0_i32, %c0_i32_0 : i32, i32
  }
  func.func @transform_3(%arg0: i32) -> (i32, i32) {
    %c0_i32 = arith.constant 0 : i32
    %c0_i32_0 = arith.constant 0 : i32
    return %arg0, %c0_i32 : i32, i32
  }
}

module attributes {stable_mosaic.version = 11 : i64} {
  func.func @kernel(%arg0: i32, %arg1: memref<32x128xbf16, #tpu.memory_space<vmem>>, %arg2: memref<128x32xbf16, #tpu.memory_space<vmem>>, %arg3: memref<1x32xf32, #tpu.memory_space<vmem>>, %arg4: memref<32x32xbf16, #tpu.memory_space<vmem>>) attributes {dimension_semantics = [#tpu.dimension_semantics<parallel>], iteration_bounds = array<i64: 1>, scalar_prefetch = 0 : i64, scratch_operands = 0 : i64, tpu.core_type = #tpu.core_type<tc>, window_params = [{transform_indices = @transform_0, window_bounds = array<i64: 32, 128>}, {pipeline_mode = #tpu.pipeline_mode<synchronous>, transform_indices = @transform_1, window_bounds = array<i64: 128, 32>}, {pipeline_mode = #tpu.pipeline_mode<synchronous>, transform_indices = @transform_2, window_bounds = array<i64: 1, 32>}, {transform_indices = @transform_3, window_bounds = array<i64: 32, 32>}]} {
    %c0 = arith.constant 0 : index
    %c0_0 = arith.constant 0 : index
    %0 = vector.load %arg1[%c0, %c0_0] : memref<32x128xbf16, #tpu.memory_space<vmem>>, vector<32x128xbf16>
    %c0_1 = arith.constant 0 : index
    %c0_2 = arith.constant 0 : index
    %1 = vector.load %arg2[%c0_1, %c0_2] : memref<128x32xbf16, #tpu.memory_space<vmem>>, vector<128x32xbf16>
    %cst = arith.constant dense<0.000000e+00> : vector<32x32xf32>
    %2 = tpu.matmul %0, %1, %cst {dimension_numbers = #tpu.dot_dimension_numbers<[1], [0], [0], [1], [0, 0, 1, 1], [], []>} : vector<32x128xbf16>, vector<128x32xbf16>, vector<32x32xf32> -> vector<32x32xf32>
    %c0_3 = arith.constant 0 : index
    %c0_4 = arith.constant 0 : index
    %3 = vector.load %arg3[%c0_3, %c0_4] : memref<1x32xf32, #tpu.memory_space<vmem>>, vector<1x32xf32>
    %4 = vector.broadcast %3 : vector<1x32xf32> to vector<32x32xf32>
    %5 = arith.addf %2, %4 : vector<32x32xf32>
    %cst_5 = arith.constant 0.000000e+00 : f32
    %6 = vector.broadcast %cst_5 : f32 to vector<32x32xf32>
    %7 = arith.maximumf %5, %6 : vector<32x32xf32>
    %8 = arith.truncf %7 : vector<32x32xf32> to vector<32x32xbf16>
    %c0_6 = arith.constant 0 : index
    %c0_7 = arith.constant 0 : index
    %9 = vector.load %arg4[%c0_6, %c0_7] : memref<32x32xbf16, #tpu.memory_space<vmem>>, vector<32x32xbf16>
    tpu.vector_store %arg4[%c0_6, %c0_7], %8 {strides = array<i32>} : memref<32x32xbf16, #tpu.memory_space<vmem>>, vector<32x32xbf16>,
    return
  }
  func.func @transform_0(%arg0: i32) -> (i32, i32) {
    %c0_i32 = arith.constant 0 : i32
    %c0_i32_0 = arith.constant 0 : i32
    return %arg0, %c0_i32 : i32, i32
  }
  func.func @transform_1(%arg0: i32) -> (i32, i32) {
    %c0_i32 = arith.constant 0 : i32
    %c0_i32_0 = arith.constant 0 : i32
    %c0_i32_1 = arith.constant 0 : i32
    return %c0_i32, %c0_i32_0 : i32, i32
  }
  func.func @transform_2(%arg0: i32) -> (i32, i32) {
    %c0_i32 = arith.constant 0 : i32
    %c0_i32_0 = arith.constant 0 : i32
    %c0_i32_1 = arith.constant 0 : i32
    return %c0_i32, %c0_i32_0 : i32, i32
  }
  func.func @transform_3(%arg0: i32) -> (i32, i32) {
    %c0_i32 = arith.constant 0 : i32
    %c0_i32_0 = arith.constant 0 : i32
    return %arg0, %c0_i32 : i32, i32
  }
}

module attributes {stable_mosaic.version = 11 : i64} {
  func.func @kernel(%arg0: i32, %arg1: memref<128x64xbf16, #tpu.memory_space<vmem>>, %arg2: memref<64x32xbf16, #tpu.memory_space<vmem>>, %arg3: memref<1x32xf32, #tpu.memory_space<vmem>>, %arg4: memref<128x32xbf16, #tpu.memory_space<vmem>>) attributes {dimension_semantics = [#tpu.dimension_semantics<parallel>], iteration_bounds = array<i64: 4>, scalar_prefetch = 0 : i64, scratch_operands = 0 : i64, tpu.core_type = #tpu.core_type<tc>, window_params = [{transform_indices = @transform_0, window_bounds = array<i64: 128, 64>}, {pipeline_mode = #tpu.pipeline_mode<synchronous>, transform_indices = @transform_1, window_bounds = array<i64: 64, 32>}, {pipeline_mode = #tpu.pipeline_mode<synchronous>, transform_indices = @transform_2, window_bounds = array<i64: 1, 32>}, {transform_indices = @transform_3, window_bounds = array<i64: 128, 32>}]} {
    %c0 = arith.constant 0 : index
    %c0_0 = arith.constant 0 : index
    %0 = vector.load %arg1[%c0, %c0_0] : memref<128x64xbf16, #tpu.memory_space<vmem>>, vector<128x64xbf16>
    %c0_1 = arith.constant 0 : index
    %c0_2 = arith.constant 0 : index
    %1 = vector.load %arg2[%c0_1, %c0_2] : memref<64x32xbf16, #tpu.memory_space<vmem>>, vector<64x32xbf16>
    %cst = arith.constant dense<0.000000e+00> : vector<128x32xf32>
    %2 = tpu.matmul %0, %1, %cst {dimension_numbers = #tpu.dot_dimension_numbers<[1], [0], [0], [1], [0, 0, 1, 1], [], []>} : vector<128x64xbf16>, vector<64x32xbf16>, vector<128x32xf32> -> vector<128x32xf32>
    %c0_3 = arith.constant 0 : index
    %c0_4 = arith.constant 0 : index
    %3 = vector.load %arg3[%c0_3, %c0_4] : memref<1x32xf32, #tpu.memory_space<vmem>>, vector<1x32xf32>
    %4 = vector.broadcast %3 : vector<1x32xf32> to vector<128x32xf32>
    %5 = arith.addf %2, %4 : vector<128x32xf32>
    %cst_5 = arith.constant 0.000000e+00 : f32
    %6 = vector.broadcast %cst_5 : f32 to vector<128x32xf32>
    %7 = arith.maximumf %5, %6 : vector<128x32xf32>
    %8 = arith.truncf %7 : vector<128x32xf32> to vector<128x32xbf16>
    %c0_6 = arith.constant 0 : index
    %c0_7 = arith.constant 0 : index
    %9 = vector.load %arg4[%c0_6, %c0_7] : memref<128x32xbf16, #tpu.memory_space<vmem>>, vector<128x32xbf16>
    tpu.vector_store %arg4[%c0_6, %c0_7], %8 {strides = array<i32>} : memref<128x32xbf16, #tpu.memory_space<vmem>>, vector<128x32xbf16>,
    return
  }
  func.func @transform_0(%arg0: i32) -> (i32, i32) {
    %c0_i32 = arith.constant 0 : i32
    %c0_i32_0 = arith.constant 0 : i32
    return %arg0, %c0_i32 : i32, i32
  }
  func.func @transform_1(%arg0: i32) -> (i32, i32) {
    %c0_i32 = arith.constant 0 : i32
    %c0_i32_0 = arith.constant 0 : i32
    %c0_i32_1 = arith.constant 0 : i32
    return %c0_i32, %c0_i32_0 : i32, i32
  }
  func.func @transform_2(%arg0: i32) -> (i32, i32) {
    %c0_i32 = arith.constant 0 : i32
    %c0_i32_0 = arith.constant 0 : i32
    %c0_i32_1 = arith.constant 0 : i32
    return %c0_i32, %c0_i32_0 : i32, i32
  }
  func.func @transform_3(%arg0: i32) -> (i32, i32) {
    %c0_i32 = arith.constant 0 : i32
    %c0_i32_0 = arith.constant 0 : i32
    return %arg0, %c0_i32 : i32, i32
  }
}

module attributes {stable_mosaic.version = 11 : i64} {
  func.func @kernel(%arg0: i32, %arg1: i32, %arg2: memref<1x1x16x32xbf16, #tpu.memory_space<vmem>>, %arg3: memref<32x32xbf16, #tpu.memory_space<vmem>>, %arg4: memref<1x32xf32, #tpu.memory_space<vmem>>, %arg5: memref<1x1x4x32xbf16, #tpu.memory_space<vmem>>) attributes {dimension_semantics = [#tpu.dimension_semantics<parallel>, #tpu.dimension_semantics<parallel>], iteration_bounds = array<i64: 2, 4>, scalar_prefetch = 0 : i64, scratch_operands = 0 : i64, tpu.core_type = #tpu.core_type<tc>, window_params = [{transform_indices = @transform_0, window_bounds = array<i64: 1, 1, 16, 32>}, {pipeline_mode = #tpu.pipeline_mode<synchronous>, transform_indices = @transform_1, window_bounds = array<i64: 32, 32>}, {pipeline_mode = #tpu.pipeline_mode<synchronous>, transform_indices = @transform_2, window_bounds = array<i64: 1, 32>}, {transform_indices = @transform_3, window_bounds = array<i64: 1, 1, 4, 32>}]} {
    %c0 = arith.constant 0 : index
    %c0_0 = arith.constant 0 : index
    %c0_1 = arith.constant 0 : index
    %c0_2 = arith.constant 0 : index
    %0 = vector.load %arg2[%c0, %c0_0, %c0_1, %c0_2] : memref<1x1x16x32xbf16, #tpu.memory_space<vmem>>, vector<1x1x16x32xbf16>
    %1 = vector.shape_cast %0 : vector<1x1x16x32xbf16> to vector<16x32xbf16>
    %2 = vector.shape_cast %1 : vector<16x32xbf16> to vector<4x4x32xbf16>
    %3 = vector.extract_strided_slice %2 {offsets = [0, 0, 0], sizes = [4, 1, 32], strides = [1, 1, 1]} : vector<4x4x32xbf16> to vector<4x1x32xbf16>
    %4 = vector.shape_cast %3 : vector<4x1x32xbf16> to vector<4x32xbf16>
    %c0_3 = arith.constant 0 : index
    %c0_4 = arith.constant 0 : index
    %5 = vector.load %arg3[%c0_3, %c0_4] : memref<32x32xbf16, #tpu.memory_space<vmem>>, vector<32x32xbf16>
    %cst = arith.constant dense<0.000000e+00> : vector<4x32xf32>
    %6 = tpu.matmul %4, %5, %cst {dimension_numbers = #tpu.dot_dimension_numbers<[1], [0], [0], [1], [0, 0, 1, 1], [], []>} : vector<4x32xbf16>, vector<32x32xbf16>, vector<4x32xf32> -> vector<4x32xf32>
    %c0_5 = arith.constant 0 : index
    %c0_6 = arith.constant 0 : index
    %7 = vector.load %arg4[%c0_5, %c0_6] : memref<1x32xf32, #tpu.memory_space<vmem>>, vector<1x32xf32>
    %8 = vector.broadcast %7 : vector<1x32xf32> to vector<4x32xf32>
    %9 = arith.addf %6, %8 : vector<4x32xf32>
    %10 = arith.truncf %9 : vector<4x32xf32> to vector<4x32xbf16>
    %c0_7 = arith.constant 0 : index
    %c0_8 = arith.constant 0 : index
    %c0_9 = arith.constant 0 : index
    %c0_10 = arith.constant 0 : index
    %11 = vector.load %arg5[%c0_7, %c0_8, %c0_9, %c0_10] : memref<1x1x4x32xbf16, #tpu.memory_space<vmem>>, vector<1x1x4x32xbf16>
    %12 = vector.shape_cast %11 : vector<1x1x4x32xbf16> to vector<4x32xbf16>
    %13 = vector.shape_cast %10 : vector<4x32xbf16> to vector<1x1x4x32xbf16>
    tpu.vector_store %arg5[%c0_7, %c0_8, %c0_9, %c0_10], %13 {strides = array<i32>} : memref<1x1x4x32xbf16, #tpu.memory_space<vmem>>, vector<1x1x4x32xbf16>,
    return
  }
  func.func @transform_0(%arg0: i32, %arg1: i32) -> (i32, i32, i32, i32) {
    %c4_i32 = arith.constant 4 : i32
    %0 = arith.muli %c4_i32, %arg1 : i32
    %c0_i32 = arith.constant 0 : i32
    %c0_i32_0 = arith.constant 0 : i32
    %c0_i32_1 = arith.constant 0 : i32
    return %arg0, %0, %c0_i32, %c0_i32_0 : i32, i32, i32, i32
  }
  func.func @transform_1(%arg0: i32, %arg1: i32) -> (i32, i32) {
    %c0_i32 = arith.constant 0 : i32
    %c0_i32_0 = arith.constant 0 : i32
    %c0_i32_1 = arith.constant 0 : i32
    return %c0_i32, %c0_i32_0 : i32, i32
  }
  func.func @transform_2(%arg0: i32, %arg1: i32) -> (i32, i32) {
    %c0_i32 = arith.constant 0 : i32
    %c0_i32_0 = arith.constant 0 : i32
    %c0_i32_1 = arith.constant 0 : i32
    return %c0_i32, %c0_i32_0 : i32, i32
  }
  func.func @transform_3(%arg0: i32, %arg1: i32) -> (i32, i32, i32, i32) {
    %c0_i32 = arith.constant 0 : i32
    %c0_i32_0 = arith.constant 0 : i32
    %c0_i32_1 = arith.constant 0 : i32
    return %arg0, %arg1, %c0_i32, %c0_i32_0 : i32, i32, i32, i32
  }
}

module attributes {stable_mosaic.version = 11 : i64} {
  func.func @kernel(%arg0: i32, %arg1: i32, %arg2: memref<1x1x32x32xbf16, #tpu.memory_space<vmem>>, %arg3: memref<32x32xbf16, #tpu.memory_space<vmem>>, %arg4: memref<1x32xf32, #tpu.memory_space<vmem>>, %arg5: memref<1x1x4x32xbf16, #tpu.memory_space<vmem>>) attributes {dimension_semantics = [#tpu.dimension_semantics<parallel>, #tpu.dimension_semantics<parallel>], iteration_bounds = array<i64: 2, 4>, scalar_prefetch = 0 : i64, scratch_operands = 0 : i64, tpu.core_type = #tpu.core_type<tc>, window_params = [{transform_indices = @transform_0, window_bounds = array<i64: 1, 1, 32, 32>}, {pipeline_mode = #tpu.pipeline_mode<synchronous>, transform_indices = @transform_1, window_bounds = array<i64: 32, 32>}, {pipeline_mode = #tpu.pipeline_mode<synchronous>, transform_indices = @transform_2, window_bounds = array<i64: 1, 32>}, {transform_indices = @transform_3, window_bounds = array<i64: 1, 1, 4, 32>}]} {
    %c0 = arith.constant 0 : index
    %c0_0 = arith.constant 0 : index
    %c0_1 = arith.constant 0 : index
    %c0_2 = arith.constant 0 : index
    %0 = vector.load %arg2[%c0, %c0_0, %c0_1, %c0_2] : memref<1x1x32x32xbf16, #tpu.memory_space<vmem>>, vector<1x1x32x32xbf16>
    %1 = vector.shape_cast %0 : vector<1x1x32x32xbf16> to vector<32x32xbf16>
    %2 = vector.shape_cast %1 : vector<32x32xbf16> to vector<4x8x32xbf16>
    %3 = vector.extract_strided_slice %2 {offsets = [0, 0, 0], sizes = [4, 1, 32], strides = [1, 1, 1]} : vector<4x8x32xbf16> to vector<4x1x32xbf16>
    %4 = vector.shape_cast %3 : vector<4x1x32xbf16> to vector<4x32xbf16>
    %c0_3 = arith.constant 0 : index
    %c0_4 = arith.constant 0 : index
    %5 = vector.load %arg3[%c0_3, %c0_4] : memref<32x32xbf16, #tpu.memory_space<vmem>>, vector<32x32xbf16>
    %cst = arith.constant dense<0.000000e+00> : vector<4x32xf32>
    %6 = tpu.matmul %4, %5, %cst {dimension_numbers = #tpu.dot_dimension_numbers<[1], [0], [0], [1], [0, 0, 1, 1], [], []>} : vector<4x32xbf16>, vector<32x32xbf16>, vector<4x32xf32> -> vector<4x32xf32>
    %c0_5 = arith.constant 0 : index
    %c0_6 = arith.constant 0 : index
    %7 = vector.load %arg4[%c0_5, %c0_6] : memref<1x32xf32, #tpu.memory_space<vmem>>, vector<1x32xf32>
    %8 = vector.broadcast %7 : vector<1x32xf32> to vector<4x32xf32>
    %9 = arith.addf %6, %8 : vector<4x32xf32>
    %10 = arith.truncf %9 : vector<4x32xf32> to vector<4x32xbf16>
    %c0_7 = arith.constant 0 : index
    %c0_8 = arith.constant 0 : index
    %c0_9 = arith.constant 0 : index
    %c0_10 = arith.constant 0 : index
    %11 = vector.load %arg5[%c0_7, %c0_8, %c0_9, %c0_10] : memref<1x1x4x32xbf16, #tpu.memory_space<vmem>>, vector<1x1x4x32xbf16>
    %12 = vector.shape_cast %11 : vector<1x1x4x32xbf16> to vector<4x32xbf16>
    %13 = vector.shape_cast %10 : vector<4x32xbf16> to vector<1x1x4x32xbf16>
    tpu.vector_store %arg5[%c0_7, %c0_8, %c0_9, %c0_10], %13 {strides = array<i32>} : memref<1x1x4x32xbf16, #tpu.memory_space<vmem>>, vector<1x1x4x32xbf16>,
    return
  }
  func.func @transform_0(%arg0: i32, %arg1: i32) -> (i32, i32, i32, i32) {
    %c8_i32 = arith.constant 8 : i32
    %0 = arith.muli %c8_i32, %arg1 : i32
    %c0_i32 = arith.constant 0 : i32
    %c0_i32_0 = arith.constant 0 : i32
    %c0_i32_1 = arith.constant 0 : i32
    return %arg0, %0, %c0_i32, %c0_i32_0 : i32, i32, i32, i32
  }
  func.func @transform_1(%arg0: i32, %arg1: i32) -> (i32, i32) {
    %c0_i32 = arith.constant 0 : i32
    %c0_i32_0 = arith.constant 0 : i32
    %c0_i32_1 = arith.constant 0 : i32
    return %c0_i32, %c0_i32_0 : i32, i32
  }
  func.func @transform_2(%arg0: i32, %arg1: i32) -> (i32, i32) {
    %c0_i32 = arith.constant 0 : i32
    %c0_i32_0 = arith.constant 0 : i32
    %c0_i32_1 = arith.constant 0 : i32
    return %c0_i32, %c0_i32_0 : i32, i32
  }
  func.func @transform_3(%arg0: i32, %arg1: i32) -> (i32, i32, i32, i32) {
    %c0_i32 = arith.constant 0 : i32
    %c0_i32_0 = arith.constant 0 : i32
    %c0_i32_1 = arith.constant 0 : i32
    return %arg0, %arg1, %c0_i32, %c0_i32_0 : i32, i32, i32, i32
  }
}

module attributes {stable_mosaic.version = 11 : i64} {
  func.func @kernel(%arg0: i32, %arg1: memref<32x128xbf16, #tpu.memory_space<vmem>>, %arg2: memref<128x128xbf16, #tpu.memory_space<vmem>>, %arg3: memref<1x128xf32, #tpu.memory_space<vmem>>, %arg4: memref<32x128xf32, #tpu.memory_space<vmem>>) attributes {dimension_semantics = [#tpu.dimension_semantics<parallel>], iteration_bounds = array<i64: 1>, scalar_prefetch = 0 : i64, scratch_operands = 0 : i64, tpu.core_type = #tpu.core_type<tc>, window_params = [{transform_indices = @transform_0, window_bounds = array<i64: 32, 128>}, {pipeline_mode = #tpu.pipeline_mode<synchronous>, transform_indices = @transform_1, window_bounds = array<i64: 128, 128>}, {pipeline_mode = #tpu.pipeline_mode<synchronous>, transform_indices = @transform_2, window_bounds = array<i64: 1, 128>}, {transform_indices = @transform_3, window_bounds = array<i64: 32, 128>}]} {
    %c0 = arith.constant 0 : index
    %c0_0 = arith.constant 0 : index
    %0 = vector.load %arg1[%c0, %c0_0] : memref<32x128xbf16, #tpu.memory_space<vmem>>, vector<32x128xbf16>
    %c0_1 = arith.constant 0 : index
    %c0_2 = arith.constant 0 : index
    %1 = vector.load %arg2[%c0_1, %c0_2] : memref<128x128xbf16, #tpu.memory_space<vmem>>, vector<128x128xbf16>
    %cst = arith.constant dense<0.000000e+00> : vector<32x128xf32>
    %2 = tpu.matmul %0, %1, %cst {dimension_numbers = #tpu.dot_dimension_numbers<[1], [0], [0], [1], [0, 0, 1, 1], [], []>} : vector<32x128xbf16>, vector<128x128xbf16>, vector<32x128xf32> -> vector<32x128xf32>
    %c0_3 = arith.constant 0 : index
    %c0_4 = arith.constant 0 : index
    %3 = vector.load %arg3[%c0_3, %c0_4] : memref<1x128xf32, #tpu.memory_space<vmem>>, vector<1x128xf32>
    %4 = vector.broadcast %3 : vector<1x128xf32> to vector<32x128xf32>
    %5 = arith.addf %2, %4 : vector<32x128xf32>
    %c0_5 = arith.constant 0 : index
    %c0_6 = arith.constant 0 : index
    %6 = vector.load %arg4[%c0_5, %c0_6] : memref<32x128xf32, #tpu.memory_space<vmem>>, vector<32x128xf32>
    tpu.vector_store %arg4[%c0_5, %c0_6], %5 {strides = array<i32>} : memref<32x128xf32, #tpu.memory_space<vmem>>, vector<32x128xf32>,
    return
  }
  func.func @transform_0(%arg0: i32) -> (i32, i32) {
    %c0_i32 = arith.constant 0 : i32
    %c0_i32_0 = arith.constant 0 : i32
    return %arg0, %c0_i32 : i32, i32
  }
  func.func @transform_1(%arg0: i32) -> (i32, i32) {
    %c0_i32 = arith.constant 0 : i32
    %c0_i32_0 = arith.constant 0 : i32
    %c0_i32_1 = arith.constant 0 : i32
    return %c0_i32, %c0_i32_0 : i32, i32
  }
  func.func @transform_2(%arg0: i32) -> (i32, i32) {
    %c0_i32 = arith.constant 0 : i32
    %c0_i32_0 = arith.constant 0 : i32
    %c0_i32_1 = arith.constant 0 : i32
    return %c0_i32, %c0_i32_0 : i32, i32
  }
  func.func @transform_3(%arg0: i32) -> (i32, i32) {
    %c0_i32 = arith.constant 0 : i32
    %c0_i32_0 = arith.constant 0 : i32
    return %arg0, %c0_i32 : i32, i32
  }
}

</mosaic_0001>

<bundles_post_ra>
// kernel: edgepoint_forward.19
= control target key start
LH: loop header
LB: loop body
LE: loop exit
PB: predicated region body
PF: predicated region fallthrough
CT: control target
= control target key end

     0   :  { %s2035_s18 = smov 0   ;;  %s2037_s19 = smov 0   ;;  %s3007_s0 = inlined_call_operand.vmem [shape: bf16[2,34,34,3], index: 0, kind: input, shape index: {}, may-alias: {0,1,2}]   ;;  %s3008_s1 = inlined_call_operand.vmem [shape: bf16[2,34,34,3], index: 1, kind: input, shape index: {}, may-alias: {0,1,2}]   ;;  %s3009_s2 = inlined_call_operand.vmem [shape: bf16[2,34,34,3], index: 2, kind: input, shape index: {}, may-alias: {0,1,2}]   ;;  %s3010_s3 = inlined_call_operand.vmem [shape: bf16[27,32], index: 3, kind: input, shape index: {}]   ;;  %s3011_s4 = inlined_call_operand.vmem [shape: f32[1,32], index: 4, kind: input, shape index: {}]   ;;  %s3012_s5 = inlined_call_operand.vmem [shape: bf16[2,32,32,32], index: 5, kind: output, shape index: {}]  }
   0x1   :  { %s2039_s20 = smov 0   ;;  %s2041_s21 = smov 0  }
   0x2   :  { %s2043_s22 = smov 0  }
   0x3 LB: > { %s24_s23 = sadd.s32 1, %s1986_s20  ;;  %s27_s24 = sadd.s32 1, %s1990_s21  ;;  %s1994_s22 = sphi %s2043_s22, %s15_s22   ;;  %s1990_s21 = sphi %s2041_s21, %s3027_s21   ;;  %s1986_s20 = sphi %s2039_s20, %s3026_s20   ;;  %s1982_s19 = sphi %s2037_s19, %s3025_s19   ;;  %s1978_s18 = sphi %s2035_s18, %s3024_s18  }
   0x4   : > { %p25_p0 = scmp.ge.s32.totalorder %s24_s23, 4  ;;  %p1744_p1 = scmp.ge.s32.totalorder %s1994_s22, 1 }
   0x5   : > { %p271_p2 = scmp.lt.s32.totalorder %s1994_s22, 9 }
   0x6   : > { %s3029_s23 = smov (%p25_p0, %s24_s23), 0  ;;  %s3031_s24 = smov (!%p25_p0, %s27_s24), %s1990_s21 }
   0x7   : > { %p272_p3 = pnand %p1744_p1, %p271_p2  ;;  %p29_p4 = scmp.ge.s32.totalorder %s3031_s24, 2 }
   0x9   : > { %s3033_s24 = smov (%p29_p4, %s3031_s24), 0  ;;  %275 = sbr.rel (%p272_p3) target bundleno = 627 (0x273), region = 40 }
   0xe   : > { %s2065_s25 = sshll.u32 %s1978_s18, 3  ;;  %p343_p5 = scmp.lt.s32.totalorder %s1982_s19, 1  ;;  %vm552_vm0 = vsmask.f32 7424  ;;  %vm745_vm1 = vcmask 1046528   ;;  %vm1119_vm2 = vcmask 48128  }
   0xf   : > { %p345_p6 = scmp.lt.s32.totalorder %s2065_s25, 33  ;;  %s1996_s9 = smov 3   ;;  %vm1086_vm3 = vcmask 23552   ;;  %vm1152_vm4 = vcmask 72704   ;;  %vm1402_vm5 = vcmask 1044480   ;;  %vm1403_vm6 = vcmask 1045504  }
  0x10   : > { %s3035_s19 = smov (!%p343_p5, %s1982_s19), 1  ;;  %s1997_s10 = smov 6   ;;  %vm1185_vm7 = vcmask 97280   ;;  %vm1218_vm8 = vcmask 121856   ;;  %vm1251_vm9 = vcmask 146432   ;;  %vm1284_vm10 = vcmask 171008  }
  0x11   : > { %s346_s26 = scalar_select %p345_p6, %s2065_s25, 33  ;;  %vm1317_vm11 = vcmask 195584   ;;  %vm1369_vm12 = vcmask 220160   ;;  %vm1562_vm13 = vcmask 257024  }
  0x12   : > { %s2072_s27 = smul.u32 170, %s3035_s19  ;;  %s1998_s11 = smov 9  }
  0x13   : > { %s1901_s28 = smul.u32 5, %s346_s26  ;;  %s2373_s12 = sadd.s32 8, %s2065_s25 }
  0x14   : > { %p362_p7 = scmp.lt.s32.totalorder %s2373_s12, 33  ;;  %s2002_s6 = smov 21  }
  0x15   : > { %s349_s29 = sadd.s32 %s2072_s27, %s1901_s28  ;;  %s1999_s28 = smov 12  }
  0x16   : > { %s1746_s30 = sshll.u32 %s349_s29, 2  ;;  %s2000_s29 = smov 18  }
  0x17   : > { %s2078_s8 = scalar_lea.vmem %s3007_s0, %s1746_s30  ;;  %s2001_s30 = smov 15  }
  0x18   : > { %v2081_v0 = vld [vmem:[%s2078_s8 + $0x28] sm:$0xff]  ;;  %v2084_v1 = vld [vmem:[%s2078_s8 + $0x30] sm:$0xff]  ;;  %v2090_v3 = vld [vmem:[%s2078_s8 + $0x1c] sm:$0xff]  ;;  %s363_s13 = scalar_select %p362_p7, %s2373_s12, 33 }
  0x19   : > { %v2087_v2 = vld [vmem:[%s2078_s8 + $0x14] sm:$0xff]  ;;  %v2093_v4 = vld [vmem:[%s2078_s8] sm:$0xff]  ;;  %v2096_v5 = vld [vmem:[%s2078_s8 + $0x8] sm:$0xff]  ;;  %v594_v6 = vshrl.u32 %v2081_v0, 16  ;;  %v596_v7 = vshll.u32 %v2081_v0, 16  ;;  %v601_v8 = vshll.u32 %v2084_v1, 16 }
  0x1a   : > { %v574_v9 = vshrl.u32 %v2087_v2, 16  ;;  %v412_v10 = vld [vmem:[%s2078_s8 + $0x38] sm:$0x1]  ;;  %v576_v11 = vshll.u32 %v2087_v2, 16  ;;  %v581_v12 = vshll.u32 %v2090_v3, 16  ;;  %v554_v13 = vshrl.u32 %v2093_v4, 16 }
  0x1b   : > { %v556_v14 = vshll.u32 %v2093_v4, 16  ;;  %v407_v15 = vld [vmem:[%s2078_s8 + $0x24] sm:$0x1]  ;;  %v598_v16 = vrot.slane %v596_v7, 1  ;;  %v603_v17 = vrot.slane %v601_v8, 1  ;;  %v561_v18 = vshll.u32 %v2096_v5, 16 }
  0x1c   : > { %v538_v19 = vunpack.c.l.b16 %v412_v10  ;;  %v578_v20 = vrot.slane %v576_v11, 1  ;;  %v583_v21 = vrot.slane %v581_v12, 1  ;;  %v605_v23 = vshrl.u32 %v2084_v1, 16  ;;  %v402_v24 = vld [vmem:[%s2078_s8 + $0x10] sm:$0x1]  ;;  %v2124_v37 = vld [vmem:[%s2078_s8 + $0x58] sm:$0xff] }
  0x1d   : > { %v558_v22 = vrot.slane %v556_v14, 1  ;;  %v599_v25 = vor.u32 %v598_v16, %v594_v6  ;;  %v563_v26 = vrot.slane %v561_v18, 1  ;;  %v537_v28 = vunpack.c.l.b16 %v407_v15  ;;  %v2115_v32 = vld [vmem:[%s2078_s8 + $0x50] sm:$0xff]  ;;  %v2127_v38 = vld [vmem:[%s2078_s8 + $0x44] sm:$0xff]  ;;  %v417_v39 = vld [vmem:[%s2078_s8 + $0x4c] sm:$0x1] }
  0x1e   : > { %v2111_v27 = vpack.c.b16 %v538_v19, %v538_v19  ;;  %v579_v29 = vor.u32 %v578_v20, %v574_v9  ;;  %v585_v31 = vshrl.u32 %v2090_v3, 16  ;;  %v536_v36 = vunpack.c.l.b16 %v402_v24  ;;  %v2145_v51 = vld [vmem:[%s2078_s8 + $0x3c] sm:$0xff]  ;;  %v427_v56 = vld [vmem:[%s2078_s8 + $0x74] sm:$0x1]  ;;  %v2158_v61 = vld [vmem:[%s2078_s8 + $0x6c] sm:$0xff]  ;;  %s1903_s14 = smul.u32 5, %s363_s13 }
  0x1f   : > { %v559_v30 = vor.u32 %v558_v22, %v554_v13  ;;  %v2118_v33 = vsel %vm552_vm0, %v599_v25, %v603_v17  ;;  %v2121_v35 = vpack.c.b16 %v537_v28, %v537_v28  ;;  %v607_v42 = vor.u32 %v605_v23, %v603_v17  ;;  %v2165_v8 = vld [vmem:[%s2078_s8 + $0x64] sm:$0xff]  ;;  %v422_v13 = vld [vmem:[%s2078_s8 + $0x60] sm:$0x1]  ;;  %s2003_s7 = smov 24   ;;  %p389_p9 = scmp.lt.s32.totalorder %s2065_s25, 31 }
  0x20   : > { %v609_v34 = vshll.u32 %v2111_v27, 16  ;;  %721 = vrot.lane.b32.xlu2 %v2118_v33, %s1996_s9  ;;  %v2133_v40 = vsel %vm552_vm0, %v579_v29, %v583_v21  ;;  %v565_v43 = vshrl.u32 %v2096_v5, 16  ;;  %v587_v45 = vor.u32 %v585_v31, %v583_v21  ;;  %v2187_v31 = vld [vmem:[%s2078_s8 + $0x8c] sm:$0xff]  ;;  %s366_s15 = sadd.s32 %s1903_s14, %s2072_s27 }
  0x21   : > { %v564_v41 = vsel %vm552_vm0, %v559_v30, %v563_v26  ;;  %717 = vrot.lane.b32.xlu1 %v2133_v40, %s1996_s9  ;;  %v589_v46 = vshll.u32 %v2121_v35, 16  ;;  %v2141_v47 = vpack.c.b16 %v536_v36, %v536_v36  ;;  %v636_v49 = vshll.u32 %v2115_v32, 16  ;;  %s1748_s16 = sshll.u32 %s366_s15, 2  ;;  %s3039_s25 = smov (!%p389_p9, %s2065_s25), 31 }
  0x22   : > { %713 = vrot.lane.b32.xlu0 %v564_v41, %s1996_s9  ;;  %v611_v44 = vrot.slane %v609_v34, 1  ;;  %v567_v48 = vor.u32 %v565_v43, %v563_v26  ;;  %v539_v50 = vunpack.c.l.b16 %v417_v39  ;;  %v641_v54 = vshll.u32 %v2124_v37, 16  ;;  %v432_v26 = vld [vmem:[%s2078_s8 + $0x88] sm:$0x1]  ;;  %s2403_s26 = scalar_lea.vmem %s3008_s1, %s1748_s16 }
  0x23   : > { %v591_v52 = vrot.slane %v589_v46, 1  ;;  %v569_v53 = vshll.u32 %v2141_v47, 16  ;;  %v621_v55 = vshll.u32 %v2127_v38, 16  ;;  %v634_v58 = vshrl.u32 %v2115_v32, 16 }
  0x24   : > { %v2152_v57 = vsel %vm552_vm0, %v607_v42, %v611_v44  ;;  %v638_v59 = vrot.slane %v636_v49, 1  ;;  %v2155_v60 = vpack.c.b16 %v539_v50, %v539_v50  ;;  %v625_v7 = vshrl.u32 %v2127_v38, 16  ;;  %v2197_v42 = vld [vmem:[%s2078_s8 + $0x80] sm:$0xff] }
  0x25   : > { %v2161_v62 = vsel %vm552_vm0, %v587_v45, %v591_v52  ;;  %v571_v63 = vrot.slane %v569_v53, 1  ;;  %v623_v6 = vrot.slane %v621_v55, 1  ;;  %v614_v10 = vshrl.u32 %v2145_v51, 16  ;;  %v2210_v52 = vld [vmem:[%s2078_s8 + $0x94] sm:$0xff] }
  0x26   : > { %v629_v9 = vshll.u32 %v2155_v60, 16  ;;  %v616_v11 = vshll.u32 %v2145_v51, 16  ;;  %v541_v12 = vunpack.c.l.b16 %v427_v56  ;;  %v643_v15 = vrot.slane %v641_v54, 1 }
  0x27   : > { %v572_v14 = vsel %vm552_vm0, %v567_v48, %v571_v63  ;;  %v639_v16 = vor.u32 %v638_v59, %v634_v58  ;;  %v661_v19 = vshll.u32 %v2158_v61, 16  ;;  %v627_v20 = vor.u32 %v625_v7, %v623_v6  ;;  %v2205_v48 = vld [vmem:[%s2078_s8 + $0x78] sm:$0xff] }
  0x28   : > { %723 = vrot.lane.b32.xlu2 %v2152_v57, %s1996_s9  ;;  %v618_v17 = vrot.slane %v616_v11, 1  ;;  %v2174_v18 = vpack.c.b16 %v541_v12, %v541_v12  ;;  %v631_v21 = vrot.slane %v629_v9, 1  ;;  %v656_v22 = vshll.u32 %v2165_v8, 16 }
  0x29   : > { %719 = vrot.lane.b32.xlu1 %v2161_v62, %s1996_s9  ;;  %v540_v23 = vunpack.c.l.b16 %v422_v13  ;;  %v663_v28 = vrot.slane %v661_v19, 1  ;;  %v665_v29 = vshrl.u32 %v2158_v61, 16  ;;  %v2190_v34 = vsel %vm552_vm0, %v639_v16, %v643_v15 }
  0x2a   : > { %715 = vrot.lane.b32.xlu0 %v572_v14, %s1996_s9  ;;  %v619_v24 = vor.u32 %v618_v17, %v614_v10  ;;  %v669_v30 = vshll.u32 %v2174_v18, 16  ;;  %v2193_v36 = vsel %vm552_vm0, %v627_v20, %v631_v21  ;;  %v654_v39 = vshrl.u32 %v2165_v8, 16 }
  0x2b   : > { %v2181_v25 = vpack.c.b16 %v540_v23, %v540_v23  ;;  %v658_v41 = vrot.slane %v656_v22, 1  ;;  %v645_v44 = vshrl.u32 %v2124_v37, 16  ;;  %v542_v46 = vunpack.c.l.b16 %v432_v26 }
  0x2c   : > { %v2200_v43 = vsel %vm552_vm0, %v619_v24, %v623_v6  ;;  %v667_v49 = vor.u32 %v665_v29, %v663_v28  ;;  %v671_v50 = vrot.slane %v669_v30, 1  ;;  %v696_v53 = vshll.u32 %v2187_v31, 16  ;;  %v437_v6 = vld [vmem:[%s2078_s8 + $0x9c] sm:$0x1] }
  0x2d   : > { %v649_v45 = vshll.u32 %v2181_v25, 16  ;;  %v659_v54 = vor.u32 %v658_v41, %v654_v39  ;;  %v681_v55 = vshll.u32 %v2197_v42, 16  ;;  %v647_v56 = vor.u32 %v645_v44, %v643_v15 }
  0x2e   : > { %v2218_v59 = vpack.c.b16 %v542_v46, %v542_v46  ;;  %v676_v63 = vshll.u32 %v2205_v48, 16  ;;  %v2223_v7 = vsel %vm552_vm0, %v667_v49, %v671_v50  ;;  %v694_v9 = vshrl.u32 %v2187_v31, 16 }
  0x2f   : > { %v651_v58 = vrot.slane %v649_v45, 1  ;;  %v698_v10 = vrot.slane %v696_v53, 1  ;;  %v701_v11 = vshll.u32 %v2210_v52, 16  ;;  %v2228_v12 = vsel %vm552_vm0, %v659_v54, %v663_v28 }
  0x30   : > { %729 = vrot.lane.b32.xlu2 %v2190_v34, %s1996_s9  ;;  %3017 = vst [vmem:[#allocation2_spill] sm:$0xff] %v2228_v12  ;;  %v683_v13 = vrot.slane %v681_v55, 1  ;;  %v685_v14 = vshrl.u32 %v2197_v42, 16  ;;  %v674_v15 = vshrl.u32 %v2205_v48, 16  ;;  %v689_v17 = vshll.u32 %v2218_v59, 16 }
  0x31   : > { %727 = vrot.lane.b32.xlu1 %v2193_v36, %s1996_s9  ;;  %v2233_v16 = vsel %vm552_vm0, %v647_v56, %v651_v58  ;;  %v678_v19 = vrot.slane %v676_v63, 1  ;;  %v543_v20 = vunpack.c.l.b16 %v437_v6  ;;  %v699_v21 = vor.u32 %v698_v10, %v694_v9 }
  0x32   : > { %725 = vrot.lane.b32.xlu0 %v2200_v43, %s1996_s9  ;;  %v703_v22 = vrot.slane %v701_v11, 1  ;;  %v687_v23 = vor.u32 %v685_v14, %v683_v13  ;;  %v691_v24 = vrot.slane %v689_v17, 1  ;;  %v705_v41 = vshrl.u32 %v2210_v52, 16 }
  0x33   : > { %v679_v26 = vor.u32 %v678_v19, %v674_v15  ;;  %v2242_v28 = vpack.c.b16 %v543_v20, %v543_v20  ;;  %v747_v45 = vrot.slane %v2096_v5, 1  ;;  %v749_v46 = vrot.slane %v2141_v47, 1 }
  0x34   : > { %v2245_v29 = vsel %vm552_vm0, %v699_v21, %v703_v22  ;;  %v2248_v30 = vsel %vm552_vm0, %v687_v23, %v691_v24  ;;  %v746_v49 = vrot.slane %v2093_v4, 1  ;;  %v707_v50 = vor.u32 %v705_v41, %v703_v22 }
  0x35   : > { %3018 = vst [vmem:[#allocation3_spill] sm:$0xff] %v2245_v29  ;;  %v2251_v39 = vsel %vm552_vm0, %v679_v26, %v683_v13  ;;  %v709_v44 = vshll.u32 %v2242_v28, 16  ;;  %v750_v54 = vsel %vm745_vm1, %v747_v45, %v749_v46  ;;  %v756_v47 = vrot.slane %v2081_v0, 1 }
  0x36   : > { %v748_v55 = vsel %vm745_vm1, %v746_v49, %v747_v45  ;;  %v757_v58 = vrot.slane %v2084_v1, 1  ;;  %v752_v63 = vrot.slane %v2090_v3, 1  ;;  %v754_v6 = vrot.slane %v2121_v35, 1 }
  0x37   : > { %v711_v53 = vrot.slane %v709_v44, 1  ;;  %v751_v9 = vrot.slane %v2087_v2, 1  ;;  %v762_v35 = vrot.slane %v2127_v38, 1  ;;  %v764_v14 = vrot.slane %v2155_v60, 1 }
  0x38   : > { %735 = vrot.lane.b32.xlu2 %v2223_v7, %s1996_s9  ;;  %v2279_v10 = vsel %vm745_vm1, %v756_v47, %v757_v58  ;;  %v2282_v11 = vsel %vm745_vm1, %v752_v63, %v754_v6  ;;  %v761_v15 = vrot.slane %v2145_v51, 1  ;;  %v759_v17 = vrot.slane %v2111_v27, 1 }
  0x39   : > { %733 = vrot.lane.b32.xlu1 %v2228_v12, %s1996_s9  ;;  %v2267_v56 = vsel %vm552_vm0, %v707_v50, %v711_v53  ;;  %v2285_v13 = vsel %vm745_vm1, %v751_v9, %v752_v63  ;;  %v2298_v19 = vsel %vm745_vm1, %v762_v35, %v764_v14  ;;  %v771_v27 = vrot.slane %v2165_v8, 1 }
  0x3a   : > { %731 = vrot.lane.b32.xlu0 %v2233_v16, %s1996_s9  ;;  %v2301_v20 = vsel %vm745_vm1, %v761_v15, %v762_v35  ;;  %v2304_v21 = vsel %vm745_vm1, %v757_v58, %v759_v17  ;;  %v772_v60 = vrot.slane %v2158_v61, 1  ;;  %v767_v22 = vrot.slane %v2124_v37, 1  ;;  %v2410_v15 = vld [vmem:[%s2403_s26 + $0x8] sm:$0xff]  ;;  %v1889_v17 = vld [vmem:[%s2403_s26] sm:$0xff] }
  0x3b   : > { %v769_v23 = vrot.slane %v2181_v25, 1  ;;  %v766_v24 = vrot.slane %v2115_v32, 1  ;;  %v777_v25 = vrot.slane %v2197_v42, 1  ;;  %v779_v45 = vrot.slane %v2218_v59, 1 }
  0x3c   : > { %v2318_v26 = vsel %vm745_vm1, %v771_v27, %v772_v60  ;;  %v776_v46 = vrot.slane %v2205_v48, 1  ;;  %v774_v49 = vrot.slane %v2174_v18, 1  ;;  %v782_v18 = vrot.slane %v2210_v52, 1 }
  0x3d   : > { %3019 = vst [vmem:[#allocation4_spill] sm:$0xff] %v2318_v26  ;;  %v2321_v41 = vsel %vm745_vm1, %v767_v22, %v769_v23  ;;  %v2324_v44 = vsel %vm745_vm1, %v766_v24, %v767_v22  ;;  %v2337_v50 = vsel %vm745_vm1, %v777_v25, %v779_v45  ;;  %v784_v59 = vrot.slane %v2242_v28, 1 }
  0x3e   : > { %v2340_v53 = vsel %vm745_vm1, %v776_v46, %v777_v25  ;;  %v866_v23 = vshll.u32 %v1889_v17, 16 }
  0x3f   : > { %v2355_v47 = vsel %vm745_vm1, %v782_v18, %v784_v59 }
  0x40   : > { %741 = vrot.lane.b32.xlu2 %v2245_v29, %s1996_s9  ;;  %v868_v59 = vrot.slane %v866_v23, 1 }
  0x41   : > { %739 = vrot.lane.b32.xlu1 %v2248_v30, %s1996_s9 }
  0x42   : > { %737 = vrot.lane.b32.xlu0 %v2251_v39, %s1996_s9 }
  0x48   : > { %788 = vrot.lane.b32.xlu2 %v750_v54, %s1997_s10  ;;  %v2343_v54 = vsel %vm745_vm1, %v772_v60, %v774_v49 }
  0x49   : > { %786 = vrot.lane.b32.xlu1 %v748_v55, %s1997_s10  ;;  %v781_v55 = vrot.slane %v2187_v31, 1 }
  0x4a   : > { %743 = vrot.lane.b32.xlu0 %v2267_v56, %s1996_s9  ;;  %s373_s9 = sadd.s32 1, %s2373_s12 }
  0x4b   : > { %v2358_v58 = vsel %vm745_vm1, %v781_v55, %v782_v18  ;;  %v864_v18 = vshrl.u32 %v1889_v17, 16  ;;  %v871_v55 = vshll.u32 %v2410_v15, 16  ;;  %p376_p8 = scmp.lt.s32.totalorder %s373_s9, 33 }
  0x4d   : > { %s3037_s9 = smov (!%p376_p8, %s373_s9), 33 }
  0x50   : > { %794 = vrot.lane.b32.xlu2 %v2279_v10, %s1997_s10 }
  0x51   : > { %792 = vrot.lane.b32.xlu1 %v2282_v11, %s1997_s10 }
  0x52   : > { %790 = vrot.lane.b32.xlu0 %v2285_v13, %s1997_s10 }
  0x58   : > { %800 = vrot.lane.b32.xlu2 %v2298_v19, %s1997_s10 }
  0x59   : > { %798 = vrot.lane.b32.xlu1 %v2301_v20, %s1997_s10 }
  0x5a   : > { %796 = vrot.lane.b32.xlu0 %v2304_v21, %s1997_s10 }
  0x60   : > { %806 = vrot.lane.b32.xlu2 %v2318_v26, %s1997_s10 }
  0x61   : > { %804 = vrot.lane.b32.xlu1 %v2321_v41, %s1997_s10 }
  0x62   : > { %802 = vrot.lane.b32.xlu0 %v2324_v44, %s1997_s10 }
  0x68   : > { %812 = vrot.lane.b32.xlu2 %v2337_v50, %s1997_s10 }
  0x69   : > { %810 = vrot.lane.b32.xlu1 %v2340_v53, %s1997_s10 }
  0x6a   : > { %808 = vrot.lane.b32.xlu0 %v2343_v54, %s1997_s10 }
  0x70   : > { %828 = vrot.lane.b32.xlu2 %v2087_v2, %s1998_s11 }
  0x71   : > { %816 = vrot.lane.b32.xlu1 %v2355_v47, %s1997_s10 }
  0x72   : > { %814 = vrot.lane.b32.xlu0 %v2358_v58, %s1997_s10  ;;  %s1904_s10 = smul.u32 5, %s3037_s9 }
  0x78   : > { %834 = vrot.lane.b32.xlu2 %v2084_v1, %s1998_s11 }
  0x79   : > { %832 = vrot.lane.b32.xlu1 %v2081_v0, %s1998_s11 }
  0x7a   : > { %830 = vrot.lane.b32.xlu0 %v2090_v3, %s1998_s11  ;;  %v722_v28 = vpop.permute.xlu2 %721 }
  0x80   : > { %840 = vrot.lane.b32.xlu2 %v2115_v32, %s1998_s11 }
  0x81   : > { %838 = vrot.lane.b32.xlu1 %v2127_v38, %s1998_s11 }
  0x82   : > { %836 = vrot.lane.b32.xlu0 %v2145_v51, %s1998_s11  ;;  %v2382_v63 = vpop.permute.xlu2 %723 }
  0x88   : > { %846 = vrot.lane.b32.xlu2 %v2158_v61, %s1998_s11 }
  0x89   : > { %844 = vrot.lane.b32.xlu1 %v2165_v8, %s1998_s11 }
  0x8a   : > { %842 = vrot.lane.b32.xlu0 %v2124_v37, %s1998_s11  ;;  %v2391_v6 = vpop.permute.xlu2 %729 }
  0x90   : > { %852 = vrot.lane.b32.xlu2 %v2187_v31, %s1998_s11 }
  0x91   : > { %850 = vrot.lane.b32.xlu1 %v2197_v42, %s1998_s11 }
  0x92   : > { %848 = vrot.lane.b32.xlu0 %v2205_v48, %s1998_s11  ;;  %v2405_v9 = vpop.permute.xlu2 %735 }
  0x93   : > { %v2407_v35 = vpop.permute.xlu1 %717 }
  0x94   : > { %v714_v14 = vpop.permute.xlu0 %713 }
  0x98   : > { %858 = vrot.lane.b32.xlu2 %v2410_v15, %s1998_s11 }
  0x99   : > { %856 = vrot.lane.b32.xlu1 %v1889_v17, %s1998_s11 }
  0x9a   : > { %854 = vrot.lane.b32.xlu0 %v2210_v52, %s1998_s11  ;;  %v2418_v27 = vpop.permute.xlu2 %741  ;;  %s380_s11 = sadd.s32 %s1904_s10, %s2072_s27 }
  0x9b   : > { %v720_v60 = vpop.permute.xlu1 %719  ;;  %s1750_s12 = sshll.u32 %s380_s11, 2 }
  0x9c   : > { %v716_v22 = vpop.permute.xlu0 %715  ;;  %s2647_s18 = scalar_lea.vmem %s3009_s2, %s1750_s12 }
  0x9d   : > { %v1090_v24 = vsel %vm1086_vm3, %v2096_v5, %v716_v22  ;;  %v869_v5 = vor.u32 %v868_v59, %v864_v18  ;;  %v1096_v22 = vsel %vm1086_vm3, %v2081_v0, %v722_v28  ;;  %v915_v59 = vrot.slane %v1889_v17, 1 }
  0xa0   : > { %907 = vrot.lane.b32.xlu2 %v2245_v29, %s1999_s28 }
  0xa1   : > { %899 = vrot.lane.b32.xlu1 %v2228_v12, %s1999_s28 }
  0xa2   : > { %883 = vrot.lane.b32.xlu0 %v2133_v40, %s1999_s28  ;;  %v789_v25 = vpop.permute.xlu2 %788  ;;  %v2438_v40 = vrot.slane %v871_v55, 1  ;;  %v3016_v55 = vrot.slane %v2410_v15, 1 }
  0xa3   : > { %v728_v45 = vpop.permute.xlu1 %727  ;;  %v2429_v46 = vsel %vm1119_vm2, %v1090_v24, %v789_v25 }
  0xa4   : > { %v726_v49 = vpop.permute.xlu0 %725  ;;  %v2447_v29 = vsel %vm552_vm0, %v869_v5, %v2438_v40  ;;  %v1102_v28 = vsel %vm1086_vm3, %v2127_v38, %v728_v45  ;;  %v1088_v45 = vsel %vm1086_vm3, %v2093_v4, %v714_v14  ;;  %v1092_v14 = vsel %vm1086_vm3, %v2087_v2, %v2407_v35 }
  0xa5   : > { %v1100_v35 = vsel %vm1086_vm3, %v2145_v51, %v726_v49  ;;  %v1104_v49 = vsel %vm1086_vm3, %v2115_v32, %v2391_v6  ;;  %v1110_v6 = vsel %vm1086_vm3, %v2158_v61, %v2405_v9 }
  0xa8   : > { %978 = vrot.lane.b32.xlu2 %v2205_v48, %s2000_s29 }
  0xa9   : > { %944 = vrot.lane.b32.xlu1 %v2358_v58, %s2001_s30 }
  0xaa   : > { %936 = vrot.lane.b32.xlu0 %v2318_v26, %s2001_s30  ;;  %v795_v23 = vpop.permute.xlu2 %794  ;;  %v2463_v26 = vsel %vm745_vm1, %v915_v59, %v3016_v55 }
  0xab   : > { %v734_v24 = vpop.permute.xlu1 %733  ;;  %v2443_v25 = vsel %vm1119_vm2, %v1096_v22, %v795_v23 }
  0xac   : > { %v732_v12 = vpop.permute.xlu0 %731  ;;  %v1108_v38 = vsel %vm1086_vm3, %v2165_v8, %v734_v24 }
  0xb0   : > { %1041 = vrot.lane.b32.xlu2 %v2447_v29, %s2002_s6 }
  0xb1   : > { %1033 = vrot.lane.b32.xlu1 %v2251_v39, %s2002_s6 }
  0xb2   : > { %986 = vrot.lane.b32.xlu0 %v1889_v17, %s2000_s29  ;;  %v801_v18 = vpop.permute.xlu2 %800 }
  0xb3   : > { %v740_v22 = vpop.permute.xlu1 %739  ;;  %v2458_v5 = vsel %vm1119_vm2, %v1102_v28, %v801_v18 }
  0xb4   : > { %v738_v23 = vpop.permute.xlu0 %737  ;;  %v1114_v24 = vsel %vm1086_vm3, %v2197_v42, %v740_v22 }
  0xb8   : > { %891 = vrot.lane.b32.xlu2 %v2200_v43, %s1999_s28 }
  0xb9   : > { %1078 = vrot.lane.b32.xlu1 %v2463_v26, %s2003_s7 }
  0xba   : > { %1070 = vrot.lane.b32.xlu0 %v2340_v53, %s2003_s7  ;;  %v807_v17 = vpop.permute.xlu2 %806 }
  0xbb   : > { %v2476_v28 = vsel %vm1119_vm2, %v1108_v38, %v807_v17  ;;  %v787_v18 = vpop.permute.xlu1 %786  ;;  %v1094_v38 = vsel %vm1086_vm3, %v2090_v3, %v720_v60  ;;  %v1098_v3 = vsel %vm1086_vm3, %v2084_v1, %v2382_v63 }
  0xbc   : > { %v744_v59 = vpop.permute.xlu0 %743  ;;  %v1121_v55 = vsel %vm1119_vm2, %v1088_v45, %v787_v18 }
  0xc0   : > { %962 = vrot.lane.b32.xlu2 %v2081_v0, %s2000_s29 }
  0xc1   : > { %928 = vrot.lane.b32.xlu1 %v2301_v20, %s2001_s30 }
  0xc2   : > { %920 = vrot.lane.b32.xlu0 %v2285_v13, %s2001_s30  ;;  %v813_v4 = vpop.permute.xlu2 %812 }
  0xc3   : > { %v2493_v17 = vsel %vm1119_vm2, %v1114_v24, %v813_v4  ;;  %v793_v0 = vpop.permute.xlu1 %792 }
  0xc4   : > { %v791_v45 = vpop.permute.xlu0 %790  ;;  %v1127_v18 = vsel %vm1119_vm2, %v1094_v38, %v793_v0 }
  0xc5   : > { %v2497_v13 = vsel %vm1119_vm2, %v1092_v14, %v791_v45 }
  0xc8   : > { %1025 = vrot.lane.b32.xlu2 %v2190_v34, %s2002_s6 }
  0xc9   : > { %1017 = vrot.lane.b32.xlu1 %v2118_v33, %s2002_s6 }
  0xca   : > { %970 = vrot.lane.b32.xlu0 %v2115_v32, %s2000_s29  ;;  %v829_v2 = vpop.permute.xlu2 %828 }
  0xcb   : > { %v2511_v60 = vsel %vm1152_vm4, %v1121_v55, %v829_v2  ;;  %v799_v22 = vpop.permute.xlu1 %798  ;;  %v1106_v55 = vsel %vm1086_vm3, %v2124_v37, %v732_v12  ;;  %v442_v2 = vld [vmem:[%s2403_s26 + $0x10] sm:$0x1] }
  0xcc   : > { %v797_v24 = vpop.permute.xlu0 %796  ;;  %v1133_v4 = vsel %vm1119_vm2, %v1100_v35, %v799_v22  ;;  %v861_v22 = vunpack.c.l.b16 %v442_v2 }
  0xcd   : > { %v1131_v14 = vsel %vm1119_vm2, %v1098_v3, %v797_v24 }
  0xce   : > { %v862_v12 = vpack.c.b16 %v861_v22, %v861_v22  ;;  %v1116_v22 = vsel %vm1086_vm3, %v2187_v31, %v2418_v27 }
  0xd0   : > { %901 = vrot.lane.b32.xlu2 %v2223_v7, %s1999_s28  ;;  %v879_v2 = vshll.u32 %v862_v12, 16 }
  0xd1   : > { %1062 = vrot.lane.b32.xlu1 %v2324_v44, %s2003_s7 }
  0xd2   : > { %1054 = vrot.lane.b32.xlu0 %v2279_v10, %s2003_s7  ;;  %v835_v63 = vpop.permute.xlu2 %834 }
  0xd3   : > { %v2527_v38 = vsel %vm1152_vm4, %v1127_v18, %v835_v63  ;;  %v805_v0 = vpop.permute.xlu1 %804  ;;  %v1112_v18 = vsel %vm1086_vm3, %v2205_v48, %v738_v23  ;;  %v918_v48 = vrot.slane %v862_v12, 1 }
  0xd4   : > { %v803_v45 = vpop.permute.xlu0 %802  ;;  %v1139_v3 = vsel %vm1119_vm2, %v1106_v55, %v805_v0 }
  0xd5   : > { %v2532_v35 = vsel %vm1119_vm2, %v1104_v49, %v803_v45  ;;  %v875_v45 = vshrl.u32 %v2410_v15, 16 }
  0xd7   : > { %v877_v23 = vor.u32 %v875_v45, %v2438_v40  ;;  %v3020_v40 = vrot.slane %v2410_v15, 1 }
  0xd8   : > { %946 = vrot.lane.b32.xlu2 %v2355_v47, %s2001_s30 }
  0xd9   : > { %938 = vrot.lane.b32.xlu1 %v2343_v54, %s2001_s30 }
  0xda   : > { %909 = vrot.lane.b32.xlu0 %v2267_v56, %s1999_s28  ;;  %v841_v32 = vpop.permute.xlu2 %840 }
  0xdb   : > { %v2546_v24 = vsel %vm1152_vm4, %v1133_v4, %v841_v32  ;;  %v811_v63 = vpop.permute.xlu1 %810  ;;  %v881_v4 = vrot.slane %v879_v2, 1  ;;  %v1118_v32 = vsel %vm1086_vm3, %v2210_v52, %v744_v59 }
  0xdc   : > { %v809_v49 = vpop.permute.xlu0 %808  ;;  %v2549_v55 = vsel %vm1119_vm2, %v1112_v18, %v811_v63 }
  0xdd   : > { %v2552_v0 = vsel %vm1119_vm2, %v1110_v6, %v809_v49  ;;  %v2577_v49 = vsel %vm745_vm1, %v3020_v40, %v918_v48  ;;  %v2580_v27 = vsel %vm552_vm0, %v877_v23, %v881_v4 }
  0xe0   : > { %1035 = vrot.lane.b32.xlu2 %v2248_v30, %s2002_s6 }
  0xe1   : > { %988 = vrot.lane.b32.xlu1 %v2410_v15, %s2000_s29 }
  0xe2   : > { %980 = vrot.lane.b32.xlu0 %v2197_v42, %s2000_s29  ;;  %v847_v9 = vpop.permute.xlu2 %846 }
  0xe3   : > { %v2568_v6 = vsel %vm1152_vm4, %v1139_v3, %v847_v9  ;;  %v817_v18 = vpop.permute.xlu1 %816 }
  0xe4   : > { %v815_v63 = vpop.permute.xlu0 %814  ;;  %v1151_v42 = vsel %vm1119_vm2, %v1118_v32, %v817_v18  ;;  %v2004_v32 = vmov 65535  }
  0xe5   : > { %v2572_v12 = vsel %vm1119_vm2, %v1116_v22, %v815_v63  ;;  %v1404_v18 = vsel %vm1402_vm5, 4294967295, %v2004_v32 }
  0xe6   : > { %v1405_v40 = vsel %vm1403_vm6, %v1404_v18, 0 }
  0xe8   : > { %1080 = vrot.lane.b32.xlu2 %v2577_v49, %s2003_s7 }
  0xe9   : > { %1072 = vrot.lane.b32.xlu1 %v2337_v50, %s2003_s7 }
  0xea   : > { %1043 = vrot.lane.b32.xlu0 %v2580_v27, %s2002_s6  ;;  %v2588_v59 = vpop.permute.xlu2 %852 }
  0xeb   : > { %v833_v3 = vpop.permute.xlu1 %832 }
  0xec   : > { %v831_v45 = vpop.permute.xlu0 %830  ;;  %v2592_v15 = vsel %vm1152_vm4, %v2497_v13, %v833_v3 }
  0xed   : > { %v2596_v2 = vsel %vm1152_vm4, %v2429_v46, %v831_v45 }
  0xf0   : > { %922 = vrot.lane.b32.xlu2 %v2282_v11, %s2001_s30 }
  0xf1   : > { %893 = vrot.lane.b32.xlu1 %v2193_v36, %s1999_s28 }
  0xf2   : > { %885 = vrot.lane.b32.xlu0 %v2161_v62, %s1999_s28  ;;  %v859_v48 = vpop.permute.xlu2 %858 }
  0xf3   : > { %v2606_v13 = vsel %vm1152_vm4, %v1151_v42, %v859_v48  ;;  %v839_v9 = vpop.permute.xlu1 %838 }
  0xf4   : > { %v837_v23 = vpop.permute.xlu0 %836  ;;  %v2609_v46 = vsel %vm1152_vm4, %v1131_v14, %v839_v9  ;;  %v1891_v9 = vld [vmem:[%s2647_s18] sm:$0xff] }
  0xf5   : > { %v2613_v11 = vsel %vm1152_vm4, %v2443_v25, %v837_v23  ;;  %v1893_v23 = vld [vmem:[%s3010_s3] sm:$0xff] }
  0xf8   : > { %972 = vrot.lane.b32.xlu2 %v2124_v37, %s2000_s29  ;;  %v1894_v37 = vld [vmem:[%s3010_s3 + $0x8] sm:$0x30] }
  0xf9   : > { %964 = vrot.lane.b32.xlu1 %v2084_v1, %s2000_s29  ;;  %v1841_v1 = vld [vmem:[%s3010_s3 + $0x8] sm:$0xf] }
  0xfa   : > { %930 = vrot.lane.b32.xlu0 %v2298_v19, %s2001_s30  ;;  %v2621_v62 = vpop.permute.xlu2 %907  ;;  %v1842_v22 = vor.u32 %v1894_v37, %v1841_v1 }
  0xfb   : > { %v2623_v4 = vpop.permute.xlu1 %844 }
  0xfc   : > { %v843_v14 = vpop.permute.xlu0 %842  ;;  %v1407_v48 = vand.u32 %v1842_v22, %v1405_v40  ;;  %v998_v22 = vshrl.u32 %v1891_v9, 16 }
  0xfd   : > { %v2627_v25 = vsel %vm1152_vm4, %v2458_v5, %v843_v14 }
  0xfe   : > { %1896 = vmatpush.bf16.msra.mxu2 %v1407_v48  ;;  %1897 = vmatpush.bf16.msra.mxu3 %v1407_v48 }
  0xff   : > { %1415 = vmatpush.bf16.msra.mxu0 %v1407_v48  ;;  %1895 = vmatpush.bf16.msra.mxu1 %v1407_v48 }
 0x100   : > { %1056 = vrot.lane.b32.xlu2 %v2304_v21, %s2003_s7 }
 0x101   : > { %1027 = vrot.lane.b32.xlu1 %v2233_v16, %s2002_s6 }
 0x102   : > { %1019 = vrot.lane.b32.xlu0 %v2152_v57, %s2002_s6  ;;  %v2642_v5 = vpop.permute.xlu2 %978  ;;  %1899 = vmatpush.bf16.msra.mxu2 %v1893_v23 }
 0x103   : > { %v851_v63 = vpop.permute.xlu1 %850  ;;  %1900 = vmatpush.bf16.msra.mxu3 %v1893_v23  ;;  %1416 = vmatpush.bf16.msra.mxu0 %v1893_v23 }
 0x104   : > { %v849_v42 = vpop.permute.xlu0 %848  ;;  %v2651_v3 = vsel %vm1152_vm4, %v2552_v0, %v851_v63  ;;  %v1000_v0 = vshll.u32 %v1891_v9, 16  ;;  %1898 = vmatpush.bf16.msra.mxu1 %v1893_v23  ;;  %v3021_v23 = vld [vmem:[#allocation3_spill] sm:$0xff] }
 0x105   : > { %v2655_v45 = vsel %vm1152_vm4, %v2476_v28, %v849_v42  ;;  %v2668_v28 = vld [vmem:[%s2647_s18 + $0x8] sm:$0xff] }
 0x106   : > { %v1002_v32 = vrot.slane %v1000_v0, 1  ;;  %v1005_v18 = vshll.u32 %v2668_v28, 16 }
 0x108   : > { %911 = vrot.lane.b32.xlu2 %v2447_v29, %s1999_s28  ;;  %v1003_v63 = vor.u32 %v1002_v32, %v998_v22 }
 0x109   : > { %903 = vrot.lane.b32.xlu1 %v2251_v39, %s1999_s28 }
 0x10a   : > { %1064 = vrot.lane.b32.xlu0 %v2321_v41, %s2003_s7  ;;  %v1042_v14 = vpop.permute.xlu2 %1041 }
 0x10b   : > { %v857_v1 = vpop.permute.xlu1 %856 }
 0x10c   : > { %v855_v37 = vpop.permute.xlu0 %854  ;;  %v2672_v29 = vsel %vm1152_vm4, %v2572_v12, %v857_v1  ;;  %v2685_v12 = vrot.slane %v1005_v18, 1  ;;  %v1178_v18 = vsel %vm1152_vm4, %v2549_v55, %v2588_v59 }
 0x10d   : > { %v2676_v39 = vsel %vm1152_vm4, %v2493_v17, %v855_v37 }
 0x10e   : > { %v1008_v48 = vsel %vm552_vm0, %v1003_v63, %v2685_v12  ;;  %v1170_v63 = vsel %vm1152_vm4, %v2532_v35, %v2623_v4 }
 0x110   : > { %982 = vrot.lane.b32.xlu2 %v2187_v31, %s2000_s29 }
 0x111   : > { %948 = vrot.lane.b32.xlu1 %v2463_v26, %s2001_s30  ;;  %v1049_v26 = vrot.slane %v1891_v9, 1 }
 0x112   : > { %940 = vrot.lane.b32.xlu0 %v2340_v53, %s2001_s30  ;;  %v892_v42 = vpop.permute.xlu2 %891  ;;  %v1050_v53 = vrot.slane %v2668_v28, 1 }
 0x113   : > { %v900_v40 = vpop.permute.xlu1 %899 }
 0x114   : > { %v884_v17 = vpop.permute.xlu0 %883  ;;  %v1051_v37 = vsel %vm745_vm1, %v1049_v26, %v1050_v53 }
 0x118   : > { %1045 = vrot.lane.b32.xlu2 %v1008_v48, %s2002_s6  ;;  %v1203_v48 = vsel %vm1185_vm7, %v1170_v63, %v900_v40 }
 0x119   : > { %1037 = vrot.lane.b32.xlu1 %v3021_v23, %s2002_s6 }
 0x11a   : > { %990 = vrot.lane.b32.xlu0 %v1891_v9, %s2000_s29  ;;  %v963_v31 = vpop.permute.xlu2 %962 }
 0x11b   : > { %v945_v0 = vpop.permute.xlu1 %944 }
 0x11c   : > { %v937_v1 = vpop.permute.xlu0 %936 }
 0x11d   : > { %v1236_v23 = vsel %vm1218_vm8, %v1203_v48, %v937_v1  ;;  %v3023_v1 = vld [vmem:[#allocation2_spill] sm:$0xff] }
 0x11e   : > { %v1269_v35 = vsel %vm1251_vm9, %v1236_v23, %v2642_v5 }
 0x120   : > { %887 = vrot.lane.b32.xlu2 %v2118_v33, %s1999_s28  ;;  %v1211_v33 = vsel %vm1185_vm7, %v1178_v18, %v2621_v62 }
 0x121   : > { %1082 = vrot.lane.b32.xlu1 %v1051_v37, %s2003_s7 }
 0x122   : > { %1074 = vrot.lane.b32.xlu0 %v2358_v58, %s2003_s7  ;;  %v1026_v22 = vpop.permute.xlu2 %1025  ;;  %v1244_v58 = vsel %vm1218_vm8, %v1211_v33, %v945_v0  ;;  %v3022_v0 = vld [vmem:[#allocation4_spill] sm:$0xff] }
 0x123   : > { %v1034_v32 = vpop.permute.xlu1 %1033 }
 0x124   : > { %v987_v9 = vpop.permute.xlu0 %986  ;;  %v1302_v59 = vsel %vm1284_vm10, %v1269_v35, %v1034_v32 }
 0x125   : > { %v1277_v26 = vsel %vm1251_vm9, %v1244_v58, %v987_v9  ;;  %v447_v9 = vld [vmem:[%s2647_s18 + $0x10] sm:$0x1] }
 0x126   : > { %v1310_v40 = vsel %vm1284_vm10, %v1277_v26, %v1042_v14  ;;  %v995_v18 = vunpack.c.l.b16 %v447_v9 }
 0x128   : > { %932 = vrot.lane.b32.xlu2 %v2324_v44, %s2001_s30 }
 0x129   : > { %924 = vrot.lane.b32.xlu1 %v2279_v10, %s2001_s30 }
 0x12a   : > { %895 = vrot.lane.b32.xlu0 %v2190_v34, %s1999_s28  ;;  %v902_v55 = vpop.permute.xlu2 %901 }
 0x12b   : > { %v1079_v62 = vpop.permute.xlu1 %1078 }
 0x12c   : > { %v1071_v4 = vpop.permute.xlu0 %1070  ;;  %v1343_v10 = vsel %vm1317_vm11, %v1310_v40, %v1079_v62 }
 0x12d   : > { %v1335_v44 = vsel %vm1317_vm11, %v1302_v59, %v1071_v4  ;;  %1855 = vmatmul.msk.bf16.vlgmr.msra.gmra.mxu3 %vm1369_vm12, %v1343_v10 }
 0x12e   : > { %1851 = vmatmul.msk.bf16.vlgmr.msra.gmra.mxu2 %vm1369_vm12, %v1335_v44 }
 0x130   : > { %1021 = vrot.lane.b32.xlu2 %v2200_v43, %s2002_s6 }
 0x131   : > { %974 = vrot.lane.b32.xlu1 %v2165_v8, %s2000_s29  ;;  %v1195_v8 = vsel %vm1185_vm7, %v2613_v11, %v892_v42 }
 0x132   : > { %966 = vrot.lane.b32.xlu0 %v2145_v51, %s2000_s29  ;;  %v947_v34 = vpop.permute.xlu2 %946  ;;  %v1187_v51 = vsel %vm1185_vm7, %v2511_v60, %v884_v17  ;;  %v996_v60 = vpack.c.b16 %v995_v18, %v995_v18 }
 0x133   : > { %v929_v5 = vpop.permute.xlu1 %928 }
 0x134   : > { %v921_v14 = vpop.permute.xlu0 %920  ;;  %v1228_v63 = vsel %vm1218_vm8, %v1195_v8, %v929_v5 }
 0x135   : > { %v1220_v33 = vsel %vm1218_vm8, %v1187_v51, %v921_v14 }
 0x136   : > { %v1253_v11 = vsel %vm1251_vm9, %v1220_v33, %v963_v31 }
 0x138   : > { %1066 = vrot.lane.b32.xlu2 %v3022_v0, %s2003_s7 }
 0x139   : > { %1058 = vrot.lane.b32.xlu1 %v2301_v20, %s2003_s7 }
 0x13a   : > { %1029 = vrot.lane.b32.xlu0 %v3023_v1, %s2002_s6  ;;  %v1036_v37 = vpop.permute.xlu2 %1035 }
 0x13b   : > { %v1018_v43 = vpop.permute.xlu1 %1017 }
 0x13c   : > { %v971_v32 = vpop.permute.xlu0 %970  ;;  %v1286_v17 = vsel %vm1284_vm10, %v1253_v11, %v1018_v43 }
 0x13d   : > { %v1261_v20 = vsel %vm1251_vm9, %v1228_v63, %v971_v32 }
 0x13e   : > { %v1294_v23 = vsel %vm1284_vm10, %v1261_v20, %v1026_v22 }
 0x140   : > { %942 = vrot.lane.b32.xlu2 %v2337_v50, %s2001_s30 }
 0x141   : > { %913 = vrot.lane.b32.xlu1 %v2580_v27, %s1999_s28  ;;  %v1013_v27 = vshll.u32 %v996_v60, 16 }
 0x142   : > { %905 = vrot.lane.b32.xlu0 %v2248_v30, %s1999_s28  ;;  %v1081_v42 = vpop.permute.xlu2 %1080  ;;  %v1009_v30 = vshrl.u32 %v2668_v28, 16 }
 0x143   : > { %v1063_v48 = vpop.permute.xlu1 %1062  ;;  %v1015_v35 = vrot.slane %v1013_v27, 1 }
 0x144   : > { %v1055_v58 = vpop.permute.xlu0 %1054  ;;  %v1327_v50 = vsel %vm1317_vm11, %v1294_v23, %v1063_v48  ;;  %v1011_v22 = vor.u32 %v1009_v30, %v2685_v12  ;;  %v1205_v12 = vsel %vm1185_vm7, %v2568_v6, %v902_v55 }
 0x145   : > { %v1319_v26 = vsel %vm1317_vm11, %v1286_v17, %v1055_v58  ;;  %1847 = vmatmul.msk.bf16.vlgmr.msra.gmra.mxu1 %vm1369_vm12, %v1327_v50 }
 0x146   : > { %1843 = vmatmul.msk.bf16.vlgmr.msra.gmra.mxu0 %vm1369_vm12, %v1319_v26  ;;  %v1016_v4 = vsel %vm552_vm0, %v1011_v22, %v1015_v35 }
 0x148   : > { %992 = vrot.lane.b32.xlu2 %v2668_v28, %s2000_s29 }
 0x149   : > { %984 = vrot.lane.b32.xlu1 %v2210_v52, %s2000_s29  ;;  %v1052_v52 = vrot.slane %v996_v60, 1 }
 0x14a   : > { %950 = vrot.lane.b32.xlu0 %v2577_v49, %s2001_s30  ;;  %v923_v31 = vpop.permute.xlu2 %922 }
 0x14b   : > { %v939_v59 = vpop.permute.xlu1 %938  ;;  %v1053_v10 = vsel %vm745_vm1, %v1050_v53, %v1052_v52 }
 0x14c   : > { %v910_v62 = vpop.permute.xlu0 %909  ;;  %v1238_v5 = vsel %vm1218_vm8, %v1205_v12, %v939_v59 }
 0x150   : > { %1076 = vrot.lane.b32.xlu2 %v2355_v47, %s2003_s7  ;;  %v1213_v47 = vsel %vm1185_vm7, %v2676_v39, %v910_v62 }
 0x151   : > { %1047 = vrot.lane.b32.xlu1 %v1016_v4, %s2002_s6 }
 0x152   : > { %1039 = vrot.lane.b32.xlu0 %v2267_v56, %s2002_s6  ;;  %v973_v49 = vpop.permute.xlu2 %972  ;;  %v1246_v56 = vsel %vm1218_vm8, %v1213_v47, %v947_v34 }
 0x153   : > { %v989_v40 = vpop.permute.xlu1 %988 }
 0x154   : > { %v981_v44 = vpop.permute.xlu0 %980  ;;  %v1279_v6 = vsel %vm1251_vm9, %v1246_v56, %v989_v40 }
 0x155   : > { %v1271_v14 = vsel %vm1251_vm9, %v1238_v5, %v981_v44 }
 0x156   : > { %v1304_v55 = vsel %vm1284_vm10, %v1271_v14, %v1036_v37 }
 0x158   : > { %897 = vrot.lane.b32.xlu2 %v2233_v16, %s1999_s28 }
 0x159   : > { %889 = vrot.lane.b32.xlu1 %v2152_v57, %s1999_s28  ;;  %v1955_v57 = vld [vmem:[%s2078_s8 + $0x44] sm:$0xff]  ;;  %s1752_s8 = sshll.u32 %s3039_s25, 2  ;;  %s1753_s28 = sshll.u32 %s3035_s19, 7 }
 0x15a   : > { %1084 = vrot.lane.b32.xlu0 %v1053_v10, %s2003_s7  ;;  %v1057_v1 = vpop.permute.xlu2 %1056 }
 0x15b   : > { %v1073_v28 = vpop.permute.xlu1 %1072 }
 0x15c   : > { %v1044_v53 = vpop.permute.xlu0 %1043  ;;  %v1337_v0 = vsel %vm1317_vm11, %v1304_v55, %v1073_v28 }
 0x15d   : > { %v1312_v39 = vsel %vm1284_vm10, %v1279_v6, %v1044_v53  ;;  %1852 = vmatmul.msk.bf16.gmra.mxu2 %vm1369_vm12, %v1337_v0 }
 0x15e   : > { %v1345_v16 = vsel %vm1317_vm11, %v1312_v39, %v1081_v42 }
 0x15f   : > { %1856 = vmatmul.msk.bf16.gmra.mxu3 %vm1369_vm12, %v1345_v16  ;;  %v2860_v16 = vld [vmem:[%s3011_s4] ss:$0 sm:$0xff] }
 0x160   : > { %968 = vrot.lane.b32.xlu2 %v1955_v57, %s2000_s29 }
 0x161   : > { %934 = vrot.lane.b32.xlu1 %v2321_v41, %s2001_s30 }
 0x162   : > { %926 = vrot.lane.b32.xlu0 %v2304_v21, %s2001_s30  ;;  %v912_v43 = vpop.permute.xlu2 %911 }
 0x163   : > { %v894_v34 = vpop.permute.xlu1 %893  ;;  %v1215_v23 = vsel %vm1185_vm7, %v2672_v29, %v912_v43 }
 0x164   : > { %v886_v37 = vpop.permute.xlu0 %885 }
 0x165   : > { %v1189_v41 = vsel %vm1185_vm7, %v2596_v2, %v886_v37  ;;  %v1197_v2 = vsel %vm1185_vm7, %v2609_v46, %v894_v34 }
 0x168   : > { %1031 = vrot.lane.b32.xlu2 %v2223_v7, %s2002_s6  ;;  %v1222_v7 = vsel %vm1218_vm8, %v1189_v41, %v923_v31 }
 0x169   : > { %1023 = vrot.lane.b32.xlu1 %v2193_v36, %s2002_s6  ;;  %s393_s6 = sadd.s32 %s1753_s28, %s1752_s8 }
 0x16a   : > { %976 = vrot.lane.b32.xlu0 %v2158_v61, %s2000_s29  ;;  %v983_v21 = vpop.permute.xlu2 %982  ;;  %s1754_s19 = sshll.u32 %s393_s6, 2 }
 0x16b   : > { %v965_v32 = vpop.permute.xlu1 %964  ;;  %s2868_s10 = scalar_lea.vmem %s3012_s5, %s1754_s19 }
 0x16c   : > { %v931_v9 = vpop.permute.xlu0 %930  ;;  %v1255_v8 = vsel %vm1251_vm9, %v1222_v7, %v965_v32 }
 0x171   : > { %1068 = vrot.lane.b32.xlu1 %v2343_v54, %s2003_s7  ;;  %v1230_v54 = vsel %vm1218_vm8, %v1197_v2, %v931_v9 }
 0x172   : > { %1060 = vrot.lane.b32.xlu0 %v2298_v19, %s2003_s7  ;;  %v1263_v19 = vsel %vm1251_vm9, %v1230_v54, %v973_v49  ;;  %v1046_v11 = vpop.permute.xlu2 %1045 }
 0x173   : > { %v1028_v36 = vpop.permute.xlu1 %1027 }
 0x174   : > { %v1020_v51 = vpop.permute.xlu0 %1019  ;;  %v1296_v63 = vsel %vm1284_vm10, %v1263_v19, %v1028_v36 }
 0x175   : > { %v1288_v61 = vsel %vm1284_vm10, %v1255_v8, %v1020_v51 }
 0x176   : > { %v1321_v18 = vsel %vm1317_vm11, %v1288_v61, %v1057_v1 }
 0x177   : > { %1844 = vmatmul.msk.bf16.gmra.mxu0 %vm1369_vm12, %v1321_v18 }
 0x17a   : > { %v888_v48 = vpop.permute.xlu2 %887 }
 0x17b   : > { %v904_v33 = vpop.permute.xlu1 %903  ;;  %v1191_v5 = vsel %vm1185_vm7, %v2592_v15, %v888_v48 }
 0x17c   : > { %v1065_v20 = vpop.permute.xlu0 %1064  ;;  %v1207_v26 = vsel %vm1185_vm7, %v2655_v45, %v904_v33 }
 0x17d   : > { %v1329_v42 = vsel %vm1317_vm11, %v1296_v63, %v1065_v20 }
 0x17e   : > { %1848 = vmatmul.msk.bf16.gmra.mxu1 %vm1369_vm12, %v1329_v42 }
 0x182   : > { %v933_v27 = vpop.permute.xlu2 %932 }
 0x183   : > { %v949_v60 = vpop.permute.xlu1 %948 }
 0x184   : > { %v941_v17 = vpop.permute.xlu0 %940  ;;  %v1248_v50 = vsel %vm1218_vm8, %v1215_v23, %v949_v60 }
 0x185   : > { %v1240_v30 = vsel %vm1218_vm8, %v1207_v26, %v941_v17 }
 0x186   : > { %v1273_v22 = vsel %vm1251_vm9, %v1240_v30, %v983_v21 }
 0x18a   : > { %v1022_v52 = vpop.permute.xlu2 %1021 }
 0x18b   : > { %v1038_v58 = vpop.permute.xlu1 %1037 }
 0x18c   : > { %v991_v46 = vpop.permute.xlu0 %990  ;;  %v1306_v35 = vsel %vm1284_vm10, %v1273_v22, %v1038_v58 }
 0x18d   : > { %v1281_v31 = vsel %vm1251_vm9, %v1248_v50, %v991_v46 }
 0x18e   : > { %v1314_v29 = vsel %vm1284_vm10, %v1281_v31, %v1046_v11 }
 0x192   : > { %v1067_v10 = vpop.permute.xlu2 %1066 }
 0x193   : > { %v1083_v59 = vpop.permute.xlu1 %1082 }
 0x194   : > { %v1075_v62 = vpop.permute.xlu0 %1074  ;;  %v1347_v45 = vsel %vm1317_vm11, %v1314_v29, %v1083_v59 }
 0x195   : > { %v1339_v4 = vsel %vm1317_vm11, %v1306_v35, %v1075_v62  ;;  %1857 = vmatmul.msk.bf16.gmra.mxu3 %vm1369_vm12, %v1347_v45 }
 0x196   : > { %1853 = vmatmul.msk.bf16.gmra.mxu2 %vm1369_vm12, %v1339_v4 }
 0x19a   : > { %v943_v1 = vpop.permute.xlu2 %942 }
 0x19b   : > { %v925_v40 = vpop.permute.xlu1 %924 }
 0x19c   : > { %v896_v44 = vpop.permute.xlu0 %895  ;;  %v1224_v47 = vsel %vm1218_vm8, %v1191_v5, %v925_v40 }
 0x19d   : > { %v1199_v14 = vsel %vm1185_vm7, %v2546_v24, %v896_v44 }
 0x19e   : > { %v1232_v6 = vsel %vm1218_vm8, %v1199_v14, %v933_v27 }
 0x1a2   : > { %v993_v2 = vpop.permute.xlu2 %992 }
 0x1a3   : > { %v975_v49 = vpop.permute.xlu1 %974 }
 0x1a4   : > { %v967_v12 = vpop.permute.xlu0 %966  ;;  %v1265_v28 = vsel %vm1251_vm9, %v1232_v6, %v975_v49 }
 0x1a5   : > { %v1257_v56 = vsel %vm1251_vm9, %v1224_v47, %v967_v12 }
 0x1a6   : > { %v1290_v39 = vsel %vm1284_vm10, %v1257_v56, %v1022_v52 }
 0x1aa   : > { %v1077_v30 = vpop.permute.xlu2 %1076 }
 0x1ab   : > { %v1059_v53 = vpop.permute.xlu1 %1058 }
 0x1ac   : > { %v1030_v55 = vpop.permute.xlu0 %1029  ;;  %v1323_v0 = vsel %vm1317_vm11, %v1290_v39, %v1059_v53 }
 0x1ad   : > { %v1298_v15 = vsel %vm1284_vm10, %v1265_v28, %v1030_v55  ;;  %1845 = vmatmul.msk.bf16.gmra.mxu0 %vm1369_vm12, %v1323_v0 }
 0x1ae   : > { %v1331_v24 = vsel %vm1317_vm11, %v1298_v15, %v1067_v10 }
 0x1af   : > { %1849 = vmatmul.msk.bf16.gmra.mxu1 %vm1369_vm12, %v1331_v24 }
 0x1b0   : > { %v1478_v34 = vpop.f32.mrf.mxu3 }
 0x1b1   : > { %v1458_v57 = vpop.f32.mrf.mxu2  ;;  %v1479_v43 = vadd.f32 %v2860_v16, %v1478_v34 }
 0x1b2   : > { %v1459_v37 = vadd.f32 %v2860_v16, %v1458_v57  ;;  %v898_v14 = vpop.permute.xlu2 %897 }
 0x1b3   : > { %v1522_v9 = vmax.f32 %v1479_v43, 0.0  ;;  %v914_v41 = vpop.permute.xlu1 %913  ;;  %v1201_v0 = vsel %vm1185_vm7, %v2627_v25, %v898_v14 }
 0x1b4   : > { %v1514_v32 = vmax.f32 %v1459_v37, 0.0  ;;  %v906_v21 = vpop.permute.xlu0 %905  ;;  %v1217_v35 = vsel %vm1185_vm7, %v2606_v13, %v914_v41 }
 0x1b5   : > { %v1554_v8 = vpack.c.bf16 %v1522_v9, %v1522_v9  ;;  %v1209_v42 = vsel %vm1185_vm7, %v2651_v3, %v906_v21 }
 0x1b6   : > { %v1546_v7 = vpack.c.bf16 %v1514_v32, %v1514_v32  ;;  %v1242_v60 = vsel %vm1218_vm8, %v1209_v42, %v943_v1 }
 0x1b7   : > { %1587 = vst.msk [vmem:[%s2868_s10 + $0x60] sm:$0xf] %vm1562_vm13, %v1554_v8 }
 0x1b8   : > { %1579 = vst.msk [vmem:[%s2868_s10 + $0x40] sm:$0xf] %vm1562_vm13, %v1546_v7  ;;  %v1480_v51 = vpop.f32.mrf.mxu3 }
 0x1b9   : > { %v1460_v36 = vpop.f32.mrf.mxu2  ;;  %v1481_v18 = vadd.f32 %v2860_v16, %v1480_v51 }
 0x1ba   : > { %v1461_v61 = vadd.f32 %v2860_v16, %v1460_v36  ;;  %v969_v55 = vpop.permute.xlu2 %968 }
 0x1bb   : > { %v1523_v19 = vmax.f32 %v1481_v18, 0.0  ;;  %v985_v63 = vpop.permute.xlu1 %984 }
 0x1bc   : > { %v1515_v54 = vmax.f32 %v1461_v61, 0.0  ;;  %v951_v33 = vpop.permute.xlu0 %950  ;;  %v1275_v58 = vsel %vm1251_vm9, %v1242_v60, %v985_v63 }
 0x1bd   : > { %v1555_v11 = vpack.c.bf16 %v1523_v19, %v1523_v19  ;;  %v1250_v59 = vsel %vm1218_vm8, %v1217_v35, %v951_v33 }
 0x1be   : > { %v1547_v20 = vpack.c.bf16 %v1515_v54, %v1515_v54  ;;  %v1283_v4 = vsel %vm1251_vm9, %v1250_v59, %v993_v2 }
 0x1bf   : > { %1588 = vst.msk [vmem:[%s2868_s10 + $0x64] sm:$0xf] %vm1562_vm13, %v1555_v11 }
 0x1c0   : > { %1580 = vst.msk [vmem:[%s2868_s10 + $0x44] sm:$0xf] %vm1562_vm13, %v1547_v20 }
 0x1c2   : > { %v1438_v48 = vpop.f32.mrf.mxu1  ;;  %v1032_v37 = vpop.permute.xlu2 %1031 }
 0x1c3   : > { %v1418_v17 = vpop.f32.mrf.mxu0  ;;  %v1439_v23 = vadd.f32 %v2860_v16, %v1438_v48  ;;  %v1048_v26 = vpop.permute.xlu1 %1047 }
 0x1c4   : > { %v1419_v46 = vadd.f32 %v2860_v16, %v1418_v17  ;;  %v1040_v50 = vpop.permute.xlu0 %1039  ;;  %v1316_v40 = vsel %vm1284_vm10, %v1283_v4, %v1048_v26 }
 0x1c5   : > { %v1308_v3 = vsel %vm1284_vm10, %v1275_v58, %v1040_v50  ;;  %v1506_v31 = vmax.f32 %v1439_v23, 0.0 }
 0x1c6   : > { %v1498_v27 = vmax.f32 %v1419_v46, 0.0  ;;  %v1341_v22 = vsel %vm1317_vm11, %v1308_v3, %v1077_v30 }
 0x1c7   : > { %1854 = vmatmul.msk.bf16.gmra.mxu2 %vm1369_vm12, %v1341_v22  ;;  %v1538_v29 = vpack.c.bf16 %v1506_v31, %v1506_v31 }
 0x1c8   : > { %v1530_v62 = vpack.c.bf16 %v1498_v27, %v1498_v27 }
 0x1c9   : > { %1571 = vst.msk [vmem:[%s2868_s10 + $0x20] sm:$0xf] %vm1562_vm13, %v1538_v29 }
 0x1ca   : > { %1563 = vst.msk [vmem:[%s2868_s10] sm:$0xf] %vm1562_vm13, %v1530_v62  ;;  %v1440_v52 = vpop.f32.mrf.mxu1 }
 0x1cb   : > { %v1420_v45 = vpop.f32.mrf.mxu0  ;;  %v1441_v44 = vadd.f32 %v2860_v16, %v1440_v52  ;;  %v890_v49 = vpop.permute.xlu1 %889 }
 0x1cc   : > { %v1421_v13 = vadd.f32 %v2860_v16, %v1420_v45  ;;  %v1085_v12 = vpop.permute.xlu0 %1084  ;;  %v1193_v24 = vsel %vm1185_vm7, %v2527_v38, %v890_v49 }
 0x1cd   : > { %v1349_v10 = vsel %vm1317_vm11, %v1316_v40, %v1085_v12  ;;  %v1507_v47 = vmax.f32 %v1441_v44, 0.0 }
 0x1ce   : > { %v1499_v5 = vmax.f32 %v1421_v13, 0.0  ;;  %1858 = vmatmul.msk.bf16.gmra.mxu3 %vm1369_vm12, %v1349_v10 }
 0x1cf   : > { %v1539_v6 = vpack.c.bf16 %v1507_v47, %v1507_v47 }
 0x1d0   : > { %v1531_v56 = vpack.c.bf16 %v1499_v5, %v1499_v5 }
 0x1d1   : > { %1572 = vst.msk [vmem:[%s2868_s10 + $0x24] sm:$0xf] %vm1562_vm13, %v1539_v6 }
 0x1d2   : > { %1564 = vst.msk [vmem:[%s2868_s10 + $0x4] sm:$0xf] %vm1562_vm13, %v1531_v56 }
 0x1d3   : > { %v935_v28 = vpop.permute.xlu1 %934 }
 0x1d4   : > { %v927_v53 = vpop.permute.xlu0 %926  ;;  %v1234_v1 = vsel %vm1218_vm8, %v1201_v0, %v935_v28 }
 0x1d5   : > { %v1226_v57 = vsel %vm1218_vm8, %v1193_v24, %v927_v53 }
 0x1d6   : > { %v1259_v41 = vsel %vm1251_vm9, %v1226_v57, %v969_v55 }
 0x1db   : > { %v1024_v39 = vpop.permute.xlu1 %1023 }
 0x1dc   : > { %v977_v15 = vpop.permute.xlu0 %976  ;;  %v1292_v21 = vsel %vm1284_vm10, %v1259_v41, %v1024_v39 }
 0x1dd   : > { %v1267_v34 = vsel %vm1251_vm9, %v1234_v1, %v977_v15 }
 0x1de   : > { %v1300_v38 = vsel %vm1284_vm10, %v1267_v34, %v1032_v37 }
 0x1e0   : > { %v1463_v43 = vpop.f32.mrf.mxu2 }
 0x1e1   : > { %v1464_v32 = vadd.f32 %v2860_v16, %v1463_v43 }
 0x1e2   : > { %v1483_v9 = vpop.f32.mrf.mxu3 }
 0x1e3   : > { %v1484_v25 = vadd.f32 %v2860_v16, %v1483_v9  ;;  %v1516_v7 = vmax.f32 %v1464_v32, 0.0  ;;  %v1069_v8 = vpop.permute.xlu1 %1068 }
 0x1e4   : > { %v1061_v36 = vpop.permute.xlu0 %1060  ;;  %v1333_v18 = vsel %vm1317_vm11, %v1300_v38, %v1069_v8 }
 0x1e5   : > { %v1524_v51 = vmax.f32 %v1484_v25, 0.0  ;;  %v1325_v61 = vsel %vm1317_vm11, %v1292_v21, %v1061_v36  ;;  %v1548_v2 = vpack.c.bf16 %v1516_v7, %v1516_v7  ;;  %1850 = vmatmul.msk.bf16.gmra.mxu1 %vm1369_vm12, %v1333_v18 }
 0x1e6   : > { %1846 = vmatmul.msk.bf16.gmra.mxu0 %vm1369_vm12, %v1325_v61 }
 0x1e7   : > { %v1556_v54 = vpack.c.bf16 %v1524_v51, %v1524_v51  ;;  %1581 = vst.msk [vmem:[%s2868_s10 + $0x48] sm:$0xf] %vm1562_vm13, %v1548_v2 }
 0x1e8   : > { %v1465_v19 = vpop.f32.mrf.mxu2 }
 0x1e9   : > { %1589 = vst.msk [vmem:[%s2868_s10 + $0x68] sm:$0xf] %vm1562_vm13, %v1556_v54  ;;  %v1466_v63 = vadd.f32 %v2860_v16, %v1465_v19 }
 0x1ea   : > { %v1485_v33 = vpop.f32.mrf.mxu3 }
 0x1eb   : > { %v1486_v20 = vadd.f32 %v2860_v16, %v1485_v33  ;;  %v1517_v11 = vmax.f32 %v1466_v63, 0.0 }
 0x1ed   : > { %v1525_v42 = vmax.f32 %v1486_v20, 0.0  ;;  %v1549_v60 = vpack.c.bf16 %v1517_v11, %v1517_v11 }
 0x1ef   : > { %v1557_v17 = vpack.c.bf16 %v1525_v42, %v1525_v42  ;;  %1582 = vst.msk [vmem:[%s2868_s10 + $0x4c] sm:$0xf] %vm1562_vm13, %v1549_v60 }
 0x1f1   : > { %1590 = vst.msk [vmem:[%s2868_s10 + $0x6c] sm:$0xf] %vm1562_vm13, %v1557_v17 }
 0x1f4   : > { %v1423_v48 = vpop.f32.mrf.mxu0 }
 0x1f5   : > { %v1424_v58 = vadd.f32 %v2860_v16, %v1423_v48 }
 0x1f7   : > { %v1500_v46 = vmax.f32 %v1424_v58, 0.0 }
 0x1f9   : > { %v1532_v23 = vpack.c.bf16 %v1500_v46, %v1500_v46 }
 0x1fb   : > { %1565 = vst.msk [vmem:[%s2868_s10 + $0x8] sm:$0xf] %vm1562_vm13, %v1532_v23  ;;  %v1443_v26 = vpop.f32.mrf.mxu1 }
 0x1fc   : > { %v1444_v50 = vadd.f32 %v2860_v16, %v1443_v26  ;;  %v1425_v30 = vpop.f32.mrf.mxu0 }
 0x1fd   : > { %v1426_v3 = vadd.f32 %v2860_v16, %v1425_v30 }
 0x1fe   : > { %v1508_v27 = vmax.f32 %v1444_v50, 0.0 }
 0x1ff   : > { %v1501_v31 = vmax.f32 %v1426_v3, 0.0 }
 0x200   : > { %v1540_v22 = vpack.c.bf16 %v1508_v27, %v1508_v27 }
 0x201   : > { %v1533_v35 = vpack.c.bf16 %v1501_v31, %v1501_v31 }
 0x202   : > { %1573 = vst.msk [vmem:[%s2868_s10 + $0x28] sm:$0xf] %vm1562_vm13, %v1540_v22 }
 0x203   : > { %1566 = vst.msk [vmem:[%s2868_s10 + $0xc] sm:$0xf] %vm1562_vm13, %v1533_v35  ;;  %v1445_v59 = vpop.f32.mrf.mxu1 }
 0x204   : > { %v1446_v62 = vadd.f32 %v2860_v16, %v1445_v59 }
 0x206   : > { %v1509_v29 = vmax.f32 %v1446_v62, 0.0 }
 0x208   : > { %v1541_v4 = vpack.c.bf16 %v1509_v29, %v1509_v29 }
 0x20a   : > { %1574 = vst.msk [vmem:[%s2868_s10 + $0x2c] sm:$0xf] %vm1562_vm13, %v1541_v4 }
 0x218   : > { %v1488_v52 = vpop.f32.mrf.mxu3 }
 0x219   : > { %v1468_v45 = vpop.f32.mrf.mxu2  ;;  %v1489_v13 = vadd.f32 %v2860_v16, %v1488_v52 }
 0x21a   : > { %v1469_v40 = vadd.f32 %v2860_v16, %v1468_v45 }
 0x21b   : > { %v1526_v49 = vmax.f32 %v1489_v13, 0.0 }
 0x21c   : > { %v1518_v44 = vmax.f32 %v1469_v40, 0.0 }
 0x21d   : > { %v1558_v10 = vpack.c.bf16 %v1526_v49, %v1526_v49 }
 0x21e   : > { %v1550_v12 = vpack.c.bf16 %v1518_v44, %v1518_v44 }
 0x21f   : > { %1591 = vst.msk [vmem:[%s2868_s10 + $0x70] sm:$0xf] %vm1562_vm13, %v1558_v10 }
 0x220   : > { %1583 = vst.msk [vmem:[%s2868_s10 + $0x50] sm:$0xf] %vm1562_vm13, %v1550_v12  ;;  %v1490_v47 = vpop.f32.mrf.mxu3 }
 0x221   : > { %v1470_v5 = vpop.f32.mrf.mxu2  ;;  %v1491_v56 = vadd.f32 %v2860_v16, %v1490_v47 }
 0x222   : > { %v1471_v14 = vadd.f32 %v2860_v16, %v1470_v5 }
 0x223   : > { %v1527_v28 = vmax.f32 %v1491_v56, 0.0 }
 0x224   : > { %v1519_v6 = vmax.f32 %v1471_v14, 0.0 }
 0x225   : > { %v1559_v55 = vpack.c.bf16 %v1527_v28, %v1527_v28 }
 0x226   : > { %v1551_v53 = vpack.c.bf16 %v1519_v6, %v1519_v6 }
 0x227   : > { %1592 = vst.msk [vmem:[%s2868_s10 + $0x74] sm:$0xf] %vm1562_vm13, %v1559_v55 }
 0x228   : > { %1584 = vst.msk [vmem:[%s2868_s10 + $0x54] sm:$0xf] %vm1562_vm13, %v1551_v53 }
 0x22a   : > { %v1428_v39 = vpop.f32.mrf.mxu0 }
 0x22b   : > { %v1429_v15 = vadd.f32 %v2860_v16, %v1428_v39 }
 0x22c   : > { %v1448_v0 = vpop.f32.mrf.mxu1 }
 0x22d   : > { %v1449_v24 = vadd.f32 %v2860_v16, %v1448_v0  ;;  %v1502_v1 = vmax.f32 %v1429_v15, 0.0 }
 0x22f   : > { %v1510_v57 = vmax.f32 %v1449_v24, 0.0  ;;  %v1534_v34 = vpack.c.bf16 %v1502_v1, %v1502_v1 }
 0x231   : > { %v1542_v37 = vpack.c.bf16 %v1510_v57, %v1510_v57  ;;  %1567 = vst.msk [vmem:[%s2868_s10 + $0x10] sm:$0xf] %vm1562_vm13, %v1534_v34 }
 0x232   : > { %v1430_v43 = vpop.f32.mrf.mxu0 }
 0x233   : > { %1575 = vst.msk [vmem:[%s2868_s10 + $0x30] sm:$0xf] %vm1562_vm13, %v1542_v37  ;;  %v1431_v32 = vadd.f32 %v2860_v16, %v1430_v43 }
 0x234   : > { %v1450_v9 = vpop.f32.mrf.mxu1 }
 0x235   : > { %v1451_v41 = vadd.f32 %v2860_v16, %v1450_v9  ;;  %v1503_v25 = vmax.f32 %v1431_v32, 0.0 }
 0x237   : > { %v1511_v21 = vmax.f32 %v1451_v41, 0.0  ;;  %v1535_v38 = vpack.c.bf16 %v1503_v25, %v1503_v25 }
 0x239   : > { %v1543_v7 = vpack.c.bf16 %v1511_v21, %v1511_v21  ;;  %1568 = vst.msk [vmem:[%s2868_s10 + $0x14] sm:$0xf] %vm1562_vm13, %v1535_v38 }
 0x23b   : > { %1576 = vst.msk [vmem:[%s2868_s10 + $0x34] sm:$0xf] %vm1562_vm13, %v1543_v7 }
 0x24a   : > { %v1473_v8 = vpop.f32.mrf.mxu2 }
 0x24b   : > { %v1474_v36 = vadd.f32 %v2860_v16, %v1473_v8 }
 0x24d   : > { %v1520_v51 = vmax.f32 %v1474_v36, 0.0 }
 0x24f   : > { %v1552_v61 = vpack.c.bf16 %v1520_v51, %v1520_v51 }
 0x251   : > { %1585 = vst.msk [vmem:[%s2868_s10 + $0x58] sm:$0xf] %vm1562_vm13, %v1552_v61  ;;  %v1493_v18 = vpop.f32.mrf.mxu3 }
 0x252   : > { %v1494_v2 = vadd.f32 %v2860_v16, %v1493_v18  ;;  %v1475_v54 = vpop.f32.mrf.mxu2 }
 0x253   : > { %v1476_v19 = vadd.f32 %v2860_v16, %v1475_v54 }
 0x254   : > { %v1528_v63 = vmax.f32 %v1494_v2, 0.0 }
 0x255   : > { %v1521_v33 = vmax.f32 %v1476_v19, 0.0 }
 0x256   : > { %v1560_v20 = vpack.c.bf16 %v1528_v63, %v1528_v63 }
 0x257   : > { %v1553_v11 = vpack.c.bf16 %v1521_v33, %v1521_v33 }
 0x258   : > { %1593 = vst.msk [vmem:[%s2868_s10 + $0x78] sm:$0xf] %vm1562_vm13, %v1560_v20 }
 0x259   : > { %1586 = vst.msk [vmem:[%s2868_s10 + $0x5c] sm:$0xf] %vm1562_vm13, %v1553_v11  ;;  %v1495_v42 = vpop.f32.mrf.mxu3 }
 0x25a   : > { %v1496_v60 = vadd.f32 %v2860_v16, %v1495_v42 }
 0x25c   : > { %v1529_v17 = vmax.f32 %v1496_v60, 0.0 }
 0x25e   : > { %v1561_v48 = vpack.c.bf16 %v1529_v17, %v1529_v17 }
 0x260   : > { %1594 = vst.msk [vmem:[%s2868_s10 + $0x7c] sm:$0xf] %vm1562_vm13, %v1561_v48 }
 0x262   : > { %v1453_v46 = vpop.f32.mrf.mxu1 }
 0x263   : > { %v1433_v58 = vpop.f32.mrf.mxu0  ;;  %v1454_v26 = vadd.f32 %v2860_v16, %v1453_v46 }
 0x264   : > { %v1434_v23 = vadd.f32 %v2860_v16, %v1433_v58 }
 0x265   : > { %v1512_v30 = vmax.f32 %v1454_v26, 0.0 }
 0x266   : > { %v1504_v50 = vmax.f32 %v1434_v23, 0.0 }
 0x267   : > { %v1544_v27 = vpack.c.bf16 %v1512_v30, %v1512_v30 }
 0x268   : > { %v1536_v3 = vpack.c.bf16 %v1504_v50, %v1504_v50 }
 0x269   : > { %1577 = vst.msk [vmem:[%s2868_s10 + $0x38] sm:$0xf] %vm1562_vm13, %v1544_v27 }
 0x26a   : > { %1569 = vst.msk [vmem:[%s2868_s10 + $0x18] sm:$0xf] %vm1562_vm13, %v1536_v3  ;;  %v1455_v22 = vpop.f32.mrf.mxu1 }
 0x26b   : > { %v1435_v31 = vpop.f32.mrf.mxu0  ;;  %v1456_v59 = vadd.f32 %v2860_v16, %v1455_v22 }
 0x26c   : > { %v1436_v35 = vadd.f32 %v2860_v16, %v1435_v31 }
 0x26d   : > { %v1513_v29 = vmax.f32 %v1456_v59, 0.0 }
 0x26e   : > { %v1505_v62 = vmax.f32 %v1436_v35, 0.0 }
 0x26f   : > { %v1545_v45 = vpack.c.bf16 %v1513_v29, %v1513_v29 }
 0x270   : > { %v1537_v4 = vpack.c.bf16 %v1505_v62, %v1505_v62 }
 0x271   : > { %1578 = vst.msk [vmem:[%s2868_s10 + $0x3c] sm:$0xf] %vm1562_vm13, %v1545_v45 }
 0x272   : > { %1570 = vst.msk [vmem:[%s2868_s10 + $0x1c] sm:$0xf] %vm1562_vm13, %v1537_v4 }
 0x273 PF: > { %s15_s22 = sadd.s32 1, %s1994_s22   ;;  %s3024_s18 = smov %s1986_s20 }
 0x274   : > { %p12_p10 = scmp.ge.s32.totalorder %s15_s22, 10   ;;  %s3025_s19 = smov %s1990_s21 }
 0x275   : > { %s3026_s20 = smov %s3029_s23  ;;  %s3027_s21 = smov %s3033_s24 }
 0x276   :  { %14 = sbr.rel (!%p12_p10) target bundleno = 3 (0x3), region = 76 }

// kernel: edgepoint_forward.30
= control target key start
LH: loop header
LB: loop body
LE: loop exit
PB: predicated region body
PF: predicated region fallthrough
CT: control target
= control target key end

     0   :  { %s1075_s20 = smov 0   ;;  %s1388_s0 = inlined_call_operand.vmem [shape: bf16[2048,32], index: 0, kind: input, shape index: {}]   ;;  %s1389_s1 = inlined_call_operand.vmem [shape: bf16[32,32], index: 1, kind: input, shape index: {}]   ;;  %s1390_s2 = inlined_call_operand.vmem [shape: f32[1,32], index: 2, kind: input, shape index: {}]   ;;  %s1391_s3 = inlined_call_operand.<no memory space> [shape: f32[1,1], index: 3, kind: input, shape index: {}]   ;;  %s1392_s4 = inlined_call_operand.vmem [shape: bf16[2048,32], index: 4, kind: output, shape index: {0}]   ;;  %s1393_s5 = inlined_call_operand.vmem [shape: f32[2048,1], index: 5, kind: output, shape index: {1}]  }
   0x1   :  { %v11_v0 = vstv %s1391_s3 }
   0x2   :  { %12 = vst [vmem:[#allocation2] sm:$0x1] %v11_v0 }
   0x3 LB: > { %s899_s21 = sadd.s32 4294967295, %s1040_s20   ;;  %p903_p0 = scmp.ge.s32.totalorder %s1040_s20, 1  ;;  %s1040_s20 = sphi %s1075_s20, %s18_s20  }
   0x4   : > { %p193_p1 = scmp.lt.s32.totalorder %s1040_s20, 9 }
   0x6   : > { %p194_p2 = pnand %p903_p0, %p193_p1 }
   0x7   : > { %s904_s3 = sshll.u32 (!%p194_p2), %s899_s21, 5 }
   0x8   : > { %197 = sbr.rel (%p194_p2) target bundleno = 358 (0x166), region = 36  ;;  %p227_p3 = scmp.lt.s32.totalorder (!%p194_p2), %s904_s3, 255 }
   0xd   : > { %v1017_v1 = vld [vmem:[%s1389_s1 + $0x8] sm:$0xff]  ;;  %v1016_v2 = vld [vmem:[%s1389_s1] sm:$0xff]  ;;  %s1395_s3 = smov (!%p227_p3, %s904_s3), 255  ;;  %vm373_vm0 = vcmask 261120   ;;  %vm743_vm1 = vcmask 257024   ;;  %vm776_vm2 = vcmask 7168  }
   0xe   : > { %428 = vmatpush.bf16.msra.mxu0 %v1017_v1  ;;  %1019 = vmatpush.bf16.msra.mxu2 %v1017_v1  ;;  %s905_s26 = sshll.u32 %s1395_s3, 2  ;;  %v1134_v19 = vld [vmem:[%s1390_s2] ss:$0 sm:$0xff]  ;;  %s909_s10 = sshll.u32 %s1395_s3, 3 }
   0xf   : > { %1020 = vmatpush.bf16.msra.mxu3 %v1017_v1  ;;  %1018 = vmatpush.bf16.msra.mxu1 %v1017_v1  ;;  %s1097_s29 = scalar_lea.vmem %s1388_s0, %s905_s26  ;;  %s1141_s9 = scalar_lea.vmem %s1392_s4, %s905_s26 }
  0x10   : > { %v1000_v3 = vld [vmem:[%s1097_s29] sm:$0xff]  ;;  %v1001_v7 = vld [vmem:[%s1097_s29 + $0x8] sm:$0xff]  ;;  %v1002_v11 = vld [vmem:[%s1097_s29 + $0x10] sm:$0xff]  ;;  %s1287_s13 = scalar_lea.vmem %s1393_s5, %s909_s10 }
  0x11   : > { %v1008_v4 = vld [vmem:[%s1097_s29 + $0x40] sm:$0xff]  ;;  %v1009_v8 = vld [vmem:[%s1097_s29 + $0x48] sm:$0xff]  ;;  %v1010_v12 = vld [vmem:[%s1097_s29 + $0x50] sm:$0xff] }
  0x12   : > { %429 = vmatpush.bf16.msra.mxu0 %v1016_v2  ;;  %1022 = vmatpush.bf16.msra.mxu2 %v1016_v2  ;;  %v1012_v5 = vld [vmem:[%s1097_s29 + $0x60] sm:$0xff]  ;;  %v1013_v9 = vld [vmem:[%s1097_s29 + $0x68] sm:$0xff]  ;;  %v1014_v13 = vld [vmem:[%s1097_s29 + $0x70] sm:$0xff] }
  0x13   : > { %1023 = vmatpush.bf16.msra.mxu3 %v1016_v2  ;;  %1021 = vmatpush.bf16.msra.mxu1 %v1016_v2  ;;  %v1004_v6 = vld [vmem:[%s1097_s29 + $0x20] sm:$0xff]  ;;  %v1005_v10 = vld [vmem:[%s1097_s29 + $0x28] sm:$0xff]  ;;  %v1006_v14 = vld [vmem:[%s1097_s29 + $0x30] sm:$0xff] }
  0x14   : > { %v1011_v15 = vld [vmem:[%s1097_s29 + $0x58] sm:$0xff] }
  0x15   : > { %982 = vmatmul.msk.bf16.vlgmr.msra.gmra.mxu0 %vm373_vm0, %v1000_v3  ;;  %990 = vmatmul.msk.bf16.vlgmr.msra.gmra.mxu2 %vm373_vm0, %v1008_v4  ;;  %v1003_v16 = vld [vmem:[%s1097_s29 + $0x18] sm:$0xff] }
  0x16   : > { %994 = vmatmul.msk.bf16.vlgmr.msra.gmra.mxu3 %vm373_vm0, %v1012_v5  ;;  %986 = vmatmul.msk.bf16.vlgmr.msra.gmra.mxu1 %vm373_vm0, %v1004_v6  ;;  %v1007_v17 = vld [vmem:[%s1097_s29 + $0x38] sm:$0xff] }
  0x17   : > { %v1015_v18 = vld [vmem:[%s1097_s29 + $0x78] sm:$0xff] }
  0x25   : > { %983 = vmatmul.msk.bf16.gmra.mxu0 %vm373_vm0, %v1001_v7  ;;  %991 = vmatmul.msk.bf16.gmra.mxu2 %vm373_vm0, %v1009_v8 }
  0x26   : > { %995 = vmatmul.msk.bf16.gmra.mxu3 %vm373_vm0, %v1013_v9  ;;  %987 = vmatmul.msk.bf16.gmra.mxu1 %vm373_vm0, %v1005_v10 }
  0x35   : > { %984 = vmatmul.msk.bf16.gmra.mxu0 %vm373_vm0, %v1002_v11  ;;  %992 = vmatmul.msk.bf16.gmra.mxu2 %vm373_vm0, %v1010_v12 }
  0x36   : > { %996 = vmatmul.msk.bf16.gmra.mxu3 %vm373_vm0, %v1014_v13  ;;  %988 = vmatmul.msk.bf16.gmra.mxu1 %vm373_vm0, %v1006_v14 }
  0x45   : > { %993 = vmatmul.msk.bf16.gmra.mxu2 %vm373_vm0, %v1011_v15  ;;  %985 = vmatmul.msk.bf16.gmra.mxu0 %vm373_vm0, %v1003_v16 }
  0x46   : > { %989 = vmatmul.msk.bf16.gmra.mxu1 %vm373_vm0, %v1007_v17  ;;  %997 = vmatmul.msk.bf16.gmra.mxu3 %vm373_vm0, %v1015_v18 }
  0x92   : > { %v431_v20 = vpop.f32.mrf.mxu0 }
  0x93   : > { %v511_v21 = vmax.f32 %v431_v20, 0.0  ;;  %v451_v22 = vpop.f32.mrf.mxu1 }
  0x94   : > { %v519_v23 = vmax.f32 %v451_v22, 0.0 }
  0x95   : > { %v711_v24 = vpack.c.bf16 %v511_v21, %v511_v21  ;;  %v547_v25 = vmul.f32 %v1134_v19, %v511_v21 }
  0x96   : > { %v719_v26 = vpack.c.bf16 %v519_v23, %v519_v23  ;;  %v555_v27 = vmul.f32 %v1134_v19, %v519_v23 }
  0x97   : > { %744 = vst.msk [vmem:[%s1141_s9] sm:$0xf] %vm743_vm1, %v711_v24  ;;  %v579_v28 = vsel %vm373_vm0, %v547_v25, 0.0 }
  0x98   : > { %752 = vst.msk [vmem:[%s1141_s9 + $0x20] sm:$0xf] %vm743_vm1, %v719_v26  ;;  %v471_v29 = vpop.f32.mrf.mxu2  ;;  %580 = vadd.xlane.f32.xlu0 %v579_v28  ;;  %v603_v30 = vsel %vm373_vm0, %v555_v27, 0.0 }
  0x99   : > { %v527_v31 = vmax.f32 %v471_v29, 0.0  ;;  %v491_v32 = vpop.f32.mrf.mxu3  ;;  %604 = vadd.xlane.f32.xlu2 %v603_v30 }
  0x9a   : > { %v535_v33 = vmax.f32 %v491_v32, 0.0  ;;  %v433_v34 = vpop.f32.mrf.mxu0 }
  0x9b   : > { %v727_v35 = vpack.c.bf16 %v527_v31, %v527_v31  ;;  %v512_v36 = vmax.f32 %v433_v34, 0.0  ;;  %v563_v37 = vmul.f32 %v1134_v19, %v527_v31  ;;  %v453_v38 = vpop.f32.mrf.mxu1 }
  0x9c   : > { %v735_v39 = vpack.c.bf16 %v535_v33, %v535_v33  ;;  %v520_v40 = vmax.f32 %v453_v38, 0.0  ;;  %v571_v41 = vmul.f32 %v1134_v19, %v535_v33 }
  0x9d   : > { %760 = vst.msk [vmem:[%s1141_s9 + $0x40] sm:$0xf] %vm743_vm1, %v727_v35  ;;  %v712_v42 = vpack.c.bf16 %v512_v36, %v512_v36  ;;  %v627_v43 = vsel %vm373_vm0, %v563_v37, 0.0  ;;  %v548_v55 = vmul.f32 %v1134_v19, %v512_v36 }
  0x9e   : > { %768 = vst.msk [vmem:[%s1141_s9 + $0x60] sm:$0xf] %vm743_vm1, %v735_v39  ;;  %628 = vadd.xlane.f32.xlu1 %v627_v43  ;;  %v720_v44 = vpack.c.bf16 %v520_v40, %v520_v40  ;;  %v651_v45 = vsel %vm373_vm0, %v571_v41, 0.0  ;;  %v556_v9 = vmul.f32 %v1134_v19, %v520_v40 }
  0x9f   : > { %745 = vst.msk [vmem:[%s1141_s9 + $0x4] sm:$0xf] %vm743_vm1, %v712_v42  ;;  %v582_v63 = vsel %vm373_vm0, %v548_v55, 0.0 }
  0xa0   : > { %753 = vst.msk [vmem:[%s1141_s9 + $0x24] sm:$0xf] %vm743_vm1, %v720_v44  ;;  %v473_v46 = vpop.f32.mrf.mxu2  ;;  %652 = vadd.xlane.f32.xlu0 %v651_v45  ;;  %v606_v17 = vsel %vm373_vm0, %v556_v9, 0.0 }
  0xa1   : > { %v528_v47 = vmax.f32 %v473_v46, 0.0  ;;  %v493_v48 = vpop.f32.mrf.mxu3 }
  0xa2   : > { %v536_v49 = vmax.f32 %v493_v48, 0.0  ;;  %v436_v50 = vpop.f32.mrf.mxu0 }
  0xa3   : > { %v728_v51 = vpack.c.bf16 %v528_v47, %v528_v47  ;;  %v513_v52 = vmax.f32 %v436_v50, 0.0  ;;  %v564_v53 = vmul.f32 %v1134_v19, %v528_v47  ;;  %v456_v54 = vpop.f32.mrf.mxu1 }
  0xa4   : > { %v736_v56 = vpack.c.bf16 %v536_v49, %v536_v49  ;;  %v572_v57 = vmul.f32 %v1134_v19, %v536_v49  ;;  %v521_v58 = vmax.f32 %v456_v54, 0.0 }
  0xa5   : > { %761 = vst.msk [vmem:[%s1141_s9 + $0x44] sm:$0xf] %vm743_vm1, %v728_v51  ;;  %v713_v59 = vpack.c.bf16 %v513_v52, %v513_v52  ;;  %v630_v60 = vsel %vm373_vm0, %v564_v53, 0.0  ;;  %v549_v0 = vmul.f32 %v1134_v19, %v513_v52 }
  0xa6   : > { %769 = vst.msk [vmem:[%s1141_s9 + $0x64] sm:$0xf] %vm743_vm1, %v736_v56  ;;  %v654_v61 = vsel %vm373_vm0, %v572_v57, 0.0  ;;  %631 = vadd.xlane.f32.xlu2 %v630_v60  ;;  %v721_v62 = vpack.c.bf16 %v521_v58, %v521_v58  ;;  %v557_v20 = vmul.f32 %v1134_v19, %v521_v58 }
  0xa7   : > { %746 = vst.msk [vmem:[%s1141_s9 + $0x8] sm:$0xf] %vm743_vm1, %v713_v59  ;;  %655 = vadd.xlane.f32.xlu1 %v654_v61  ;;  %v585_v12 = vsel %vm373_vm0, %v549_v0, 0.0 }
  0xa8   : > { %754 = vst.msk [vmem:[%s1141_s9 + $0x28] sm:$0xf] %vm743_vm1, %v721_v62  ;;  %583 = vadd.xlane.f32.xlu0 %v582_v63  ;;  %v476_v1 = vpop.f32.mrf.mxu2  ;;  %v609_v32 = vsel %vm373_vm0, %v557_v20, 0.0 }
  0xa9   : > { %v496_v2 = vpop.f32.mrf.mxu3  ;;  %v529_v3 = vmax.f32 %v476_v1, 0.0 }
  0xaa   : > { %v537_v4 = vmax.f32 %v496_v2, 0.0  ;;  %v438_v5 = vpop.f32.mrf.mxu0 }
  0xab   : > { %v514_v6 = vmax.f32 %v438_v5, 0.0  ;;  %v458_v7 = vpop.f32.mrf.mxu1  ;;  %v729_v8 = vpack.c.bf16 %v529_v3, %v529_v3  ;;  %v565_v24 = vmul.f32 %v1134_v19, %v529_v3 }
  0xac   : > { %v737_v10 = vpack.c.bf16 %v537_v4, %v537_v4  ;;  %v573_v11 = vmul.f32 %v1134_v19, %v537_v4  ;;  %v522_v13 = vmax.f32 %v458_v7, 0.0 }
  0xad   : > { %v714_v14 = vpack.c.bf16 %v514_v6, %v514_v6  ;;  %762 = vst.msk [vmem:[%s1141_s9 + $0x48] sm:$0xf] %vm743_vm1, %v729_v8  ;;  %v633_v34 = vsel %vm373_vm0, %v565_v24, 0.0  ;;  %v550_v41 = vmul.f32 %v1134_v19, %v514_v6 }
  0xae   : > { %770 = vst.msk [vmem:[%s1141_s9 + $0x68] sm:$0xf] %vm743_vm1, %v737_v10  ;;  %v657_v15 = vsel %vm373_vm0, %v573_v11, 0.0  ;;  %v722_v16 = vpack.c.bf16 %v522_v13, %v522_v13  ;;  %v558_v18 = vmul.f32 %v1134_v19, %v522_v13 }
  0xaf   : > { %747 = vst.msk [vmem:[%s1141_s9 + $0xc] sm:$0xf] %vm743_vm1, %v714_v14  ;;  %658 = vadd.xlane.f32.xlu2 %v657_v15  ;;  %586 = vadd.xlane.f32.xlu1 %v585_v12  ;;  %v588_v52 = vsel %vm373_vm0, %v550_v41, 0.0 }
  0xb0   : > { %755 = vst.msk [vmem:[%s1141_s9 + $0x2c] sm:$0xf] %vm743_vm1, %v722_v16  ;;  %607 = vadd.xlane.f32.xlu0 %v606_v17  ;;  %v478_v21 = vpop.f32.mrf.mxu2  ;;  %v612_v31 = vsel %vm373_vm0, %v558_v18, 0.0 }
  0xb1   : > { %v498_v22 = vpop.f32.mrf.mxu3  ;;  %v530_v23 = vmax.f32 %v478_v21, 0.0 }
  0xb2   : > { %v538_v25 = vmax.f32 %v498_v22, 0.0  ;;  %v441_v26 = vpop.f32.mrf.mxu0 }
  0xb3   : > { %v730_v27 = vpack.c.bf16 %v530_v23, %v530_v23  ;;  %v515_v28 = vmax.f32 %v441_v26, 0.0  ;;  %v461_v29 = vpop.f32.mrf.mxu1  ;;  %v566_v60 = vmul.f32 %v1134_v19, %v530_v23 }
  0xb4   : > { %v738_v30 = vpack.c.bf16 %v538_v25, %v538_v25  ;;  %v523_v33 = vmax.f32 %v461_v29, 0.0  ;;  %v574_v45 = vmul.f32 %v1134_v19, %v538_v25 }
  0xb5   : > { %763 = vst.msk [vmem:[%s1141_s9 + $0x4c] sm:$0xf] %vm743_vm1, %v730_v27  ;;  %v715_v35 = vpack.c.bf16 %v515_v28, %v515_v28  ;;  %v551_v37 = vmul.f32 %v1134_v19, %v515_v28  ;;  %v636_v7 = vsel %vm373_vm0, %v566_v60, 0.0 }
  0xb6   : > { %771 = vst.msk [vmem:[%s1141_s9 + $0x6c] sm:$0xf] %vm743_vm1, %v738_v30  ;;  %v723_v36 = vpack.c.bf16 %v523_v33, %v523_v33  ;;  %v660_v54 = vsel %vm373_vm0, %v574_v45, 0.0  ;;  %v559_v59 = vmul.f32 %v1134_v19, %v523_v33 }
  0xb7   : > { %613 = vadd.xlane.f32.xlu2 %v612_v31  ;;  %610 = vadd.xlane.f32.xlu1 %v609_v32  ;;  %748 = vst.msk [vmem:[%s1141_s9 + $0x10] sm:$0xf] %vm743_vm1, %v715_v35  ;;  %v591_v48 = vsel %vm373_vm0, %v551_v37, 0.0 }
  0xb8   : > { %634 = vadd.xlane.f32.xlu0 %v633_v34  ;;  %756 = vst.msk [vmem:[%s1141_s9 + $0x30] sm:$0xf] %vm743_vm1, %v723_v36  ;;  %v481_v38 = vpop.f32.mrf.mxu2  ;;  %v615_v5 = vsel %vm373_vm0, %v559_v59, 0.0 }
  0xb9   : > { %v531_v39 = vmax.f32 %v481_v38, 0.0  ;;  %v501_v40 = vpop.f32.mrf.mxu3 }
  0xba   : > { %v539_v42 = vmax.f32 %v501_v40, 0.0  ;;  %v443_v43 = vpop.f32.mrf.mxu0 }
  0xbb   : > { %v731_v44 = vpack.c.bf16 %v531_v39, %v531_v39  ;;  %v516_v46 = vmax.f32 %v443_v43, 0.0  ;;  %v463_v47 = vpop.f32.mrf.mxu1  ;;  %v567_v55 = vmul.f32 %v1134_v19, %v531_v39 }
  0xbc   : > { %v739_v49 = vpack.c.bf16 %v539_v42, %v539_v42  ;;  %v1209_v50 = vmax.f32 %v463_v47, 0.0  ;;  %v575_v9 = vmul.f32 %v1134_v19, %v539_v42 }
  0xbd   : > { %764 = vst.msk [vmem:[%s1141_s9 + $0x50] sm:$0xf] %vm743_vm1, %v731_v44  ;;  %v716_v51 = vpack.c.bf16 %v516_v46, %v516_v46  ;;  %v639_v2 = vsel %vm373_vm0, %v567_v55, 0.0  ;;  %v552_v13 = vmul.f32 %v1134_v19, %v516_v46 }
  0xbe   : > { %772 = vst.msk [vmem:[%s1141_s9 + $0x70] sm:$0xf] %vm743_vm1, %v739_v49  ;;  %v724_v53 = vpack.c.bf16 %v1209_v50, %v1209_v50  ;;  %v663_v21 = vsel %vm373_vm0, %v575_v9, 0.0  ;;  %v560_v33 = vmul.f32 %v1134_v19, %v1209_v50 }
  0xbf   : > { %589 = vadd.xlane.f32.xlu1 %v588_v52  ;;  %592 = vadd.xlane.f32.xlu2 %v591_v48  ;;  %749 = vst.msk [vmem:[%s1141_s9 + $0x14] sm:$0xf] %vm743_vm1, %v716_v51  ;;  %v594_v25 = vsel %vm373_vm0, %v552_v13, 0.0 }
  0xc0   : > { %661 = vadd.xlane.f32.xlu0 %v660_v54  ;;  %757 = vst.msk [vmem:[%s1141_s9 + $0x34] sm:$0xf] %vm743_vm1, %v724_v53  ;;  %v483_v56 = vpop.f32.mrf.mxu2  ;;  %v618_v39 = vsel %vm373_vm0, %v560_v33, 0.0  ;;  %v1282_v54 = vld [vmem:[#allocation2] ss:$0 sm:$0xff] }
  0xc1   : > { %v532_v57 = vmax.f32 %v483_v56, 0.0  ;;  %v503_v58 = vpop.f32.mrf.mxu3 }
  0xc2   : > { %v1226_v61 = vmax.f32 %v503_v58, 0.0  ;;  %v446_v62 = vpop.f32.mrf.mxu0 }
  0xc3   : > { %v732_v63 = vpack.c.bf16 %v532_v57, %v532_v57  ;;  %v466_v0 = vpop.f32.mrf.mxu1  ;;  %v517_v1 = vmax.f32 %v446_v62, 0.0  ;;  %v568_v17 = vmul.f32 %v1134_v19, %v532_v57 }
  0xc4   : > { %v740_v3 = vpack.c.bf16 %v1226_v61, %v1226_v61  ;;  %v525_v4 = vmax.f32 %v466_v0, 0.0  ;;  %v576_v47 = vmul.f32 %v1134_v19, %v1226_v61 }
  0xc5   : > { %765 = vst.msk [vmem:[%s1141_s9 + $0x54] sm:$0xf] %vm743_vm1, %v732_v63  ;;  %v717_v6 = vpack.c.bf16 %v517_v1, %v517_v1  ;;  %v642_v27 = vsel %vm373_vm0, %v568_v17, 0.0  ;;  %v553_v31 = vmul.f32 %v1134_v19, %v517_v1 }
  0xc6   : > { %773 = vst.msk [vmem:[%s1141_s9 + $0x74] sm:$0xf] %vm743_vm1, %v740_v3  ;;  %v725_v8 = vpack.c.bf16 %v525_v4, %v525_v4  ;;  %v561_v28 = vmul.f32 %v1134_v19, %v525_v4  ;;  %v666_v49 = vsel %vm373_vm0, %v576_v47, 0.0 }
  0xc7   : > { %637 = vadd.xlane.f32.xlu1 %v636_v7  ;;  %640 = vadd.xlane.f32.xlu2 %v639_v2  ;;  %750 = vst.msk [vmem:[%s1141_s9 + $0x18] sm:$0xf] %vm743_vm1, %v717_v6  ;;  %v597_v38 = vsel %vm373_vm0, %v553_v31, 0.0 }
  0xc8   : > { %616 = vadd.xlane.f32.xlu0 %v615_v5  ;;  %758 = vst.msk [vmem:[%s1141_s9 + $0x38] sm:$0xf] %vm743_vm1, %v725_v8  ;;  %v486_v10 = vpop.f32.mrf.mxu2  ;;  %v621_v36 = vsel %vm373_vm0, %v561_v28, 0.0 }
  0xc9   : > { %v533_v11 = vmax.f32 %v486_v10, 0.0  ;;  %v506_v12 = vpop.f32.mrf.mxu3 }
  0xca   : > { %v541_v14 = vmax.f32 %v506_v12, 0.0  ;;  %v448_v15 = vpop.f32.mrf.mxu0 }
  0xcb   : > { %v733_v16 = vpack.c.bf16 %v533_v11, %v533_v11  ;;  %v468_v18 = vpop.f32.mrf.mxu1  ;;  %v518_v20 = vmax.f32 %v448_v15, 0.0  ;;  %v569_v41 = vmul.f32 %v1134_v19, %v533_v11 }
  0xcc   : > { %v526_v22 = vmax.f32 %v468_v18, 0.0  ;;  %v741_v23 = vpack.c.bf16 %v541_v14, %v541_v14  ;;  %v577_v48 = vmul.f32 %v1134_v19, %v541_v14 }
  0xcd   : > { %766 = vst.msk [vmem:[%s1141_s9 + $0x58] sm:$0xf] %vm743_vm1, %v733_v16  ;;  %v718_v24 = vpack.c.bf16 %v518_v20, %v518_v20  ;;  %v645_v43 = vsel %vm373_vm0, %v569_v41, 0.0  ;;  %v554_v46 = vmul.f32 %v1134_v19, %v518_v20 }
  0xce   : > { %v726_v26 = vpack.c.bf16 %v526_v22, %v526_v22  ;;  %774 = vst.msk [vmem:[%s1141_s9 + $0x78] sm:$0xf] %vm743_vm1, %v741_v23  ;;  %v562_v42 = vmul.f32 %v1134_v19, %v526_v22  ;;  %v669_v51 = vsel %vm373_vm0, %v577_v48, 0.0 }
  0xcf   : > { %664 = vadd.xlane.f32.xlu1 %v663_v21  ;;  %595 = vadd.xlane.f32.xlu2 %v594_v25  ;;  %751 = vst.msk [vmem:[%s1141_s9 + $0x1c] sm:$0xf] %vm743_vm1, %v718_v24  ;;  %v600_v50 = vsel %vm373_vm0, %v554_v46, 0.0 }
  0xd0   : > { %643 = vadd.xlane.f32.xlu0 %v642_v27  ;;  %759 = vst.msk [vmem:[%s1141_s9 + $0x3c] sm:$0xf] %vm743_vm1, %v726_v26  ;;  %v488_v29 = vpop.f32.mrf.mxu2  ;;  %v624_v45 = vsel %vm373_vm0, %v562_v42, 0.0 }
  0xd1   : > { %v534_v30 = vmax.f32 %v488_v29, 0.0  ;;  %v508_v32 = vpop.f32.mrf.mxu3 }
  0xd2   : > { %v542_v34 = vmax.f32 %v508_v32, 0.0 }
  0xd3   : > { %v734_v35 = vpack.c.bf16 %v534_v30, %v534_v30  ;;  %v570_v40 = vmul.f32 %v1134_v19, %v534_v30 }
  0xd4   : > { %v742_v37 = vpack.c.bf16 %v542_v34, %v542_v34  ;;  %v578_v52 = vmul.f32 %v1134_v19, %v542_v34 }
  0xd5   : > { %767 = vst.msk [vmem:[%s1141_s9 + $0x5c] sm:$0xf] %vm743_vm1, %v734_v35  ;;  %v648_v44 = vsel %vm373_vm0, %v570_v40, 0.0 }
  0xd6   : > { %775 = vst.msk [vmem:[%s1141_s9 + $0x7c] sm:$0xf] %vm743_vm1, %v742_v37  ;;  %v672_v53 = vsel %vm373_vm0, %v578_v52, 0.0 }
  0xd7   : > { %619 = vadd.xlane.f32.xlu1 %v618_v39  ;;  %622 = vadd.xlane.f32.xlu2 %v621_v36 }
  0xd8   : > { %598 = vadd.xlane.f32.xlu0 %v597_v38 }
  0xdf   : > { %646 = vadd.xlane.f32.xlu1 %v645_v43  ;;  %649 = vadd.xlane.f32.xlu2 %v648_v44 }
  0xe0   : > { %625 = vadd.xlane.f32.xlu0 %v624_v45 }
  0xe7   : > { %667 = vadd.xlane.f32.xlu2 %v666_v49  ;;  %601 = vadd.xlane.f32.xlu1 %v600_v50 }
  0xe8   : > { %670 = vadd.xlane.f32.xlu0 %v669_v51 }
  0xef   : > { %673 = vadd.xlane.f32.xlu1 %v672_v53 }
 0x10b   : > { %v581_v55 = vpop.xlane.xlu0 %580 }
 0x10c   : > { %v679_v56 = vadd.f32 %v1282_v54, %v581_v55  ;;  %v605_v19 = vpop.xlane.xlu2 %604 }
 0x10d   : > { %v687_v57 = vadd.f32 %v1282_v54, %v605_v19 }
 0x10e   : > { %777 = vst.msk [vmem:[%s1287_s13] sm:$0xff] %vm776_vm2, %v679_v56 }
 0x10f   : > { %785 = vst.msk [vmem:[%s1287_s13 + $0x40] sm:$0xff] %vm776_vm2, %v687_v57 }
 0x111   : > { %v629_v58 = vpop.xlane.xlu1 %628 }
 0x112   : > { %v695_v59 = vadd.f32 %v1282_v54, %v629_v58 }
 0x113   : > { %v653_v60 = vpop.xlane.xlu0 %652 }
 0x114   : > { %793 = vst.msk [vmem:[%s1287_s13 + $0x80] sm:$0xff] %vm776_vm2, %v695_v59  ;;  %v703_v61 = vadd.f32 %v1282_v54, %v653_v60 }
 0x116   : > { %801 = vst.msk [vmem:[%s1287_s13 + $0xc0] sm:$0xff] %vm776_vm2, %v703_v61 }
 0x119   : > { %v632_v62 = vpop.xlane.xlu2 %631 }
 0x11a   : > { %v656_v63 = vpop.xlane.xlu1 %655  ;;  %v696_v0 = vadd.f32 %v1282_v54, %v632_v62 }
 0x11b   : > { %v704_v1 = vadd.f32 %v1282_v54, %v656_v63  ;;  %v584_v2 = vpop.xlane.xlu0 %583 }
 0x11c   : > { %794 = vst.msk [vmem:[%s1287_s13 + $0x88] sm:$0xff] %vm776_vm2, %v696_v0  ;;  %v680_v3 = vadd.f32 %v1282_v54, %v584_v2 }
 0x11d   : > { %802 = vst.msk [vmem:[%s1287_s13 + $0xc8] sm:$0xff] %vm776_vm2, %v704_v1 }
 0x11e   : > { %778 = vst.msk [vmem:[%s1287_s13 + $0x8] sm:$0xff] %vm776_vm2, %v680_v3 }
 0x122   : > { %v659_v4 = vpop.xlane.xlu2 %658  ;;  %v587_v5 = vpop.xlane.xlu1 %586 }
 0x123   : > { %v705_v6 = vadd.f32 %v1282_v54, %v659_v4  ;;  %v681_v7 = vadd.f32 %v1282_v54, %v587_v5  ;;  %v608_v8 = vpop.xlane.xlu0 %607 }
 0x124   : > { %v688_v9 = vadd.f32 %v1282_v54, %v608_v8 }
 0x125   : > { %803 = vst.msk [vmem:[%s1287_s13 + $0xd0] sm:$0xff] %vm776_vm2, %v705_v6 }
 0x126   : > { %779 = vst.msk [vmem:[%s1287_s13 + $0x10] sm:$0xff] %vm776_vm2, %v681_v7 }
 0x127   : > { %786 = vst.msk [vmem:[%s1287_s13 + $0x48] sm:$0xff] %vm776_vm2, %v688_v9 }
 0x12a   : > { %v614_v10 = vpop.xlane.xlu2 %613  ;;  %v611_v11 = vpop.xlane.xlu1 %610 }
 0x12b   : > { %v690_v12 = vadd.f32 %v1282_v54, %v614_v10  ;;  %v689_v13 = vadd.f32 %v1282_v54, %v611_v11  ;;  %v635_v14 = vpop.xlane.xlu0 %634 }
 0x12c   : > { %v697_v15 = vadd.f32 %v1282_v54, %v635_v14 }
 0x12d   : > { %788 = vst.msk [vmem:[%s1287_s13 + $0x58] sm:$0xff] %vm776_vm2, %v690_v12 }
 0x12e   : > { %787 = vst.msk [vmem:[%s1287_s13 + $0x50] sm:$0xff] %vm776_vm2, %v689_v13 }
 0x12f   : > { %795 = vst.msk [vmem:[%s1287_s13 + $0x90] sm:$0xff] %vm776_vm2, %v697_v15 }
 0x132   : > { %v590_v16 = vpop.xlane.xlu1 %589  ;;  %v593_v17 = vpop.xlane.xlu2 %592 }
 0x133   : > { %v682_v18 = vadd.f32 %v1282_v54, %v590_v16  ;;  %v683_v20 = vadd.f32 %v1282_v54, %v593_v17  ;;  %v662_v21 = vpop.xlane.xlu0 %661 }
 0x134   : > { %v706_v22 = vadd.f32 %v1282_v54, %v662_v21 }
 0x135   : > { %780 = vst.msk [vmem:[%s1287_s13 + $0x18] sm:$0xff] %vm776_vm2, %v682_v18 }
 0x136   : > { %781 = vst.msk [vmem:[%s1287_s13 + $0x20] sm:$0xff] %vm776_vm2, %v683_v20 }
 0x137   : > { %804 = vst.msk [vmem:[%s1287_s13 + $0xd8] sm:$0xff] %vm776_vm2, %v706_v22 }
 0x13a   : > { %v638_v23 = vpop.xlane.xlu1 %637  ;;  %v641_v24 = vpop.xlane.xlu2 %640 }
 0x13b   : > { %v698_v25 = vadd.f32 %v1282_v54, %v638_v23  ;;  %v699_v26 = vadd.f32 %v1282_v54, %v641_v24  ;;  %v617_v27 = vpop.xlane.xlu0 %616 }
 0x13c   : > { %v691_v28 = vadd.f32 %v1282_v54, %v617_v27 }
 0x13d   : > { %796 = vst.msk [vmem:[%s1287_s13 + $0x98] sm:$0xff] %vm776_vm2, %v698_v25 }
 0x13e   : > { %797 = vst.msk [vmem:[%s1287_s13 + $0xa0] sm:$0xff] %vm776_vm2, %v699_v26 }
 0x13f   : > { %789 = vst.msk [vmem:[%s1287_s13 + $0x60] sm:$0xff] %vm776_vm2, %v691_v28 }
 0x142   : > { %v665_v29 = vpop.xlane.xlu1 %664  ;;  %v596_v30 = vpop.xlane.xlu2 %595 }
 0x143   : > { %v707_v31 = vadd.f32 %v1282_v54, %v665_v29  ;;  %v684_v32 = vadd.f32 %v1282_v54, %v596_v30  ;;  %v644_v33 = vpop.xlane.xlu0 %643 }
 0x144   : > { %v700_v34 = vadd.f32 %v1282_v54, %v644_v33 }
 0x145   : > { %805 = vst.msk [vmem:[%s1287_s13 + $0xe0] sm:$0xff] %vm776_vm2, %v707_v31 }
 0x146   : > { %782 = vst.msk [vmem:[%s1287_s13 + $0x28] sm:$0xff] %vm776_vm2, %v684_v32 }
 0x147   : > { %798 = vst.msk [vmem:[%s1287_s13 + $0xa8] sm:$0xff] %vm776_vm2, %v700_v34 }
 0x14a   : > { %v620_v35 = vpop.xlane.xlu1 %619  ;;  %v623_v36 = vpop.xlane.xlu2 %622 }
 0x14b   : > { %v692_v37 = vadd.f32 %v1282_v54, %v620_v35  ;;  %v693_v38 = vadd.f32 %v1282_v54, %v623_v36  ;;  %v599_v39 = vpop.xlane.xlu0 %598 }
 0x14c   : > { %v685_v40 = vadd.f32 %v1282_v54, %v599_v39 }
 0x14d   : > { %790 = vst.msk [vmem:[%s1287_s13 + $0x68] sm:$0xff] %vm776_vm2, %v692_v37 }
 0x14e   : > { %791 = vst.msk [vmem:[%s1287_s13 + $0x70] sm:$0xff] %vm776_vm2, %v693_v38 }
 0x14f   : > { %783 = vst.msk [vmem:[%s1287_s13 + $0x30] sm:$0xff] %vm776_vm2, %v685_v40 }
 0x152   : > { %v647_v41 = vpop.xlane.xlu1 %646  ;;  %v650_v42 = vpop.xlane.xlu2 %649 }
 0x153   : > { %v701_v43 = vadd.f32 %v1282_v54, %v647_v41  ;;  %v702_v44 = vadd.f32 %v1282_v54, %v650_v42  ;;  %v626_v45 = vpop.xlane.xlu0 %625 }
 0x154   : > { %v694_v46 = vadd.f32 %v1282_v54, %v626_v45 }
 0x155   : > { %799 = vst.msk [vmem:[%s1287_s13 + $0xb0] sm:$0xff] %vm776_vm2, %v701_v43 }
 0x156   : > { %800 = vst.msk [vmem:[%s1287_s13 + $0xb8] sm:$0xff] %vm776_vm2, %v702_v44 }
 0x157   : > { %792 = vst.msk [vmem:[%s1287_s13 + $0x78] sm:$0xff] %vm776_vm2, %v694_v46 }
 0x15a   : > { %v668_v47 = vpop.xlane.xlu2 %667  ;;  %v602_v48 = vpop.xlane.xlu1 %601 }
 0x15b   : > { %v708_v49 = vadd.f32 %v1282_v54, %v668_v47  ;;  %v686_v50 = vadd.f32 %v1282_v54, %v602_v48  ;;  %v671_v51 = vpop.xlane.xlu0 %670 }
 0x15c   : > { %v709_v52 = vadd.f32 %v1282_v54, %v671_v51 }
 0x15d   : > { %806 = vst.msk [vmem:[%s1287_s13 + $0xe8] sm:$0xff] %vm776_vm2, %v708_v49 }
 0x15e   : > { %784 = vst.msk [vmem:[%s1287_s13 + $0x38] sm:$0xff] %vm776_vm2, %v686_v50 }
 0x15f   : > { %807 = vst.msk [vmem:[%s1287_s13 + $0xf0] sm:$0xff] %vm776_vm2, %v709_v52 }
 0x162   : > { %v674_v53 = vpop.xlane.xlu1 %673 }
 0x163   : > { %v710_v55 = vadd.f32 %v1282_v54, %v674_v53 }
 0x165   : > { %808 = vst.msk [vmem:[%s1287_s13 + $0xf8] sm:$0xff] %vm776_vm2, %v710_v55 }
 0x166 PF: > { %s18_s20 = sadd.s32 1, %s1040_s20  }
 0x167   : > { %p15_p4 = scmp.ge.s32.totalorder %s18_s20, 10  }
 0x169   :  { %17 = sbr.rel (!%p15_p4) target bundleno = 3 (0x3), region = 78 }

// kernel: edgepoint_forward.20
= control target key start
LH: loop header
LB: loop body
LE: loop exit
PB: predicated region body
PF: predicated region fallthrough
CT: control target
= control target key end

     0   :  { %s2344_s18 = smov 0   ;;  %s2346_s19 = smov 0   ;;  %s3334_s0 = inlined_call_operand.vmem [shape: bf16[2,34,34,32], index: 0, kind: input, shape index: {}, may-alias: {0,1,2}]   ;;  %s3335_s1 = inlined_call_operand.vmem [shape: bf16[2,34,34,32], index: 1, kind: input, shape index: {}, may-alias: {0,1,2}]   ;;  %s3336_s2 = inlined_call_operand.vmem [shape: bf16[2,34,34,32], index: 2, kind: input, shape index: {}, may-alias: {0,1,2}]   ;;  %s3337_s3 = inlined_call_operand.vmem [shape: bf16[288,32], index: 3, kind: input, shape index: {}]   ;;  %s3338_s4 = inlined_call_operand.vmem [shape: f32[1,32], index: 4, kind: input, shape index: {}]   ;;  %s3339_s5 = inlined_call_operand.vmem [shape: bf16[2,32,32,32], index: 5, kind: output, shape index: {}]  }
   0x1   :  { %s2348_s20 = smov 0   ;;  %s2350_s21 = smov 0  }
   0x2   :  { %s2352_s22 = smov 0  }
   0x3 LB: > { %s24_s23 = sadd.s32 1, %s2301_s20  ;;  %s27_s24 = sadd.s32 1, %s2305_s21  ;;  %s2309_s22 = sphi %s2352_s22, %s15_s22   ;;  %s2305_s21 = sphi %s2350_s21, %s3343_s21   ;;  %s2301_s20 = sphi %s2348_s20, %s3342_s20   ;;  %s2297_s19 = sphi %s2346_s19, %s3341_s19   ;;  %s2293_s18 = sphi %s2344_s18, %s3340_s18  }
   0x4   : > { %p25_p0 = scmp.ge.s32.totalorder %s24_s23, 4  ;;  %p1974_p1 = scmp.ge.s32.totalorder %s2309_s22, 1 }
   0x5   : > { %p271_p2 = scmp.lt.s32.totalorder %s2309_s22, 9 }
   0x6   : > { %s3345_s23 = smov (%p25_p0, %s24_s23), 0  ;;  %s3347_s24 = smov (!%p25_p0, %s27_s24), %s2305_s21 }
   0x7   : > { %p272_p3 = pnand %p1974_p1, %p271_p2  ;;  %p29_p4 = scmp.ge.s32.totalorder %s3347_s24, 2 }
   0x8   : > { %s2374_s25 = sshll.u32 (!%p272_p3), %s2293_s18, 3  ;;  %p343_p5 = scmp.lt.s32.totalorder (!%p272_p3), %s2297_s19, 1 }
   0x9   : > { %s3349_s24 = smov (%p29_p4, %s3347_s24), 0  ;;  %275 = sbr.rel (%p272_p3) target bundleno = 535 (0x217), region = 40 }
   0xa   : > { %p345_p6 = scmp.lt.s32.totalorder (!%p272_p3), %s2374_s25, 33  ;;  %s2311_s9 = smov (!%p272_p3), 96  }
   0xb   : > { %s2312_s10 = smov (!%p272_p3), 64   ;;  %s2313_s11 = smov (!%p272_p3), 32  }
   0xc   : > { %s2520_s16 = sadd.s32 (!%p272_p3), 8, %s2374_s25  ;;  %p389_p9 = scmp.lt.s32.totalorder (!%p272_p3), %s2374_s25, 31 }
   0xd   : > { %s373_s17 = sadd.s32 (!%p272_p3), 1, %s2520_s16  ;;  %p362_p8 = scmp.lt.s32.totalorder (!%p272_p3), %s2520_s16, 33 }
   0xe   : > { %s3351_s19 = smov (!%p343_p5, %s2297_s19), 1  ;;  %vm745_vm0 = vcmask 1046528   ;;  %vm552_vm1 = vsmask.f32 7424  ;;  %v2475_v59 = vld [vmem:[%s3337_s3 + $0x88] sm:$0xff]  ;;  %vm1022_vm2 = vcmask 261120  }
   0xf   : > { %s346_s26 = scalar_select %p345_p6, %s2374_s25, 33  ;;  %1645 = vmatpush.bf16.msra.mxu2 %v2475_v59  ;;  %vm1055_vm3 = vcmask 523264   ;;  %vm1088_vm4 = vcmask 785408   ;;  %vm1792_vm5 = vcmask 257024  }
  0x10   : > { %s2381_s27 = smul.u32 170, %s3351_s19  ;;  %p376_p7 = scmp.lt.s32.totalorder %s373_s17, 33 }
  0x11   : > { %s2223_s28 = smul.u32 5, %s346_s26  ;;  %s3355_s16 = smov (!%p362_p8, %s2520_s16), 33 }
  0x12   : > { %s3353_s17 = smov (!%p376_p7, %s373_s17), 33  ;;  %s2225_s6 = smul.u32 5, %s3355_s16 }
  0x13   : > { %s349_s29 = sadd.s32 %s2381_s27, %s2223_s28  ;;  %s2226_s18 = smul.u32 5, %s3353_s17 }
  0x14   : > { %s1976_s30 = sshll.u32 %s349_s29, 2  ;;  %s366_s16 = sadd.s32 %s2225_s6, %s2381_s27 }
  0x15   : > { %s2387_s8 = scalar_lea.vmem %s3334_s0, %s1976_s30  ;;  %s2536_s26 = sadd.s32 %s2226_s18, %s2381_s27 }
  0x16   : > { %v2390_v0 = vld [vmem:[%s2387_s8 + $0x14] sm:$0xff]  ;;  %v2393_v1 = vld [vmem:[%s2387_s8] sm:$0xff]  ;;  %v2396_v2 = vld [vmem:[%s2387_s8 + $0x8] sm:$0xff]  ;;  %s1978_s27 = sshll.u32 %s366_s16, 2  ;;  %s3357_s25 = smov (!%p389_p9, %s2374_s25), 31 }
  0x17   : > { %v2399_v3 = vld [vmem:[%s2387_s8 + $0x1c] sm:$0xff]  ;;  %v402_v4 = vld [vmem:[%s2387_s8 + $0x10] sm:$0x1]  ;;  %v2403_v5 = vld [vmem:[%s2387_s8 + $0x28] sm:$0xff]  ;;  %828 = vrot.lane.b32.xlu1 %v2390_v0, %s2311_s9  ;;  %v746_v6 = vrot.slane %v2393_v1, 1  ;;  %v747_v7 = vrot.slane %v2396_v2, 1  ;;  %s2686_s6 = scalar_lea.vmem %s3335_s1, %s1978_s27 }
  0x18   : > { %v751_v8 = vrot.slane %v2390_v0, 1  ;;  %v554_v9 = vshrl.u32 %v2393_v1, 16  ;;  %v752_v10 = vrot.slane %v2399_v3, 1  ;;  %v556_v11 = vshll.u32 %v2393_v1, 16  ;;  %930 = vrot.lane.b32.xlu2 %v2403_v5, %s2312_s10  ;;  %v2419_v18 = vld [vmem:[%s2387_s8 + $0x30] sm:$0xff]  ;;  %v2449_v44 = vld [vmem:[%s2387_s8 + $0x78] sm:$0xff] }
  0x19   : > { %v561_v12 = vshll.u32 %v2396_v2, 16  ;;  %v536_v13 = vunpack.c.l.b16 %v402_v4  ;;  %v748_v14 = vsel %vm745_vm0, %v746_v6, %v747_v7  ;;  %v596_v19 = vshll.u32 %v2403_v5, 16  ;;  %v412_v25 = vld [vmem:[%s2387_s8 + $0x38] sm:$0x1]  ;;  %v407_v30 = vld [vmem:[%s2387_s8 + $0x24] sm:$0x1] }
  0x1a   : > { %786 = vrot.lane.b32.xlu0 %v748_v14, %s2312_s10  ;;  %v558_v15 = vrot.slane %v556_v11, 1  ;;  %v2423_v20 = vsel %vm745_vm0, %v751_v8, %v752_v10  ;;  %v594_v22 = vshrl.u32 %v2403_v5, 16  ;;  %v601_v24 = vshll.u32 %v2419_v18, 16  ;;  %v2457_v49 = vld [vmem:[%s2387_s8 + $0x80] sm:$0xff]  ;;  %s1983_s12 = sshll.u32 %s3351_s19, 7 }
  0x1b   : > { %v563_v16 = vrot.slane %v561_v12, 1  ;;  %v544_v17 = vpack.c.b16 %v536_v13, %v536_v13  ;;  %v598_v23 = vrot.slane %v596_v19, 1  ;;  %v565_v27 = vshrl.u32 %v2396_v2, 16  ;;  %v2487_v4 = vld [vmem:[%s3337_s3 + $0x80] sm:$0xff] }
  0x1c   : > { %v559_v21 = vor.u32 %v558_v15, %v554_v9  ;;  %v538_v31 = vunpack.c.l.b16 %v412_v25  ;;  %v603_v33 = vrot.slane %v601_v24, 1  ;;  %v537_v37 = vunpack.c.l.b16 %v407_v30  ;;  %1646 = vmatpush.bf16.msra.mxu2 %v2487_v4  ;;  %v2504_v13 = vld [vmem:[%s2387_s8 + $0x3c] sm:$0xff]  ;;  %v2514_v15 = vld [vmem:[%s2387_s8 + $0x44] sm:$0xff] }
  0x1d   : > { %v569_v28 = vshll.u32 %v544_v17, 16  ;;  %v749_v29 = vrot.slane %v544_v17, 1  ;;  %v599_v32 = vor.u32 %v598_v23, %v594_v22  ;;  %v567_v35 = vor.u32 %v565_v27, %v563_v16  ;;  %v432_v17 = vld [vmem:[%s2387_s8 + $0x88] sm:$0x1]  ;;  %v2527_v23 = vld [vmem:[%s2387_s8 + $0x8c] sm:$0xff] }
  0x1e   : > { %v564_v26 = vsel %vm552_vm1, %v559_v21, %v563_v16  ;;  %v2436_v34 = vpack.c.b16 %v538_v31, %v538_v31  ;;  %v605_v40 = vshrl.u32 %v2419_v18, 16  ;;  %v2446_v43 = vpack.c.b16 %v537_v37, %v537_v37 }
  0x1f   : > { %888 = vrot.lane.b32.xlu1 %v2423_v20, %s2313_s11  ;;  %v571_v36 = vrot.slane %v569_v28, 1  ;;  %v750_v38 = vsel %vm745_vm0, %v747_v7, %v749_v29  ;;  %v2440_v39 = vsel %vm552_vm1, %v599_v32, %v603_v33  ;;  %v576_v47 = vshll.u32 %v2390_v0, 16 }
  0x20   : > { %830 = vrot.lane.b32.xlu2 %v2399_v3, %s2311_s9  ;;  %v609_v41 = vshll.u32 %v2436_v34, 16  ;;  %v607_v45 = vor.u32 %v605_v40, %v603_v33  ;;  %v754_v48 = vrot.slane %v2446_v43, 1  ;;  %v676_v50 = vshll.u32 %v2449_v44, 16 }
  0x21   : > { %v572_v42 = vsel %vm552_vm1, %v567_v35, %v571_v36  ;;  %v574_v52 = vshrl.u32 %v2390_v0, 16  ;;  %v578_v53 = vrot.slane %v576_v47, 1  ;;  %v581_v54 = vshll.u32 %v2399_v3, 16  ;;  %v2575_v47 = vld [vmem:[%s3337_s3 + $0x78] sm:$0xff] }
  0x22   : > { %713 = vrot.lane.b32.xlu0 %v564_v26, %s2313_s11  ;;  %v611_v46 = vrot.slane %v609_v41, 1  ;;  %v2468_v55 = vsel %vm745_vm0, %v752_v10, %v754_v48  ;;  %v674_v56 = vshrl.u32 %v2449_v44, 16  ;;  %v678_v57 = vrot.slane %v676_v50, 1  ;;  %1550 = vmatpush.bf16.msra.mxu1 %v2575_v47 }
  0x23   : > { %v681_v58 = vshll.u32 %v2457_v49, 16  ;;  %v776_v60 = vrot.slane %v2449_v44, 1  ;;  %v777_v61 = vrot.slane %v2457_v49, 1  ;;  %v579_v62 = vor.u32 %v578_v53, %v574_v52 }
  0x24   : > { %v2461_v51 = vsel %vm552_vm1, %v607_v45, %v611_v46  ;;  %v583_v63 = vrot.slane %v581_v54, 1  ;;  %v679_v6 = vor.u32 %v678_v57, %v674_v56  ;;  %v756_v8 = vrot.slane %v2403_v5, 1  ;;  %v2582_v54 = vld [vmem:[%s2387_s8 + $0x94] sm:$0xff] }
  0x25   : > { %v683_v7 = vrot.slane %v681_v58, 1  ;;  %v757_v9 = vrot.slane %v2419_v18, 1  ;;  %v2492_v10 = vsel %vm745_vm0, %v776_v60, %v777_v61  ;;  %v616_v16 = vshll.u32 %v2504_v13, 16  ;;  %v2194_v57 = vld [vmem:[%s3337_s3 + $0x38] sm:$0xff]  ;;  %v2595_v58 = vld [vmem:[%s3337_s3 + $0x70] sm:$0xff] }
  0x26   : > { %v2495_v11 = vsel %vm552_vm1, %v579_v62, %v583_v63  ;;  %v614_v19 = vshrl.u32 %v2504_v13, 16  ;;  %v621_v22 = vshll.u32 %v2514_v15, 16  ;;  %v542_v24 = vunpack.c.l.b16 %v432_v17  ;;  %1461 = vmatpush.bf16.msra.mxu0 %v2194_v57  ;;  %1551 = vmatpush.bf16.msra.mxu1 %v2595_v58  ;;  %v2611_v62 = vld [vmem:[%s3337_s3 + $0x68] sm:$0xff]  ;;  %v2629_v17 = vld [vmem:[%s3337_s3 + $0x60] sm:$0xff] }
  0x27   : > { %788 = vrot.lane.b32.xlu1 %v750_v38, %s2312_s10  ;;  %v2501_v12 = vsel %vm552_vm1, %v679_v6, %v683_v7  ;;  %v2507_v14 = vsel %vm745_vm0, %v756_v8, %v757_v9  ;;  %v618_v21 = vrot.slane %v616_v16, 1  ;;  %v759_v28 = vrot.slane %v2436_v34, 1  ;;  %2205 = vmatpush.bf16.msra.mxu3 %v2194_v57  ;;  %v2192_v16 = vld [vmem:[%s3337_s3 + $0x28] sm:$0xff]  ;;  %v2713_v57 = vld [vmem:[%s3337_s3 + $0x40] sm:$0xff] }
  0x28   : > { %985 = vrot.lane.b32.xlu2 %v2440_v39, %s2311_s9  ;;  %2137 = vmatmul.msk.bf16.vlgmr.msra.gmra.mxu2 %vm1022_vm2, %v2507_v14  ;;  %v623_v26 = vrot.slane %v621_v22, 1  ;;  %v550_v27 = vpack.c.b16 %v542_v24, %v542_v24  ;;  %v589_v30 = vshll.u32 %v2446_v43, 16  ;;  %v685_v31 = vshrl.u32 %v2457_v49, 16  ;;  %v2191_v22 = vld [vmem:[%s3337_s3 + $0x20] sm:$0xff]  ;;  %v2644_v24 = vld [vmem:[%s3337_s3 + $0x58] sm:$0xff] }
  0x29   : > { %v619_v25 = vor.u32 %v618_v21, %v614_v19  ;;  %v2548_v33 = vsel %vm745_vm0, %v757_v9, %v759_v28  ;;  %v761_v48 = vrot.slane %v2504_v13, 1  ;;  %v762_v50 = vrot.slane %v2514_v15, 1 }
  0x2a   : > { %715 = vrot.lane.b32.xlu0 %v572_v42, %s2313_s11  ;;  %v689_v32 = vshll.u32 %v550_v27, 16  ;;  %v779_v35 = vrot.slane %v550_v27, 1  ;;  %v591_v36 = vrot.slane %v589_v30, 1  ;;  %v687_v37 = vor.u32 %v685_v31, %v683_v7  ;;  %v417_v42 = vld [vmem:[%s2387_s8 + $0x4c] sm:$0x1]  ;;  %1552 = vmatpush.bf16.msra.mxu1 %v2611_v62  ;;  %v2659_v30 = vld [vmem:[%s2387_s8 + $0x50] sm:$0xff] }
  0x2b   : > { %v2540_v29 = vsel %vm552_vm1, %v619_v25, %v623_v26  ;;  %v539_v45 = vunpack.c.l.b16 %v417_v42  ;;  %v625_v52 = vshrl.u32 %v2514_v15, 16  ;;  %v2587_v56 = vsel %vm745_vm0, %v761_v48, %v762_v50  ;;  %v2695_v42 = vld [vmem:[%s3337_s3 + $0x48] sm:$0xff] }
  0x2c   : > { %v691_v38 = vrot.slane %v689_v32, 1  ;;  %v2557_v40 = vsel %vm745_vm0, %v777_v61, %v779_v35  ;;  %v2193_v61 = vld [vmem:[%s3337_s3 + $0x30] sm:$0xff]  ;;  %v694_v7 = vshrl.u32 %v2527_v23, 16  ;;  %v701_v9 = vshll.u32 %v2582_v54, 16  ;;  %v2190_v32 = vld [vmem:[%s3337_s3 + $0x18] sm:$0xff] }
  0x2d   : > { %v547_v46 = vpack.c.b16 %v539_v45, %v539_v45  ;;  %1462 = vmatpush.bf16.msra.mxu0 %v2193_v61  ;;  %2206 = vmatpush.bf16.msra.mxu3 %v2193_v61  ;;  %v781_v19 = vrot.slane %v2527_v23, 1  ;;  %v782_v21 = vrot.slane %v2582_v54, 1  ;;  %v2674_v35 = vld [vmem:[%s3337_s3 + $0x50] sm:$0xff]  ;;  %v634_v45 = vshrl.u32 %v2659_v30, 16 }
  0x2e   : > { %v2566_v43 = vsel %vm552_vm1, %v687_v37, %v691_v38  ;;  %1553 = vmatpush.bf16.msra.mxu1 %v2629_v17  ;;  %v2189_v37 = vld [vmem:[%s3337_s3 + $0x10] sm:$0xff]  ;;  %v437_v38 = vld [vmem:[%s2387_s8 + $0x9c] sm:$0x1] }
  0x2f   : > { %932 = vrot.lane.b32.xlu1 %v2419_v18, %s2312_s10  ;;  %v629_v53 = vshll.u32 %v547_v46, 16  ;;  %v2649_v27 = vsel %vm745_vm0, %v781_v19, %v782_v21  ;;  %v764_v28 = vrot.slane %v547_v46, 1 }
  0x30   : > { %987 = vrot.lane.b32.xlu2 %v2461_v51, %s2311_s9 }
  0x31   : > { %v631_v60 = vrot.slane %v629_v53, 1  ;;  %1463 = vmatpush.bf16.msra.mxu0 %v2192_v16  ;;  %2207 = vmatpush.bf16.msra.mxu3 %v2192_v16  ;;  %v2662_v31 = vsel %vm745_vm0, %v762_v50, %v764_v28  ;;  %v2700_v50 = vld [vmem:[%s2686_s6] sm:$0xff]  ;;  %v2188_v53 = vld [vmem:[%s3337_s3 + $0x8] sm:$0xff]  ;;  %v705_v16 = vshrl.u32 %v2582_v54, 16 }
  0x32   : > { %890 = vrot.lane.b32.xlu0 %v2468_v55, %s2313_s11  ;;  %1554 = vmatpush.bf16.msra.mxu1 %v2644_v24 }
  0x35   : > { %1464 = vmatpush.bf16.msra.mxu0 %v2191_v22  ;;  %2208 = vmatpush.bf16.msra.mxu3 %v2191_v22 }
  0x36   : > { %1555 = vmatpush.bf16.msra.mxu1 %v2674_v35 }
  0x37   : > { %810 = vrot.lane.b32.xlu1 %v2492_v10, %s2312_s10 }
  0x38   : > { %717 = vrot.lane.b32.xlu2 %v2495_v11, %s2313_s11  ;;  %2138 = vmatmul.msk.bf16.gmra.mxu2 %vm1022_vm2, %v2548_v33 }
  0x39   : > { %1465 = vmatpush.bf16.msra.mxu0 %v2190_v32  ;;  %2209 = vmatpush.bf16.msra.mxu3 %v2190_v32 }
  0x3a   : > { %737 = vrot.lane.b32.xlu0 %v2501_v12, %s2313_s11  ;;  %1556 = vmatpush.bf16.msra.mxu1 %v2695_v42 }
  0x3d   : > { %1466 = vmatpush.bf16.msra.mxu0 %v2189_v37  ;;  %2210 = vmatpush.bf16.msra.mxu3 %v2189_v37 }
  0x3e   : > { %1557 = vmatpush.bf16.msra.mxu1 %v2713_v57 }
  0x3f   : > { %790 = vrot.lane.b32.xlu1 %v2423_v20, %s2312_s10  ;;  %v585_v20 = vshrl.u32 %v2399_v3, 16 }
  0x40   : > { %832 = vrot.lane.b32.xlu2 %v2403_v5, %s2311_s9 }
  0x41   : > { %v587_v34 = vor.u32 %v585_v20, %v583_v63  ;;  %v696_v63 = vshll.u32 %v2527_v23, 16  ;;  %1467 = vmatpush.bf16.msra.mxu0 %v2188_v53  ;;  %2211 = vmatpush.bf16.msra.mxu3 %v2188_v53 }
  0x42   : > { %852 = vrot.lane.b32.xlu0 %v2527_v23, %s2311_s9 }
  0x43   : > { %v2560_v41 = vsel %vm552_vm1, %v587_v34, %v591_v36  ;;  %v698_v8 = vrot.slane %v696_v63, 1  ;;  %v2677_v34 = vld [vmem:[%s2387_s8 + $0x58] sm:$0xff]  ;;  %v636_v36 = vshll.u32 %v2659_v30, 16  ;;  %v2187_v63 = vld [vmem:[%s3337_s3] sm:$0xff] }
  0x44   : > { %v641_v48 = vshll.u32 %v2677_v34, 16 }
  0x45   : > { %v699_v25 = vor.u32 %v698_v8, %v694_v7  ;;  %v638_v46 = vrot.slane %v636_v36, 1  ;;  %1468 = vmatpush.bf16.msra.mxu0 %v2187_v63  ;;  %v766_v8 = vrot.slane %v2659_v30, 1  ;;  %2212 = vmatpush.bf16.msra.mxu3 %v2187_v63 }
  0x47   : > { %934 = vrot.lane.b32.xlu1 %v2504_v13, %s2312_s10 }
  0x48   : > { %989 = vrot.lane.b32.xlu2 %v2540_v29, %s2311_s9  ;;  %2139 = vmatmul.msk.bf16.gmra.mxu2 %vm1022_vm2, %v2587_v56 }
  0x49   : > { %2213 = vmatpush.bf16.msrb.mxu3 %v2575_v47 }
  0x4a   : > { %892 = vrot.lane.b32.xlu0 %v2507_v14, %s2313_s11 }
  0x4d   : > { %2214 = vmatpush.bf16.msrb.mxu3 %v2595_v58  ;;  %v645_v58 = vshrl.u32 %v2677_v34, 16 }
  0x4f   : > { %812 = vrot.lane.b32.xlu1 %v2557_v40, %s2312_s10 }
  0x50   : > { %719 = vrot.lane.b32.xlu2 %v2560_v41, %s2313_s11 }
  0x51   : > { %2215 = vmatpush.bf16.msrb.mxu3 %v2611_v62 }
  0x52   : > { %739 = vrot.lane.b32.xlu0 %v2566_v43, %s2313_s11 }
  0x55   : > { %2216 = vmatpush.bf16.msrb.mxu3 %v2629_v17 }
  0x57   : > { %792 = vrot.lane.b32.xlu1 %v2468_v55, %s2312_s10  ;;  %v627_v55 = vor.u32 %v625_v52, %v623_v26  ;;  %v703_v26 = vrot.slane %v701_v9, 1  ;;  %v543_v52 = vunpack.c.l.b16 %v437_v38  ;;  %v767_v9 = vrot.slane %v2677_v34, 1  ;;  %v422_v38 = vld [vmem:[%s2387_s8 + $0x60] sm:$0x1] }
  0x58   : > { %834 = vrot.lane.b32.xlu2 %v2419_v18, %s2311_s9  ;;  %2140 = vmatmul.msk.bf16.gmra.mxu2 %vm1022_vm2, %v2662_v31 }
  0x59   : > { %v2616_v6 = vsel %vm552_vm1, %v627_v55, %v631_v60  ;;  %v2656_v20 = vsel %vm552_vm1, %v699_v25, %v703_v26  ;;  %v639_v55 = vor.u32 %v638_v46, %v634_v45  ;;  %v643_v60 = vrot.slane %v641_v48, 1  ;;  %2217 = vmatpush.bf16.msrb.mxu3 %v2644_v24  ;;  %v442_v24 = vld [vmem:[%s2686_s6 + $0x10] sm:$0x1] }
  0x5a   : > { %854 = vrot.lane.b32.xlu0 %v2582_v54, %s2311_s9  ;;  %v551_v61 = vpack.c.b16 %v543_v52, %v543_v52  ;;  %v2732_v22 = vsel %vm745_vm0, %v766_v8, %v767_v9  ;;  %v707_v32 = vor.u32 %v705_v16, %v703_v26  ;;  %v540_v45 = vunpack.c.l.b16 %v422_v38  ;;  %v2763_v52 = vld [vmem:[%s2686_s6 + $0x8] sm:$0xff] }
  0x5b   : > { %v2724_v7 = vsel %vm552_vm1, %v639_v55, %v643_v60  ;;  %v647_v55 = vor.u32 %v645_v58, %v643_v60  ;;  %v871_v60 = vshll.u32 %v2763_v52, 16  ;;  %v875_v58 = vshrl.u32 %v2763_v52, 16 }
  0x5c   : > { %v709_v19 = vshll.u32 %v551_v61, 16  ;;  %v784_v25 = vrot.slane %v551_v61, 1  ;;  %v548_v26 = vpack.c.b16 %v540_v45, %v540_v45 }
  0x5d   : > { %2218 = vmatpush.bf16.msrb.mxu3 %v2674_v35 }
  0x5e   : > { %v711_v36 = vrot.slane %v709_v19, 1  ;;  %v2746_v37 = vsel %vm745_vm0, %v782_v21, %v784_v25  ;;  %v769_v46 = vrot.slane %v548_v26, 1  ;;  %v649_v48 = vshll.u32 %v548_v26, 16 }
  0x5f   : > { %936 = vrot.lane.b32.xlu1 %v2514_v15, %s2312_s10  ;;  %v866_v25 = vshll.u32 %v2700_v50, 16 }
  0x60   : > { %991 = vrot.lane.b32.xlu2 %v2616_v6, %s2311_s9  ;;  %v2753_v47 = vsel %vm552_vm1, %v707_v32, %v711_v36  ;;  %v2768_v53 = vsel %vm745_vm0, %v767_v9, %v769_v46  ;;  %v651_v61 = vrot.slane %v649_v48, 1  ;;  %v861_v9 = vunpack.c.l.b16 %v442_v24  ;;  %v2800_v32 = vld [vmem:[%s2387_s8 + $0x64] sm:$0xff]  ;;  %v2803_v36 = vld [vmem:[%s2387_s8 + $0x6c] sm:$0xff] }
  0x61   : > { %2219 = vmatpush.bf16.msrb.mxu3 %v2695_v42  ;;  %v771_v46 = vrot.slane %v2800_v32, 1 }
  0x62   : > { %894 = vrot.lane.b32.xlu0 %v2548_v33, %s2313_s11  ;;  %v2780_v63 = vsel %vm552_vm1, %v647_v55, %v651_v61  ;;  %v2805_v38 = vpack.c.b16 %v861_v9, %v861_v9  ;;  %v864_v55 = vshrl.u32 %v2700_v50, 16  ;;  %v656_v9 = vshll.u32 %v2800_v32, 16 }
  0x64   : > { %v879_v61 = vshll.u32 %v2805_v38, 16 }
  0x65   : > { %2220 = vmatpush.bf16.msrb.mxu3 %v2713_v57 }
  0x66   : > { %v881_v57 = vrot.slane %v879_v61, 1 }
  0x67   : > { %814 = vrot.lane.b32.xlu1 %v2649_v27, %s2312_s10 }
  0x68   : > { %721 = vrot.lane.b32.xlu2 %v2440_v39, %s2313_s11  ;;  %2141 = vmatmul.msk.bf16.gmra.mxu2 %vm1022_vm2, %v2732_v22 }
  0x6a   : > { %741 = vrot.lane.b32.xlu0 %v2656_v20, %s2313_s11 }
  0x6f   : > { %794 = vrot.lane.b32.xlu1 %v2507_v14, %s2312_s10 }
  0x70   : > { %836 = vrot.lane.b32.xlu2 %v2504_v13, %s2311_s9 }
  0x72   : > { %856 = vrot.lane.b32.xlu0 %v2700_v50, %s2311_s9  ;;  %v2717_v14 = vpop.permute.xlu2 %930 }
  0x77   : > { %938 = vrot.lane.b32.xlu1 %v2659_v30, %s2312_s10 }
  0x78   : > { %993 = vrot.lane.b32.xlu2 %v2724_v7, %s2311_s9  ;;  %2142 = vmatmul.msk.bf16.gmra.mxu2 %vm1022_vm2, %v2768_v53 }
  0x7a   : > { %896 = vrot.lane.b32.xlu0 %v2587_v56, %s2313_s11  ;;  %v2741_v28 = vpop.permute.xlu2 %830 }
  0x7f   : > { %816 = vrot.lane.b32.xlu1 %v2746_v37, %s2312_s10 }
  0x80   : > { %723 = vrot.lane.b32.xlu2 %v2461_v51, %s2313_s11 }
  0x82   : > { %743 = vrot.lane.b32.xlu0 %v2753_v47, %s2313_s11  ;;  %v986_v21 = vpop.permute.xlu2 %985 }
  0x87   : > { %796 = vrot.lane.b32.xlu1 %v2548_v33, %s2312_s10 }
  0x88   : > { %838 = vrot.lane.b32.xlu2 %v2514_v15, %s2311_s9 }
  0x89   : > { %v829_v62 = vpop.permute.xlu1 %828 }
  0x8a   : > { %858 = vrot.lane.b32.xlu0 %v2763_v52, %s2311_s9  ;;  %v2777_v17 = vpop.permute.xlu2 %987 }
  0x8c   : > { %v787_v33 = vpop.permute.xlu0 %786 }
  0x8f   : > { %940 = vrot.lane.b32.xlu1 %v2677_v34, %s2312_s10 }
  0x90   : > { %995 = vrot.lane.b32.xlu2 %v2780_v63, %s2311_s9 }
  0x91   : > { %v889_v8 = vpop.permute.xlu1 %888 }
  0x92   : > { %v1139_v16 = vsel %vm1022_vm2, %v2495_v11, %v889_v8  ;;  %898 = vrot.lane.b32.xlu0 %v2662_v31, %s2313_s11  ;;  %v2794_v35 = vpop.permute.xlu2 %717  ;;  %v873_v11 = vrot.slane %v871_v60, 1 }
  0x93   : > { %v1186_v19 = vsel %vm1055_vm3, %v1139_v16, %v2717_v14  ;;  %v772_v14 = vrot.slane %v2803_v36, 1 }
  0x94   : > { %v714_v42 = vpop.permute.xlu0 %713  ;;  %v1218_v45 = vsel %vm1088_vm4, %v1186_v19, %v986_v21  ;;  %v868_v21 = vrot.slane %v866_v25, 1  ;;  %v877_v24 = vor.u32 %v875_v58, %v873_v11  ;;  %v654_v25 = vshrl.u32 %v2800_v32, 16  ;;  %v427_v58 = vld [vmem:[%s2387_s8 + $0x74] sm:$0x1]  ;;  %s1980_s8 = sshll.u32 %s2536_s26, 2 }
  0x95   : > { %v1024_v26 = vsel %vm1022_vm2, %v2393_v1, %v714_v42  ;;  %1558 = vmatmul.bf16.vlgmr.msra.gmra.mxu1 %v1218_v45  ;;  %v2821_v60 = vsel %vm745_vm0, %v771_v46, %v772_v14  ;;  %v658_v42 = vrot.slane %v656_v9, 1  ;;  %v661_v45 = vshll.u32 %v2803_v36, 16  ;;  %s2909_s6 = scalar_lea.vmem %s3336_s2, %s1980_s8 }
  0x96   : > { %v1057_v48 = vsel %vm1055_vm3, %v1024_v26, %v787_v33  ;;  %2143 = vmatmul.msk.bf16.gmra.mxu2 %vm1022_vm2, %v2821_v60  ;;  %v869_v16 = vor.u32 %v868_v21, %v864_v55  ;;  %v541_v55 = vunpack.c.l.b16 %v427_v58 }
  0x97   : > { %954 = vrot.lane.b32.xlu1 %v2700_v50, %s2312_s10  ;;  %v1090_v1 = vsel %vm1088_vm4, %v1057_v48, %v829_v62  ;;  %v2830_v62 = vsel %vm552_vm1, %v877_v24, %v881_v57  ;;  %v663_v21 = vrot.slane %v661_v45, 1 }
  0x98   : > { %1469 = vmatmul.bf16.vlgmr.msra.gmra.mxu0 %v1090_v1  ;;  %725 = vrot.lane.b32.xlu2 %v2540_v29, %s2313_s11  ;;  %v2838_v26 = vsel %vm552_vm1, %v869_v16, %v873_v11  ;;  %v659_v1 = vor.u32 %v658_v42, %v654_v25  ;;  %v549_v24 = vpack.c.b16 %v541_v55, %v541_v55  ;;  %v884_v42 = vrot.slane %v2763_v52, 1 }
  0x99   : > { %v789_v33 = vpop.permute.xlu1 %788 }
  0x9a   : > { %912 = vrot.lane.b32.xlu0 %v2649_v27, %s2313_s11  ;;  %v833_v8 = vpop.permute.xlu2 %832 }
  0x9c   : > { %v716_v19 = vpop.permute.xlu0 %715 }
  0x9d   : > { %v1026_v46 = vsel %vm1022_vm2, %v2396_v2, %v716_v19  ;;  %v774_v2 = vrot.slane %v549_v24, 1  ;;  %v2854_v19 = vsel %vm552_vm1, %v659_v1, %v663_v21 }
  0x9f   : > { %798 = vrot.lane.b32.xlu1 %v2587_v56, %s2312_s10  ;;  %v1059_v56 = vsel %vm1055_vm3, %v1026_v46, %v789_v33  ;;  %v2861_v25 = vsel %vm745_vm0, %v772_v14, %v774_v2 }
  0xa0   : > { %840 = vrot.lane.b32.xlu2 %v2659_v30, %s2311_s9  ;;  %v1093_v9 = vsel %vm1088_vm4, %v1059_v56, %v2741_v28 }
  0xa1   : > { %v933_v48 = vpop.permute.xlu1 %932 }
  0xa2   : > { %1009 = vrot.lane.b32.xlu0 %v2838_v26, %s2311_s9  ;;  %v990_v61 = vpop.permute.xlu2 %989 }
  0xa4   : > { %v891_v11 = vpop.permute.xlu0 %890 }
  0xa5   : > { %v1142_v57 = vsel %vm1022_vm2, %v2560_v41, %v891_v11  ;;  %v883_v41 = vrot.slane %v2700_v50, 1  ;;  %v665_v11 = vshrl.u32 %v2803_v36, 16 }
  0xa6   : > { %v1188_v16 = vsel %vm1055_vm3, %v1142_v57, %v933_v48  ;;  %2144 = vmatmul.msk.bf16.gmra.mxu2 %vm1022_vm2, %v2861_v25  ;;  %v1028_v48 = vsel %vm1022_vm2, %v2390_v0, %v2794_v35  ;;  %v669_v57 = vshll.u32 %v549_v24, 16 }
  0xa7   : > { %942 = vrot.lane.b32.xlu1 %v2800_v32, %s2312_s10  ;;  %v1221_v33 = vsel %vm1088_vm4, %v1188_v16, %v2777_v17  ;;  %v2870_v45 = vsel %vm745_vm0, %v883_v41, %v884_v42  ;;  %v667_v24 = vor.u32 %v665_v11, %v663_v21  ;;  %v2919_v41 = vld [vmem:[%s2909_s6] sm:$0xff] }
  0xa8   : > { %1474 = vmatmul.bf16.gmra.mxu0 %v1093_v9  ;;  %1563 = vmatmul.bf16.gmra.mxu1 %v1221_v33  ;;  %v671_v9 = vrot.slane %v669_v57, 1  ;;  %v886_v33 = vrot.slane %v2805_v38, 1 }
  0xa9   : > { %v811_v28 = vpop.permute.xlu1 %810  ;;  %997 = vrot.lane.b32.xlu2 %v2854_v19, %s2311_s9 }
  0xaa   : > { %900 = vrot.lane.b32.xlu0 %v2732_v22, %s2313_s11  ;;  %v720_v17 = vpop.permute.xlu2 %719  ;;  %v2912_v21 = vsel %vm552_vm1, %v667_v24, %v671_v9 }
  0xac   : > { %v738_v14 = vpop.permute.xlu0 %737 }
  0xad   : > { %v1048_v50 = vsel %vm1022_vm2, %v2449_v44, %v738_v14 }
  0xaf   : > { %956 = vrot.lane.b32.xlu1 %v2763_v52, %s2312_s10  ;;  %v1081_v52 = vsel %vm1055_vm3, %v1048_v50, %v811_v28  ;;  %v2924_v28 = vsel %vm745_vm0, %v884_v42, %v886_v33  ;;  %v2929_v50 = vld [vmem:[%s2909_s6 + $0x8] sm:$0xff] }
  0xb0   : > { %v973_v42 = vshll.u32 %v2929_v50, 16 }
  0xb1   : > { %v791_v46 = vpop.permute.xlu1 %790  ;;  %727 = vrot.lane.b32.xlu2 %v2616_v6, %s2313_s11 }
  0xb2   : > { %914 = vrot.lane.b32.xlu0 %v2746_v37, %s2313_s11  ;;  %v835_v58 = vpop.permute.xlu2 %834  ;;  %v1061_v55 = vsel %vm1055_vm3, %v1028_v48, %v791_v46  ;;  %v966_v48 = vshrl.u32 %v2919_v41, 16 }
  0xb3   : > { %v1096_v2 = vsel %vm1088_vm4, %v1061_v55, %v833_v8 }
  0xb4   : > { %v853_v1 = vpop.permute.xlu0 %852 }
  0xb5   : > { %v1126_v56 = vsel %vm1088_vm4, %v1081_v52, %v853_v1  ;;  %v1030_v1 = vsel %vm1022_vm2, %v2399_v3, %v720_v17  ;;  %v975_v3 = vrot.slane %v973_v42, 1 }
  0xb6   : > { %1529 = vmatmul.bf16.vlgmr.msra.gmra.mxu3 %v1126_v56  ;;  %2145 = vmatmul.msk.bf16.gmra.mxu2 %vm1022_vm2, %v2492_v10 }
  0xb7   : > { %800 = vrot.lane.b32.xlu1 %v2662_v31, %s2312_s10  ;;  %2221 = vmatpush.bf16.msra.mxu3 %v2475_v59  ;;  %v2900_v31 = vpop.f32.mrf.mxu2 }
  0xb8   : > { %1479 = vmatmul.bf16.gmra.mxu0 %v1096_v2 }
  0xb9   : > { %v935_v0 = vpop.permute.xlu1 %934  ;;  %842 = vrot.lane.b32.xlu2 %v2677_v34, %s2311_s9 }
  0xba   : > { %1011 = vrot.lane.b32.xlu0 %v2830_v62, %s2311_s9  ;;  %v992_v35 = vpop.permute.xlu2 %991 }
  0xbb   : > { %2222 = vmatpush.bf16.msra.mxu3 %v2487_v4 }
  0xbc   : > { %v893_v59 = vpop.permute.xlu0 %892 }
  0xbd   : > { %v1145_v8 = vsel %vm1022_vm2, %v2440_v39, %v893_v59 }
  0xbe   : > { %v1190_v16 = vsel %vm1055_vm3, %v1145_v8, %v935_v0 }
  0xbf   : > { %944 = vrot.lane.b32.xlu1 %v2803_v36, %s2312_s10  ;;  %v1224_v4 = vsel %vm1088_vm4, %v1190_v16, %v990_v61  ;;  %v968_v61 = vshll.u32 %v2919_v41, 16  ;;  %v2932_v46 = vpop.f32.mrf.mxu2 }
  0xc0   : > { %1568 = vmatmul.bf16.gmra.mxu1 %v1224_v4 }
  0xc1   : > { %v813_v39 = vpop.permute.xlu1 %812  ;;  %999 = vrot.lane.b32.xlu2 %v2912_v21, %s2311_s9  ;;  %v970_v55 = vrot.slane %v968_v61, 1  ;;  %v447_v61 = vld [vmem:[%s2909_s6 + $0x10] sm:$0x1] }
  0xc2   : > { %902 = vrot.lane.b32.xlu0 %v2768_v53, %s2313_s11  ;;  %v722_v14 = vpop.permute.xlu2 %721 }
  0xc3   : > { %v971_v0 = vor.u32 %v970_v55, %v966_v48  ;;  %v963_v48 = vunpack.c.l.b16 %v447_v61 }
  0xc4   : > { %v740_v38 = vpop.permute.xlu0 %739 }
  0xc5   : > { %v1050_v52 = vsel %vm1022_vm2, %v2457_v49, %v740_v38  ;;  %v976_v8 = vsel %vm552_vm1, %v971_v0, %v975_v3  ;;  %v2975_v42 = vpack.c.b16 %v963_v48, %v963_v48 }
  0xc6   : > { %2146 = vmatmul.msk.bf16.gmra.mxu2 %vm1022_vm2, %v2557_v40  ;;  %v1083_v9 = vsel %vm1055_vm3, %v1050_v52, %v813_v39 }
  0xc7   : > { %958 = vrot.lane.b32.xlu1 %v2919_v41, %s2312_s10  ;;  %v2950_v17 = vpop.f32.mrf.mxu2 }
  0xc9   : > { %v793_v56 = vpop.permute.xlu1 %792  ;;  %729 = vrot.lane.b32.xlu2 %v2724_v7, %s2313_s11 }
  0xca   : > { %v1063_v11 = vsel %vm1055_vm3, %v1030_v1, %v793_v56  ;;  %916 = vrot.lane.b32.xlu0 %v2870_v45, %s2313_s11  ;;  %v837_v57 = vpop.permute.xlu2 %836  ;;  %v981_v56 = vshll.u32 %v2975_v42, 16 }
  0xcb   : > { %v1099_v2 = vsel %vm1088_vm4, %v1063_v11, %v835_v58  ;;  %v1032_v11 = vsel %vm1022_vm2, %v2403_v5, %v722_v14 }
  0xcc   : > { %1484 = vmatmul.bf16.gmra.mxu0 %v1099_v2  ;;  %v855_v24 = vpop.permute.xlu0 %854 }
  0xcd   : > { %v1129_v59 = vsel %vm1088_vm4, %v1083_v9, %v855_v24 }
  0xce   : > { %1534 = vmatmul.bf16.gmra.mxu3 %v1129_v59 }
  0xcf   : > { %802 = vrot.lane.b32.xlu1 %v2732_v22, %s2312_s10  ;;  %v2960_v4 = vpop.f32.mrf.mxu2 }
  0xd1   : > { %v937_v16 = vpop.permute.xlu1 %936  ;;  %844 = vrot.lane.b32.xlu2 %v2800_v32, %s2311_s9 }
  0xd2   : > { %1013 = vrot.lane.b32.xlu0 %v976_v8, %s2311_s9  ;;  %v994_v58 = vpop.permute.xlu2 %993  ;;  %v983_v8 = vrot.slane %v981_v56, 1 }
  0xd4   : > { %v895_v33 = vpop.permute.xlu0 %894 }
  0xd5   : > { %v1148_v39 = vsel %vm1022_vm2, %v2461_v51, %v895_v33 }
  0xd6   : > { %v1192_v38 = vsel %vm1055_vm3, %v1148_v39, %v937_v16  ;;  %2147 = vmatmul.msk.bf16.gmra.mxu2 %vm1022_vm2, %v2649_v27 }
  0xd7   : > { %946 = vrot.lane.b32.xlu1 %v2449_v44, %s2312_s10  ;;  %v1227_v22 = vsel %vm1088_vm4, %v1192_v38, %v992_v35  ;;  %v2977_v1 = vpop.f32.mrf.mxu2  ;;  %v977_v35 = vshrl.u32 %v2929_v50, 16 }
  0xd8   : > { %1573 = vmatmul.bf16.gmra.mxu1 %v1227_v22 }
  0xd9   : > { %v815_v55 = vpop.permute.xlu1 %814  ;;  %1001 = vrot.lane.b32.xlu2 %v2501_v12, %s2311_s9  ;;  %v979_v59 = vor.u32 %v977_v35, %v975_v3 }
  0xda   : > { %904 = vrot.lane.b32.xlu0 %v2821_v60, %s2313_s11  ;;  %v724_v51 = vpop.permute.xlu2 %723 }
  0xdb   : > { %v984_v61 = vsel %vm552_vm1, %v979_v59, %v983_v8 }
  0xdc   : > { %v742_v52 = vpop.permute.xlu0 %741 }
  0xdd   : > { %v1052_v27 = vsel %vm1022_vm2, %v2527_v23, %v742_v52 }
  0xde   : > { %v1085_v14 = vsel %vm1055_vm3, %v1052_v27, %v815_v55 }
  0xdf   : > { %960 = vrot.lane.b32.xlu1 %v2929_v50, %s2312_s10  ;;  %v2993_v16 = vpop.f32.mrf.mxu2 }
  0xe1   : > { %v795_v2 = vpop.permute.xlu1 %794  ;;  %731 = vrot.lane.b32.xlu2 %v2780_v63, %s2313_s11 }
  0xe2   : > { %v1065_v0 = vsel %vm1055_vm3, %v1032_v11, %v795_v2  ;;  %918 = vrot.lane.b32.xlu0 %v2924_v28, %s2313_s11  ;;  %v839_v24 = vpop.permute.xlu2 %838 }
  0xe3   : > { %v1102_v9 = vsel %vm1088_vm4, %v1065_v0, %v837_v57 }
  0xe4   : > { %1489 = vmatmul.bf16.gmra.mxu0 %v1102_v9  ;;  %v857_v5 = vpop.permute.xlu0 %856 }
  0xe5   : > { %v1132_v33 = vsel %vm1088_vm4, %v1085_v14, %v857_v5 }
  0xe6   : > { %1539 = vmatmul.bf16.gmra.mxu3 %v1132_v33  ;;  %2148 = vmatmul.msk.bf16.gmra.mxu2 %vm1022_vm2, %v2746_v37 }
  0xe7   : > { %804 = vrot.lane.b32.xlu1 %v2768_v53, %s2312_s10  ;;  %v3005_v3 = vpop.f32.mrf.mxu2 }
  0xe9   : > { %v939_v39 = vpop.permute.xlu1 %938  ;;  %846 = vrot.lane.b32.xlu2 %v2803_v36, %s2311_s9 }
  0xea   : > { %1015 = vrot.lane.b32.xlu0 %v984_v61, %s2311_s9  ;;  %v996_v57 = vpop.permute.xlu2 %995 }
  0xec   : > { %v897_v38 = vpop.permute.xlu0 %896 }
  0xed   : > { %v1151_v22 = vsel %vm1022_vm2, %v2540_v29, %v897_v38  ;;  %v1034_v29 = vsel %vm1022_vm2, %v2419_v18, %v724_v51 }
  0xee   : > { %v1194_v53 = vsel %vm1055_vm3, %v1151_v22, %v939_v39 }
  0xef   : > { %v1230_v48 = vsel %vm1088_vm4, %v1194_v53, %v994_v58  ;;  %948 = vrot.lane.b32.xlu1 %v2457_v49, %s2312_s10  ;;  %v3017_v52 = vpop.f32.mrf.mxu2 }
  0xf0   : > { %1578 = vmatmul.bf16.gmra.mxu1 %v1230_v48 }
  0xf1   : > { %v817_v55 = vpop.permute.xlu1 %816  ;;  %1003 = vrot.lane.b32.xlu2 %v2566_v43, %s2311_s9 }
  0xf2   : > { %906 = vrot.lane.b32.xlu0 %v2861_v25, %s2313_s11  ;;  %v726_v37 = vpop.permute.xlu2 %725 }
  0xf4   : > { %v744_v35 = vpop.permute.xlu0 %743 }
  0xf5   : > { %v1054_v58 = vsel %vm1022_vm2, %v2582_v54, %v744_v35 }
  0xf6   : > { %2149 = vmatmul.msk.bf16.gmra.mxu2 %vm1022_vm2, %v2870_v45  ;;  %v1087_v51 = vsel %vm1055_vm3, %v1054_v58, %v817_v55 }
  0xf7   : > { %806 = vrot.lane.b32.xlu1 %v2821_v60, %s2312_s10  ;;  %v3033_v2 = vpop.f32.mrf.mxu2 }
  0xf9   : > { %v797_v56 = vpop.permute.xlu1 %796  ;;  %848 = vrot.lane.b32.xlu2 %v2449_v44, %s2311_s9 }
  0xfa   : > { %v1067_v11 = vsel %vm1055_vm3, %v1034_v29, %v797_v56  ;;  %733 = vrot.lane.b32.xlu0 %v2854_v19, %s2313_s11  ;;  %v841_v27 = vpop.permute.xlu2 %840 }
  0xfb   : > { %v1105_v60 = vsel %vm1088_vm4, %v1067_v11, %v839_v24 }
  0xfc   : > { %1494 = vmatmul.bf16.gmra.mxu0 %v1105_v60  ;;  %v859_v18 = vpop.permute.xlu0 %858 }
  0xfd   : > { %v1135_v0 = vsel %vm1088_vm4, %v1087_v51, %v859_v18 }
  0xfe   : > { %1544 = vmatmul.bf16.gmra.mxu3 %v1135_v0 }
  0xff   : > { %950 = vrot.lane.b32.xlu1 %v2527_v23, %s2312_s10  ;;  %v3043_v45 = vpop.f32.mrf.mxu2 }
 0x101   : > { %v941_v44 = vpop.permute.xlu1 %940  ;;  %1005 = vrot.lane.b32.xlu2 %v2656_v20, %s2311_s9 }
 0x102   : > { %908 = vrot.lane.b32.xlu0 %v2492_v10, %s2313_s11 }
 0x103   : > { %v998_v9 = vpop.permute.xlu2 %997 }
 0x104   : > { %v899_v24 = vpop.permute.xlu0 %898 }
 0x105   : > { %v1154_v59 = vsel %vm1022_vm2, %v2616_v6, %v899_v24 }
 0x106   : > { %v1196_v8 = vsel %vm1055_vm3, %v1154_v59, %v941_v44  ;;  %2150 = vmatmul.msk.bf16.gmra.mxu2 %vm1022_vm2, %v2924_v28 }
 0x107   : > { %v1233_v23 = vsel %vm1088_vm4, %v1196_v8, %v996_v57  ;;  %808 = vrot.lane.b32.xlu1 %v2861_v25, %s2312_s10  ;;  %v3057_v10 = vpop.f32.mrf.mxu2  ;;  %v1036_v25 = vsel %vm1022_vm2, %v2504_v13, %v726_v37 }
 0x108   : > { %1583 = vmatmul.bf16.gmra.mxu1 %v1233_v23 }
 0x109   : > { %v955_v5 = vpop.permute.xlu1 %954  ;;  %850 = vrot.lane.b32.xlu2 %v2457_v49, %s2311_s9 }
 0x10a   : > { %735 = vrot.lane.b32.xlu0 %v2912_v21, %s2313_s11 }
 0x10b   : > { %v728_v14 = vpop.permute.xlu2 %727 }
 0x10c   : > { %v913_v6 = vpop.permute.xlu0 %912 }
 0x10d   : > { %v1175_v49 = vsel %vm1022_vm2, %v2656_v20, %v913_v6 }
 0x10e   : > { %v1210_v20 = vsel %vm1055_vm3, %v1175_v49, %v955_v5 }
 0x10f   : > { %952 = vrot.lane.b32.xlu1 %v2582_v54, %s2312_s10  ;;  %v3075_v54 = vld [vmem:[%s3338_s4] ss:$0 sm:$0xff]  ;;  %s1982_s10 = sshll.u32 %s3357_s25, 2  ;;  %v3080_v57 = vpop.f32.mrf.mxu2 }
 0x111   : > { %v799_v28 = vpop.permute.xlu1 %798  ;;  %1007 = vrot.lane.b32.xlu2 %v2753_v47, %s2311_s9  ;;  %s393_s9 = sadd.s32 %s1983_s12, %s1982_s10 }
 0x112   : > { %v1069_v33 = vsel %vm1055_vm3, %v1036_v25, %v799_v28  ;;  %910 = vrot.lane.b32.xlu0 %v2557_v40, %s2313_s11  ;;  %v1559_v61 = vpop.f32.mrf.mxu1  ;;  %s1984_s11 = sshll.u32 %s393_s9, 2 }
 0x113   : > { %v1108_v13 = vsel %vm1088_vm4, %v1069_v33, %v841_v27  ;;  %v843_v48 = vpop.permute.xlu2 %842  ;;  %s3088_s13 = scalar_lea.vmem %s3339_s5, %s1984_s11 }
 0x114   : > { %1499 = vmatmul.bf16.gmra.mxu0 %v1108_v13  ;;  %v1010_v39 = vpop.permute.xlu0 %1009 }
 0x115   : > { %v1470_v38 = vpop.f32.mrf.mxu0  ;;  %v1254_v22 = vsel %vm1088_vm4, %v1210_v20, %v1010_v39 }
 0x116   : > { %v1471_v40 = vadd.f32 %v3075_v54, %v1470_v38  ;;  %1618 = vmatmul.bf16.vlgmr.msrb.gmra.mxu3 %v1254_v22 }
 0x118   : > { %v1560_v53 = vadd.f32 %v1559_v61, %v1471_v40 }
 0x119   : > { %v943_v55 = vpop.permute.xlu1 %942  ;;  %v3094_v18 = vpop.f32.mrf.mxu2 }
 0x11a   : > { %v1649_v37 = vadd.f32 %v2900_v31, %v1560_v53  ;;  %v1561_v58 = vpop.f32.mrf.mxu1 }
 0x11b   : > { %v1000_v59 = vpop.permute.xlu2 %999 }
 0x11c   : > { %v1728_v35 = vmax.f32 %v1649_v37, 0.0  ;;  %v901_v29 = vpop.permute.xlu0 %900 }
 0x11d   : > { %v1157_v56 = vsel %vm1022_vm2, %v2724_v7, %v901_v29  ;;  %v1472_v11 = vpop.f32.mrf.mxu0 }
 0x11e   : > { %v1760_v27 = vpack.c.bf16 %v1728_v35, %v1728_v35  ;;  %v1473_v60 = vadd.f32 %v3075_v54, %v1472_v11  ;;  %v1198_v31 = vsel %vm1055_vm3, %v1157_v56, %v943_v55 }
 0x11f   : > { %v1236_v51 = vsel %vm1088_vm4, %v1198_v31, %v998_v9  ;;  %v1038_v9 = vsel %vm1022_vm2, %v2514_v15, %v728_v14 }
 0x120   : > { %1793 = vst.msk [vmem:[%s3088_s13] sm:$0xf] %vm1792_vm5, %v1760_v27  ;;  %v1562_v0 = vadd.f32 %v1561_v58, %v1473_v60  ;;  %1588 = vmatmul.bf16.gmra.mxu1 %v1236_v51 }
 0x121   : > { %v957_v44 = vpop.permute.xlu1 %956  ;;  %v3103_v28 = vpop.f32.mrf.mxu2 }
 0x122   : > { %v1651_v24 = vadd.f32 %v2932_v46, %v1562_v0 }
 0x123   : > { %v730_v40 = vpop.permute.xlu2 %729 }
 0x124   : > { %v1729_v7 = vmax.f32 %v1651_v24, 0.0  ;;  %v915_v8 = vpop.permute.xlu0 %914 }
 0x125   : > { %v1475_v23 = vpop.f32.mrf.mxu0  ;;  %v1564_v5 = vpop.f32.mrf.mxu1  ;;  %v1178_v33 = vsel %vm1022_vm2, %v2753_v47, %v915_v8 }
 0x126   : > { %v1761_v6 = vpack.c.bf16 %v1729_v7, %v1729_v7  ;;  %v1476_v25 = vadd.f32 %v3075_v54, %v1475_v23  ;;  %v1212_v22 = vsel %vm1055_vm3, %v1178_v33, %v957_v44 }
 0x128   : > { %1794 = vst.msk [vmem:[%s3088_s13 + $0x4] sm:$0xf] %vm1792_vm5, %v1761_v6  ;;  %v1565_v49 = vadd.f32 %v1564_v5, %v1476_v25  ;;  %v1040_v5 = vsel %vm1022_vm2, %v2659_v30, %v730_v40 }
 0x129   : > { %v801_v46 = vpop.permute.xlu1 %800  ;;  %v3118_v35 = vpop.f32.mrf.mxu2 }
 0x12a   : > { %v1654_v61 = vadd.f32 %v2950_v17, %v1565_v49  ;;  %v1071_v13 = vsel %vm1055_vm3, %v1038_v9, %v801_v46 }
 0x12b   : > { %v1111_v39 = vsel %vm1088_vm4, %v1071_v13, %v843_v48  ;;  %v845_v60 = vpop.permute.xlu2 %844 }
 0x12c   : > { %v1730_v20 = vmax.f32 %v1654_v61, 0.0  ;;  %1504 = vmatmul.bf16.gmra.mxu0 %v1111_v39  ;;  %v1012_v38 = vpop.permute.xlu0 %1011 }
 0x12d   : > { %v1477_v53 = vpop.f32.mrf.mxu0  ;;  %v1257_v15 = vsel %vm1088_vm4, %v1212_v22, %v1012_v38  ;;  %v1566_v55 = vpop.f32.mrf.mxu1 }
 0x12e   : > { %v1762_v14 = vpack.c.bf16 %v1730_v20, %v1730_v20  ;;  %v1478_v47 = vadd.f32 %v3075_v54, %v1477_v53  ;;  %1623 = vmatmul.bf16.gmra.mxu3 %v1257_v15 }
 0x130   : > { %1795 = vst.msk [vmem:[%s3088_s13 + $0x8] sm:$0xf] %vm1792_vm5, %v1762_v14  ;;  %v1567_v17 = vadd.f32 %v1566_v55, %v1478_v47 }
 0x131   : > { %v945_v37 = vpop.permute.xlu1 %944  ;;  %v3127_v24 = vpop.f32.mrf.mxu2 }
 0x132   : > { %v1656_v48 = vadd.f32 %v2960_v4, %v1567_v17 }
 0x133   : > { %v1002_v23 = vpop.permute.xlu2 %1001 }
 0x134   : > { %v1731_v29 = vmax.f32 %v1656_v48, 0.0  ;;  %v903_v58 = vpop.permute.xlu0 %902 }
 0x135   : > { %v1160_v56 = vsel %vm1022_vm2, %v2780_v63, %v903_v58  ;;  %v1480_v31 = vpop.f32.mrf.mxu0 }
 0x136   : > { %v1763_v11 = vpack.c.bf16 %v1731_v29, %v1731_v29  ;;  %v1200_v27 = vsel %vm1055_vm3, %v1160_v56, %v945_v37  ;;  %v1481_v4 = vadd.f32 %v3075_v54, %v1480_v31 }
 0x137   : > { %v1239_v51 = vsel %vm1088_vm4, %v1200_v27, %v1000_v59 }
 0x138   : > { %1796 = vst.msk [vmem:[%s3088_s13 + $0xc] sm:$0xf] %vm1792_vm5, %v1763_v11  ;;  %1593 = vmatmul.bf16.gmra.mxu1 %v1239_v51 }
 0x139   : > { %v959_v0 = vpop.permute.xlu1 %958  ;;  %v3141_v20 = vpop.f32.mrf.mxu2 }
 0x13a   : > { %v3152_v29 = vpop.f32.mrf.mxu3 }
 0x13b   : > { %v732_v53 = vpop.permute.xlu2 %731 }
 0x13c   : > { %v917_v44 = vpop.permute.xlu0 %916  ;;  %v1042_v51 = vsel %vm1022_vm2, %v2677_v34, %v732_v53  ;;  %v1018_v53 = vrot.slane %v2929_v50, 1 }
 0x13d   : > { %v1569_v7 = vpop.f32.mrf.mxu1  ;;  %v1181_v59 = vsel %vm1022_vm2, %v2838_v26, %v917_v44  ;;  %v1482_v6 = vpop.f32.mrf.mxu0 }
 0x13e   : > { %v1570_v8 = vadd.f32 %v1569_v7, %v1481_v4  ;;  %v1483_v46 = vadd.f32 %v3075_v54, %v1482_v6  ;;  %v1214_v13 = vsel %vm1055_vm3, %v1181_v59, %v959_v0 }
 0x140   : > { %v1659_v63 = vadd.f32 %v2977_v1, %v1570_v8 }
 0x141   : > { %v803_v25 = vpop.permute.xlu1 %802  ;;  %v3150_v48 = vpop.f32.mrf.mxu2 }
 0x142   : > { %v1732_v49 = vmax.f32 %v1659_v63, 0.0  ;;  %v1073_v9 = vsel %vm1055_vm3, %v1040_v5, %v803_v25  ;;  %v3163_v63 = vpop.f32.mrf.mxu3 }
 0x143   : > { %v1114_v33 = vsel %vm1088_vm4, %v1073_v9, %v845_v60  ;;  %v847_v11 = vpop.permute.xlu2 %846 }
 0x144   : > { %v1764_v61 = vpack.c.bf16 %v1732_v49, %v1732_v49  ;;  %1509 = vmatmul.bf16.gmra.mxu0 %v1114_v33  ;;  %v1014_v1 = vpop.permute.xlu0 %1013 }
 0x145   : > { %v1571_v39 = vpop.f32.mrf.mxu1  ;;  %v1260_v30 = vsel %vm1088_vm4, %v1214_v13, %v1014_v1 }
 0x146   : > { %1797 = vst.msk [vmem:[%s3088_s13 + $0x10] sm:$0xf] %vm1792_vm5, %v1764_v61  ;;  %v1572_v26 = vadd.f32 %v1571_v39, %v1483_v46  ;;  %1628 = vmatmul.bf16.gmra.mxu3 %v1260_v30 }
 0x148   : > { %v1661_v38 = vadd.f32 %v2993_v16, %v1572_v26 }
 0x149   : > { %v947_v22 = vpop.permute.xlu1 %946  ;;  %v1485_v17 = vpop.f32.mrf.mxu0 }
 0x14a   : > { %v1733_v40 = vmax.f32 %v1661_v38, 0.0  ;;  %v1486_v58 = vadd.f32 %v3075_v54, %v1485_v17  ;;  %v3161_v8 = vpop.f32.mrf.mxu2 }
 0x14b   : > { %v1004_v6 = vpop.permute.xlu2 %1003 }
 0x14c   : > { %v1765_v15 = vpack.c.bf16 %v1733_v40, %v1733_v40  ;;  %v905_v14 = vpop.permute.xlu0 %904 }
 0x14d   : > { %v1163_v47 = vsel %vm1022_vm2, %v2854_v19, %v905_v14 }
 0x14e   : > { %1798 = vst.msk [vmem:[%s3088_s13 + $0x14] sm:$0xf] %vm1792_vm5, %v1765_v15  ;;  %v1202_v55 = vsel %vm1055_vm3, %v1163_v47, %v947_v22 }
 0x14f   : > { %v1242_v37 = vsel %vm1088_vm4, %v1202_v55, %v1002_v23 }
 0x150   : > { %1598 = vmatmul.bf16.gmra.mxu1 %v1242_v37 }
 0x151   : > { %v961_v16 = vpop.permute.xlu1 %960  ;;  %v1487_v31 = vpop.f32.mrf.mxu0 }
 0x152   : > { %v3172_v61 = vpop.f32.mrf.mxu3  ;;  %v3174_v39 = vpop.f32.mrf.mxu2 }
 0x153   : > { %v849_v38 = vpop.permute.xlu2 %848 }
 0x154   : > { %v919_v56 = vpop.permute.xlu0 %918 }
 0x155   : > { %v1574_v27 = vpop.f32.mrf.mxu1  ;;  %v1184_v0 = vsel %vm1022_vm2, %v2830_v62, %v919_v56 }
 0x156   : > { %v1575_v60 = vadd.f32 %v1574_v27, %v1486_v58  ;;  %v1216_v34 = vsel %vm1055_vm3, %v1184_v0, %v961_v16 }
 0x158   : > { %v1664_v19 = vadd.f32 %v3005_v3, %v1575_v60  ;;  %v1488_v3 = vadd.f32 %v3075_v54, %v1487_v31 }
 0x159   : > { %v805_v4 = vpop.permute.xlu1 %804 }
 0x15a   : > { %v1734_v44 = vmax.f32 %v1664_v19, 0.0  ;;  %v1075_v7 = vsel %vm1055_vm3, %v1042_v51, %v805_v4 }
 0x15b   : > { %v1117_v23 = vsel %vm1088_vm4, %v1075_v7, %v847_v11  ;;  %v1006_v11 = vpop.permute.xlu2 %1005 }
 0x15c   : > { %v1766_v5 = vpack.c.bf16 %v1734_v44, %v1734_v44  ;;  %1514 = vmatmul.bf16.gmra.mxu0 %v1117_v23  ;;  %v1016_v59 = vpop.permute.xlu0 %1015 }
 0x15d   : > { %v1576_v62 = vpop.f32.mrf.mxu1  ;;  %v1263_v25 = vsel %vm1088_vm4, %v1216_v34, %v1016_v59 }
 0x15e   : > { %1799 = vst.msk [vmem:[%s3088_s13 + $0x18] sm:$0xf] %vm1792_vm5, %v1766_v5  ;;  %v1577_v49 = vadd.f32 %v1576_v62, %v1488_v3  ;;  %1633 = vmatmul.bf16.gmra.mxu3 %v1263_v25  ;;  %v1020_v3 = vrot.slane %v2975_v42, 1 }
 0x160   : > { %v1666_v9 = vadd.f32 %v3017_v52, %v1577_v49  ;;  %v1017_v52 = vrot.slane %v2919_v41, 1  ;;  %v3192_v41 = vpop.f32.mrf.mxu2 }
 0x161   : > { %v949_v33 = vpop.permute.xlu1 %948  ;;  %v1490_v22 = vpop.f32.mrf.mxu0 }
 0x162   : > { %v1735_v46 = vmax.f32 %v1666_v9, 0.0  ;;  %v1019_v14 = vsel %vm745_vm0, %v1017_v52, %v1018_v53  ;;  %v1491_v47 = vadd.f32 %v3075_v54, %v1490_v22 }
 0x163   : > { %v851_v62 = vpop.permute.xlu2 %850 }
 0x164   : > { %v1767_v1 = vpack.c.bf16 %v1735_v46, %v1735_v46  ;;  %v907_v13 = vpop.permute.xlu0 %906 }
 0x165   : > { %v1166_v30 = vsel %vm1022_vm2, %v2912_v21, %v907_v13  ;;  %v3186_v21 = vpop.f32.mrf.mxu3 }
 0x166   : > { %1800 = vst.msk [vmem:[%s3088_s13 + $0x1c] sm:$0xf] %vm1792_vm5, %v1767_v1  ;;  %v1204_v26 = vsel %vm1055_vm3, %v1166_v30, %v949_v33 }
 0x167   : > { %v1245_v40 = vsel %vm1088_vm4, %v1204_v26, %v1004_v6 }
 0x168   : > { %1603 = vmatmul.bf16.gmra.mxu1 %v1245_v40  ;;  %v3207_v59 = vpop.f32.mrf.mxu2 }
 0x169   : > { %v807_v15 = vpop.permute.xlu1 %806  ;;  %v1492_v27 = vpop.f32.mrf.mxu0 }
 0x16c   : > { %v734_v55 = vpop.permute.xlu0 %733 }
 0x16d   : > { %v1044_v17 = vsel %vm1022_vm2, %v2800_v32, %v734_v55  ;;  %v1579_v37 = vpop.f32.mrf.mxu1  ;;  %v1493_v32 = vadd.f32 %v3075_v54, %v1492_v27  ;;  %v3197_v0 = vpop.f32.mrf.mxu3 }
 0x16e   : > { %v1077_v16 = vsel %vm1055_vm3, %v1044_v17, %v807_v15  ;;  %v1580_v58 = vadd.f32 %v1579_v37, %v1491_v47  ;;  %2151 = vmatmul.msk.bf16.vlgmr.msra.gmra.mxu3 %vm1022_vm2, %v1019_v14 }
 0x16f   : > { %v1120_v50 = vsel %vm1088_vm4, %v1077_v16, %v849_v38 }
 0x170   : > { %v1669_v56 = vadd.f32 %v3033_v2, %v1580_v58  ;;  %1519 = vmatmul.bf16.gmra.mxu0 %v1120_v50  ;;  %v3219_v1 = vpop.f32.mrf.mxu2 }
 0x171   : > { %v951_v19 = vpop.permute.xlu1 %950 }
 0x172   : > { %v1736_v60 = vmax.f32 %v1669_v56, 0.0 }
 0x174   : > { %v1768_v31 = vpack.c.bf16 %v1736_v60, %v1736_v60  ;;  %v909_v51 = vpop.permute.xlu0 %908 }
 0x175   : > { %v1169_v4 = vsel %vm1022_vm2, %v2501_v12, %v909_v51  ;;  %v1581_v44 = vpop.f32.mrf.mxu1  ;;  %v1021_v12 = vsel %vm745_vm0, %v1018_v53, %v1020_v3  ;;  %v3216_v42 = vpop.f32.mrf.mxu3 }
 0x176   : > { %1801 = vst.msk [vmem:[%s3088_s13 + $0x20] sm:$0xf] %vm1792_vm5, %v1768_v31  ;;  %v1206_v2 = vsel %vm1055_vm3, %v1169_v4, %v951_v19  ;;  %v1582_v7 = vadd.f32 %v1581_v44, %v1493_v32  ;;  %v1531_v19 = vadd.f32 %v3075_v54, %v3152_v29 }
 0x177   : > { %v1248_v23 = vsel %vm1088_vm4, %v1206_v2, %v1006_v11 }
 0x178   : > { %v1671_v5 = vadd.f32 %v3043_v45, %v1582_v7  ;;  %1608 = vmatmul.bf16.gmra.mxu1 %v1248_v23  ;;  %v3230_v16 = vpop.f32.mrf.mxu2  ;;  %v1533_v7 = vadd.f32 %v3075_v54, %v3163_v63 }
 0x179   : > { %v809_v6 = vpop.permute.xlu1 %808  ;;  %v1495_v45 = vpop.f32.mrf.mxu0 }
 0x17a   : > { %v1737_v34 = vmax.f32 %v1671_v5, 0.0  ;;  %v1496_v30 = vadd.f32 %v3075_v54, %v1495_v45 }
 0x17c   : > { %v1769_v25 = vpack.c.bf16 %v1737_v34, %v1737_v34  ;;  %v736_v49 = vpop.permute.xlu0 %735 }
 0x17d   : > { %v1046_v9 = vsel %vm1022_vm2, %v2803_v36, %v736_v49  ;;  %v1008_v36 = vpop.permute.xlu2 %1007 }
 0x17e   : > { %1802 = vst.msk [vmem:[%s3088_s13 + $0x24] sm:$0xf] %vm1792_vm5, %v1769_v25  ;;  %v1079_v33 = vsel %vm1055_vm3, %v1046_v9, %v809_v6  ;;  %2152 = vmatmul.msk.bf16.gmra.mxu3 %vm1022_vm2, %v1021_v12 }
 0x17f   : > { %v1123_v46 = vsel %vm1088_vm4, %v1079_v33, %v851_v62 }
 0x180   : > { %1524 = vmatmul.bf16.gmra.mxu0 %v1123_v46 }
 0x181   : > { %v953_v13 = vpop.permute.xlu1 %952  ;;  %v3225_v53 = vpop.f32.mrf.mxu3 }
 0x182   : > { %v1497_v47 = vpop.f32.mrf.mxu0 }
 0x183   : > { %v1498_v17 = vadd.f32 %v3075_v54, %v1497_v47  ;;  %v1538_v47 = vadd.f32 %v3075_v54, %v3186_v21 }
 0x184   : > { %v911_v26 = vpop.permute.xlu0 %910 }
 0x185   : > { %v1172_v38 = vsel %vm1022_vm2, %v2566_v43, %v911_v26  ;;  %v1584_v22 = vpop.f32.mrf.mxu1 }
 0x186   : > { %v1208_v40 = vsel %vm1055_vm3, %v1172_v38, %v953_v13  ;;  %v1585_v52 = vadd.f32 %v1584_v22, %v1496_v30 }
 0x187   : > { %v1251_v15 = vsel %vm1088_vm4, %v1208_v40, %v1008_v36  ;;  %v1536_v36 = vadd.f32 %v3075_v54, %v3172_v61 }
 0x188   : > { %v1674_v14 = vadd.f32 %v3057_v10, %v1585_v52  ;;  %1613 = vmatmul.bf16.gmra.mxu1 %v1251_v15  ;;  %v1708_v10 = vpop.f32.mrf.mxu2 }
 0x189   : > { %v3235_v56 = vpop.f32.mrf.mxu3 }
 0x18a   : > { %v1738_v55 = vmax.f32 %v1674_v14, 0.0 }
 0x18c   : > { %v1770_v37 = vpack.c.bf16 %v1738_v55, %v1738_v55 }
 0x18d   : > { %v1586_v43 = vpop.f32.mrf.mxu1 }
 0x18e   : > { %1803 = vst.msk [vmem:[%s3088_s13 + $0x28] sm:$0xf] %vm1792_vm5, %v1770_v37  ;;  %v1587_v58 = vadd.f32 %v1586_v43, %v1498_v17 }
 0x190   : > { %v1676_v50 = vadd.f32 %v3080_v57, %v1587_v58  ;;  %v1710_v5 = vpop.f32.mrf.mxu2 }
 0x191   : > { %v1500_v60 = vpop.f32.mrf.mxu0 }
 0x192   : > { %v1739_v11 = vmax.f32 %v1676_v50, 0.0  ;;  %v1501_v51 = vadd.f32 %v3075_v54, %v1500_v60 }
 0x194   : > { %v1771_v27 = vpack.c.bf16 %v1739_v11, %v1739_v11 }
 0x196   : > { %1804 = vst.msk [vmem:[%s3088_s13 + $0x2c] sm:$0xf] %vm1792_vm5, %v1771_v27 }
 0x198   : > { %v1713_v30 = vpop.f32.mrf.mxu2 }
 0x199   : > { %v1619_v32 = vpop.f32.mrf.mxu3  ;;  %v1502_v34 = vpop.f32.mrf.mxu0 }
 0x19a   : > { %v1620_v31 = vadd.f32 %v1619_v32, %v1531_v19  ;;  %v1503_v12 = vadd.f32 %v3075_v54, %v1502_v34 }
 0x19c   : > { %v1709_v4 = vadd.f32 %v1708_v10, %v1620_v31 }
 0x19d   : > { %v1589_v44 = vpop.f32.mrf.mxu1 }
 0x19e   : > { %v1752_v57 = vmax.f32 %v1709_v4, 0.0  ;;  %v1590_v2 = vadd.f32 %v1589_v44, %v1501_v51 }
 0x1a0   : > { %v1784_v23 = vpack.c.bf16 %v1752_v57, %v1752_v57  ;;  %v1679_v3 = vadd.f32 %v3094_v18, %v1590_v2  ;;  %v1715_v37 = vpop.f32.mrf.mxu2 }
 0x1a1   : > { %v1621_v6 = vpop.f32.mrf.mxu3 }
 0x1a2   : > { %1817 = vst.msk [vmem:[%s3088_s13 + $0x60] sm:$0xf] %vm1792_vm5, %v1784_v23  ;;  %v1740_v29 = vmax.f32 %v1679_v3, 0.0  ;;  %v1622_v62 = vadd.f32 %v1621_v6, %v1533_v7 }
 0x1a4   : > { %v1772_v25 = vpack.c.bf16 %v1740_v29, %v1740_v29  ;;  %v1711_v49 = vadd.f32 %v1710_v5, %v1622_v62 }
 0x1a5   : > { %v1591_v9 = vpop.f32.mrf.mxu1 }
 0x1a6   : > { %1805 = vst.msk [vmem:[%s3088_s13 + $0x30] sm:$0xf] %vm1792_vm5, %v1772_v25  ;;  %v1753_v63 = vmax.f32 %v1711_v49, 0.0  ;;  %v1592_v33 = vadd.f32 %v1591_v9, %v1503_v12 }
 0x1a8   : > { %v1785_v45 = vpack.c.bf16 %v1753_v63, %v1753_v63  ;;  %v1681_v18 = vadd.f32 %v3103_v28, %v1592_v33 }
 0x1a9   : > { %v1505_v26 = vpop.f32.mrf.mxu0 }
 0x1aa   : > { %1818 = vst.msk [vmem:[%s3088_s13 + $0x64] sm:$0xf] %vm1792_vm5, %v1785_v45  ;;  %v1741_v46 = vmax.f32 %v1681_v18, 0.0  ;;  %v1506_v40 = vadd.f32 %v3075_v54, %v1505_v26 }
 0x1ac   : > { %v1773_v13 = vpack.c.bf16 %v1741_v46, %v1741_v46 }
 0x1ae   : > { %1806 = vst.msk [vmem:[%s3088_s13 + $0x34] sm:$0xf] %vm1792_vm5, %v1773_v13 }
 0x1b1   : > { %v1624_v38 = vpop.f32.mrf.mxu3  ;;  %v1507_v43 = vpop.f32.mrf.mxu0 }
 0x1b2   : > { %v1625_v22 = vadd.f32 %v1624_v38, %v1536_v36  ;;  %v1508_v11 = vadd.f32 %v3075_v54, %v1507_v43 }
 0x1b4   : > { %v1714_v52 = vadd.f32 %v1713_v30, %v1625_v22  ;;  %v1541_v22 = vadd.f32 %v3075_v54, %v3197_v0  ;;  %v1543_v0 = vadd.f32 %v3075_v54, %v3216_v42  ;;  %v1546_v42 = vadd.f32 %v3075_v54, %v3225_v53 }
 0x1b5   : > { %v1594_v15 = vpop.f32.mrf.mxu1 }
 0x1b6   : > { %v1754_v28 = vmax.f32 %v1714_v52, 0.0  ;;  %v1595_v14 = vadd.f32 %v1594_v15, %v1506_v40 }
 0x1b8   : > { %v1786_v55 = vpack.c.bf16 %v1754_v28, %v1754_v28  ;;  %v1684_v17 = vadd.f32 %v3118_v35, %v1595_v14 }
 0x1b9   : > { %v1626_v58 = vpop.f32.mrf.mxu3 }
 0x1ba   : > { %1819 = vst.msk [vmem:[%s3088_s13 + $0x68] sm:$0xf] %vm1792_vm5, %v1786_v55  ;;  %v1742_v61 = vmax.f32 %v1684_v17, 0.0  ;;  %v1627_v50 = vadd.f32 %v1626_v58, %v1538_v47 }
 0x1bc   : > { %v1774_v27 = vpack.c.bf16 %v1742_v61, %v1742_v61  ;;  %v1716_v10 = vadd.f32 %v1715_v37, %v1627_v50 }
 0x1bd   : > { %v1596_v60 = vpop.f32.mrf.mxu1 }
 0x1be   : > { %1807 = vst.msk [vmem:[%s3088_s13 + $0x38] sm:$0xf] %vm1792_vm5, %v1774_v27  ;;  %v1755_v21 = vmax.f32 %v1716_v10, 0.0  ;;  %v1597_v19 = vadd.f32 %v1596_v60, %v1508_v11 }
 0x1c0   : > { %v1787_v32 = vpack.c.bf16 %v1755_v21, %v1755_v21  ;;  %v1686_v35 = vadd.f32 %v3127_v24, %v1597_v19 }
 0x1c1   : > { %v1510_v4 = vpop.f32.mrf.mxu0 }
 0x1c2   : > { %1820 = vst.msk [vmem:[%s3088_s13 + $0x6c] sm:$0xf] %vm1792_vm5, %v1787_v32  ;;  %v1743_v31 = vmax.f32 %v1686_v35, 0.0  ;;  %v1511_v44 = vadd.f32 %v3075_v54, %v1510_v4 }
 0x1c4   : > { %v1775_v51 = vpack.c.bf16 %v1743_v31, %v1743_v31 }
 0x1c6   : > { %1808 = vst.msk [vmem:[%s3088_s13 + $0x3c] sm:$0xf] %vm1792_vm5, %v1775_v51 }
 0x1c9   : > { %v1629_v7 = vpop.f32.mrf.mxu3  ;;  %v1512_v3 = vpop.f32.mrf.mxu0 }
 0x1ca   : > { %v1513_v24 = vadd.f32 %v3075_v54, %v1512_v3  ;;  %v1630_v52 = vadd.f32 %v1629_v7, %v1541_v22 }
 0x1cd   : > { %v1599_v57 = vpop.f32.mrf.mxu1 }
 0x1ce   : > { %v1600_v2 = vadd.f32 %v1599_v57, %v1511_v44 }
 0x1d0   : > { %v1689_v23 = vadd.f32 %v3141_v20, %v1600_v2 }
 0x1d1   : > { %v1631_v12 = vpop.f32.mrf.mxu3 }
 0x1d2   : > { %v1744_v5 = vmax.f32 %v1689_v23, 0.0  ;;  %v1632_v50 = vadd.f32 %v1631_v12, %v1543_v0 }
 0x1d4   : > { %v1776_v34 = vpack.c.bf16 %v1744_v5, %v1744_v5  ;;  %v1548_v5 = vadd.f32 %v3075_v54, %v3235_v56 }
 0x1d5   : > { %v1601_v6 = vpop.f32.mrf.mxu1 }
 0x1d6   : > { %1809 = vst.msk [vmem:[%s3088_s13 + $0x40] sm:$0xf] %vm1792_vm5, %v1776_v34  ;;  %v1602_v29 = vadd.f32 %v1601_v6, %v1513_v24 }
 0x1d8   : > { %v1691_v62 = vadd.f32 %v3150_v48, %v1602_v29 }
 0x1d9   : > { %v1515_v49 = vpop.f32.mrf.mxu0 }
 0x1da   : > { %v1745_v25 = vmax.f32 %v1691_v62, 0.0  ;;  %v1516_v20 = vadd.f32 %v3075_v54, %v1515_v49 }
 0x1dc   : > { %v1777_v9 = vpack.c.bf16 %v1745_v25, %v1745_v25 }
 0x1de   : > { %1810 = vst.msk [vmem:[%s3088_s13 + $0x44] sm:$0xf] %vm1792_vm5, %v1777_v9 }
 0x1e1   : > { %v1634_v63 = vpop.f32.mrf.mxu3  ;;  %v1517_v33 = vpop.f32.mrf.mxu0 }
 0x1e2   : > { %v1518_v26 = vadd.f32 %v3075_v54, %v1517_v33  ;;  %v1635_v4 = vadd.f32 %v1634_v63, %v1546_v42 }
 0x1e5   : > { %v1604_v45 = vpop.f32.mrf.mxu1 }
 0x1e6   : > { %v1605_v18 = vadd.f32 %v1604_v45, %v1516_v20 }
 0x1e8   : > { %v1694_v46 = vadd.f32 %v3161_v8, %v1605_v18 }
 0x1e9   : > { %v1636_v13 = vpop.f32.mrf.mxu3 }
 0x1ea   : > { %v1746_v30 = vmax.f32 %v1694_v46, 0.0  ;;  %v1637_v6 = vadd.f32 %v1636_v13, %v1548_v5 }
 0x1ec   : > { %v1778_v48 = vpack.c.bf16 %v1746_v30, %v1746_v30 }
 0x1ed   : > { %v1520_v36 = vpop.f32.mrf.mxu0  ;;  %v1606_v38 = vpop.f32.mrf.mxu1 }
 0x1ee   : > { %1811 = vst.msk [vmem:[%s3088_s13 + $0x48] sm:$0xf] %vm1792_vm5, %v1778_v48  ;;  %v1607_v40 = vadd.f32 %v1606_v38, %v1518_v26  ;;  %v1521_v47 = vadd.f32 %v3075_v54, %v1520_v36 }
 0x1f0   : > { %v1696_v15 = vadd.f32 %v3174_v39, %v1607_v40 }
 0x1f1   : > { %v1718_v28 = vpop.f32.mrf.mxu3 }
 0x1f2   : > { %v1747_v8 = vmax.f32 %v1696_v15, 0.0  ;;  %v1719_v14 = vadd.f32 %v1718_v28, %v1630_v52 }
 0x1f4   : > { %v1779_v55 = vpack.c.bf16 %v1747_v8, %v1747_v8  ;;  %v1756_v17 = vmax.f32 %v1719_v14, 0.0 }
 0x1f5   : > { %v1522_v37 = vpop.f32.mrf.mxu0  ;;  %v1609_v43 = vpop.f32.mrf.mxu1 }
 0x1f6   : > { %1812 = vst.msk [vmem:[%s3088_s13 + $0x4c] sm:$0xf] %vm1792_vm5, %v1779_v55  ;;  %v1788_v58 = vpack.c.bf16 %v1756_v17, %v1756_v17  ;;  %v1610_v61 = vadd.f32 %v1609_v43, %v1521_v47  ;;  %v1523_v60 = vadd.f32 %v3075_v54, %v1522_v37 }
 0x1f8   : > { %1821 = vst.msk [vmem:[%s3088_s13 + $0x70] sm:$0xf] %vm1792_vm5, %v1788_v58  ;;  %v1699_v39 = vadd.f32 %v3192_v41, %v1610_v61 }
 0x1f9   : > { %v1720_v11 = vpop.f32.mrf.mxu3 }
 0x1fa   : > { %v1748_v27 = vmax.f32 %v1699_v39, 0.0  ;;  %v1721_v10 = vadd.f32 %v1720_v11, %v1632_v50 }
 0x1fc   : > { %v1780_v21 = vpack.c.bf16 %v1748_v27, %v1748_v27  ;;  %v1757_v19 = vmax.f32 %v1721_v10, 0.0 }
 0x1fd   : > { %v1611_v32 = vpop.f32.mrf.mxu1  ;;  %v1525_v51 = vpop.f32.mrf.mxu0 }
 0x1fe   : > { %1813 = vst.msk [vmem:[%s3088_s13 + $0x50] sm:$0xf] %vm1792_vm5, %v1780_v21  ;;  %v1789_v35 = vpack.c.bf16 %v1757_v19, %v1757_v19  ;;  %v1612_v31 = vadd.f32 %v1611_v32, %v1523_v60  ;;  %v1526_v7 = vadd.f32 %v3075_v54, %v1525_v51 }
 0x200   : > { %1822 = vst.msk [vmem:[%s3088_s13 + $0x74] sm:$0xf] %vm1792_vm5, %v1789_v35  ;;  %v1701_v41 = vadd.f32 %v3207_v59, %v1612_v31 }
 0x201   : > { %v1723_v44 = vpop.f32.mrf.mxu3 }
 0x202   : > { %v1749_v57 = vmax.f32 %v1701_v41, 0.0  ;;  %v1724_v2 = vadd.f32 %v1723_v44, %v1635_v4 }
 0x204   : > { %v1781_v23 = vpack.c.bf16 %v1749_v57, %v1749_v57  ;;  %v1758_v3 = vmax.f32 %v1724_v2, 0.0 }
 0x205   : > { %v1614_v53 = vpop.f32.mrf.mxu1  ;;  %v1527_v29 = vpop.f32.mrf.mxu0 }
 0x206   : > { %1814 = vst.msk [vmem:[%s3088_s13 + $0x54] sm:$0xf] %vm1792_vm5, %v1781_v23  ;;  %v1790_v24 = vpack.c.bf16 %v1758_v3, %v1758_v3  ;;  %v1615_v34 = vadd.f32 %v1614_v53, %v1526_v7  ;;  %v1528_v49 = vadd.f32 %v3075_v54, %v1527_v29 }
 0x208   : > { %1823 = vst.msk [vmem:[%s3088_s13 + $0x78] sm:$0xf] %vm1792_vm5, %v1790_v24  ;;  %v1704_v59 = vadd.f32 %v3219_v1, %v1615_v34 }
 0x209   : > { %v1725_v62 = vpop.f32.mrf.mxu3 }
 0x20a   : > { %v1750_v12 = vmax.f32 %v1704_v59, 0.0  ;;  %v1726_v25 = vadd.f32 %v1725_v62, %v1637_v6 }
 0x20c   : > { %v1782_v9 = vpack.c.bf16 %v1750_v12, %v1750_v12  ;;  %v1759_v63 = vmax.f32 %v1726_v25, 0.0 }
 0x20d   : > { %v1616_v56 = vpop.f32.mrf.mxu1 }
 0x20e   : > { %1815 = vst.msk [vmem:[%s3088_s13 + $0x58] sm:$0xf] %vm1792_vm5, %v1782_v9  ;;  %v1791_v20 = vpack.c.bf16 %v1759_v63, %v1759_v63  ;;  %v1617_v33 = vadd.f32 %v1616_v56, %v1528_v49 }
 0x210   : > { %1824 = vst.msk [vmem:[%s3088_s13 + $0x7c] sm:$0xf] %vm1792_vm5, %v1791_v20  ;;  %v1706_v45 = vadd.f32 %v3230_v16, %v1617_v33 }
 0x212   : > { %v1751_v18 = vmax.f32 %v1706_v45, 0.0 }
 0x214   : > { %v1783_v1 = vpack.c.bf16 %v1751_v18, %v1751_v18 }
 0x216   : > { %1816 = vst.msk [vmem:[%s3088_s13 + $0x5c] sm:$0xf] %vm1792_vm5, %v1783_v1 }
 0x217 PF: > { %s15_s22 = sadd.s32 1, %s2309_s22   ;;  %s3340_s18 = smov %s2301_s20 }
 0x218   : > { %p12_p10 = scmp.ge.s32.totalorder %s15_s22, 10   ;;  %s3341_s19 = smov %s2305_s21 }
 0x219   : > { %s3342_s20 = smov %s3345_s23  ;;  %s3343_s21 = smov %s3349_s24 }
 0x21a   :  { %14 = sbr.rel (!%p12_p10) target bundleno = 3 (0x3), region = 76 }

// kernel: edgepoint_forward.22
= control target key start
LH: loop header
LB: loop body
LE: loop exit
PB: predicated region body
PF: predicated region fallthrough
CT: control target
= control target key end

     0   :  { %s1374_s18 = smov 0   ;;  %s1376_s19 = smov 0   ;;  %s1699_s0 = inlined_call_operand.vmem [shape: bf16[2,18,18,32], index: 0, kind: input, shape index: {}, may-alias: {0,1,2}]   ;;  %s1700_s1 = inlined_call_operand.vmem [shape: bf16[2,18,18,32], index: 1, kind: input, shape index: {}, may-alias: {0,1,2}]   ;;  %s1701_s2 = inlined_call_operand.vmem [shape: bf16[2,18,18,32], index: 2, kind: input, shape index: {}, may-alias: {0,1,2}]   ;;  %s1702_s3 = inlined_call_operand.vmem [shape: bf16[288,64], index: 3, kind: input, shape index: {}]   ;;  %s1703_s4 = inlined_call_operand.vmem [shape: f32[1,64], index: 4, kind: input, shape index: {}]   ;;  %s1704_s5 = inlined_call_operand.vmem [shape: bf16[2,16,16,64], index: 5, kind: output, shape index: {}]  }
   0x1   :  { %s1378_s20 = smov 0   ;;  %s1380_s21 = smov 0  }
   0x2   :  { %s1382_s22 = smov 0  }
   0x3 LB: > { %s24_s23 = sadd.s32 1, %s1331_s20  ;;  %s27_s24 = sadd.s32 1, %s1335_s21  ;;  %s1339_s22 = sphi %s1382_s22, %s15_s22   ;;  %s1335_s21 = sphi %s1380_s21, %s1708_s21   ;;  %s1331_s20 = sphi %s1378_s20, %s1707_s20   ;;  %s1327_s19 = sphi %s1376_s19, %s1706_s19   ;;  %s1323_s18 = sphi %s1374_s18, %s1705_s18  }
   0x4   : > { %p25_p0 = scmp.ge.s32.totalorder %s24_s23, 4  ;;  %p1088_p1 = scmp.ge.s32.totalorder %s1339_s22, 1 }
   0x5   : > { %p271_p2 = scmp.lt.s32.totalorder %s1339_s22, 9 }
   0x6   : > { %s1710_s23 = smov (%p25_p0, %s24_s23), 0  ;;  %s1712_s24 = smov (!%p25_p0, %s27_s24), %s1335_s21 }
   0x7   : > { %p272_p3 = pnand %p1088_p1, %p271_p2  ;;  %p29_p4 = scmp.ge.s32.totalorder %s1712_s24, 2 }
   0x8   : > { %s1404_s25 = sshll.u32 (!%p272_p3), %s1323_s18, 2  ;;  %p343_p5 = scmp.lt.s32.totalorder (!%p272_p3), %s1327_s19, 1 }
   0x9   : > { %s1714_s24 = smov (%p29_p4, %s1712_s24), 0  ;;  %275 = sbr.rel (%p272_p3) target bundleno = 346 (0x15a), region = 40 }
   0xa   : > { %p345_p6 = scmp.lt.s32.totalorder (!%p272_p3), %s1404_s25, 17  ;;  %s1415_s30 = sadd.s32 (!%p272_p3), 4, %s1404_s25 }
   0xb   : > { %p362_p7 = scmp.lt.s32.totalorder (!%p272_p3), %s1415_s30, 17  ;;  %s1341_s10 = smov (!%p272_p3), 96  }
   0xc   : > { %s1342_s11 = smov (!%p272_p3), 64   ;;  %s1343_s14 = smov (!%p272_p3), 32  }
   0xd   : > { %s373_s17 = sadd.s32 (!%p272_p3), 1, %s1415_s30  ;;  %p389_p9 = scmp.lt.s32.totalorder (!%p272_p3), %s1404_s25, 15 }
   0xe   : > { %s1716_s19 = smov (!%p343_p5, %s1327_s19), 1  ;;  %vm505_vm0 = vcmask 1046528   ;;  %vm448_vm1 = vsmask.f32 7424  ;;  %p376_p8 = scmp.lt.s32.totalorder %s373_s17, 17  ;;  %vm604_vm2 = vcmask 261120  }
   0xf   : > { %s346_s26 = scalar_select %p345_p6, %s1404_s25, 17  ;;  %vm613_vm3 = vcmask 523264   ;;  %vm622_vm4 = vcmask 785408   ;;  %vm930_vm5 = vcmask 519168  }
  0x10   : > { %s1411_s27 = smul.u32 54, %s1716_s19  ;;  %s1718_s17 = smov (!%p376_p8, %s373_s17), 17 }
  0x11   : > { %s1253_s28 = smul.u32 3, %s346_s26  ;;  %s1720_s25 = smov (!%p389_p9, %s1404_s25), 15 }
  0x12   : > { %s363_s12 = scalar_select %p362_p7, %s1415_s30, 17 }
  0x13   : > { %s349_s29 = sadd.s32 %s1411_s27, %s1253_s28 }
  0x14   : > { %s1090_s6 = sshll.u32 %s349_s29, 2  ;;  %s1255_s13 = smul.u32 3, %s363_s12 }
  0x15   : > { %s1420_s9 = scalar_lea.vmem %s1699_s0, %s1090_s6  ;;  %s1256_s29 = smul.u32 3, %s1718_s17 }
  0x16   : > { %v1423_v0 = vld [vmem:[%s1420_s9 + $0x18] sm:$0xff]  ;;  %v1426_v1 = vld [vmem:[%s1420_s9 + $0xc] sm:$0xff]  ;;  %v403_v2 = vld [vmem:[%s1420_s9 + $0x14] sm:$0x1]  ;;  %s366_s15 = sadd.s32 %s1255_s13, %s1411_s27 }
  0x17   : > { %v441_v3 = vunpack.c.l.b16 %v403_v2  ;;  %v406_v4 = vld [vmem:[%s1420_s9 + $0x20] sm:$0x1]  ;;  %v1432_v5 = vld [vmem:[%s1420_s9 + $0x24] sm:$0xff]  ;;  %v409_v6 = vld [vmem:[%s1420_s9 + $0x2c] sm:$0x1]  ;;  %533 = vrot.lane.b32.xlu1 %v1423_v0, %s1341_s10  ;;  %v509_v9 = vrot.slane %v1426_v1, 1  ;;  %s380_s30 = sadd.s32 %s1256_s29, %s1411_s27 }
  0x18   : > { %v442_v7 = vunpack.c.l.b16 %v406_v4  ;;  %v464_v10 = vshll.u32 %v1426_v1, 16  ;;  %572 = vrot.lane.b32.xlu2 %v1432_v5, %s1342_s11  ;;  %v512_v12 = vrot.slane %v1423_v0, 1  ;;  %v443_v13 = vunpack.c.l.b16 %v409_v6  ;;  %v400_v25 = vld [vmem:[%s1420_s9 + $0x8] sm:$0x1]  ;;  %v1468_v35 = vld [vmem:[%s1420_s9] sm:$0xff]  ;;  %s1092_s16 = sshll.u32 %s366_s15, 2 }
  0x19   : > { %v445_v8 = vpack.c.b16 %v441_v3, %v441_v3  ;;  %v462_v15 = vshrl.u32 %v1426_v1, 16  ;;  %v476_v24 = vshll.u32 %v1423_v0, 16  ;;  %v486_v26 = vshrl.u32 %v1432_v5, 16  ;;  %s368_s28 = scalar_lea.vmem %s1700_s1, %s1092_s16  ;;  %v1508_v6 = vld [vmem:[%s1702_s3 + $0x78] sm:$0xff]  ;;  %s1094_s8 = sshll.u32 %s380_s30, 2 }
  0x1a   : > { %v446_v11 = vpack.c.b16 %v442_v7, %v442_v7  ;;  %v466_v16 = vrot.slane %v464_v10, 1  ;;  %v447_v21 = vpack.c.b16 %v443_v13, %v443_v13  ;;  %v488_v27 = vshll.u32 %v1432_v5, 16  ;;  %v412_v45 = vld [vmem:[%s368_s28 + $0x8] sm:$0x1]  ;;  %v1217_v54 = vld [vmem:[%s368_s28] sm:$0xff]  ;;  %v1226_v7 = vld [vmem:[%s1702_s3 + $0x38] sm:$0xff]  ;;  %1245 = vmatpush.bf16.msra.mxu1 %v1508_v6  ;;  %s382_s26 = scalar_lea.vmem %s1701_s2, %s1094_s8 }
  0x1b   : > { %v510_v14 = vrot.slane %v445_v8, 1  ;;  %v469_v17 = vshll.u32 %v445_v8, 16  ;;  %v474_v29 = vshrl.u32 %v1423_v0, 16  ;;  %v478_v33 = vrot.slane %v476_v24, 1  ;;  %v1519_v8 = vld [vmem:[%s1702_s3 + $0x70] sm:$0xff]  ;;  %1237 = vmatpush.bf16.msra.mxu3 %v1226_v7  ;;  %827 = vmatpush.bf16.msra.mxu0 %v1226_v7 }
  0x1c   : > { %v513_v18 = vrot.slane %v446_v11, 1  ;;  %v467_v22 = vor.u32 %v466_v16, %v462_v15  ;;  %v493_v28 = vshll.u32 %v447_v21, 16  ;;  %v490_v30 = vrot.slane %v488_v27, 1  ;;  %v415_v10 = vld [vmem:[%s382_s26 + $0x8] sm:$0x1]  ;;  %v1231_v15 = vld [vmem:[%s1702_s3 + $0x60] sm:$0xff] }
  0x1d   : > { %v1447_v19 = vsel %vm505_vm0, %v509_v9, %v510_v14  ;;  %v471_v23 = vrot.slane %v469_v17, 1  ;;  %v481_v34 = vshll.u32 %v446_v11, 16  ;;  %v440_v36 = vunpack.c.l.b16 %v400_v25  ;;  %v1225_v9 = vld [vmem:[%s1702_s3 + $0x30] sm:$0xff]  ;;  %v1533_v11 = vld [vmem:[%s1702_s3 + $0x68] sm:$0xff]  ;;  %v1541_v14 = vld [vmem:[%s382_s26] sm:$0xff] }
  0x1e   : > { %520 = vrot.lane.b32.xlu0 %v1447_v19, %s1342_s11  ;;  %v1452_v20 = vsel %vm505_vm0, %v512_v12, %v513_v18  ;;  %v495_v31 = vrot.slane %v493_v28, 1  ;;  %v491_v37 = vor.u32 %v490_v30, %v486_v26  ;;  %v479_v39 = vor.u32 %v478_v33, %v474_v29  ;;  %1246 = vmatpush.bf16.msra.mxu1 %v1519_v8  ;;  %v1224_v12 = vld [vmem:[%s1702_s3 + $0x28] sm:$0xff]  ;;  %v1230_v29 = vld [vmem:[%s1702_s3 + $0x58] sm:$0xff]  ;;  %v1235_v33 = vld [vmem:[%s1702_s3 + $0x80] sm:$0xff] }
  0x1f   : > { %559 = vrot.lane.b32.xlu1 %v1452_v20, %s1343_s14  ;;  %v1465_v32 = vsel %vm448_vm1, %v467_v22, %v471_v23  ;;  %v483_v40 = vrot.slane %v481_v34, 1  ;;  %v444_v41 = vpack.c.b16 %v440_v36, %v440_v36  ;;  %v452_v42 = vshll.u32 %v1468_v35, 16  ;;  %1238 = vmatpush.bf16.msra.mxu3 %v1225_v9  ;;  %v1236_v30 = vld [vmem:[%s1702_s3 + $0x88] sm:$0xff]  ;;  %v1222_v34 = vld [vmem:[%s1702_s3 + $0x18] sm:$0xff] }
  0x20   : > { %535 = vrot.lane.b32.xlu2 %v1432_v5, %s1341_s10  ;;  %v1474_v38 = vsel %vm448_vm1, %v491_v37, %v495_v31  ;;  %v515_v43 = vrot.slane %v1432_v5, 1  ;;  %v516_v44 = vrot.slane %v447_v21, 1  ;;  %v450_v47 = vshrl.u32 %v1468_v35, 16  ;;  %828 = vmatpush.bf16.msra.mxu0 %v1225_v9  ;;  %v1223_v31 = vld [vmem:[%s1702_s3 + $0x20] sm:$0xff]  ;;  %v1228_v36 = vld [vmem:[%s1702_s3 + $0x48] sm:$0xff]  ;;  %v1221_v37 = vld [vmem:[%s1702_s3 + $0x10] sm:$0xff] }
  0x21   : > { %v1486_v46 = vsel %vm448_vm1, %v479_v39, %v483_v40  ;;  %v454_v48 = vrot.slane %v452_v42, 1  ;;  %v457_v49 = vshll.u32 %v444_v41, 16  ;;  %v540_v50 = vunpack.c.l.b16 %v412_v45  ;;  %891 = vmatpush.bf16.msra.mxu2 %v1236_v30  ;;  %v1227_v39 = vld [vmem:[%s1702_s3 + $0x40] sm:$0xff]  ;;  %v1220_v40 = vld [vmem:[%s1702_s3 + $0x8] sm:$0xff] }
  0x22   : > { %v506_v51 = vrot.slane %v1468_v35, 1  ;;  %v507_v52 = vrot.slane %v444_v41, 1  ;;  %v1491_v53 = vsel %vm505_vm0, %v515_v43, %v516_v44  ;;  %v545_v59 = vshll.u32 %v1217_v54, 16  ;;  %1247 = vmatpush.bf16.msra.mxu1 %v1533_v11 }
  0x23   : > { %v455_v56 = vor.u32 %v454_v48, %v450_v47  ;;  %v459_v57 = vrot.slane %v457_v49, 1  ;;  %v541_v58 = vpack.c.b16 %v540_v50, %v540_v50  ;;  %v543_v60 = vshrl.u32 %v1217_v54, 16  ;;  %1239 = vmatpush.bf16.msra.mxu3 %v1224_v12 }
  0x24   : > { %v508_v55 = vsel %vm505_vm0, %v506_v51, %v507_v52  ;;  %v547_v61 = vrot.slane %v545_v59, 1  ;;  %v579_v13 = vunpack.c.l.b16 %v415_v10  ;;  %v554_v16 = vrot.slane %v1217_v54, 1  ;;  %829 = vmatpush.bf16.msra.mxu0 %v1224_v12 }
  0x25   : > { %v550_v62 = vshll.u32 %v541_v58, 16  ;;  %v460_v63 = vsel %vm448_vm1, %v455_v56, %v459_v57  ;;  %v555_v17 = vrot.slane %v541_v58, 1  ;;  %v584_v21 = vshll.u32 %v1541_v14, 16  ;;  %892 = vmatpush.bf16.msra.mxu2 %v1235_v33 }
  0x26   : > { %499 = vrot.lane.b32.xlu0 %v1465_v32, %s1343_s14  ;;  %v548_v2 = vor.u32 %v547_v61, %v543_v60  ;;  %v1548_v18 = vpack.c.b16 %v579_v13, %v579_v13  ;;  %1248 = vmatpush.bf16.msra.mxu1 %v1231_v15  ;;  %v582_v23 = vshrl.u32 %v1541_v14, 16  ;;  %v601_v56 = vrot.slane %v1541_v14, 1 }
  0x27   : > { %522 = vrot.lane.b32.xlu1 %v1452_v20, %s1342_s11  ;;  %v552_v3 = vrot.slane %v550_v62, 1  ;;  %v556_v22 = vsel %vm505_vm0, %v554_v16, %v555_v17  ;;  %v586_v24 = vrot.slane %v584_v21, 1  ;;  %1240 = vmatpush.bf16.msra.mxu3 %v1223_v31 }
  0x28   : > { %595 = vrot.lane.b32.xlu2 %v1474_v38, %s1341_s10  ;;  %v589_v25 = vshll.u32 %v1548_v18, 16  ;;  %830 = vmatpush.bf16.msra.mxu0 %v1223_v31  ;;  %v1651_v31 = vld [vmem:[%s1703_s4] ss:$0 sm:$0xff] }
  0x29   : > { %v1503_v4 = vsel %vm448_vm1, %v548_v2, %v552_v3  ;;  %v587_v26 = vor.u32 %v586_v24, %v582_v23  ;;  %1195 = vmatmul.msk.bf16.vlgmr.msra.gmra.mxu2 %vm604_vm2, %v1452_v20  ;;  %v1219_v20 = vld [vmem:[%s1702_s3] sm:$0xff] }
  0x2a   : > { %v591_v27 = vrot.slane %v589_v25, 1  ;;  %1249 = vmatpush.bf16.msra.mxu1 %v1230_v29 }
  0x2b   : > { %1241 = vmatpush.bf16.msra.mxu3 %v1222_v34 }
  0x2c   : > { %v592_v28 = vsel %vm448_vm1, %v587_v26, %v591_v27  ;;  %831 = vmatpush.bf16.msra.mxu0 %v1222_v34 }
  0x2e   : > { %501 = vrot.lane.b32.xlu0 %v1486_v46, %s1343_s14 }
  0x2f   : > { %561 = vrot.lane.b32.xlu1 %v1491_v53, %s1343_s14  ;;  %1242 = vmatpush.bf16.msra.mxu3 %v1221_v37 }
  0x30   : > { %518 = vrot.lane.b32.xlu2 %v508_v55, %s1342_s11  ;;  %832 = vmatpush.bf16.msra.mxu0 %v1221_v37 }
  0x33   : > { %1243 = vmatpush.bf16.msra.mxu3 %v1220_v40 }
  0x34   : > { %833 = vmatpush.bf16.msra.mxu0 %v1220_v40 }
  0x36   : > { %497 = vrot.lane.b32.xlu0 %v460_v63, %s1343_s14 }
  0x37   : > { %531 = vrot.lane.b32.xlu1 %v1426_v1, %s1341_s10  ;;  %1244 = vmatpush.bf16.msra.mxu3 %v1219_v20 }
  0x38   : > { %597 = vrot.lane.b32.xlu2 %v1503_v4, %s1341_s10  ;;  %834 = vmatpush.bf16.msra.mxu0 %v1219_v20 }
  0x39   : > { %1196 = vmatmul.msk.bf16.gmra.mxu2 %vm604_vm2, %v1491_v53 }
  0x3c   : > { %856 = vmatpush.bf16.msrb.mxu0 %v1508_v6 }
  0x3e   : > { %574 = vrot.lane.b32.xlu0 %v1217_v54, %s1342_s11 }
  0x3f   : > { %524 = vrot.lane.b32.xlu1 %v1491_v53, %s1342_s11 }
  0x40   : > { %537 = vrot.lane.b32.xlu2 %v1217_v54, %s1341_s10  ;;  %857 = vmatpush.bf16.msrb.mxu0 %v1519_v8 }
  0x44   : > { %858 = vmatpush.bf16.msrb.mxu0 %v1533_v11 }
  0x46   : > { %503 = vrot.lane.b32.xlu0 %v1474_v38, %s1343_s14 }
  0x47   : > { %563 = vrot.lane.b32.xlu1 %v556_v22, %s1343_s14 }
  0x48   : > { %570 = vrot.lane.b32.xlu2 %v1423_v0, %s1342_s11  ;;  %859 = vmatpush.bf16.msrb.mxu0 %v1231_v15 }
  0x49   : > { %1197 = vmatmul.msk.bf16.gmra.mxu2 %vm604_vm2, %v556_v22 }
  0x4c   : > { %860 = vmatpush.bf16.msrb.mxu0 %v1230_v29 }
  0x4e   : > { %557 = vrot.lane.b32.xlu0 %v1447_v19, %s1343_s14  ;;  %v1229_v19 = vld [vmem:[%s1702_s3 + $0x50] sm:$0xff]  ;;  %s1097_s14 = sshll.u32 %s1716_s19, 5 }
  0x4f   : > { %593 = vrot.lane.b32.xlu1 %v1486_v46, %s1341_s10  ;;  %1250 = vmatpush.bf16.msra.mxu1 %v1229_v19 }
  0x50   : > { %599 = vrot.lane.b32.xlu2 %v592_v28, %s1341_s10  ;;  %861 = vmatpush.bf16.msrb.mxu0 %v1229_v19  ;;  %s1096_s10 = sshll.u32 %s1720_s25, 1 }
  0x51   : > { %s393_s17 = sadd.s32 %s1097_s14, %s1096_s10 }
  0x52   : > { %s1098_s18 = sshll.u32 %s393_s17, 2 }
  0x53   : > { %1251 = vmatpush.bf16.msra.mxu1 %v1228_v36  ;;  %s1658_s29 = scalar_lea.vmem %s1704_s5, %s1098_s18 }
  0x54   : > { %862 = vmatpush.bf16.msrb.mxu0 %v1228_v36 }
  0x56   : > { %576 = vrot.lane.b32.xlu0 %v1541_v14, %s1342_s11 }
  0x57   : > { %1252 = vmatpush.bf16.msra.mxu1 %v1227_v39 }
  0x58   : > { %863 = vmatpush.bf16.msrb.mxu0 %v1227_v39 }
  0x72   : > { %v573_v41 = vpop.permute.xlu2 %572 }
  0x7a   : > { %v536_v42 = vpop.permute.xlu2 %535 }
  0x82   : > { %v596_v47 = vpop.permute.xlu2 %595 }
  0x89   : > { %v534_v43 = vpop.permute.xlu1 %533 }
  0x8a   : > { %v519_v58 = vpop.permute.xlu2 %518 }
  0x90   : > { %v521_v44 = vpop.permute.xlu0 %520 }
  0x91   : > { %v560_v45 = vpop.permute.xlu1 %559 }
  0x92   : > { %v640_v48 = vsel %vm604_vm2, %v1486_v46, %v560_v45  ;;  %v602_v46 = vrot.slane %v1548_v18, 1  ;;  %v598_v2 = vpop.permute.xlu2 %597 }
  0x93   : > { %v650_v49 = vsel %vm613_vm3, %v640_v48, %v573_v41 }
  0x94   : > { %v659_v50 = vsel %vm622_vm4, %v650_v49, %v596_v47  ;;  %v603_v57 = vsel %vm505_vm0, %v601_v56, %v602_v46 }
  0x95   : > { %869 = vmatmul.bf16.vlgmr.msra.gmra.mxu1 %v659_v50  ;;  %1198 = vmatmul.msk.bf16.gmra.mxu2 %vm604_vm2, %v603_v57 }
  0x98   : > { %v500_v51 = vpop.permute.xlu0 %499 }
  0x99   : > { %v608_v52 = vsel %vm604_vm2, %v1426_v1, %v500_v51  ;;  %v523_v53 = vpop.permute.xlu1 %522 }
  0x9a   : > { %v617_v54 = vsel %vm613_vm3, %v608_v52, %v521_v44 }
  0x9b   : > { %v627_v55 = vsel %vm622_vm4, %v617_v54, %v534_v43 }
  0x9c   : > { %840 = vmatmul.bf16.vlgmr.msra.gmra.mxu3 %v627_v55 }
  0xa0   : > { %v502_v59 = vpop.permute.xlu0 %501 }
  0xa1   : > { %v562_v60 = vpop.permute.xlu1 %561  ;;  %v610_v1 = vsel %vm604_vm2, %v1423_v0, %v502_v59 }
  0xa2   : > { %v619_v62 = vsel %vm613_vm3, %v610_v1, %v523_v53  ;;  %v643_v9 = vsel %vm604_vm2, %v1474_v38, %v562_v60 }
  0xa3   : > { %v630_v7 = vsel %vm622_vm4, %v619_v62, %v536_v42 }
  0xa8   : > { %v498_v61 = vpop.permute.xlu0 %497 }
  0xa9   : > { %v606_v63 = vsel %vm604_vm2, %v1468_v35, %v498_v61  ;;  %v532_v6 = vpop.permute.xlu1 %531  ;;  %v538_v35 = vpop.permute.xlu2 %537 }
  0xaa   : > { %v615_v3 = vsel %vm613_vm3, %v606_v63, %v519_v58 }
  0xab   : > { %v624_v8 = vsel %vm622_vm4, %v615_v3, %v532_v6 }
  0xac   : > { %845 = vmatmul.bf16.gmra.mxu3 %v630_v7  ;;  %835 = vmatmul.bf16.vlgmr.msra.gmra.mxu0 %v624_v8  ;;  %v894_v29 = vpop.f32.mrf.mxu2 }
  0xb0   : > { %v575_v0 = vpop.permute.xlu0 %574 }
  0xb1   : > { %v652_v10 = vsel %vm613_vm3, %v643_v9, %v575_v0  ;;  %v525_v11 = vpop.permute.xlu1 %524  ;;  %v571_v38 = vpop.permute.xlu2 %570 }
  0xb2   : > { %v662_v12 = vsel %vm622_vm4, %v652_v10, %v598_v2 }
  0xb3   : > { %874 = vmatmul.bf16.gmra.mxu1 %v662_v12 }
  0xb4   : > { %v1644_v30 = vpop.f32.mrf.mxu2 }
  0xb8   : > { %v504_v13 = vpop.permute.xlu0 %503 }
  0xb9   : > { %v612_v14 = vsel %vm604_vm2, %v1432_v5, %v504_v13  ;;  %v564_v15 = vpop.permute.xlu1 %563  ;;  %v600_v5 = vpop.permute.xlu2 %599 }
  0xba   : > { %v621_v16 = vsel %vm613_vm3, %v612_v14, %v525_v11  ;;  %v646_v25 = vsel %vm604_vm2, %v1503_v4, %v564_v15 }
  0xbb   : > { %v633_v17 = vsel %vm622_vm4, %v621_v16, %v538_v35 }
  0xbc   : > { %850 = vmatmul.bf16.gmra.mxu3 %v633_v17 }
  0xc0   : > { %v558_v18 = vpop.permute.xlu0 %557 }
  0xc1   : > { %v637_v21 = vsel %vm604_vm2, %v1465_v32, %v558_v18  ;;  %v594_v23 = vpop.permute.xlu1 %593  ;;  %v899_v32 = vpop.f32.mrf.mxu2 }
  0xc2   : > { %v648_v22 = vsel %vm613_vm3, %v637_v21, %v571_v38 }
  0xc3   : > { %v656_v24 = vsel %vm622_vm4, %v648_v22, %v594_v23 }
  0xc4   : > { %864 = vmatmul.bf16.vlgmr.msrb.gmra.mxu0 %v656_v24 }
  0xc8   : > { %v577_v26 = vpop.permute.xlu0 %576 }
  0xc9   : > { %v654_v27 = vsel %vm613_vm3, %v646_v25, %v577_v26  ;;  %v901_v37 = vpop.f32.mrf.mxu2 }
  0xca   : > { %v665_v28 = vsel %vm622_vm4, %v654_v27, %v600_v5 }
  0xcb   : > { %879 = vmatmul.bf16.gmra.mxu1 %v665_v28 }
  0xd1   : > { %v904_v47 = vpop.f32.mrf.mxu2 }
  0xd9   : > { %v906_v60 = vpop.f32.mrf.mxu2 }
 0x112   : > { %v870_v19 = vpop.f32.mrf.mxu1 }
 0x118   : > { %v909_v12 = vpop.f32.mrf.mxu2 }
 0x11a   : > { %v872_v20 = vpop.f32.mrf.mxu1 }
 0x11f   : > { %v841_v4 = vpop.f32.mrf.mxu3 }
 0x120   : > { %v842_v33 = vadd.f32 %v1651_v31, %v841_v4  ;;  %v911_v26 = vpop.f32.mrf.mxu2 }
 0x122   : > { %v871_v34 = vadd.f32 %v870_v19, %v842_v33 }
 0x124   : > { %v900_v36 = vadd.f32 %v899_v32, %v871_v34 }
 0x126   : > { %v916_v39 = vmax.f32 %v900_v36, 0.0 }
 0x127   : > { %v843_v40 = vpop.f32.mrf.mxu3 }
 0x128   : > { %v924_v41 = vpack.c.bf16 %v916_v39, %v916_v39  ;;  %v844_v42 = vadd.f32 %v1651_v31, %v843_v40 }
 0x129   : > { %v836_v48 = vpop.f32.mrf.mxu0 }
 0x12a   : > { %933 = vst.msk [vmem:[%s1658_s29 + $0x8] sm:$0xf] %vm930_vm5, %v924_v41  ;;  %v873_v43 = vadd.f32 %v872_v20, %v844_v42  ;;  %v837_v63 = vadd.f32 %v1651_v31, %v836_v48 }
 0x12c   : > { %v902_v44 = vadd.f32 %v901_v37, %v873_v43 }
 0x12e   : > { %v917_v45 = vmax.f32 %v902_v44, 0.0 }
 0x12f   : > { %v846_v49 = vpop.f32.mrf.mxu3 }
 0x130   : > { %v925_v50 = vpack.c.bf16 %v917_v45, %v917_v45  ;;  %v847_v51 = vadd.f32 %v1651_v31, %v846_v49  ;;  %v875_v52 = vpop.f32.mrf.mxu1 }
 0x131   : > { %v838_v59 = vpop.f32.mrf.mxu0 }
 0x132   : > { %934 = vst.msk [vmem:[%s1658_s29 + $0xc] sm:$0xf] %vm930_vm5, %v925_v50  ;;  %v876_v53 = vadd.f32 %v875_v52, %v847_v51  ;;  %v839_v10 = vadd.f32 %v1651_v31, %v838_v59 }
 0x134   : > { %v905_v54 = vadd.f32 %v904_v47, %v876_v53 }
 0x136   : > { %v918_v55 = vmax.f32 %v905_v54, 0.0 }
 0x137   : > { %v848_v56 = vpop.f32.mrf.mxu3 }
 0x138   : > { %v926_v46 = vpack.c.bf16 %v918_v55, %v918_v55  ;;  %v849_v57 = vadd.f32 %v1651_v31, %v848_v56  ;;  %v877_v58 = vpop.f32.mrf.mxu1 }
 0x13a   : > { %935 = vst.msk [vmem:[%s1658_s29 + $0x10] sm:$0xf] %vm930_vm5, %v926_v46  ;;  %v878_v1 = vadd.f32 %v877_v58, %v849_v57 }
 0x13c   : > { %v907_v61 = vadd.f32 %v906_v60, %v878_v1 }
 0x13e   : > { %v919_v62 = vmax.f32 %v907_v61, 0.0 }
 0x13f   : > { %v851_v6 = vpop.f32.mrf.mxu3 }
 0x140   : > { %v927_v2 = vpack.c.bf16 %v919_v62, %v919_v62  ;;  %v852_v0 = vadd.f32 %v1651_v31, %v851_v6 }
 0x141   : > { %v865_v3 = vpop.f32.mrf.mxu0 }
 0x142   : > { %936 = vst.msk [vmem:[%s1658_s29 + $0x14] sm:$0xf] %vm930_vm5, %v927_v2  ;;  %v866_v7 = vadd.f32 %v865_v3, %v837_v63 }
 0x144   : > { %v895_v8 = vadd.f32 %v894_v29, %v866_v7 }
 0x146   : > { %v914_v9 = vmax.f32 %v895_v8, 0.0 }
 0x147   : > { %v853_v17 = vpop.f32.mrf.mxu3 }
 0x148   : > { %v922_v11 = vpack.c.bf16 %v914_v9, %v914_v9  ;;  %v880_v35 = vpop.f32.mrf.mxu1  ;;  %v854_v22 = vadd.f32 %v1651_v31, %v853_v17 }
 0x149   : > { %v881_v13 = vadd.f32 %v880_v35, %v852_v0  ;;  %v867_v14 = vpop.f32.mrf.mxu0 }
 0x14a   : > { %931 = vst.msk [vmem:[%s1658_s29] sm:$0xf] %vm930_vm5, %v922_v11  ;;  %v868_v15 = vadd.f32 %v867_v14, %v839_v10 }
 0x14b   : > { %v910_v16 = vadd.f32 %v909_v12, %v881_v13 }
 0x14c   : > { %v897_v38 = vadd.f32 %v1644_v30, %v868_v15 }
 0x14d   : > { %v920_v18 = vmax.f32 %v910_v16, 0.0 }
 0x14e   : > { %v915_v21 = vmax.f32 %v897_v38, 0.0 }
 0x14f   : > { %v928_v23 = vpack.c.bf16 %v920_v18, %v920_v18 }
 0x150   : > { %v923_v24 = vpack.c.bf16 %v915_v21, %v915_v21  ;;  %v882_v5 = vpop.f32.mrf.mxu1 }
 0x151   : > { %937 = vst.msk [vmem:[%s1658_s29 + $0x18] sm:$0xf] %vm930_vm5, %v928_v23  ;;  %v883_v25 = vadd.f32 %v882_v5, %v854_v22 }
 0x152   : > { %932 = vst.msk [vmem:[%s1658_s29 + $0x4] sm:$0xf] %vm930_vm5, %v923_v24 }
 0x153   : > { %v912_v27 = vadd.f32 %v911_v26, %v883_v25 }
 0x155   : > { %v921_v28 = vmax.f32 %v912_v27, 0.0 }
 0x157   : > { %v929_v29 = vpack.c.bf16 %v921_v28, %v921_v28 }
 0x159   : > { %938 = vst.msk [vmem:[%s1658_s29 + $0x1c] sm:$0xf] %vm930_vm5, %v929_v29 }
 0x15a PF: > { %s15_s22 = sadd.s32 1, %s1339_s22   ;;  %s1705_s18 = smov %s1331_s20 }
 0x15b   : > { %p12_p10 = scmp.ge.s32.totalorder %s15_s22, 10   ;;  %s1706_s19 = smov %s1335_s21 }
 0x15c   : > { %s1707_s20 = smov %s1710_s23  ;;  %s1708_s21 = smov %s1714_s24 }
 0x15d   :  { %14 = sbr.rel (!%p12_p10) target bundleno = 3 (0x3), region = 76 }

// kernel: edgepoint_forward.21
= control target key start
LH: loop header
LB: loop body
LE: loop exit
PB: predicated region body
PF: predicated region fallthrough
CT: control target
= control target key end

     0   :  { %s526_s12 = smov 0   ;;  %s597_s0 = inlined_call_operand.vmem [shape: bf16[512,32], index: 0, kind: input, shape index: {}]   ;;  %s598_s1 = inlined_call_operand.vmem [shape: bf16[32,64], index: 1, kind: input, shape index: {}]   ;;  %s599_s2 = inlined_call_operand.vmem [shape: f32[1,64], index: 2, kind: input, shape index: {}]   ;;  %s600_s3 = inlined_call_operand.vmem [shape: bf16[512,64], index: 3, kind: output, shape index: {}]  }
   0x1 LB: > { %s414_s13 = sadd.s32 4294967295, %s504_s12   ;;  %p418_p0 = scmp.ge.s32.totalorder %s504_s12, 1  ;;  %s504_s12 = sphi %s526_s12, %s13_s12  }
   0x2   : > { %p138_p1 = scmp.lt.s32.totalorder %s504_s12, 5 }
   0x4   : > { %p139_p2 = pnand %p418_p0, %p138_p1 }
   0x5   : > { %s419_s16 = sshll.u32 (!%p139_p2), %s414_s13, 4 }
   0x6   : > { %142 = sbr.rel (%p139_p2) target bundleno = 182 (0xb6), region = 32  ;;  %p163_p3 = scmp.lt.s32.totalorder (!%p139_p2), %s419_s16, 63 }
   0xb   : > { %v482_v0 = vld [vmem:[%s598_s1 + $0x8] sm:$0xff]  ;;  %v481_v1 = vld [vmem:[%s598_s1] sm:$0xff]  ;;  %s602_s16 = smov (!%p163_p3, %s419_s16), 63  ;;  %vm251_vm0 = vcmask 261120   ;;  %vm341_vm1 = vcmask 519168  }
   0xc   : > { %282 = vmatpush.bf16.msra.mxu0 %v482_v0  ;;  %483 = vmatpush.bf16.msra.mxu1 %v482_v0  ;;  %s420_s19 = sshll.u32 %s602_s16, 2  ;;  %v497_v10 = vld [vmem:[%s599_s2] ss:$0 sm:$0xff] }
   0xd   : > { %484 = vmatpush.bf16.msra.mxu2 %v482_v0  ;;  %485 = vmatpush.bf16.msra.mxu3 %v482_v0  ;;  %s166_s22 = scalar_lea.vmem %s597_s0, %s420_s19  ;;  %s560_s27 = scalar_lea.vmem %s600_s3, %s420_s19 }
   0xe   : > { %v473_v2 = vld [vmem:[%s166_s22] sm:$0xff]  ;;  %v475_v3 = vld [vmem:[%s166_s22 + $0x10] sm:$0xff]  ;;  %v474_v6 = vld [vmem:[%s166_s22 + $0x8] sm:$0xff] }
   0xf   : > { %v477_v4 = vld [vmem:[%s166_s22 + $0x20] sm:$0xff]  ;;  %v479_v5 = vld [vmem:[%s166_s22 + $0x30] sm:$0xff]  ;;  %v476_v7 = vld [vmem:[%s166_s22 + $0x18] sm:$0xff] }
  0x10   : > { %283 = vmatpush.bf16.msra.mxu0 %v481_v1  ;;  %486 = vmatpush.bf16.msra.mxu1 %v481_v1  ;;  %v478_v8 = vld [vmem:[%s166_s22 + $0x28] sm:$0xff]  ;;  %v480_v9 = vld [vmem:[%s166_s22 + $0x38] sm:$0xff] }
  0x11   : > { %487 = vmatpush.bf16.msra.mxu2 %v481_v1  ;;  %488 = vmatpush.bf16.msra.mxu3 %v481_v1 }
  0x13   : > { %463 = vmatmul.msk.bf16.vlgmr.msra.gmra.mxu0 %vm251_vm0, %v473_v2  ;;  %465 = vmatmul.msk.bf16.vlgmr.msra.gmra.mxu1 %vm251_vm0, %v475_v3 }
  0x14   : > { %467 = vmatmul.msk.bf16.vlgmr.msra.gmra.mxu2 %vm251_vm0, %v477_v4  ;;  %469 = vmatmul.msk.bf16.vlgmr.msra.gmra.mxu3 %vm251_vm0, %v479_v5 }
  0x23   : > { %464 = vmatmul.msk.bf16.gmra.mxu0 %vm251_vm0, %v474_v6  ;;  %466 = vmatmul.msk.bf16.gmra.mxu1 %vm251_vm0, %v476_v7 }
  0x24   : > { %468 = vmatmul.msk.bf16.gmra.mxu2 %vm251_vm0, %v478_v8  ;;  %470 = vmatmul.msk.bf16.gmra.mxu3 %vm251_vm0, %v480_v9 }
  0x90   : > { %v285_v11 = vpop.f32.mrf.mxu0  ;;  %v295_v12 = vpop.f32.mrf.mxu1 }
  0x91   : > { %v286_v13 = vadd.f32 %v497_v10, %v285_v11  ;;  %v296_v14 = vadd.f32 %v497_v10, %v295_v12 }
  0x93   : > { %v325_v15 = vpack.c.bf16 %v286_v13, %v286_v13  ;;  %v329_v16 = vpack.c.bf16 %v296_v14, %v296_v14 }
  0x95   : > { %342 = vst.msk [vmem:[%s560_s27] sm:$0xf] %vm341_vm1, %v325_v15 }
  0x96   : > { %346 = vst.msk [vmem:[%s560_s27 + $0x10] sm:$0xf] %vm341_vm1, %v329_v16 }
  0x97   : > { %v305_v17 = vpop.f32.mrf.mxu2  ;;  %v315_v18 = vpop.f32.mrf.mxu3 }
  0x98   : > { %v306_v19 = vadd.f32 %v497_v10, %v305_v17  ;;  %v316_v20 = vadd.f32 %v497_v10, %v315_v18  ;;  %v287_v21 = vpop.f32.mrf.mxu0  ;;  %v297_v22 = vpop.f32.mrf.mxu1 }
  0x99   : > { %v288_v23 = vadd.f32 %v497_v10, %v287_v21  ;;  %v298_v24 = vadd.f32 %v497_v10, %v297_v22 }
  0x9a   : > { %v333_v25 = vpack.c.bf16 %v306_v19, %v306_v19  ;;  %v337_v26 = vpack.c.bf16 %v316_v20, %v316_v20 }
  0x9b   : > { %v326_v27 = vpack.c.bf16 %v288_v23, %v288_v23  ;;  %v330_v28 = vpack.c.bf16 %v298_v24, %v298_v24 }
  0x9c   : > { %350 = vst.msk [vmem:[%s560_s27 + $0x20] sm:$0xf] %vm341_vm1, %v333_v25 }
  0x9d   : > { %354 = vst.msk [vmem:[%s560_s27 + $0x30] sm:$0xf] %vm341_vm1, %v337_v26 }
  0x9e   : > { %343 = vst.msk [vmem:[%s560_s27 + $0x4] sm:$0xf] %vm341_vm1, %v326_v27 }
  0x9f   : > { %347 = vst.msk [vmem:[%s560_s27 + $0x14] sm:$0xf] %vm341_vm1, %v330_v28  ;;  %v307_v29 = vpop.f32.mrf.mxu2  ;;  %v317_v30 = vpop.f32.mrf.mxu3 }
  0xa0   : > { %v308_v31 = vadd.f32 %v497_v10, %v307_v29  ;;  %v318_v32 = vadd.f32 %v497_v10, %v317_v30  ;;  %v290_v33 = vpop.f32.mrf.mxu0  ;;  %v300_v34 = vpop.f32.mrf.mxu1 }
  0xa1   : > { %v291_v35 = vadd.f32 %v497_v10, %v290_v33  ;;  %v301_v36 = vadd.f32 %v497_v10, %v300_v34 }
  0xa2   : > { %v334_v37 = vpack.c.bf16 %v308_v31, %v308_v31  ;;  %v338_v38 = vpack.c.bf16 %v318_v32, %v318_v32 }
  0xa3   : > { %v327_v39 = vpack.c.bf16 %v291_v35, %v291_v35  ;;  %v331_v40 = vpack.c.bf16 %v301_v36, %v301_v36 }
  0xa4   : > { %351 = vst.msk [vmem:[%s560_s27 + $0x24] sm:$0xf] %vm341_vm1, %v334_v37 }
  0xa5   : > { %355 = vst.msk [vmem:[%s560_s27 + $0x34] sm:$0xf] %vm341_vm1, %v338_v38 }
  0xa6   : > { %344 = vst.msk [vmem:[%s560_s27 + $0x8] sm:$0xf] %vm341_vm1, %v327_v39 }
  0xa7   : > { %348 = vst.msk [vmem:[%s560_s27 + $0x18] sm:$0xf] %vm341_vm1, %v331_v40  ;;  %v310_v41 = vpop.f32.mrf.mxu2  ;;  %v320_v42 = vpop.f32.mrf.mxu3 }
  0xa8   : > { %v311_v43 = vadd.f32 %v497_v10, %v310_v41  ;;  %v321_v44 = vadd.f32 %v497_v10, %v320_v42  ;;  %v292_v45 = vpop.f32.mrf.mxu0  ;;  %v302_v46 = vpop.f32.mrf.mxu1 }
  0xa9   : > { %v293_v47 = vadd.f32 %v497_v10, %v292_v45  ;;  %v303_v48 = vadd.f32 %v497_v10, %v302_v46 }
  0xaa   : > { %v335_v49 = vpack.c.bf16 %v311_v43, %v311_v43  ;;  %v339_v50 = vpack.c.bf16 %v321_v44, %v321_v44 }
  0xab   : > { %v328_v51 = vpack.c.bf16 %v293_v47, %v293_v47  ;;  %v332_v52 = vpack.c.bf16 %v303_v48, %v303_v48 }
  0xac   : > { %352 = vst.msk [vmem:[%s560_s27 + $0x28] sm:$0xf] %vm341_vm1, %v335_v49 }
  0xad   : > { %356 = vst.msk [vmem:[%s560_s27 + $0x38] sm:$0xf] %vm341_vm1, %v339_v50 }
  0xae   : > { %345 = vst.msk [vmem:[%s560_s27 + $0xc] sm:$0xf] %vm341_vm1, %v328_v51 }
  0xaf   : > { %349 = vst.msk [vmem:[%s560_s27 + $0x1c] sm:$0xf] %vm341_vm1, %v332_v52  ;;  %v312_v53 = vpop.f32.mrf.mxu2  ;;  %v322_v54 = vpop.f32.mrf.mxu3 }
  0xb0   : > { %v313_v55 = vadd.f32 %v497_v10, %v312_v53  ;;  %v323_v56 = vadd.f32 %v497_v10, %v322_v54 }
  0xb2   : > { %v336_v57 = vpack.c.bf16 %v313_v55, %v313_v55  ;;  %v340_v58 = vpack.c.bf16 %v323_v56, %v323_v56 }
  0xb4   : > { %353 = vst.msk [vmem:[%s560_s27 + $0x2c] sm:$0xf] %vm341_vm1, %v336_v57 }
  0xb5   : > { %357 = vst.msk [vmem:[%s560_s27 + $0x3c] sm:$0xf] %vm341_vm1, %v340_v58 }
  0xb6 PF: > { %s13_s12 = sadd.s32 1, %s504_s12  }
  0xb7   : > { %p10_p4 = scmp.ge.s32.totalorder %s13_s12, 6  }
  0xb9   :  { %12 = sbr.rel (!%p10_p4) target bundleno = 1 (0x1), region = 62 }

// kernel: edgepoint_forward.23
= control target key start
LH: loop header
LB: loop body
LE: loop exit
PB: predicated region body
PF: predicated region fallthrough
CT: control target
= control target key end

     0   :  { %s1767_s21 = smov 0   ;;  %s1769_s22 = smov 0   ;;  %s2148_s0 = inlined_call_operand.vmem [shape: bf16[2,18,18,64], index: 0, kind: input, shape index: {}, may-alias: {0,1,2}]   ;;  %s2149_s1 = inlined_call_operand.vmem [shape: bf16[2,18,18,64], index: 1, kind: input, shape index: {}, may-alias: {0,1,2}]   ;;  %s2150_s2 = inlined_call_operand.vmem [shape: bf16[2,18,18,64], index: 2, kind: input, shape index: {}, may-alias: {0,1,2}]   ;;  %s2151_s3 = inlined_call_operand.vmem [shape: bf16[576,64], index: 3, kind: input, shape index: {}]   ;;  %s2152_s4 = inlined_call_operand.vmem [shape: f32[1,64], index: 4, kind: input, shape index: {}]   ;;  %s2153_s5 = inlined_call_operand.vmem [shape: bf16[2,16,16,64], index: 5, kind: input, shape index: {}]   ;;  %s2154_s6 = inlined_call_operand.vmem [shape: bf16[2,16,16,64], index: 6, kind: output, shape index: {}]  }
   0x1   :  { %s1771_s23 = smov 0   ;;  %s1773_s24 = smov 0  }
   0x2   :  { %s1775_s25 = smov 0  }
   0x3 LB: > { %s25_s26 = sadd.s32 1, %s1721_s23  ;;  %s28_s27 = sadd.s32 1, %s1725_s24  ;;  %s1729_s25 = sphi %s1775_s25, %s16_s25   ;;  %s1725_s24 = sphi %s1773_s24, %s2159_s24   ;;  %s1721_s23 = sphi %s1771_s23, %s2158_s23   ;;  %s1717_s22 = sphi %s1769_s22, %s2157_s22   ;;  %s1713_s21 = sphi %s1767_s21, %s2156_s21  }
   0x4   : > { %p26_p0 = scmp.ge.s32.totalorder %s25_s26, 4  ;;  %p1367_p1 = scmp.ge.s32.totalorder %s1729_s25, 1 }
   0x5   : > { %p314_p2 = scmp.lt.s32.totalorder %s1729_s25, 9 }
   0x6   : > { %s2161_s26 = smov (%p26_p0, %s25_s26), 0  ;;  %s2163_s27 = smov (!%p26_p0, %s28_s27), %s1725_s24 }
   0x7   : > { %p315_p3 = pnand %p1367_p1, %p314_p2  ;;  %p30_p4 = scmp.ge.s32.totalorder %s2163_s27, 2 }
   0x8   : > { %s1797_s28 = sshll.u32 (!%p315_p3), %s1713_s21, 2  ;;  %p398_p5 = scmp.lt.s32.totalorder (!%p315_p3), %s1717_s22, 1 }
   0x9   : > { %s2165_s27 = smov (%p30_p4, %s2163_s27), 0  ;;  %318 = sbr.rel (%p315_p3) target bundleno = 378 (0x17a), region = 44 }
   0xa   : > { %p400_p6 = scmp.lt.s32.totalorder (!%p315_p3), %s1797_s28, 17  ;;  %s1807_s7 = sadd.s32 (!%p315_p3), 4, %s1797_s28 }
   0xb   : > { %p417_p7 = scmp.lt.s32.totalorder (!%p315_p3), %s1807_s7, 17  ;;  %s428_s9 = sadd.s32 (!%p315_p3), 1, %s1807_s7 }
   0xc   : > { %p1815_p8 = scmp.lt.s32.totalorder (!%p315_p3), %s428_s9, 17  ;;  %s1731_s20 = smov (!%p315_p3), 64  }
   0xd   : > { %p444_p9 = scmp.lt.s32.totalorder (!%p315_p3), %s1797_s28, 15 }
   0xe   : > { %s2167_s22 = smov (!%p398_p5, %s1717_s22), 1  ;;  %s2169_s7 = smov (!%p417_p7, %s1807_s7), 17  ;;  %vm514_vm0 = vsmask.f32 7424  ;;  %vm571_vm1 = vcmask 1046528   ;;  %v1581_v42 = vld [vmem:[%s2151_s3 + $0x38] sm:$0xff] }
   0xf   : > { %s401_s29 = scalar_select %p400_p6, %s1797_s28, 17  ;;  %v1605_v43 = vld [vmem:[%s2151_s3 + $0xf8] sm:$0xff]  ;;  %1630 = vmatpush.bf16.msra.mxu2 %v1581_v42  ;;  %v1580_v48 = vld [vmem:[%s2151_s3 + $0x30] sm:$0xff]  ;;  %1629 = vmatpush.bf16.msra.mxu1 %v1581_v42  ;;  %v1579_v54 = vld [vmem:[%s2151_s3 + $0x28] sm:$0xff]  ;;  %vm650_vm2 = vcmask 523264   ;;  %vm1188_vm3 = vcmask 519168  }
  0x10   : > { %s1804_s30 = smul.u32 54, %s2167_s22  ;;  %s2171_s9 = smov (!%p1815_p8, %s428_s9), 17  ;;  %1090 = vmatpush.bf16.msra.mxu3 %v1605_v43  ;;  %v1604_v50 = vld [vmem:[%s2151_s3 + $0xf0] sm:$0xff]  ;;  %1003 = vmatpush.bf16.msra.mxu0 %v1581_v42  ;;  %v1603_v57 = vld [vmem:[%s2151_s3 + $0xe8] sm:$0xff]  ;;  %v1578_v61 = vld [vmem:[%s2151_s3 + $0x20] sm:$0xff] }
  0x11   : > { %s1645_s8 = smul.u32 3, %s401_s29  ;;  %v1594_v42 = vld [vmem:[%s2151_s3 + $0xa0] sm:$0xff]  ;;  %v1587_v43 = vld [vmem:[%s2151_s3 + $0x68] sm:$0xff]  ;;  %s2173_s28 = smov (!%p444_p9, %s1797_s28), 15 }
  0x12   : > { %s1647_s16 = smul.u32 3, %s2169_s7 }
  0x13   : > { %s404_s10 = sadd.s32 %s1804_s30, %s1645_s8  ;;  %s1648_s19 = smul.u32 3, %s2171_s9  ;;  %1632 = vmatpush.bf16.msra.mxu2 %v1580_v48  ;;  %1631 = vmatpush.bf16.msra.mxu1 %v1580_v48 }
  0x14   : > { %s1369_s11 = sshll.u32 %s404_s10, 2  ;;  %s421_s17 = sadd.s32 %s1647_s16, %s1804_s30  ;;  %1091 = vmatpush.bf16.msra.mxu3 %v1604_v50  ;;  %1004 = vmatpush.bf16.msra.mxu0 %v1580_v48  ;;  %v1592_v48 = vld [vmem:[%s2151_s3 + $0x90] sm:$0xff]  ;;  %v1591_v50 = vld [vmem:[%s2151_s3 + $0x88] sm:$0xff] }
  0x15   : > { %s406_s14 = scalar_lea.vmem %s2148_s0, %s1369_s11  ;;  %s1371_s18 = sshll.u32 %s421_s17, 2 }
  0x16   : > { %v1819_v0 = vld [vmem:[%s406_s14 + $0x18] sm:$0xff]  ;;  %v472_v1 = vld [vmem:[%s406_s14 + $0x20] sm:$0x1]  ;;  %v1821_v2 = vld [vmem:[%s406_s14 + $0xc] sm:$0xff]  ;;  %s423_s7 = scalar_lea.vmem %s2149_s1, %s1371_s18  ;;  %s435_s12 = sadd.s32 %s1648_s19, %s1804_s30 }
  0x17   : > { %v508_v3 = vunpack.c.l.b16 %v472_v1  ;;  %v469_v4 = vld [vmem:[%s406_s14 + $0x14] sm:$0x1]  ;;  %v1824_v5 = vld [vmem:[%s406_s14 + $0x24] sm:$0xff]  ;;  %v475_v6 = vld [vmem:[%s406_s14 + $0x2c] sm:$0x1]  ;;  %v540_v7 = vshrl.u32 %v1819_v0, 16  ;;  %1634 = vmatpush.bf16.msra.mxu2 %v1579_v54  ;;  %1633 = vmatpush.bf16.msra.mxu1 %v1579_v54 }
  0x18   : > { %v542_v8 = vshll.u32 %v1819_v0, 16  ;;  %v507_v9 = vunpack.c.l.b16 %v469_v4  ;;  %v466_v10 = vld [vmem:[%s406_s14 + $0x8] sm:$0x1]  ;;  %v528_v12 = vshrl.u32 %v1821_v2, 16  ;;  %v530_v13 = vshll.u32 %v1821_v2, 16  ;;  %v1832_v15 = vld [vmem:[%s406_s14] sm:$0xff]  ;;  %1092 = vmatpush.bf16.msra.mxu3 %v1603_v57  ;;  %1005 = vmatpush.bf16.msra.mxu0 %v1579_v54 }
  0x19   : > { %v1828_v11 = vpack.c.b16 %v508_v3, %v508_v3  ;;  %v509_v14 = vunpack.c.l.b16 %v475_v6  ;;  %v554_v18 = vshll.u32 %v1824_v5, 16  ;;  %v506_v19 = vunpack.c.l.b16 %v466_v10  ;;  %v478_v47 = vld [vmem:[%s423_s7 + $0x8] sm:$0x1]  ;;  %s1373_s15 = sshll.u32 %s435_s12, 2  ;;  %v1887_v52 = vld [vmem:[%s423_s7] sm:$0xff]  ;;  %v1577_v10 = vld [vmem:[%s2151_s3 + $0x18] sm:$0xff] }
  0x1a   : > { %v544_v16 = vrot.slane %v542_v8, 1  ;;  %v511_v17 = vpack.c.b16 %v507_v9, %v507_v9  ;;  %v532_v21 = vrot.slane %v530_v13, 1  ;;  %v552_v25 = vshrl.u32 %v1824_v5, 16  ;;  %s437_s29 = scalar_lea.vmem %s2150_s2, %s1373_s15  ;;  %v1602_v3 = vld [vmem:[%s2151_s3 + $0xe0] sm:$0xff]  ;;  %v1584_v54 = vld [vmem:[%s2151_s3 + $0x50] sm:$0xff]  ;;  %v1583_v57 = vld [vmem:[%s2151_s3 + $0x48] sm:$0xff] }
  0x1b   : > { %v547_v20 = vshll.u32 %v1828_v11, 16  ;;  %v1840_v22 = vpack.c.b16 %v509_v14, %v509_v14  ;;  %v1844_v26 = vpack.c.b16 %v506_v19, %v506_v19  ;;  %v516_v29 = vshrl.u32 %v1832_v15, 16  ;;  %v481_v60 = vld [vmem:[%s437_s29 + $0x8] sm:$0x1]  ;;  %v1918_v8 = vld [vmem:[%s437_s29] sm:$0xff]  ;;  %1636 = vmatpush.bf16.msra.mxu2 %v1578_v61  ;;  %1635 = vmatpush.bf16.msra.mxu1 %v1578_v61  ;;  %s1375_s18 = sshll.u32 %s2173_s28, 1 }
  0x1c   : > { %v545_v23 = vor.u32 %v544_v16, %v540_v7  ;;  %v535_v24 = vshll.u32 %v511_v17, 16  ;;  %v533_v28 = vor.u32 %v532_v21, %v528_v12  ;;  %v518_v30 = vshll.u32 %v1832_v15, 16  ;;  %1093 = vmatpush.bf16.msra.mxu3 %v1602_v3  ;;  %v1601_v12 = vld [vmem:[%s2151_s3 + $0xd8] sm:$0xff]  ;;  %1006 = vmatpush.bf16.msra.mxu0 %v1578_v61  ;;  %v1600_v21 = vld [vmem:[%s2151_s3 + $0xd0] sm:$0xff]  ;;  %s1376_s19 = sshll.u32 %s2167_s22, 5 }
  0x1d   : > { %v549_v27 = vrot.slane %v547_v20, 1  ;;  %v556_v32 = vrot.slane %v554_v18, 1  ;;  %v559_v33 = vshll.u32 %v1840_v22, 16  ;;  %v523_v34 = vshll.u32 %v1844_v26, 16  ;;  %v1576_v18 = vld [vmem:[%s2151_s3 + $0x10] sm:$0xff]  ;;  %s448_s21 = sadd.s32 %s1376_s19, %s1375_s18 }
  0x1e   : > { %v537_v31 = vrot.slane %v535_v24, 1  ;;  %v520_v36 = vrot.slane %v518_v30, 1  ;;  %v575_v38 = vrot.slane %v1821_v2, 1  ;;  %v576_v39 = vrot.slane %v511_v17, 1  ;;  %s1377_s29 = sshll.u32 %s448_s21, 2 }
  0x1f   : > { %v1852_v35 = vsel %vm514_vm0, %v545_v23, %v549_v27  ;;  %v525_v41 = vrot.slane %v523_v34, 1  ;;  %v557_v44 = vor.u32 %v556_v32, %v552_v25  ;;  %v561_v45 = vrot.slane %v559_v33, 1  ;;  %1638 = vmatpush.bf16.msra.mxu2 %v1577_v10  ;;  %1637 = vmatpush.bf16.msra.mxu1 %v1577_v10  ;;  %v1575_v27 = vld [vmem:[%s2151_s3 + $0x8] sm:$0xff]  ;;  %v1574_v32 = vld [vmem:[%s2151_s3] sm:$0xff]  ;;  %v1597_v33 = vld [vmem:[%s2151_s3 + $0xb8] sm:$0xff]  ;;  %s2095_s10 = scalar_lea.vmem %s2153_s5, %s1377_s29  ;;  %s2102_s11 = scalar_lea.vmem %s2154_s6, %s1377_s29 }
  0x20   : > { %567 = vrot.lane.b32.xlu1 %v1852_v35, %s1731_s20  ;;  %v1857_v37 = vsel %vm514_vm0, %v533_v28, %v537_v31  ;;  %v521_v40 = vor.u32 %v520_v36, %v516_v29  ;;  %v1872_v46 = vsel %vm571_vm1, %v575_v38, %v576_v39  ;;  %v598_v53 = vunpack.c.l.b16 %v478_v47  ;;  %1094 = vmatpush.bf16.msra.mxu3 %v1601_v12  ;;  %v1599_v29 = vld [vmem:[%s2151_s3 + $0xc8] sm:$0xff]  ;;  %v1598_v36 = vld [vmem:[%s2151_s3 + $0xc0] sm:$0xff]  ;;  %v1596_v38 = vld [vmem:[%s2151_s3 + $0xb0] sm:$0xff] }
  0x21   : > { %565 = vrot.lane.b32.xlu0 %v1857_v37, %s1731_s20  ;;  %615 = vrot.lane.b32.xlu2 %v1872_v46, %s1731_s20  ;;  %v1885_v51 = vsel %vm514_vm0, %v557_v44, %v561_v45  ;;  %v578_v55 = vrot.slane %v1819_v0, 1  ;;  %v579_v56 = vrot.slane %v1828_v11, 1  ;;  %v603_v59 = vshll.u32 %v1887_v52, 16  ;;  %v1589_v39 = vld [vmem:[%s2151_s3 + $0x78] sm:$0xff]  ;;  %v1586_v47 = vld [vmem:[%s2151_s3 + $0x60] sm:$0xff] }
  0x22   : > { %v526_v49 = vsel %vm514_vm0, %v521_v40, %v525_v41  ;;  %v599_v58 = vpack.c.b16 %v598_v53, %v598_v53  ;;  %v581_v62 = vrot.slane %v1824_v5, 1  ;;  %v582_v63 = vrot.slane %v1840_v22, 1  ;;  %1007 = vmatpush.bf16.msra.mxu0 %v1577_v10  ;;  %v1595_v40 = vld [vmem:[%s2151_s3 + $0xa8] sm:$0xff]  ;;  %v1588_v41 = vld [vmem:[%s2151_s3 + $0x70] sm:$0xff]  ;;  %v1593_v44 = vld [vmem:[%s2151_s3 + $0x98] sm:$0xff] }
  0x23   : > { %v1912_v1 = vsel %vm571_vm1, %v578_v55, %v579_v56  ;;  %v601_v4 = vshrl.u32 %v1887_v52, 16  ;;  %v605_v6 = vrot.slane %v603_v59, 1  ;;  %v629_v9 = vunpack.c.l.b16 %v481_v60  ;;  %1640 = vmatpush.bf16.msra.mxu2 %v1576_v18  ;;  %1639 = vmatpush.bf16.msra.mxu1 %v1576_v18  ;;  %v1609_v45 = vld [vmem:[%s2151_s3 + $0x118] sm:$0xff]  ;;  %v1608_v53 = vld [vmem:[%s2151_s3 + $0x110] sm:$0xff]  ;;  %v1590_v55 = vld [vmem:[%s2151_s3 + $0x80] sm:$0xff] }
  0x24   : > { %v608_v7 = vshll.u32 %v599_v58, 16  ;;  %v1926_v11 = vsel %vm571_vm1, %v581_v62, %v582_v63  ;;  %v634_v17 = vshll.u32 %v1918_v8, 16  ;;  %v612_v19 = vrot.slane %v1887_v52, 1  ;;  %1095 = vmatpush.bf16.msra.mxu3 %v1600_v21  ;;  %v1607_v56 = vld [vmem:[%s2151_s3 + $0x108] sm:$0xff]  ;;  %v1582_v59 = vld [vmem:[%s2151_s3 + $0x40] sm:$0xff] }
  0x25   : > { %v606_v13 = vor.u32 %v605_v6, %v601_v4  ;;  %v1933_v16 = vpack.c.b16 %v629_v9, %v629_v9  ;;  %v613_v20 = vrot.slane %v599_v58, 1  ;;  %v632_v23 = vshrl.u32 %v1918_v8, 16  ;;  %v1606_v58 = vld [vmem:[%s2151_s3 + $0x100] sm:$0xff] }
  0x26   : > { %v610_v14 = vrot.slane %v608_v7, 1  ;;  %v636_v24 = vrot.slane %v634_v17, 1  ;;  %1008 = vmatpush.bf16.msra.mxu0 %v1576_v18  ;;  %v573_v12 = vrot.slane %v1844_v26, 1 }
  0x27   : > { %v639_v25 = vshll.u32 %v1933_v16, 16  ;;  %v1956_v28 = vsel %vm571_vm1, %v612_v19, %v613_v20  ;;  %1642 = vmatpush.bf16.msra.mxu2 %v1575_v27  ;;  %1641 = vmatpush.bf16.msra.mxu1 %v1575_v27 }
  0x28   : > { %563 = vrot.lane.b32.xlu1 %v526_v49, %s1731_s20  ;;  %v1946_v22 = vsel %vm514_vm0, %v606_v13, %v610_v14  ;;  %v637_v30 = vor.u32 %v636_v24, %v632_v23  ;;  %1096 = vmatpush.bf16.msra.mxu3 %v1599_v29  ;;  %v1585_v49 = vld [vmem:[%s2151_s3 + $0x58] sm:$0xff]  ;;  %v647_v24 = vrot.slane %v1918_v8, 1 }
  0x29   : > { %569 = vrot.lane.b32.xlu0 %v1885_v51, %s1731_s20  ;;  %589 = vrot.lane.b32.xlu2 %v1821_v2, %s1731_s20  ;;  %v641_v31 = vrot.slane %v639_v25, 1 }
  0x2a   : > { %1009 = vmatpush.bf16.msra.mxu0 %v1575_v27 }
  0x2b   : > { %v642_v34 = vsel %vm514_vm0, %v637_v30, %v641_v31  ;;  %1644 = vmatpush.bf16.msra.mxu2 %v1574_v32  ;;  %1643 = vmatpush.bf16.msra.mxu1 %v1574_v32 }
  0x2c   : > { %1097 = vmatpush.bf16.msra.mxu3 %v1598_v36 }
  0x2e   : > { %1010 = vmatpush.bf16.msra.mxu0 %v1574_v32 }
  0x2f   : > { %1061 = vmatpush.bf16.msrb.mxu2 %v1597_v33  ;;  %1032 = vmatpush.bf16.msrb.mxu1 %v1589_v39 }
  0x30   : > { %591 = vrot.lane.b32.xlu1 %v1819_v0, %s1731_s20 }
  0x31   : > { %617 = vrot.lane.b32.xlu0 %v1912_v1, %s1731_s20  ;;  %619 = vrot.lane.b32.xlu2 %v1926_v11, %s1731_s20 }
  0x32   : > { %1123 = vmatpush.bf16.msrb.mxu0 %v1609_v45 }
  0x33   : > { %1062 = vmatpush.bf16.msrb.mxu2 %v1596_v38  ;;  %1033 = vmatpush.bf16.msrb.mxu1 %v1588_v41 }
  0x36   : > { %1124 = vmatpush.bf16.msrb.mxu0 %v1608_v53 }
  0x37   : > { %1063 = vmatpush.bf16.msrb.mxu2 %v1595_v40  ;;  %1034 = vmatpush.bf16.msrb.mxu1 %v1587_v43  ;;  %v1611_v43 = vld [vmem:[%s2095_s10] sm:$0xff]  }
  0x38   : > { %593 = vrot.lane.b32.xlu1 %v1824_v5, %s1731_s20 }
  0x39   : > { %643 = vrot.lane.b32.xlu0 %v1946_v22, %s1731_s20  ;;  %621 = vrot.lane.b32.xlu2 %v1956_v28, %s1731_s20 }
  0x3a   : > { %1125 = vmatpush.bf16.msrb.mxu0 %v1607_v56 }
  0x3b   : > { %1064 = vmatpush.bf16.msrb.mxu2 %v1594_v42  ;;  %1035 = vmatpush.bf16.msrb.mxu1 %v1586_v47 }
  0x3e   : > { %1126 = vmatpush.bf16.msrb.mxu0 %v1606_v58 }
  0x3f   : > { %1065 = vmatpush.bf16.msrb.mxu2 %v1593_v44  ;;  %1036 = vmatpush.bf16.msrb.mxu1 %v1585_v49 }
  0x40   : > { %595 = vrot.lane.b32.xlu1 %v1887_v52, %s1731_s20 }
  0x41   : > { %645 = vrot.lane.b32.xlu0 %v642_v34, %s1731_s20 }
  0x43   : > { %1066 = vmatpush.bf16.msrb.mxu2 %v1592_v48  ;;  %1037 = vmatpush.bf16.msrb.mxu1 %v1584_v54  ;;  %v1612_v48 = vunpack.c.l.bf16 %v1611_v43 }
  0x47   : > { %1067 = vmatpush.bf16.msrb.mxu2 %v1591_v50  ;;  %1038 = vmatpush.bf16.msrb.mxu1 %v1583_v57 }
  0x4b   : > { %1068 = vmatpush.bf16.msrb.mxu2 %v1590_v55  ;;  %1039 = vmatpush.bf16.msrb.mxu1 %v1582_v59 }
  0x7b   : > { %v616_v9 = vpop.permute.xlu2 %615 }
  0x83   : > { %v590_v14 = vpop.permute.xlu2 %589 }
  0x92   : > { %v568_v60 = vpop.permute.xlu1 %567 }
  0x93   : > { %v566_v61 = vpop.permute.xlu0 %565  ;;  %v658_v62 = vsel %vm650_vm2, %v1819_v0, %v568_v60  ;;  %v681_v0 = vsel %vm650_vm2, %v1857_v37, %v616_v9 }
  0x94   : > { %v655_v63 = vsel %vm650_vm2, %v1821_v2, %v566_v61  ;;  %1098 = vmatmul.bf16.vlgmr.msra.gmra.mxu3 %v658_v62  ;;  %v572_v2 = vrot.slane %v1832_v15, 1 }
  0x95   : > { %1016 = vmatmul.bf16.vlgmr.msra.gmra.mxu1 %v655_v63  ;;  %v1613_v63 = vunpack.c.h.bf16 %v1611_v43 }
  0x9a   : > { %v564_v3 = vpop.permute.xlu1 %563 }
  0x9b   : > { %v570_v4 = vpop.permute.xlu0 %569  ;;  %v652_v6 = vsel %vm650_vm2, %v1832_v15, %v564_v3 }
  0x9c   : > { %v661_v7 = vsel %vm650_vm2, %v1824_v5, %v570_v4  ;;  %1011 = vmatmul.bf16.vlgmr.msra.gmra.mxu0 %v652_v6  ;;  %v574_v5 = vsel %vm571_vm1, %v572_v2, %v573_v12 }
  0x9d   : > { %1026 = vmatmul.bf16.vlgmr.msra.gmra.mxu2 %v661_v7  ;;  %v665_v18 = vsel %vm650_vm2, %v574_v5, %v590_v14 }
  0xa2   : > { %v592_v37 = vpop.permute.xlu1 %591 }
  0xa3   : > { %v618_v10 = vpop.permute.xlu0 %617  ;;  %v669_v20 = vsel %vm650_vm2, %v1872_v46, %v592_v37  ;;  %v648_v46 = vrot.slane %v1933_v16, 1 }
  0xa4   : > { %1103 = vmatmul.bf16.gmra.mxu3 %v661_v7  ;;  %v685_v15 = vsel %vm650_vm2, %v1852_v35, %v618_v10 }
  0xa5   : > { %1021 = vmatmul.bf16.gmra.mxu1 %v658_v62  ;;  %v649_v27 = vsel %vm571_vm1, %v647_v24, %v648_v46 }
  0xaa   : > { %v594_v35 = vpop.permute.xlu1 %593 }
  0xab   : > { %v644_v13 = vpop.permute.xlu0 %643  ;;  %v673_v23 = vsel %vm650_vm2, %v1912_v1, %v594_v35 }
  0xac   : > { %1550 = vmatmul.msk.bf16.vlgmr.msrb.gmra.mxu0 %vm650_vm2, %v1912_v1  ;;  %v696_v17 = vsel %vm650_vm2, %v1887_v52, %v644_v13  ;;  %v620_v52 = vpop.permute.xlu2 %619 }
  0xad   : > { %1069 = vmatmul.bf16.vlgmr.msrb.gmra.mxu2 %v681_v0  ;;  %v689_v21 = vsel %vm650_vm2, %v1885_v51, %v620_v52  ;;  %v1626_v0 = vld [vmem:[%s2095_s10 + $0x8] sm:$0xff]  }
  0xae   : > { %v1617_v46 = vunpack.c.h.bf16 %v1626_v0 }
  0xb3   : > { %v646_v26 = vpop.permute.xlu0 %645 }
  0xb4   : > { %1108 = vmatmul.bf16.gmra.mxu3 %v696_v17  ;;  %v699_v19 = vsel %vm650_vm2, %v1918_v8, %v646_v26  ;;  %v622_v25 = vpop.permute.xlu2 %621  ;;  %v1616_v17 = vunpack.c.l.bf16 %v1626_v0 }
  0xb5   : > { %1040 = vmatmul.bf16.vlgmr.msrb.gmra.mxu1 %v665_v18  ;;  %v693_v51 = vsel %vm650_vm2, %v1946_v22, %v622_v25 }
  0xbc   : > { %1551 = vmatmul.msk.bf16.gmra.mxu0 %vm650_vm2, %v1926_v11 }
  0xbd   : > { %1074 = vmatmul.bf16.gmra.mxu2 %v685_v15 }
  0xc4   : > { %1113 = vmatmul.bf16.gmra.mxu3 %v699_v19 }
  0xc5   : > { %1045 = vmatmul.bf16.gmra.mxu1 %v669_v20 }
  0xcc   : > { %1552 = vmatmul.msk.bf16.gmra.mxu0 %vm650_vm2, %v1956_v28  ;;  %v596_v28 = vpop.permute.xlu1 %595 }
  0xcd   : > { %1079 = vmatmul.bf16.gmra.mxu2 %v689_v21  ;;  %v677_v1 = vsel %vm650_vm2, %v1926_v11, %v596_v28  ;;  %v2089_v11 = vld [vmem:[%s2152_s4] ss:$0 sm:$0xff] }
  0xd5   : > { %1050 = vmatmul.bf16.gmra.mxu1 %v673_v23 }
  0xdc   : > { %1553 = vmatmul.msk.bf16.gmra.mxu0 %vm650_vm2, %v649_v27 }
  0xdd   : > { %1084 = vmatmul.bf16.gmra.mxu2 %v693_v51 }
  0xe5   : > { %1055 = vmatmul.bf16.gmra.mxu1 %v677_v1 }
 0x112   : > { %v1017_v29 = vpop.f32.mrf.mxu1 }
 0x113   : > { %v1018_v4 = vadd.f32 %v2089_v11, %v1017_v29 }
 0x117   : > { %v1099_v33 = vpop.f32.mrf.mxu3 }
 0x119   : > { %v1012_v8 = vpop.f32.mrf.mxu0 }
 0x11a   : > { %v1019_v30 = vpop.f32.mrf.mxu1  ;;  %v1013_v39 = vadd.f32 %v2089_v11, %v1012_v8 }
 0x11b   : > { %v1020_v26 = vadd.f32 %v2089_v11, %v1019_v30 }
 0x11f   : > { %v1101_v41 = vpop.f32.mrf.mxu3 }
 0x120   : > { %v2075_v16 = vpop.f32.mrf.mxu2 }
 0x121   : > { %v1014_v31 = vpop.f32.mrf.mxu0 }
 0x122   : > { %v2078_v32 = vpop.f32.mrf.mxu1  ;;  %v1015_v50 = vadd.f32 %v2089_v11, %v1014_v31  ;;  %v1627_v31 = vld [vmem:[%s2095_s10 + $0x10] sm:$0xff]  }
 0x123   : > { %v1023_v51 = vadd.f32 %v2089_v11, %v2078_v32 }
 0x127   : > { %v1104_v57 = vpop.f32.mrf.mxu3 }
 0x128   : > { %v2081_v22 = vpop.f32.mrf.mxu2 }
 0x129   : > { %v1128_v36 = vpop.f32.mrf.mxu0 }
 0x12a   : > { %v2084_v34 = vpop.f32.mrf.mxu1 }
 0x12f   : > { %v1106_v13 = vpop.f32.mrf.mxu3 }
 0x130   : > { %v1070_v38 = vpop.f32.mrf.mxu2 }
 0x131   : > { %v1130_v44 = vpop.f32.mrf.mxu0 }
 0x132   : > { %v1041_v40 = vpop.f32.mrf.mxu1 }
 0x133   : > { %v1042_v42 = vadd.f32 %v1041_v40, %v1013_v39  ;;  %v1620_v40 = vunpack.c.l.bf16 %v1627_v31 }
 0x135   : > { %v1071_v45 = vadd.f32 %v1070_v38, %v1042_v42  ;;  %v1025_v42 = vadd.f32 %v2089_v11, %v2084_v34 }
 0x137   : > { %v1100_v47 = vadd.f32 %v1099_v33, %v1071_v45  ;;  %v1109_v25 = vpop.f32.mrf.mxu3 }
 0x138   : > { %v1072_v49 = vpop.f32.mrf.mxu2 }
 0x139   : > { %v1129_v53 = vadd.f32 %v1128_v36, %v1100_v47  ;;  %v1133_v60 = vpop.f32.mrf.mxu0 }
 0x13a   : > { %v1043_v54 = vpop.f32.mrf.mxu1 }
 0x13b   : > { %v1164_v55 = vadd.f32 %v1612_v48, %v1129_v53  ;;  %v1044_v56 = vadd.f32 %v1043_v54, %v1015_v50 }
 0x13d   : > { %v1172_v58 = vmax.f32 %v1164_v55, 0.0  ;;  %v1073_v59 = vadd.f32 %v1072_v49, %v1044_v56  ;;  %v1621_v55 = vunpack.c.h.bf16 %v1627_v31  ;;  %v1028_v56 = vadd.f32 %v2089_v11, %v2075_v16 }
 0x13e   : > { %v1030_v16 = vadd.f32 %v2089_v11, %v2081_v22 }
 0x13f   : > { %v1180_v61 = vpack.c.bf16 %v1172_v58, %v1172_v58  ;;  %v1102_v62 = vadd.f32 %v1101_v41, %v1073_v59  ;;  %v1111_v43 = vpop.f32.mrf.mxu3 }
 0x140   : > { %v1075_v3 = vpop.f32.mrf.mxu2 }
 0x141   : > { %1189 = vst.msk [vmem:[%s2102_s11] sm:$0xf] %vm1188_vm3, %v1180_v61  ;;  %v1131_v6 = vadd.f32 %v1130_v44, %v1102_v62  ;;  %v1135_v15 = vpop.f32.mrf.mxu0  ;;  %v1628_v62 = vld [vmem:[%s2095_s10 + $0x18] sm:$0xff]  }
 0x142   : > { %v1046_v7 = vpop.f32.mrf.mxu1 }
 0x143   : > { %v1165_v9 = vadd.f32 %v1613_v63, %v1131_v6  ;;  %v1047_v10 = vadd.f32 %v1046_v7, %v1018_v4 }
 0x145   : > { %v1173_v2 = vmax.f32 %v1165_v9, 0.0  ;;  %v1076_v12 = vadd.f32 %v1075_v3, %v1047_v10  ;;  %v1624_v9 = vunpack.c.l.bf16 %v1628_v62 }
 0x147   : > { %v1181_v14 = vpack.c.bf16 %v1173_v2, %v1173_v2  ;;  %v1105_v5 = vadd.f32 %v1104_v57, %v1076_v12  ;;  %v1114_v61 = vpop.f32.mrf.mxu3 }
 0x148   : > { %v1077_v18 = vpop.f32.mrf.mxu2 }
 0x149   : > { %1190 = vst.msk [vmem:[%s2102_s11 + $0x4] sm:$0xf] %vm1188_vm3, %v1181_v14  ;;  %v1134_v37 = vadd.f32 %v1133_v60, %v1105_v5  ;;  %v1138_v1 = vpop.f32.mrf.mxu0 }
 0x14a   : > { %v1048_v19 = vpop.f32.mrf.mxu1 }
 0x14b   : > { %v1166_v20 = vadd.f32 %v1616_v17, %v1134_v37  ;;  %v1049_v52 = vadd.f32 %v1048_v19, %v1020_v26  ;;  %v1625_v26 = vunpack.c.h.bf16 %v1628_v62 }
 0x14d   : > { %v1174_v21 = vmax.f32 %v1166_v20, 0.0  ;;  %v1078_v35 = vadd.f32 %v1077_v18, %v1049_v52 }
 0x14f   : > { %v1182_v23 = vpack.c.bf16 %v1174_v21, %v1174_v21  ;;  %v1107_v24 = vadd.f32 %v1106_v13, %v1078_v35  ;;  %v1116_v17 = vpop.f32.mrf.mxu3 }
 0x150   : > { %v1080_v27 = vpop.f32.mrf.mxu2 }
 0x151   : > { %1191 = vst.msk [vmem:[%s2102_s11 + $0x8] sm:$0xf] %vm1188_vm3, %v1182_v23  ;;  %v1136_v28 = vadd.f32 %v1135_v15, %v1107_v24  ;;  %v1140_v48 = vpop.f32.mrf.mxu0 }
 0x152   : > { %v1051_v29 = vpop.f32.mrf.mxu1 }
 0x153   : > { %v1167_v8 = vadd.f32 %v1617_v46, %v1136_v28  ;;  %v1052_v30 = vadd.f32 %v1051_v29, %v1023_v51 }
 0x155   : > { %v1175_v33 = vmax.f32 %v1167_v8, 0.0  ;;  %v1081_v36 = vadd.f32 %v1080_v27, %v1052_v30 }
 0x157   : > { %v1183_v38 = vpack.c.bf16 %v1175_v33, %v1175_v33  ;;  %v1110_v39 = vadd.f32 %v1109_v25, %v1081_v36 }
 0x158   : > { %v1082_v41 = vpop.f32.mrf.mxu2 }
 0x159   : > { %1192 = vst.msk [vmem:[%s2102_s11 + $0xc] sm:$0xf] %vm1188_vm3, %v1183_v38  ;;  %v1139_v32 = vadd.f32 %v1138_v1, %v1110_v39  ;;  %v1143_v4 = vpop.f32.mrf.mxu0 }
 0x15a   : > { %v1053_v44 = vpop.f32.mrf.mxu1 }
 0x15b   : > { %v1168_v45 = vadd.f32 %v1620_v40, %v1139_v32  ;;  %v1054_v47 = vadd.f32 %v1053_v44, %v1025_v42 }
 0x15d   : > { %v1176_v49 = vmax.f32 %v1168_v45, 0.0  ;;  %v1083_v50 = vadd.f32 %v1082_v41, %v1054_v47 }
 0x15f   : > { %v1184_v53 = vpack.c.bf16 %v1176_v49, %v1176_v49  ;;  %v1112_v54 = vadd.f32 %v1111_v43, %v1083_v50 }
 0x160   : > { %v1085_v57 = vpop.f32.mrf.mxu2 }
 0x161   : > { %1193 = vst.msk [vmem:[%s2102_s11 + $0x10] sm:$0xf] %vm1188_vm3, %v1184_v53  ;;  %v1141_v34 = vadd.f32 %v1140_v48, %v1112_v54  ;;  %v1145_v37 = vpop.f32.mrf.mxu0 }
 0x162   : > { %v1056_v58 = vpop.f32.mrf.mxu1 }
 0x163   : > { %v1169_v59 = vadd.f32 %v1621_v55, %v1141_v34  ;;  %v1057_v60 = vadd.f32 %v1056_v58, %v1028_v56 }
 0x165   : > { %v1177_v63 = vmax.f32 %v1169_v59, 0.0  ;;  %v1086_v3 = vadd.f32 %v1085_v57, %v1057_v60 }
 0x167   : > { %v1185_v6 = vpack.c.bf16 %v1177_v63, %v1177_v63  ;;  %v1115_v7 = vadd.f32 %v1114_v61, %v1086_v3 }
 0x168   : > { %v1087_v13 = vpop.f32.mrf.mxu2 }
 0x169   : > { %1194 = vst.msk [vmem:[%s2102_s11 + $0x14] sm:$0xf] %vm1188_vm3, %v1185_v6  ;;  %v1144_v10 = vadd.f32 %v1143_v4, %v1115_v7 }
 0x16a   : > { %v1058_v0 = vpop.f32.mrf.mxu1 }
 0x16b   : > { %v1170_v2 = vadd.f32 %v1624_v9, %v1144_v10  ;;  %v1059_v12 = vadd.f32 %v1058_v0, %v1030_v16 }
 0x16d   : > { %v1178_v14 = vmax.f32 %v1170_v2, 0.0  ;;  %v1088_v5 = vadd.f32 %v1087_v13, %v1059_v12 }
 0x16f   : > { %v1186_v18 = vpack.c.bf16 %v1178_v14, %v1178_v14  ;;  %v1117_v15 = vadd.f32 %v1116_v17, %v1088_v5 }
 0x171   : > { %1195 = vst.msk [vmem:[%s2102_s11 + $0x18] sm:$0xf] %vm1188_vm3, %v1186_v18  ;;  %v1146_v19 = vadd.f32 %v1145_v37, %v1117_v15 }
 0x173   : > { %v1171_v20 = vadd.f32 %v1625_v26, %v1146_v19 }
 0x175   : > { %v1179_v22 = vmax.f32 %v1171_v20, 0.0 }
 0x177   : > { %v1187_v11 = vpack.c.bf16 %v1179_v22, %v1179_v22 }
 0x179   : > { %1196 = vst.msk [vmem:[%s2102_s11 + $0x1c] sm:$0xf] %vm1188_vm3, %v1187_v11 }
 0x17a PF: > { %s16_s25 = sadd.s32 1, %s1729_s25   ;;  %s2156_s21 = smov %s1721_s23 }
 0x17b   : > { %p13_p10 = scmp.ge.s32.totalorder %s16_s25, 10   ;;  %s2157_s22 = smov %s1725_s24 }
 0x17c   : > { %s2158_s23 = smov %s2161_s26  ;;  %s2159_s24 = smov %s2165_s27 }
 0x17d   :  { %15 = sbr.rel (!%p13_p10) target bundleno = 3 (0x3), region = 83 }

// kernel: edgepoint_forward.25
= control target key start
LH: loop header
LB: loop body
LE: loop exit
PB: predicated region body
PF: predicated region fallthrough
CT: control target
= control target key end

     0   :  { %s1387_s18 = smov 0   ;;  %s1389_s19 = smov 0   ;;  %s1659_s0 = inlined_call_operand.vmem [shape: bf16[2,6,6,64], index: 0, kind: input, shape index: {}, may-alias: {0,1,2}]   ;;  %s1660_s1 = inlined_call_operand.vmem [shape: bf16[2,6,6,64], index: 1, kind: input, shape index: {}, may-alias: {0,1,2}]   ;;  %s1661_s2 = inlined_call_operand.vmem [shape: bf16[2,6,6,64], index: 2, kind: input, shape index: {}, may-alias: {0,1,2}]   ;;  %s1662_s3 = inlined_call_operand.vmem [shape: bf16[576,128], index: 3, kind: input, shape index: {}]   ;;  %s1663_s4 = inlined_call_operand.vmem [shape: f32[1,128], index: 4, kind: input, shape index: {}]   ;;  %s1664_s5 = inlined_call_operand.vmem [shape: bf16[2,4,4,128], index: 5, kind: output, shape index: {}]  }
   0x1   :  { %s1391_s20 = smov 0  }
   0x2 LB: > { %s27_s21 = sadd.s32 1, %s1350_s19  ;;  %p1109_p0 = scmp.ge.s32.totalorder %s1354_s20, 1  ;;  %s1354_s20 = sphi %s1391_s20, %s15_s20   ;;  %s1350_s19 = sphi %s1389_s19, %s1666_s19   ;;  %s1346_s18 = sphi %s1387_s18, %s1665_s18  }
   0x3   : > { %p29_p1 = scmp.ge.s32.totalorder %s27_s21, 2  ;;  %p266_p2 = scmp.lt.s32.totalorder %s1354_s20, 3 }
   0x5   : > { %s1668_s21 = smov (%p29_p1, %s27_s21), 0  ;;  %p267_p3 = pnand %p1109_p0, %p266_p2 }
   0x6   : > { %p332_p4 = scmp.lt.s32.totalorder (!%p267_p3), %s1346_s18, 1  ;;  %s1356_s6 = smov (!%p267_p3), 64  }
   0x7   : > { %270 = sbr.rel (%p267_p3) target bundleno = 340 (0x154), region = 40 }
   0xc   : > { %s1670_s18 = smov (!%p332_p4, %s1346_s18), 1  ;;  %v1274_v47 = vld [vmem:[%s1662_s3 + $0x38] sm:$0xff]  ;;  %v1273_v51 = vld [vmem:[%s1662_s3 + $0x30] sm:$0xff]  ;;  %v1272_v55 = vld [vmem:[%s1662_s3 + $0x28] sm:$0xff]  ;;  %vm482_vm0 = vcmask 523264   ;;  %vm549_vm1 = vcmask 1041408  }
   0xd   : > { %s1303_s22 = smul.u32 24, %s1670_s18  ;;  %v1282_v48 = vld [vmem:[%s1662_s3 + $0x78] sm:$0xff]  ;;  %896 = vmatpush.bf16.msra.mxu0 %v1274_v47  ;;  %v1281_v52 = vld [vmem:[%s1662_s3 + $0x70] sm:$0xff]  ;;  %v1280_v56 = vld [vmem:[%s1662_s3 + $0x68] sm:$0xff]  ;;  %vm556_vm2 = vcmask 1043456   ;;  %vm552_vm3 = vcmask 1045508  }
   0xe   : > { %v1290_v49 = vld [vmem:[%s1662_s3 + $0xb8] sm:$0xff]  ;;  %910 = vmatpush.bf16.msra.mxu1 %v1282_v48  ;;  %v1289_v53 = vld [vmem:[%s1662_s3 + $0xb0] sm:$0xff]  ;;  %v1288_v57 = vld [vmem:[%s1662_s3 + $0xa8] sm:$0xff] }
   0xf   : > { %s1411_s25 = scalar_lea.vmem %s1659_s0, %s1303_s22  ;;  %s1263_s26 = sadd.s32 16, %s1303_s22  ;;  %v1298_v50 = vld [vmem:[%s1662_s3 + $0xf8] sm:$0xff]  ;;  %924 = vmatpush.bf16.msra.mxu2 %v1290_v49  ;;  %v1297_v54 = vld [vmem:[%s1662_s3 + $0xf0] sm:$0xff]  ;;  %v1296_v59 = vld [vmem:[%s1662_s3 + $0xe8] sm:$0xff] }
  0x10   : > { %v1414_v0 = vld [vmem:[%s1411_s25 + $0x4] sm:$0x7]  ;;  %v1417_v1 = vld [vmem:[%s1411_s25 + $0x8] sm:$0x7]  ;;  %v1420_v2 = vld [vmem:[%s1411_s25 + $0xc] sm:$0x7]  ;;  %s354_s29 = scalar_lea.vmem %s1660_s1, %s1263_s26  ;;  %938 = vmatpush.bf16.msra.mxu3 %v1298_v50 }
  0x11   : > { %v393_v3 = vunpack.c.l.b16 %v1414_v0  ;;  %v394_v4 = vunpack.c.l.b16 %v1417_v1  ;;  %v395_v5 = vunpack.c.l.b16 %v1420_v2  ;;  %v1428_v6 = vld [vmem:[%s354_s29] sm:$0x7]  ;;  %s1265_s30 = sadd.s32 20, %s1303_s22  ;;  %897 = vmatpush.bf16.msra.mxu0 %v1273_v51 }
  0x12   : > { %v441_v7 = vunpack.c.l.b16 %v1428_v6  ;;  %s367_s9 = scalar_lea.vmem %s1661_s2, %s1265_s30  ;;  %v1459_v27 = vld [vmem:[%s1411_s25] sm:$0x7]  ;;  %911 = vmatpush.bf16.msra.mxu1 %v1281_v52  ;;  %s1266_s25 = sshll.u32 %s1670_s18, 3 }
  0x13   : > { %v1431_v8 = vpack.c.b16 %v393_v3, %v393_v3  ;;  %v398_v9 = vpack.c.b16 %v394_v4, %v394_v4  ;;  %v399_v10 = vpack.c.b16 %v395_v5, %v395_v5  ;;  %v1446_v18 = vld [vmem:[%s367_s9] sm:$0x7]  ;;  %v392_v31 = vunpack.c.l.b16 %v1459_v27  ;;  %925 = vmatpush.bf16.msra.mxu2 %v1289_v53  ;;  %v1270_v3 = vld [vmem:[%s1662_s3 + $0x18] sm:$0xff]  ;;  %s379_s28 = scalar_lea.vmem %s1664_s5, %s1266_s25 }
  0x14   : > { %v442_v14 = vpack.c.b16 %v441_v7, %v441_v7  ;;  %v468_v20 = vunpack.c.l.b16 %v1446_v18  ;;  %939 = vmatpush.bf16.msra.mxu3 %v1297_v54  ;;  %v1271_v60 = vld [vmem:[%s1662_s3 + $0x20] sm:$0xff]  ;;  %v1278_v4 = vld [vmem:[%s1662_s3 + $0x58] sm:$0xff] }
  0x15   : > { %443 = vrot.lane.b32.xlu1 %v1431_v8, %s1356_s6  ;;  %v437_v11 = vrot.slane %v1431_v8, 1  ;;  %v417_v12 = vshll.u32 %v398_v9, 16  ;;  %v1436_v13 = vrot.slane %v398_v9, 1  ;;  %447 = vrot.lane.b32.xlu2 %v399_v10, %s1356_s6  ;;  %v415_v15 = vshrl.u32 %v398_v9, 16  ;;  %v1279_v61 = vld [vmem:[%s1662_s3 + $0x60] sm:$0xff]  ;;  %v1286_v5 = vld [vmem:[%s1662_s3 + $0x98] sm:$0xff] }
  0x16   : > { %v458_v17 = vrot.slane %v442_v14, 1  ;;  %v1448_v19 = vrot.slane %v399_v10, 1  ;;  %v424_v22 = vshll.u32 %v399_v10, 16  ;;  %v469_v23 = vpack.c.b16 %v468_v20, %v468_v20  ;;  %898 = vmatpush.bf16.msra.mxu0 %v1272_v55  ;;  %912 = vmatpush.bf16.msra.mxu1 %v1280_v56  ;;  %v1287_v62 = vld [vmem:[%s1662_s3 + $0xa0] sm:$0xff]  ;;  %v1294_v7 = vld [vmem:[%s1662_s3 + $0xd8] sm:$0xff]  ;;  %v1268_v20 = vld [vmem:[%s1662_s3 + $0x8] sm:$0xff] }
  0x17   : > { %459 = vrot.lane.b32.xlu0 %v437_v11, %s1356_s6  ;;  %v419_v16 = vrot.slane %v417_v12, 1  ;;  %660 = vst [vmem:[#allocation1 + $0x20] ss:$4 sm:$0xff] %v1436_v13  ;;  %v422_v25 = vshrl.u32 %v399_v10, 16  ;;  %v454_v28 = vshll.u32 %v442_v14, 16  ;;  %v452_v32 = vshrl.u32 %v442_v14, 16  ;;  %926 = vmatpush.bf16.msra.mxu2 %v1288_v57 }
  0x18   : > { %665 = vst [vmem:[#allocation1 + $0x22] ss:$4 sm:$0xff] %v458_v17  ;;  %v481_v24 = vrot.slane %v469_v23, 1  ;;  %v426_v26 = vrot.slane %v424_v22, 1  ;;  %v473_v29 = vshll.u32 %v469_v23, 16  ;;  %v471_v34 = vshrl.u32 %v469_v23, 16  ;;  %940 = vmatpush.bf16.msra.mxu3 %v1296_v59 }
  0x19   : > { %v1451_v21 = vor.u32 %v419_v16, %v415_v15  ;;  %662 = vst [vmem:[#allocation1 + $0x21] ss:$4 sm:$0xff] %v1448_v19  ;;  %v456_v33 = vrot.slane %v454_v28, 1  ;;  %v1470_v36 = vpack.c.b16 %v392_v31, %v392_v31  ;;  %v410_v38 = vshll.u32 %v1431_v8, 16  ;;  %v1295_v63 = vld [vmem:[%s1662_s3 + $0xe0] sm:$0xff]  ;;  %v1269_v12 = vld [vmem:[%s1662_s3 + $0x10] sm:$0xff] }
  0x1a   : > { %668 = vst [vmem:[#allocation1 + $0x23] ss:$4 sm:$0xff] %v481_v24  ;;  %v1461_v30 = vor.u32 %v426_v26, %v422_v25  ;;  %v475_v35 = vrot.slane %v473_v29, 1  ;;  %v408_v41 = vshrl.u32 %v1431_v8, 16  ;;  %899 = vmatpush.bf16.msra.mxu0 %v1271_v60  ;;  %913 = vmatpush.bf16.msra.mxu1 %v1279_v61  ;;  %v1285_v15 = vld [vmem:[%s1662_s3 + $0x90] sm:$0xff]  ;;  %v1276_v22 = vld [vmem:[%s1662_s3 + $0x48] sm:$0xff] }
  0x1b   : > { %v1472_v37 = vor.u32 %v456_v33, %v452_v32  ;;  %v403_v40 = vshll.u32 %v1470_v36, 16  ;;  %v412_v42 = vrot.slane %v410_v38, 1  ;;  %v401_v43 = vshrl.u32 %v1470_v36, 16  ;;  %927 = vmatpush.bf16.msra.mxu2 %v1287_v62  ;;  %v1284_v23 = vld [vmem:[%s1662_s3 + $0x88] sm:$0xff]  ;;  %v1267_v25 = vld [vmem:[%s1662_s3] sm:$0xff]  ;;  %v1301_v38 = vld [vmem:[%s1662_s3 + $0x110] sm:$0xff] }
  0x1c   : > { %v476_v39 = vor.u32 %v475_v35, %v471_v34  ;;  %941 = vmatpush.bf16.msra.mxu3 %v1295_v63  ;;  %v1292_v24 = vld [vmem:[%s1662_s3 + $0xc8] sm:$0xff]  ;;  %v1275_v26 = vld [vmem:[%s1662_s3 + $0x40] sm:$0xff]  ;;  %v1302_v34 = vld [vmem:[%s1662_s3 + $0x118] sm:$0xff]  ;;  %v436_v51 = vrot.slane %v1470_v36, 1 }
  0x1d   : > { %445 = vrot.lane.b32.xlu1 %v398_v9, %s1356_s6  ;;  %449 = vrot.lane.b32.xlu2 %v442_v14, %s1356_s6  ;;  %v405_v44 = vrot.slane %v403_v40, 1  ;;  %v1482_v45 = vor.u32 %v412_v42, %v408_v41  ;;  %v1277_v14 = vld [vmem:[%s1662_s3 + $0x50] sm:$0xff]  ;;  %v1283_v29 = vld [vmem:[%s1662_s3 + $0x80] sm:$0xff] }
  0x1e   : > { %900 = vmatpush.bf16.msra.mxu0 %v1270_v3  ;;  %914 = vmatpush.bf16.msra.mxu1 %v1278_v4  ;;  %v1291_v31 = vld [vmem:[%s1662_s3 + $0xc0] sm:$0xff]  ;;  %v1300_v41 = vld [vmem:[%s1662_s3 + $0x108] sm:$0xff] }
  0x1f   : > { %432 = vrot.lane.b32.xlu0 %v1451_v21, %s1356_s6  ;;  %v406_v46 = vor.u32 %v405_v44, %v401_v43  ;;  %928 = vmatpush.bf16.msra.mxu2 %v1286_v5  ;;  %v1299_v50 = vld [vmem:[%s1662_s3 + $0x100] sm:$0xff] }
  0x20   : > { %942 = vmatpush.bf16.msra.mxu3 %v1294_v7 }
  0x22   : > { %901 = vmatpush.bf16.msra.mxu0 %v1269_v12  ;;  %915 = vmatpush.bf16.msra.mxu1 %v1277_v14 }
  0x23   : > { %929 = vmatpush.bf16.msra.mxu2 %v1285_v15 }
  0x25   : > { %461 = vrot.lane.b32.xlu1 %v1436_v13, %s1356_s6  ;;  %463 = vrot.lane.b32.xlu2 %v1448_v19, %s1356_s6 }
  0x26   : > { %902 = vmatpush.bf16.msra.mxu0 %v1268_v20  ;;  %916 = vmatpush.bf16.msra.mxu1 %v1276_v22 }
  0x27   : > { %434 = vrot.lane.b32.xlu0 %v1461_v30, %s1356_s6  ;;  %930 = vmatpush.bf16.msra.mxu2 %v1284_v23  ;;  %v673_v23 = vld.sshfl [vmem:[#allocation1 + $0x20] sm:$0xff pattern:$0x73625140] }
  0x2a   : > { %903 = vmatpush.bf16.msra.mxu0 %v1267_v25  ;;  %917 = vmatpush.bf16.msra.mxu1 %v1275_v26 }
  0x2b   : > { %931 = vmatpush.bf16.msra.mxu2 %v1283_v29 }
  0x2d   : > { %477 = vrot.lane.b32.xlu1 %v1472_v37, %s1356_s6  ;;  %479 = vrot.lane.b32.xlu2 %v476_v39, %s1356_s6 }
  0x2e   : > { %956 = vmatpush.bf16.msrb.mxu0 %v1302_v34 }
  0x2f   : > { %465 = vrot.lane.b32.xlu0 %v458_v17, %s1356_s6  ;;  %v1293_v17 = vld [vmem:[%s1662_s3 + $0xd0] sm:$0xff] }
  0x30   : > { %943 = vmatpush.bf16.msra.mxu3 %v1293_v17 }
  0x32   : > { %957 = vmatpush.bf16.msrb.mxu0 %v1301_v38 }
  0x34   : > { %944 = vmatpush.bf16.msra.mxu3 %v1292_v24  ;;  %v1331_v24 = vld [vmem:[%s1663_s4] ss:$0 sm:$0xff] }
  0x35   : > { %430 = vrot.lane.b32.xlu1 %v1482_v45, %s1356_s6 }
  0x36   : > { %958 = vmatpush.bf16.msrb.mxu0 %v1300_v41 }
  0x37   : > { %428 = vrot.lane.b32.xlu0 %v406_v46, %s1356_s6 }
  0x38   : > { %945 = vmatpush.bf16.msra.mxu3 %v1291_v31 }
  0x3a   : > { %959 = vmatpush.bf16.msrb.mxu0 %v1299_v50 }
  0x6f   : > { %v448_v58 = vpop.permute.xlu2 %447 }
  0x70   : > { %v503_v42 = vsel %vm482_vm0, %v1436_v13, %v448_v58 }
  0x71   : > { %v543_v47 = vrot.slane %v503_v42, 6 }
  0x77   : > { %v450_v10 = vpop.permute.xlu2 %449 }
  0x78   : > { %v506_v44 = vsel %vm482_vm0, %v1448_v19, %v450_v10 }
  0x7f   : > { %v464_v33 = vpop.permute.xlu2 %463 }
  0x80   : > { %v515_v43 = vsel %vm482_vm0, %v1461_v30, %v464_v33  ;;  %v546_v30 = vrot.slane %v506_v44, 6 }
  0x81   : > { %v544_v48 = vrot.slane %v515_v43, 4 }
  0x87   : > { %v1547_v9 = vpop.permute.xlu1 %443  ;;  %v480_v40 = vpop.permute.xlu2 %479 }
  0x88   : > { %v524_v46 = vsel %vm482_vm0, %v1446_v18, %v480_v40 }
  0x89   : > { %v1558_v16 = vpop.permute.xlu0 %459  ;;  %v548_v52 = vrot.slane %v524_v46, 2 }
  0x8a   : > { %v509_v61 = vsel %vm482_vm0, %v1482_v45, %v1558_v16 }
  0x8b   : > { %v538_v5 = vrot.slane %v509_v61, 4 }
  0x8f   : > { %v446_v28 = vpop.permute.xlu1 %445 }
  0x90   : > { %v500_v57 = vsel %vm482_vm0, %v437_v11, %v446_v28 }
  0x91   : > { %v433_v32 = vpop.permute.xlu0 %432  ;;  %v540_v62 = vrot.slane %v500_v57, 6 }
  0x92   : > { %v491_v13 = vsel %vm482_vm0, %v1417_v1, %v433_v32 }
  0x93   : > { %v565_v1 = vsel %vm549_vm1, %v491_v13, %v543_v47  ;;  %v539_v11 = vrot.slane %v491_v13, 2 }
  0x95   : > { %v555_v14 = vsel %vm552_vm3, %v538_v5, %v539_v11 }
  0x97   : > { %v462_v35 = vpop.permute.xlu1 %461 }
  0x98   : > { %v512_v54 = vsel %vm482_vm0, %v1451_v21, %v462_v35 }
  0x99   : > { %v435_v39 = vpop.permute.xlu0 %434  ;;  %v541_v59 = vrot.slane %v512_v54, 4 }
  0x9a   : > { %v494_v55 = vsel %vm482_vm0, %v1420_v2, %v435_v39 }
  0x9b   : > { %v542_v21 = vrot.slane %v494_v55, 2  ;;  %v571_v60 = vsel %vm549_vm1, %v494_v55, %v546_v30 }
  0x9d   : > { %v562_v7 = vsel %vm552_vm3, %v541_v59, %v542_v21 }
  0x9f   : > { %v478_v49 = vpop.permute.xlu1 %477 }
  0xa0   : > { %v521_v19 = vsel %vm482_vm0, %v1428_v6, %v478_v49 }
  0xa1   : > { %v545_v18 = vrot.slane %v521_v19, 2  ;;  %v466_v53 = vpop.permute.xlu0 %465 }
  0xa2   : > { %v518_v36 = vsel %vm482_vm0, %v1472_v37, %v466_v53  ;;  %v497_v37 = vsel %vm482_vm0, %v436_v51, %v1547_v9 }
  0xa3   : > { %v568_v56 = vsel %vm552_vm3, %v544_v48, %v545_v18  ;;  %v547_v6 = vrot.slane %v518_v36, 4  ;;  %v537_v4 = vrot.slane %v497_v37, 6 }
  0xa4   : > { %v569_v58 = vsel %vm556_vm2, %v565_v1, %v568_v56 }
  0xa5   : > { %656 = vst [vmem:[#allocation1 + $0x2] ss:$4 sm:$0xff] %v569_v58  ;;  %v574_v2 = vsel %vm552_vm3, %v547_v6, %v548_v52 }
  0xa6   : > { %v575_v8 = vsel %vm556_vm2, %v571_v60, %v574_v2 }
  0xa7   : > { %658 = vst [vmem:[#allocation1 + $0x3] ss:$4 sm:$0xff] %v575_v8  ;;  %v431_v63 = vpop.permute.xlu1 %430 }
  0xa8   : > { %v488_v3 = vsel %vm482_vm0, %v1414_v0, %v431_v63 }
  0xa9   : > { %v559_v10 = vsel %vm549_vm1, %v488_v3, %v540_v62  ;;  %v429_v9 = vpop.permute.xlu0 %428 }
  0xaa   : > { %v563_v12 = vsel %vm556_vm2, %v559_v10, %v562_v7  ;;  %v485_v45 = vsel %vm482_vm0, %v1459_v27, %v429_v9 }
  0xab   : > { %654 = vst [vmem:[#allocation1 + $0x1] ss:$4 sm:$0xff] %v563_v12  ;;  %v551_v15 = vsel %vm549_vm1, %v485_v45, %v537_v4 }
  0xac   : > { %v557_v16 = vsel %vm556_vm2, %v551_v15, %v555_v14 }
  0xad   : > { %652 = vst [vmem:[#allocation1] ss:$4 sm:$0xff] %v557_v16 }
  0xb4   : > { %v669_v0 = vld.sshfl [vmem:[#allocation1] sm:$0xff pattern:$0x73625140]  ;;  %v670_v17 = vld.sshfl [vmem:[#allocation1 + $0x8] sm:$0xff pattern:$0x73625140] }
  0xb5   : > { %904 = vmatmul.bf16.vlgmr.msra.gmra.mxu0 %v669_v0  ;;  %918 = vmatmul.bf16.vlgmr.msra.gmra.mxu1 %v670_v17  ;;  %v671_v20 = vld.sshfl [vmem:[#allocation1 + $0x10] sm:$0xff pattern:$0x73625140]  ;;  %v672_v22 = vld.sshfl [vmem:[#allocation1 + $0x18] sm:$0xff pattern:$0x73625140] }
  0xb6   : > { %932 = vmatmul.bf16.vlgmr.msra.gmra.mxu2 %v671_v20  ;;  %946 = vmatmul.bf16.vlgmr.msra.gmra.mxu3 %v672_v22 }
  0xc5   : > { %1259 = vmatmul.msk.bf16.vlgmr.msrb.gmra.mxu0 %vm482_vm0, %v673_v23 }
 0x132   : > { %v905_v27 = vpop.f32.mrf.mxu0  ;;  %v919_v26 = vpop.f32.mrf.mxu1 }
 0x133   : > { %v906_v25 = vadd.f32 %v1331_v24, %v905_v27 }
 0x135   : > { %v920_v31 = vadd.f32 %v919_v26, %v906_v25 }
 0x139   : > { %v933_v28 = vpop.f32.mrf.mxu2  ;;  %v947_v33 = vpop.f32.mrf.mxu3 }
 0x13a   : > { %v907_v29 = vpop.f32.mrf.mxu0  ;;  %v934_v32 = vadd.f32 %v933_v28, %v920_v31  ;;  %v921_v38 = vpop.f32.mrf.mxu1 }
 0x13b   : > { %v908_v34 = vadd.f32 %v1331_v24, %v907_v29 }
 0x13c   : > { %v948_v35 = vadd.f32 %v947_v33, %v934_v32 }
 0x13d   : > { %v922_v41 = vadd.f32 %v921_v38, %v908_v34 }
 0x141   : > { %v935_v39 = vpop.f32.mrf.mxu2  ;;  %v949_v48 = vpop.f32.mrf.mxu3 }
 0x142   : > { %v961_v40 = vpop.f32.mrf.mxu0  ;;  %v936_v43 = vadd.f32 %v935_v39, %v922_v41 }
 0x143   : > { %v962_v42 = vadd.f32 %v961_v40, %v948_v35 }
 0x144   : > { %v950_v49 = vadd.f32 %v949_v48, %v936_v43 }
 0x145   : > { %v966_v44 = vmax.f32 %v962_v42, 0.0 }
 0x147   : > { %v970_v46 = vrot.slane %v966_v44, 4  ;;  %v974_v47 = vpack.c.bf16 %v966_v44, %v966_v44 }
 0x149   : > { %v975_v50 = vpack.c.bf16 %v970_v46, %v970_v46  ;;  %978 = vst [vmem:[%s379_s28] sm:$0x3] %v974_v47 }
 0x14a   : > { %v963_v51 = vpop.f32.mrf.mxu0 }
 0x14b   : > { %979 = vst [vmem:[%s379_s28 + $0x2] sm:$0x3] %v975_v50  ;;  %v964_v13 = vadd.f32 %v963_v51, %v950_v49 }
 0x14d   : > { %v967_v19 = vmax.f32 %v964_v13, 0.0 }
 0x14f   : > { %v971_v30 = vrot.slane %v967_v19, 4  ;;  %v976_v18 = vpack.c.bf16 %v967_v19, %v967_v19 }
 0x151   : > { %v977_v52 = vpack.c.bf16 %v971_v30, %v971_v30  ;;  %980 = vst [vmem:[%s379_s28 + $0x4] sm:$0x3] %v976_v18 }
 0x153   : > { %981 = vst [vmem:[%s379_s28 + $0x6] sm:$0x3] %v977_v52 }
 0x154 PF: > { %s15_s20 = sadd.s32 1, %s1354_s20   ;;  %s1665_s18 = smov %s1350_s19 }
 0x155   : > { %p12_p5 = scmp.ge.s32.totalorder %s15_s20, 4   ;;  %s1666_s19 = smov %s1668_s21 }
 0x157   :  { %14 = sbr.rel (!%p12_p5) target bundleno = 2 (0x2), region = 83 }

// kernel: edgepoint_forward.24
= control target key start
LH: loop header
LB: loop body
LE: loop exit
PB: predicated region body
PF: predicated region fallthrough
CT: control target
= control target key end

     0   :  { %vm65_vm0 = vcmask 523264   ;;  %s198_s1 = inlined_call_operand.vmem [shape: bf16[64,128], index: 1, kind: input, shape index: {}]   ;;  %s199_s2 = inlined_call_operand.vmem [shape: f32[1,128], index: 2, kind: input, shape index: {}]   ;;  %s200_s0 = inlined_call_operand.vmem [shape: bf16[32,64], index: 0, kind: input, shape index: {}]   ;;  %s201_s3 = inlined_call_operand.vmem [shape: bf16[32,128], index: 3, kind: output, shape index: {}]  }
   0x1   :  { %v134_v0 = vld [vmem:[%s198_s1 + $0x18] sm:$0xff]  ;;  %v133_v1 = vld [vmem:[%s198_s1 + $0x10] sm:$0xff]  ;;  %v132_v2 = vld [vmem:[%s198_s1 + $0x8] sm:$0xff] }
   0x2   :  { %76 = vmatpush.bf16.msra.mxu0 %v134_v0  ;;  %146 = vmatpush.bf16.msra.mxu1 %v134_v0  ;;  %v131_v3 = vld [vmem:[%s198_s1] sm:$0xff]  ;;  %v130_v5 = vld [vmem:[%s200_s0 + $0x8] sm:$0xff] }
   0x3   :  { %v129_v4 = vld [vmem:[%s200_s0] sm:$0xff] }
   0x4   :  { %v150_v8 = vld [vmem:[%s199_s2] ss:$0 sm:$0xff] }
   0x6   :  { %77 = vmatpush.bf16.msra.mxu0 %v133_v1  ;;  %147 = vmatpush.bf16.msra.mxu1 %v133_v1 }
   0xa   :  { %78 = vmatpush.bf16.msra.mxu0 %v132_v2  ;;  %148 = vmatpush.bf16.msra.mxu1 %v132_v2 }
   0xe   :  { %79 = vmatpush.bf16.msra.mxu0 %v131_v3  ;;  %149 = vmatpush.bf16.msra.mxu1 %v131_v3 }
  0x11   :  { %127 = vmatmul.msk.bf16.vlgmr.msra.gmra.mxu0 %vm65_vm0, %v129_v4  ;;  %128 = vmatmul.msk.bf16.vlgmr.msra.gmra.mxu1 %vm65_vm0, %v130_v5 }
  0x8e   :  { %v81_v6 = vpop.f32.mrf.mxu0  ;;  %v86_v7 = vpop.f32.mrf.mxu1 }
  0x8f   :  { %v82_v11 = vadd.f32 %v150_v8, %v81_v6  ;;  %v87_v12 = vadd.f32 %v150_v8, %v86_v7 }
  0x96   :  { %v83_v9 = vpop.f32.mrf.mxu0  ;;  %v88_v10 = vpop.f32.mrf.mxu1 }
  0x97   :  { %v84_v13 = vadd.f32 %v150_v8, %v83_v9  ;;  %v89_v14 = vadd.f32 %v150_v8, %v88_v10 }
  0x99   :  { %v138_v15 = vpack.c.bf16 %v84_v13, %v82_v11  ;;  %v143_v16 = vpack.c.bf16 %v89_v14, %v87_v12 }
  0x9b   :  { %139 = vst [vmem:[%s201_s3] sm:$0xff] %v138_v15  }
  0x9c   :  { %145 = vst [vmem:[%s201_s3 + $0x8] sm:$0xff] %v143_v16  }

// kernel: edgepoint_forward.27
= control target key start
LH: loop header
LB: loop body
LE: loop exit
PB: predicated region body
PF: predicated region fallthrough
CT: control target
= control target key end

     0   :  { %s196_s1 = inlined_call_operand.vmem [shape: bf16[128,128], index: 1, kind: input, shape index: {}]   ;;  %s197_s2 = inlined_call_operand.vmem [shape: f32[1,128], index: 2, kind: input, shape index: {}]   ;;  %s198_s0 = inlined_call_operand.vmem [shape: bf16[2,128], index: 0, kind: input, shape index: {}]   ;;  %s199_s3 = inlined_call_operand.vmem [shape: bf16[2,128], index: 3, kind: output, shape index: {}]  }
   0x1   :  { %v141_v0 = vld [vmem:[%s196_s1 + $0x38] sm:$0xff]  ;;  %v140_v1 = vld [vmem:[%s196_s1 + $0x30] sm:$0xff]  ;;  %v139_v2 = vld [vmem:[%s196_s1 + $0x28] sm:$0xff] }
   0x2   :  { %83 = vmatpush.bf16.msra.mxu0 %v141_v0  ;;  %v138_v3 = vld [vmem:[%s196_s1 + $0x20] sm:$0xff]  ;;  %v137_v4 = vld [vmem:[%s196_s1 + $0x18] sm:$0xff]  ;;  %v136_v5 = vld [vmem:[%s196_s1 + $0x10] sm:$0xff] }
   0x3   :  { %v135_v6 = vld [vmem:[%s196_s1 + $0x8] sm:$0xff]  ;;  %v134_v7 = vld [vmem:[%s196_s1] sm:$0xff] }
   0x4   :  { %v14_v8 = vld [vmem:[%s198_s0] sm:$0x1] }
   0x5   :  { %v142_v9 = vld [vmem:[%s197_s2] ss:$0 sm:$0xff] }
   0x6   :  { %84 = vmatpush.bf16.msra.mxu0 %v140_v1 }
   0xa   :  { %85 = vmatpush.bf16.msra.mxu0 %v139_v2 }
   0xe   :  { %86 = vmatpush.bf16.msra.mxu0 %v138_v3 }
  0x12   :  { %87 = vmatpush.bf16.msra.mxu0 %v137_v4 }
  0x16   :  { %88 = vmatpush.bf16.msra.mxu0 %v136_v5 }
  0x1a   :  { %89 = vmatpush.bf16.msra.mxu0 %v135_v6 }
  0x1e   :  { %90 = vmatpush.bf16.msra.mxu0 %v134_v7 }
  0x21   :  { %91 = vmatmul.bf16.vlgmr.msra.gmra.mxu0 %v14_v8 }
  0x9e   :  { %v92_v10 = vpop.f32.mrf.mxu0 }
  0x9f   :  { %v93_v11 = vadd.f32 %v142_v9, %v92_v10 }
  0xa1   :  { %v96_v12 = vpack.c.bf16 %v93_v11, %v93_v11 }
  0xa3   :  { %97 = vst [vmem:[%s199_s3] sm:$0x1] %v96_v12 }
  0xa6   :  { %v94_v13 = vpop.f32.mrf.mxu0 }

// kernel: edgepoint_forward.26
= control target key start
LH: loop header
LB: loop body
LE: loop exit
PB: predicated region body
PF: predicated region fallthrough
CT: control target
= control target key end

     0   :  { %s1996_s21 = smov 0   ;;  %s1998_s22 = smov 0   ;;  %s2358_s0 = inlined_call_operand.vmem [shape: bf16[2,6,6,128], index: 0, kind: input, shape index: {}, may-alias: {0,1,2}]   ;;  %s2359_s1 = inlined_call_operand.vmem [shape: bf16[2,6,6,128], index: 1, kind: input, shape index: {}, may-alias: {0,1,2}]   ;;  %s2360_s2 = inlined_call_operand.vmem [shape: bf16[2,6,6,128], index: 2, kind: input, shape index: {}, may-alias: {0,1,2}]   ;;  %s2361_s3 = inlined_call_operand.vmem [shape: bf16[1152,128], index: 3, kind: input, shape index: {}]   ;;  %s2362_s4 = inlined_call_operand.vmem [shape: f32[1,128], index: 4, kind: input, shape index: {}]   ;;  %s2363_s5 = inlined_call_operand.vmem [shape: bf16[2,4,4,128], index: 5, kind: input, shape index: {}]   ;;  %s2364_s6 = inlined_call_operand.vmem [shape: bf16[2,4,4,128], index: 6, kind: output, shape index: {}]  }
   0x1   :  { %s2000_s23 = smov 0  }
   0x2 LB: > { %s28_s24 = sadd.s32 1, %s1955_s22  ;;  %p1532_p0 = scmp.ge.s32.totalorder %s1959_s23, 1  ;;  %s1959_s23 = sphi %s2000_s23, %s16_s23   ;;  %s1955_s22 = sphi %s1998_s22, %s2366_s22   ;;  %s1951_s21 = sphi %s1996_s21, %s2365_s21  }
   0x3   : > { %p30_p1 = scmp.ge.s32.totalorder %s28_s24, 2  ;;  %p308_p2 = scmp.lt.s32.totalorder %s1959_s23, 3 }
   0x5   : > { %s2368_s24 = smov (%p30_p1, %s28_s24), 0  ;;  %p309_p3 = pnand %p1532_p0, %p308_p2 }
   0x6   : > { %p385_p4 = scmp.lt.s32.totalorder (!%p309_p3), %s1951_s21, 1 }
   0x7   : > { %312 = sbr.rel (%p309_p3) target bundleno = 253 (0xfd), region = 44 }
   0xc   : > { %v1844_v0 = vld [vmem:[%s2361_s3 + $0x38] sm:$0xff]  ;;  %v1843_v4 = vld [vmem:[%s2361_s3 + $0x30] sm:$0xff]  ;;  %s2370_s21 = smov (!%p385_p4, %s1951_s21), 1  ;;  %v1842_v8 = vld [vmem:[%s2361_s3 + $0x28] sm:$0xff]  ;;  %vm544_vm0 = vcmask 1045508   ;;  %vm540_vm1 = vcmask 1041408  }
   0xd   : > { %v1860_v1 = vld [vmem:[%s2361_s3 + $0xb8] sm:$0xff]  ;;  %1220 = vmatpush.bf16.msra.mxu0 %v1844_v0  ;;  %v1859_v5 = vld [vmem:[%s2361_s3 + $0xb0] sm:$0xff]  ;;  %v1858_v9 = vld [vmem:[%s2361_s3 + $0xa8] sm:$0xff]  ;;  %s1909_s29 = smul.u32 24, %s2370_s21  ;;  %vm548_vm2 = vcmask 1043456   ;;  %s1835_s17 = sshll.u32 %s2370_s21, 3 }
   0xe   : > { %v1852_v2 = vld [vmem:[%s2361_s3 + $0x78] sm:$0xff]  ;;  %1248 = vmatpush.bf16.msra.mxu2 %v1860_v1  ;;  %v1851_v6 = vld [vmem:[%s2361_s3 + $0x70] sm:$0xff]  ;;  %v1850_v10 = vld [vmem:[%s2361_s3 + $0x68] sm:$0xff]  ;;  %s432_s20 = scalar_lea.vmem %s2363_s5, %s1835_s17 }
   0xf   : > { %v1868_v3 = vld [vmem:[%s2361_s3 + $0xf8] sm:$0xff]  ;;  %1234 = vmatpush.bf16.msra.mxu1 %v1852_v2  ;;  %v1867_v7 = vld [vmem:[%s2361_s3 + $0xf0] sm:$0xff]  ;;  %v1866_v11 = vld [vmem:[%s2361_s3 + $0xe8] sm:$0xff]  ;;  %s1832_s14 = sadd.s32 16, %s1909_s29  ;;  %s1834_s15 = sadd.s32 20, %s1909_s29 }
  0x10   : > { %1262 = vmatpush.bf16.msra.mxu3 %v1868_v3  ;;  %v1841_v12 = vld [vmem:[%s2361_s3 + $0x20] sm:$0xff]  ;;  %s392_s18 = scalar_lea.vmem %s2358_s0, %s1909_s29  ;;  %v1840_v16 = vld [vmem:[%s2361_s3 + $0x18] sm:$0xff]  ;;  %s407_s30 = scalar_lea.vmem %s2359_s1, %s1832_s14  ;;  %v1839_v28 = vld [vmem:[%s2361_s3 + $0x10] sm:$0xff] }
  0x11   : > { %1221 = vmatpush.bf16.msra.mxu0 %v1843_v4  ;;  %v1857_v13 = vld [vmem:[%s2361_s3 + $0xa0] sm:$0xff]  ;;  %v1856_v17 = vld [vmem:[%s2361_s3 + $0x98] sm:$0xff]  ;;  %s420_s12 = scalar_lea.vmem %s2360_s2, %s1834_s15  ;;  %v2090_v22 = vld [vmem:[%s392_s18 + $0x8] sm:$0x7] }
  0x12   : > { %1249 = vmatpush.bf16.msra.mxu2 %v1859_v5  ;;  %v1849_v14 = vld [vmem:[%s2361_s3 + $0x60] sm:$0xff]  ;;  %v1848_v18 = vld [vmem:[%s2361_s3 + $0x58] sm:$0xff]  ;;  %v2092_v23 = vld [vmem:[%s392_s18 + $0xc] sm:$0x7]  ;;  %v456_v27 = vunpack.c.l.b16 %v2090_v22  ;;  %v524_v32 = vrot.slane %v2090_v22, 2 }
  0x13   : > { %1235 = vmatpush.bf16.msra.mxu1 %v1851_v6  ;;  %v1865_v15 = vld [vmem:[%s2361_s3 + $0xe0] sm:$0xff]  ;;  %v1864_v19 = vld [vmem:[%s2361_s3 + $0xd8] sm:$0xff]  ;;  %v1855_v29 = vld [vmem:[%s2361_s3 + $0x90] sm:$0xff]  ;;  %v457_v30 = vunpack.c.l.b16 %v2092_v23  ;;  %v530_v39 = vrot.slane %v2092_v23, 2 }
  0x14   : > { %1263 = vmatpush.bf16.msra.mxu3 %v1867_v7  ;;  %v2086_v20 = vld [vmem:[%s392_s18] sm:$0x7]  ;;  %v2088_v21 = vld [vmem:[%s392_s18 + $0x4] sm:$0x7]  ;;  %v1847_v34 = vld [vmem:[%s2361_s3 + $0x50] sm:$0xff]  ;;  %v460_v38 = vpack.c.b16 %v456_v27, %v456_v27 }
  0x15   : > { %1222 = vmatpush.bf16.msra.mxu0 %v1842_v8  ;;  %v2094_v24 = vld [vmem:[%s407_s30] sm:$0x7]  ;;  %v454_v25 = vunpack.c.l.b16 %v2086_v20  ;;  %v455_v26 = vunpack.c.l.b16 %v2088_v21  ;;  %v518_v31 = vrot.slane %v2088_v21, 2  ;;  %v1863_v35 = vld [vmem:[%s2361_s3 + $0xd0] sm:$0xff]  ;;  %v461_v40 = vpack.c.b16 %v457_v30, %v457_v30  ;;  %v1838_v44 = vld [vmem:[%s2361_s3 + $0x8] sm:$0xff]  ;;  %s442_s30 = scalar_lea.vmem %s2364_s6, %s1835_s17 }
  0x16   : > { %1250 = vmatpush.bf16.msra.mxu2 %v1858_v9  ;;  %v2108_v33 = vld [vmem:[%s420_s12] sm:$0x7]  ;;  %v536_v41 = vrot.slane %v2094_v24, 2  ;;  %v495_v42 = vunpack.c.l.b16 %v2094_v24  ;;  %v1854_v45 = vld [vmem:[%s2361_s3 + $0x88] sm:$0xff]  ;;  %v477_v50 = vshrl.u32 %v460_v38, 16  ;;  %v479_v51 = vshll.u32 %v460_v38, 16 }
  0x17   : > { %1236 = vmatpush.bf16.msra.mxu1 %v1850_v10  ;;  %v458_v36 = vpack.c.b16 %v454_v25, %v454_v25  ;;  %v2116_v37 = vpack.c.b16 %v455_v26, %v455_v26  ;;  %v506_v43 = vunpack.c.l.b16 %v2108_v33  ;;  %v484_v52 = vshrl.u32 %v461_v40, 16  ;;  %v1846_v54 = vld [vmem:[%s2361_s3 + $0x48] sm:$0xff]  ;;  %v1837_v4 = vld [vmem:[%s2361_s3] sm:$0xff]  ;;  %v1876_v10 = vld [vmem:[%s2361_s3 + $0x138] sm:$0xff] }
  0x18   : > { %1264 = vmatpush.bf16.msra.mxu3 %v1866_v11  ;;  %v486_v53 = vshll.u32 %v461_v40, 16  ;;  %v1862_v55 = vld [vmem:[%s2361_s3 + $0xc8] sm:$0xff]  ;;  %v2137_v59 = vrot.slane %v460_v38, 1  ;;  %v481_v60 = vrot.slane %v479_v51, 1  ;;  %v2139_v62 = vrot.slane %v461_v40, 1  ;;  %v1853_v5 = vld [vmem:[%s2361_s3 + $0x80] sm:$0xff] }
  0x19   : > { %1223 = vmatpush.bf16.msra.mxu0 %v1841_v12  ;;  %v463_v46 = vshrl.u32 %v458_v36, 16  ;;  %v465_v47 = vshll.u32 %v458_v36, 16  ;;  %v470_v48 = vshrl.u32 %v2116_v37, 16  ;;  %v472_v49 = vshll.u32 %v2116_v37, 16  ;;  %v1892_v11 = vld [vmem:[%s2361_s3 + $0x1b8] sm:$0xff] }
  0x1a   : > { %1251 = vmatpush.bf16.msra.mxu2 %v1857_v13  ;;  %v491_v58 = vrot.slane %v2116_v37, 1  ;;  %v488_v61 = vrot.slane %v486_v53, 1  ;;  %v1540_v63 = vrot.slane %v458_v36, 5  ;;  %v529_v3 = vrot.slane %v2137_v59, 4  ;;  %v1884_v27 = vld [vmem:[%s2361_s3 + $0x178] sm:$0xff]  ;;  %v1890_v53 = vld [vmem:[%s2361_s3 + $0x1a8] sm:$0xff] }
  0x1b   : > { %1237 = vmatpush.bf16.msra.mxu1 %v1849_v14  ;;  %v467_v56 = vrot.slane %v465_v47, 1  ;;  %v474_v57 = vrot.slane %v472_v49, 1  ;;  %v2150_v6 = vor.u32 %v481_v60, %v477_v50  ;;  %v535_v8 = vrot.slane %v2139_v62, 4 }
  0x1c   : > { %1265 = vmatpush.bf16.msra.mxu3 %v1865_v15  ;;  %v523_v2 = vrot.slane %v491_v58, 4  ;;  %v2152_v7 = vor.u32 %v488_v61, %v484_v52  ;;  %v520_v9 = vrot.slane %v2090_v22, 4  ;;  %v547_v14 = vsel %vm544_vm0, %v1540_v63, %v518_v31  ;;  %v1874_v52 = vld [vmem:[%s2361_s3 + $0x128] sm:$0xff] }
  0x1d   : > { %1224 = vmatpush.bf16.msra.mxu0 %v1840_v16  ;;  %v468_v0 = vor.u32 %v467_v56, %v463_v46  ;;  %v2141_v1 = vor.u32 %v474_v57, %v470_v48  ;;  %v1845_v16 = vld [vmem:[%s2361_s3 + $0x40] sm:$0xff]  ;;  %v576_v25 = vsel %vm544_vm0, %v529_v3, %v530_v39  ;;  %v2174_v26 = vpack.c.b16 %v495_v42, %v495_v42  ;;  %v1882_v63 = vld [vmem:[%s2361_s3 + $0x168] sm:$0xff] }
  0x1e   : > { %1252 = vmatpush.bf16.msra.mxu2 %v1856_v17  ;;  %v562_v15 = vsel %vm544_vm0, %v523_v2, %v524_v32  ;;  %v1861_v17 = vld [vmem:[%s2361_s3 + $0xc0] sm:$0xff]  ;;  %v590_v31 = vsel %vm544_vm0, %v535_v8, %v536_v41  ;;  %v2187_v32 = vpack.c.b16 %v506_v43, %v506_v43  ;;  %v526_v37 = vrot.slane %v2092_v23, 4  ;;  %v1883_v41 = vld [vmem:[%s2361_s3 + $0x170] sm:$0xff] }
  0x1f   : > { %1238 = vmatpush.bf16.msra.mxu1 %v1848_v18  ;;  %v516_v12 = vrot.slane %v468_v0, 6  ;;  %v522_v13 = vrot.slane %v2141_v1, 6  ;;  %v528_v18 = vrot.slane %v2150_v6, 6  ;;  %v519_v40 = vrot.slane %v491_v58, 6  ;;  %v1898_v0 = vld [vmem:[%s2361_s3 + $0x1e8] sm:$0xff] }
  0x20   : > { %1266 = vmatpush.bf16.msra.mxu3 %v1864_v19  ;;  %v534_v19 = vrot.slane %v2152_v7, 6  ;;  %v500_v43 = vshll.u32 %v2174_v26, 16  ;;  %v521_v46 = vrot.slane %v2150_v6, 2  ;;  %v525_v47 = vrot.slane %v2137_v59, 6 }
  0x21   : > { %1225 = vmatpush.bf16.msra.mxu0 %v1839_v28  ;;  %v1900_v28 = vld [vmem:[%s2361_s3 + $0x1f8] sm:$0xff]  ;;  %v559_v30 = vsel %vm540_vm1, %v2088_v21, %v522_v13  ;;  %v573_v36 = vsel %vm540_vm1, %v2090_v22, %v528_v18  ;;  %v1891_v21 = vld [vmem:[%s2361_s3 + $0x1b0] sm:$0xff]  ;;  %v498_v22 = vshrl.u32 %v2174_v26, 16  ;;  %v527_v48 = vrot.slane %v2152_v7, 2 }
  0x22   : > { %1253 = vmatpush.bf16.msra.mxu2 %v1855_v29  ;;  %v543_v29 = vsel %vm540_vm1, %v2086_v20, %v516_v12  ;;  %v1875_v20 = vld [vmem:[%s2361_s3 + $0x130] sm:$0xff]  ;;  %v577_v38 = vsel %vm548_vm2, %v573_v36, %v576_v25  ;;  %v587_v39 = vsel %vm540_vm1, %v2092_v23, %v534_v19  ;;  %v504_v49 = vrot.slane %v2174_v26, 1  ;;  %v1872_v25 = vld [vmem:[%s2361_s3 + $0x118] sm:$0xff]  ;;  %v1894_v36 = vld [vmem:[%s2361_s3 + $0x1c8] sm:$0xff] }
  0x23   : > { %1239 = vmatpush.bf16.msra.mxu1 %v1847_v34  ;;  %v549_v34 = vsel %vm548_vm2, %v543_v29, %v547_v14  ;;  %v591_v42 = vsel %vm548_vm2, %v587_v39, %v590_v31  ;;  %v1899_v23 = vld [vmem:[%s2361_s3 + $0x1f0] sm:$0xff]  ;;  %751 = vst [vmem:[#allocation1 + $0x2] ss:$4 sm:$0xff] %v577_v38  ;;  %v502_v50 = vrot.slane %v500_v43, 1  ;;  %v566_v56 = vsel %vm540_vm1, %v2150_v6, %v525_v47  ;;  %v1877_v38 = vld [vmem:[%s2361_s3 + $0x140] sm:$0xff]  ;;  %v1902_v47 = vld [vmem:[%s2361_s3 + $0x208] sm:$0xff] }
  0x24   : > { %1267 = vmatpush.bf16.msra.mxu3 %v1863_v35  ;;  %v563_v35 = vsel %vm548_vm2, %v559_v30, %v562_v15  ;;  %747 = vst [vmem:[#allocation1] ss:$4 sm:$0xff] %v549_v34  ;;  %v569_v61 = vsel %vm544_vm0, %v526_v37, %v527_v48  ;;  %v532_v2 = vrot.slane %v2094_v24, 4  ;;  %v538_v6 = vrot.slane %v2108_v33, 4  ;;  %v1881_v24 = vld [vmem:[%s2361_s3 + $0x160] sm:$0xff]  ;;  %v1879_v30 = vld [vmem:[%s2361_s3 + $0x150] sm:$0xff] }
  0x25   : > { %1226 = vmatpush.bf16.msra.mxu0 %v1838_v44  ;;  %749 = vst [vmem:[#allocation1 + $0x1] ss:$4 sm:$0xff] %v563_v35  ;;  %v509_v44 = vshrl.u32 %v2187_v32, 16  ;;  %v503_v57 = vor.u32 %v502_v50, %v498_v22  ;;  %v570_v3 = vsel %vm548_vm2, %v566_v56, %v569_v61  ;;  %v1897_v33 = vld [vmem:[%s2361_s3 + $0x1e0] sm:$0xff]  ;;  %v1895_v31 = vld [vmem:[%s2361_s3 + $0x1d0] sm:$0xff]  ;;  %v1886_v34 = vld [vmem:[%s2361_s3 + $0x188] sm:$0xff] }
  0x26   : > { %1254 = vmatpush.bf16.msra.mxu2 %v1854_v45  ;;  %v511_v45 = vshll.u32 %v2187_v32, 16  ;;  %753 = vst [vmem:[#allocation1 + $0x3] ss:$4 sm:$0xff] %v591_v42  ;;  %v1878_v35 = vld [vmem:[%s2361_s3 + $0x148] sm:$0xff]  ;;  %v1869_v37 = vld [vmem:[%s2361_s3 + $0x100] sm:$0xff] }
  0x27   : > { %1240 = vmatpush.bf16.msra.mxu1 %v1846_v54  ;;  %v552_v54 = vsel %vm540_vm1, %v2141_v1, %v519_v40  ;;  %v531_v1 = vrot.slane %v2139_v62, 6  ;;  %757 = vst [vmem:[#allocation1 + $0x21] ss:$4 sm:$0xff] %v570_v3  ;;  %v1893_v39 = vld [vmem:[%s2361_s3 + $0x1c0] sm:$0xff] }
  0x28   : > { %1268 = vmatpush.bf16.msra.mxu3 %v1862_v55  ;;  %v513_v51 = vrot.slane %v511_v45, 1  ;;  %v555_v55 = vsel %vm544_vm0, %v520_v9, %v521_v46  ;;  %v1873_v9 = vld [vmem:[%s2361_s3 + $0x120] sm:$0xff]  ;;  %v1903_v46 = vld [vmem:[%s2361_s3 + $0x210] sm:$0xff] }
  0x29   : > { %1227 = vmatpush.bf16.msra.mxu0 %v1837_v4  ;;  %v556_v60 = vsel %vm548_vm2, %v552_v54, %v555_v55  ;;  %v533_v4 = vrot.slane %v503_v57, 2  ;;  %v580_v14 = vsel %vm540_vm1, %v2152_v7, %v531_v1  ;;  %v1888_v7 = vld [vmem:[%s2361_s3 + $0x198] sm:$0xff]  ;;  %v1905_v45 = vld [vmem:[%s2361_s3 + $0x220] sm:$0xff] }
  0x2a   : > { %1255 = vmatpush.bf16.msra.mxu2 %v1853_v5  ;;  %v514_v58 = vor.u32 %v513_v51, %v509_v44  ;;  %755 = vst [vmem:[#allocation1 + $0x20] ss:$4 sm:$0xff] %v556_v60  ;;  %v537_v5 = vrot.slane %v504_v49, 6  ;;  %v1906_v44 = vld [vmem:[%s2361_s3 + $0x228] sm:$0xff]  ;;  %v1901_v48 = vld [vmem:[%s2361_s3 + $0x200] sm:$0xff] }
  0x2b   : > { %1241 = vmatpush.bf16.msra.mxu1 %v1845_v16  ;;  %v583_v15 = vsel %vm544_vm0, %v532_v2, %v533_v4  ;;  %v1346_v50 = vld [vmem:[%s432_s20] sm:$0x3]  ;;  %v1347_v51 = vld [vmem:[%s432_s20 + $0x2] sm:$0x3] }
  0x2c   : > { %1269 = vmatpush.bf16.msra.mxu3 %v1861_v17  ;;  %v539_v8 = vrot.slane %v514_v58, 2  ;;  %v594_v18 = vsel %vm540_vm1, %v503_v57, %v537_v5  ;;  %v584_v26 = vsel %vm548_vm2, %v580_v14, %v583_v15  ;;  %v1936_v55 = vld [vmem:[%s2362_s4] ss:$0 sm:$0xff]  ;;  %v1348_v57 = vld [vmem:[%s432_s20 + $0x4] sm:$0x3] }
  0x2d   : > { %1276 = vmatpush.bf16.msrb.mxu0 %v1876_v10  ;;  %v1889_v10 = vld [vmem:[%s2361_s3 + $0x1a0] sm:$0xff]  ;;  %v764_v13 = vld.sshfl [vmem:[#allocation1 + $0x10] sm:$0xff pattern:$0x73625140]  ;;  %759 = vst [vmem:[#allocation1 + $0x22] ss:$4 sm:$0xff] %v584_v26  ;;  %v1352_v60 = vunpack.c.l.bf16 %v1348_v57 }
  0x2e   : > { %1304 = vmatpush.bf16.msrb.mxu2 %v1892_v11  ;;  %v515_v11 = vrot.slane %v2187_v32, 1  ;;  %v762_v12 = vld.sshfl [vmem:[#allocation1] sm:$0xff pattern:$0x73625140]  ;;  %v597_v19 = vsel %vm544_vm0, %v538_v6, %v539_v8  ;;  %v1870_v32 = vld [vmem:[%s2361_s3 + $0x108] sm:$0xff] }
  0x2f   : > { %1290 = vmatpush.bf16.msrb.mxu1 %v1884_v27  ;;  %1228 = vmatmul.bf16.vlgmr.msra.gmra.mxu0 %v762_v12  ;;  %v763_v16 = vld.sshfl [vmem:[#allocation1 + $0x8] sm:$0xff pattern:$0x73625140]  ;;  %v765_v17 = vld.sshfl [vmem:[#allocation1 + $0x18] sm:$0xff pattern:$0x73625140]  ;;  %v598_v29 = vsel %vm548_vm2, %v594_v18, %v597_v19 }
  0x30   : > { %1318 = vmatpush.bf16.msrb.mxu3 %v1900_v28  ;;  %1256 = vmatmul.bf16.vlgmr.msra.gmra.mxu2 %v764_v13  ;;  %771 = vst [vmem:[#allocation1] ss:$4 sm:$0xff] %v2137_v59  ;;  %v1880_v27 = vld [vmem:[%s2361_s3 + $0x158] sm:$0xff]  ;;  %v1871_v59 = vld [vmem:[%s2361_s3 + $0x110] sm:$0xff]  ;;  %v1349_v58 = vld [vmem:[%s432_s20 + $0x6] sm:$0x3] }
  0x31   : > { %1277 = vmatpush.bf16.msrb.mxu0 %v1875_v20  ;;  %1242 = vmatmul.bf16.vlgmr.msra.gmra.mxu1 %v763_v16  ;;  %773 = vst [vmem:[#allocation1 + $0x1] ss:$4 sm:$0xff] %v2139_v62  ;;  %v1896_v28 = vld [vmem:[%s2361_s3 + $0x1d8] sm:$0xff]  ;;  %v1887_v62 = vld [vmem:[%s2361_s3 + $0x190] sm:$0xff]  ;;  %v1885_v20 = vld [vmem:[%s2361_s3 + $0x180] sm:$0xff]  ;;  %v1353_v61 = vunpack.c.l.bf16 %v1349_v58 }
  0x32   : > { %1305 = vmatpush.bf16.msrb.mxu2 %v1891_v21  ;;  %1270 = vmatmul.bf16.vlgmr.msra.gmra.mxu3 %v765_v17  ;;  %775 = vst [vmem:[#allocation1 + $0x2] ss:$4 sm:$0xff] %v504_v49  ;;  %v1908_v21 = vld [vmem:[%s2361_s3 + $0x238] sm:$0xff] }
  0x33   : > { %1291 = vmatpush.bf16.msrb.mxu1 %v1883_v41  ;;  %777 = vst [vmem:[#allocation1 + $0x3] ss:$4 sm:$0xff] %v515_v11  ;;  %v1907_v41 = vld [vmem:[%s2361_s3 + $0x230] sm:$0xff] }
  0x34   : > { %1319 = vmatpush.bf16.msrb.mxu3 %v1899_v23  ;;  %761 = vst [vmem:[#allocation1 + $0x23] ss:$4 sm:$0xff] %v598_v29  ;;  %v1904_v23 = vld [vmem:[%s2361_s3 + $0x218] sm:$0xff] }
  0x35   : > { %1278 = vmatpush.bf16.msrb.mxu0 %v1874_v52  ;;  %v1350_v52 = vunpack.c.l.bf16 %v1346_v50  ;;  %1362 = vst [vmem:[#allocation1 + $0x10] ss:$2 sm:$0xff] %v1352_v60 }
  0x36   : > { %1306 = vmatpush.bf16.msrb.mxu2 %v1890_v53  ;;  %v1351_v53 = vunpack.c.l.bf16 %v1347_v51  ;;  %1364 = vst [vmem:[#allocation1 + $0x11] ss:$2 sm:$0xff] %v1353_v61 }
  0x37   : > { %1292 = vmatpush.bf16.msrb.mxu1 %v1882_v63 }
  0x38   : > { %1320 = vmatpush.bf16.msrb.mxu3 %v1898_v0 }
  0x39   : > { %1279 = vmatpush.bf16.msrb.mxu0 %v1873_v9 }
  0x3a   : > { %1307 = vmatpush.bf16.msrb.mxu2 %v1889_v10  ;;  %v778_v49 = vld.sshfl [vmem:[#allocation1] sm:$0xff pattern:$0x73625140] }
  0x3b   : > { %1293 = vmatpush.bf16.msrb.mxu1 %v1881_v24  ;;  %v766_v22 = vld.sshfl [vmem:[#allocation1 + $0x20] sm:$0xff pattern:$0x73625140]  ;;  %v768_v40 = vld.sshfl [vmem:[#allocation1 + $0x30] sm:$0xff pattern:$0x73625140] }
  0x3c   : > { %1321 = vmatpush.bf16.msrb.mxu3 %v1897_v33  ;;  %v767_v42 = vld.sshfl [vmem:[#allocation1 + $0x28] sm:$0xff pattern:$0x73625140]  ;;  %v769_v43 = vld.sshfl [vmem:[#allocation1 + $0x38] sm:$0xff pattern:$0x73625140] }
  0x3d   : > { %1280 = vmatpush.bf16.msrb.mxu0 %v1872_v25  ;;  %1358 = vst [vmem:[#allocation1] ss:$2 sm:$0xff] %v1350_v52 }
  0x3e   : > { %1308 = vmatpush.bf16.msrb.mxu2 %v1888_v7  ;;  %1360 = vst [vmem:[#allocation1 + $0x1] ss:$2 sm:$0xff] %v1351_v53 }
  0x3f   : > { %1294 = vmatpush.bf16.msrb.mxu1 %v1880_v27 }
  0x40   : > { %1322 = vmatpush.bf16.msrb.mxu3 %v1896_v28 }
  0x41   : > { %1281 = vmatpush.bf16.msrb.mxu0 %v1871_v59 }
  0x42   : > { %1309 = vmatpush.bf16.msrb.mxu2 %v1887_v62 }
  0x43   : > { %1295 = vmatpush.bf16.msrb.mxu1 %v1879_v30 }
  0x44   : > { %1323 = vmatpush.bf16.msrb.mxu3 %v1895_v31 }
  0x45   : > { %1282 = vmatpush.bf16.msrb.mxu0 %v1870_v32  ;;  %v1365_v29 = vld.sshfl [vmem:[#allocation1] sm:$0xff pattern:$0x75316420] }
  0x46   : > { %1310 = vmatpush.bf16.msrb.mxu2 %v1886_v34 }
  0x47   : > { %1296 = vmatpush.bf16.msrb.mxu1 %v1878_v35 }
  0x48   : > { %1324 = vmatpush.bf16.msrb.mxu3 %v1894_v36 }
  0x49   : > { %1283 = vmatpush.bf16.msrb.mxu0 %v1869_v37 }
  0x4a   : > { %1311 = vmatpush.bf16.msrb.mxu2 %v1885_v20 }
  0x4b   : > { %1297 = vmatpush.bf16.msrb.mxu1 %v1877_v38 }
  0x4c   : > { %1325 = vmatpush.bf16.msrb.mxu3 %v1893_v39  ;;  %1284 = vmatmul.bf16.vlgmr.msrb.gmra.mxu0 %v766_v22 }
  0x4d   : > { %1332 = vmatpush.bf16.msra.mxu0 %v1908_v21  ;;  %1312 = vmatmul.bf16.vlgmr.msrb.gmra.mxu2 %v768_v40  ;;  %v1366_v21 = vld.sshfl [vmem:[#allocation1 + $0x10] sm:$0xff pattern:$0x75316420] }
  0x4e   : > { %1298 = vmatmul.bf16.vlgmr.msrb.gmra.mxu1 %v767_v42 }
  0x4f   : > { %1326 = vmatmul.bf16.vlgmr.msrb.gmra.mxu3 %v769_v43 }
  0x51   : > { %1333 = vmatpush.bf16.msra.mxu0 %v1907_v41 }
  0x55   : > { %1334 = vmatpush.bf16.msra.mxu0 %v1906_v44 }
  0x59   : > { %1335 = vmatpush.bf16.msra.mxu0 %v1905_v45 }
  0x5d   : > { %1336 = vmatpush.bf16.msra.mxu0 %v1904_v23 }
  0x61   : > { %1337 = vmatpush.bf16.msra.mxu0 %v1903_v46 }
  0x65   : > { %1338 = vmatpush.bf16.msra.mxu0 %v1902_v47 }
  0x69   : > { %1339 = vmatpush.bf16.msra.mxu0 %v1901_v48 }
  0x6c   : > { %1340 = vmatmul.bf16.vlgmr.msra.gmra.mxu0 %v778_v49 }
  0xac   : > { %v1229_v54 = vpop.f32.mrf.mxu0 }
  0xad   : > { %v1230_v0 = vadd.f32 %v1936_v55, %v1229_v54 }
  0xae   : > { %v1243_v56 = vpop.f32.mrf.mxu1 }
  0xaf   : > { %v1244_v3 = vadd.f32 %v1243_v56, %v1230_v0 }
  0xb3   : > { %v1257_v63 = vpop.f32.mrf.mxu2 }
  0xb4   : > { %v1231_v1 = vpop.f32.mrf.mxu0  ;;  %v1258_v5 = vadd.f32 %v1257_v63, %v1244_v3 }
  0xb5   : > { %v1271_v2 = vpop.f32.mrf.mxu3  ;;  %v1232_v9 = vadd.f32 %v1936_v55, %v1231_v1 }
  0xb6   : > { %v1245_v4 = vpop.f32.mrf.mxu1  ;;  %v1272_v10 = vadd.f32 %v1271_v2, %v1258_v5 }
  0xb7   : > { %v1246_v33 = vadd.f32 %v1245_v4, %v1232_v9 }
  0xbb   : > { %v1259_v6 = vpop.f32.mrf.mxu2 }
  0xbc   : > { %v1260_v14 = vadd.f32 %v1259_v6, %v1246_v33 }
  0xbd   : > { %v1273_v24 = vpop.f32.mrf.mxu3 }
  0xbe   : > { %v1274_v18 = vadd.f32 %v1273_v24, %v1260_v14 }
  0xc9   : > { %v1285_v8 = vpop.f32.mrf.mxu0 }
  0xca   : > { %v1286_v11 = vadd.f32 %v1285_v8, %v1272_v10 }
  0xcb   : > { %v1299_v12 = vpop.f32.mrf.mxu1 }
  0xcc   : > { %v1300_v15 = vadd.f32 %v1299_v12, %v1286_v11 }
  0xd0   : > { %v1313_v13 = vpop.f32.mrf.mxu2 }
  0xd1   : > { %v1287_v16 = vpop.f32.mrf.mxu0  ;;  %v1314_v19 = vadd.f32 %v1313_v13, %v1300_v15 }
  0xd2   : > { %v1327_v17 = vpop.f32.mrf.mxu3  ;;  %v1288_v25 = vadd.f32 %v1287_v16, %v1274_v18 }
  0xd3   : > { %v1301_v7 = vpop.f32.mrf.mxu1  ;;  %v1328_v26 = vadd.f32 %v1327_v17, %v1314_v19 }
  0xd4   : > { %v1302_v59 = vadd.f32 %v1301_v7, %v1288_v25 }
  0xd8   : > { %v1315_v27 = vpop.f32.mrf.mxu2 }
  0xd9   : > { %v1316_v30 = vadd.f32 %v1315_v27, %v1302_v59 }
  0xda   : > { %v1329_v32 = vpop.f32.mrf.mxu3 }
  0xdb   : > { %v1330_v35 = vadd.f32 %v1329_v32, %v1316_v30 }
  0xe9   : > { %v1341_v28 = vpop.f32.mrf.mxu0 }
  0xea   : > { %v1342_v62 = vadd.f32 %v1341_v28, %v1328_v26 }
  0xec   : > { %v1369_v31 = vadd.f32 %v1365_v29, %v1342_v62 }
  0xee   : > { %v1371_v34 = vmax.f32 %v1369_v31, 0.0 }
  0xf0   : > { %v1375_v36 = vrot.slane %v1371_v34, 4  ;;  %v1379_v37 = vpack.c.bf16 %v1371_v34, %v1371_v34 }
  0xf1   : > { %v1343_v20 = vpop.f32.mrf.mxu0 }
  0xf2   : > { %v1380_v38 = vpack.c.bf16 %v1375_v36, %v1375_v36  ;;  %1383 = vst [vmem:[%s442_s30] sm:$0x3] %v1379_v37  ;;  %v1344_v39 = vadd.f32 %v1343_v20, %v1330_v35 }
  0xf4   : > { %1384 = vst [vmem:[%s442_s30 + $0x2] sm:$0x3] %v1380_v38  ;;  %v1370_v22 = vadd.f32 %v1366_v21, %v1344_v39 }
  0xf6   : > { %v1372_v40 = vmax.f32 %v1370_v22, 0.0 }
  0xf8   : > { %v1376_v41 = vrot.slane %v1372_v40, 4  ;;  %v1381_v42 = vpack.c.bf16 %v1372_v40, %v1372_v40 }
  0xfa   : > { %v1382_v43 = vpack.c.bf16 %v1376_v41, %v1376_v41  ;;  %1385 = vst [vmem:[%s442_s30 + $0x4] sm:$0x3] %v1381_v42 }
  0xfc   : > { %1386 = vst [vmem:[%s442_s30 + $0x6] sm:$0x3] %v1382_v43 }
  0xfd PF: > { %s16_s23 = sadd.s32 1, %s1959_s23   ;;  %s2365_s21 = smov %s1955_s22 }
  0xfe   : > { %p13_p5 = scmp.ge.s32.totalorder %s16_s23, 4   ;;  %s2366_s22 = smov %s2368_s24 }
 0x100   :  { %15 = sbr.rel (!%p13_p5) target bundleno = 2 (0x2), region = 93 }

// kernel: edgepoint_forward.28
= control target key start
LH: loop header
LB: loop body
LE: loop exit
PB: predicated region body
PF: predicated region fallthrough
CT: control target
= control target key end

     0   :  { %s1628_s18 = smov 0   ;;  %s1630_s19 = smov 0   ;;  %s1895_s0 = inlined_call_operand.vmem [shape: bf16[2,3,3,128], index: 0, kind: input, shape index: {}, may-alias: {0,1,2}]   ;;  %s1896_s1 = inlined_call_operand.vmem [shape: bf16[2,3,3,128], index: 1, kind: input, shape index: {}, may-alias: {0,1,2}]   ;;  %s1897_s2 = inlined_call_operand.vmem [shape: bf16[2,3,3,128], index: 2, kind: input, shape index: {}, may-alias: {0,1,2}]   ;;  %s1898_s3 = inlined_call_operand.vmem [shape: bf16[1152,128], index: 3, kind: input, shape index: {}]   ;;  %s1899_s4 = inlined_call_operand.vmem [shape: f32[1,128], index: 4, kind: input, shape index: {}]   ;;  %s1900_s5 = inlined_call_operand.vmem [shape: bf16[2,1,1,128], index: 5, kind: output, shape index: {}]  }
   0x1   :  { %s1632_s20 = smov 0  }
   0x2 LB: > { %s27_s21 = sadd.s32 1, %s1592_s19  ;;  %p1177_p0 = scmp.ge.s32.totalorder %s1596_s20, 1  ;;  %s1596_s20 = sphi %s1632_s20, %s15_s20   ;;  %s1592_s19 = sphi %s1630_s19, %s1902_s19   ;;  %s1588_s18 = sphi %s1628_s18, %s1901_s18  }
   0x3   : > { %p29_p1 = scmp.ge.s32.totalorder %s27_s21, 2  ;;  %p244_p2 = scmp.lt.s32.totalorder %s1596_s20, 3 }
   0x5   : > { %s1904_s21 = smov (%p29_p1, %s27_s21), 0  ;;  %p245_p3 = pnand %p1177_p0, %p244_p2 }
   0x6   : > { %p294_p4 = scmp.lt.s32.totalorder (!%p245_p3), %s1588_s18, 1 }
   0x7   : > { %248 = sbr.rel (%p245_p3) target bundleno = 242 (0xf2), region = 40 }
   0xc   : > { %v1482_v0 = vld [vmem:[%s1898_s3 + $0x38] sm:$0xff]  ;;  %v1481_v4 = vld [vmem:[%s1898_s3 + $0x30] sm:$0xff]  ;;  %s1906_s18 = smov (!%p294_p4, %s1588_s18), 1  ;;  %v1480_v8 = vld [vmem:[%s1898_s3 + $0x28] sm:$0xff]  ;;  %vm1060_vm0 = vcmask 1040384  }
   0xd   : > { %v1498_v1 = vld [vmem:[%s1898_s3 + $0xb8] sm:$0xff]  ;;  %941 = vmatpush.bf16.msra.mxu0 %v1482_v0  ;;  %v1497_v5 = vld [vmem:[%s1898_s3 + $0xb0] sm:$0xff]  ;;  %v1496_v9 = vld [vmem:[%s1898_s3 + $0xa8] sm:$0xff]  ;;  %s1685_s25 = smul.u32 6, %s1906_s18  ;;  %s327_s13 = scalar_lea.vmem %s1900_s5, %s1906_s18  ;;  %vm1061_vm1 = vsmask.f32 256 }
   0xe   : > { %v1506_v2 = vld [vmem:[%s1898_s3 + $0xf8] sm:$0xff]  ;;  %967 = vmatpush.bf16.msra.mxu2 %v1498_v1  ;;  %v1505_v6 = vld [vmem:[%s1898_s3 + $0xf0] sm:$0xff]  ;;  %v1504_v10 = vld [vmem:[%s1898_s3 + $0xe8] sm:$0xff] }
   0xf   : > { %v1490_v3 = vld [vmem:[%s1898_s3 + $0x78] sm:$0xff]  ;;  %980 = vmatpush.bf16.msra.mxu3 %v1506_v2  ;;  %v1489_v7 = vld [vmem:[%s1898_s3 + $0x70] sm:$0xff]  ;;  %v1488_v11 = vld [vmem:[%s1898_s3 + $0x68] sm:$0xff]  ;;  %s301_s11 = scalar_lea.vmem %s1895_s0, %s1685_s25  ;;  %s1472_s16 = sadd.s32 2, %s1685_s25 }
  0x10   : > { %954 = vmatpush.bf16.msra.mxu1 %v1490_v3  ;;  %v1479_v12 = vld [vmem:[%s1898_s3 + $0x20] sm:$0xff]  ;;  %v1478_v16 = vld [vmem:[%s1898_s3 + $0x18] sm:$0xff]  ;;  %v1477_v21 = vld [vmem:[%s1898_s3 + $0x10] sm:$0xff]  ;;  %s310_s7 = scalar_lea.vmem %s1896_s1, %s1472_s16  ;;  %s1474_s16 = sadd.s32 4, %s1685_s25 }
  0x11   : > { %942 = vmatpush.bf16.msra.mxu0 %v1481_v4  ;;  %v1495_v13 = vld [vmem:[%s1898_s3 + $0xa0] sm:$0xff]  ;;  %v1494_v17 = vld [vmem:[%s1898_s3 + $0x98] sm:$0xff]  ;;  %v1493_v22 = vld [vmem:[%s1898_s3 + $0x90] sm:$0xff]  ;;  %s320_s6 = scalar_lea.vmem %s1897_s2, %s1474_s16 }
  0x12   : > { %968 = vmatpush.bf16.msra.mxu2 %v1497_v5  ;;  %v1503_v14 = vld [vmem:[%s1898_s3 + $0xe0] sm:$0xff]  ;;  %v1502_v18 = vld [vmem:[%s1898_s3 + $0xd8] sm:$0xff]  ;;  %v1501_v23 = vld [vmem:[%s1898_s3 + $0xd0] sm:$0xff] }
  0x13   : > { %981 = vmatpush.bf16.msra.mxu3 %v1505_v6  ;;  %v1487_v15 = vld [vmem:[%s1898_s3 + $0x60] sm:$0xff]  ;;  %v1486_v19 = vld [vmem:[%s1898_s3 + $0x58] sm:$0xff]  ;;  %v1485_v24 = vld [vmem:[%s1898_s3 + $0x50] sm:$0xff] }
  0x14   : > { %955 = vmatpush.bf16.msra.mxu1 %v1489_v7  ;;  %v328_v20 = vld [vmem:[%s301_s11] sm:$0x3]  ;;  %v1476_v25 = vld [vmem:[%s1898_s3 + $0x8] sm:$0xff]  ;;  %v1514_v32 = vld [vmem:[%s1898_s3 + $0x138] sm:$0xff] }
  0x15   : > { %943 = vmatpush.bf16.msra.mxu0 %v1480_v8  ;;  %332 = vst [vmem:[#allocation1] ss:$4 sm:$0xff] %v328_v20  ;;  %v1492_v26 = vld [vmem:[%s1898_s3 + $0x88] sm:$0xff]  ;;  %v1475_v30 = vld [vmem:[%s1898_s3] sm:$0xff]  ;;  %v1530_v33 = vld [vmem:[%s1898_s3 + $0x1b8] sm:$0xff] }
  0x16   : > { %969 = vmatpush.bf16.msra.mxu2 %v1496_v9  ;;  %v1500_v27 = vld [vmem:[%s1898_s3 + $0xc8] sm:$0xff]  ;;  %v1491_v31 = vld [vmem:[%s1898_s3 + $0x80] sm:$0xff]  ;;  %v1538_v36 = vld [vmem:[%s1898_s3 + $0x1f8] sm:$0xff] }
  0x17   : > { %982 = vmatpush.bf16.msra.mxu3 %v1504_v10  ;;  %v1484_v28 = vld [vmem:[%s1898_s3 + $0x48] sm:$0xff]  ;;  %v1499_v34 = vld [vmem:[%s1898_s3 + $0xc0] sm:$0xff]  ;;  %v1522_v37 = vld [vmem:[%s1898_s3 + $0x178] sm:$0xff] }
  0x18   : > { %956 = vmatpush.bf16.msra.mxu1 %v1488_v11  ;;  %v1483_v35 = vld [vmem:[%s1898_s3 + $0x40] sm:$0xff]  ;;  %v1513_v39 = vld [vmem:[%s1898_s3 + $0x130] sm:$0xff]  ;;  %v1512_v46 = vld [vmem:[%s1898_s3 + $0x128] sm:$0xff] }
  0x19   : > { %944 = vmatpush.bf16.msra.mxu0 %v1479_v12  ;;  %v329_v38 = vld [vmem:[%s310_s7] sm:$0x3]  ;;  %v1529_v40 = vld [vmem:[%s1898_s3 + $0x1b0] sm:$0xff]  ;;  %v1528_v47 = vld [vmem:[%s1898_s3 + $0x1a8] sm:$0xff] }
  0x1a   : > { %970 = vmatpush.bf16.msra.mxu2 %v1495_v13  ;;  %v1537_v42 = vld [vmem:[%s1898_s3 + $0x1f0] sm:$0xff]  ;;  %v1536_v48 = vld [vmem:[%s1898_s3 + $0x1e8] sm:$0xff]  ;;  %v1511_v50 = vld [vmem:[%s1898_s3 + $0x120] sm:$0xff] }
  0x1b   : > { %983 = vmatpush.bf16.msra.mxu3 %v1503_v14  ;;  %v1521_v43 = vld [vmem:[%s1898_s3 + $0x170] sm:$0xff]  ;;  %v1520_v49 = vld [vmem:[%s1898_s3 + $0x168] sm:$0xff]  ;;  %v1527_v51 = vld [vmem:[%s1898_s3 + $0x1a0] sm:$0xff] }
  0x1c   : > { %957 = vmatpush.bf16.msra.mxu1 %v1487_v15  ;;  %v333_v29 = vld.sshfl [vmem:[#allocation1] sm:$0xff pattern:$0x73625140]  ;;  %v1510_v55 = vld [vmem:[%s1898_s3 + $0x118] sm:$0xff]  ;;  %v1509_v60 = vld [vmem:[%s1898_s3 + $0x110] sm:$0xff] }
  0x1d   : > { %945 = vmatpush.bf16.msra.mxu0 %v1478_v16  ;;  %337 = vst [vmem:[#allocation1] ss:$4 sm:$0xff] %v328_v20  ;;  %v334_v45 = vshrl.u32 %v333_v29, 16  ;;  %v1535_v53 = vld [vmem:[%s1898_s3 + $0x1e0] sm:$0xff]  ;;  %v1526_v56 = vld [vmem:[%s1898_s3 + $0x198] sm:$0xff]  ;;  %v1525_v61 = vld [vmem:[%s1898_s3 + $0x190] sm:$0xff] }
  0x1e   : > { %971 = vmatpush.bf16.msra.mxu2 %v1494_v17  ;;  %v1519_v54 = vld [vmem:[%s1898_s3 + $0x160] sm:$0xff]  ;;  %v1534_v57 = vld [vmem:[%s1898_s3 + $0x1d8] sm:$0xff]  ;;  %v1533_v63 = vld [vmem:[%s1898_s3 + $0x1d0] sm:$0xff] }
  0x1f   : > { %984 = vmatpush.bf16.msra.mxu3 %v1502_v18  ;;  %v1518_v58 = vld [vmem:[%s1898_s3 + $0x158] sm:$0xff]  ;;  %v330_v59 = vld [vmem:[%s320_s6] sm:$0x3]  ;;  %v1517_v0 = vld [vmem:[%s1898_s3 + $0x150] sm:$0xff] }
  0x20   : > { %958 = vmatpush.bf16.msra.mxu1 %v1486_v19  ;;  %v1508_v1 = vld [vmem:[%s1898_s3 + $0x108] sm:$0xff]  ;;  %v1507_v5 = vld [vmem:[%s1898_s3 + $0x100] sm:$0xff]  ;;  %v1546_v7 = vld [vmem:[%s1898_s3 + $0x238] sm:$0xff] }
  0x21   : > { %946 = vmatpush.bf16.msra.mxu0 %v1477_v21  ;;  %v1524_v2 = vld [vmem:[%s1898_s3 + $0x188] sm:$0xff]  ;;  %v1523_v6 = vld [vmem:[%s1898_s3 + $0x180] sm:$0xff]  ;;  %v1545_v12 = vld [vmem:[%s1898_s3 + $0x230] sm:$0xff] }
  0x22   : > { %972 = vmatpush.bf16.msra.mxu2 %v1493_v22  ;;  %v1532_v3 = vld [vmem:[%s1898_s3 + $0x1c8] sm:$0xff]  ;;  %v1531_v9 = vld [vmem:[%s1898_s3 + $0x1c0] sm:$0xff]  ;;  %v1542_v17 = vld [vmem:[%s1898_s3 + $0x218] sm:$0xff] }
  0x23   : > { %985 = vmatpush.bf16.msra.mxu3 %v1501_v23  ;;  %v1516_v4 = vld [vmem:[%s1898_s3 + $0x148] sm:$0xff]  ;;  %v1515_v10 = vld [vmem:[%s1898_s3 + $0x140] sm:$0xff]  ;;  %v1541_v18 = vld [vmem:[%s1898_s3 + $0x210] sm:$0xff] }
  0x24   : > { %959 = vmatpush.bf16.msra.mxu1 %v1485_v24  ;;  %v338_v41 = vld.sshfl [vmem:[#allocation1] sm:$0xff pattern:$0x73625140]  ;;  %v1544_v15 = vld [vmem:[%s1898_s3 + $0x228] sm:$0xff]  ;;  %vm1062_vm2 = vmand %vm1060_vm0, %vm1061_vm1 }
  0x25   : > { %947 = vmatpush.bf16.msra.mxu0 %v1476_v25  ;;  %v340_v44 = vrot.slane %v338_v41, 1  ;;  %343 = vst [vmem:[#allocation1] ss:$4 sm:$0xff] %v329_v38  ;;  %v1543_v16 = vld [vmem:[%s1898_s3 + $0x220] sm:$0xff]  ;;  %v1540_v19 = vld [vmem:[%s1898_s3 + $0x208] sm:$0xff] }
  0x26   : > { %973 = vmatpush.bf16.msra.mxu2 %v1492_v26 }
  0x27   : > { %986 = vmatpush.bf16.msra.mxu3 %v1500_v27 }
  0x28   : > { %960 = vmatpush.bf16.msra.mxu1 %v1484_v28 }
  0x29   : > { %948 = vmatpush.bf16.msra.mxu0 %v1475_v30 }
  0x2a   : > { %974 = vmatpush.bf16.msra.mxu2 %v1491_v31  ;;  %v508_v31 = vld [vmem:[%s1899_s4] sm:$0x1] }
  0x2b   : > { %987 = vmatpush.bf16.msra.mxu3 %v1499_v34 }
  0x2c   : > { %961 = vmatpush.bf16.msra.mxu1 %v1483_v35  ;;  %949 = vmatmul.bf16.vlgmr.msra.gmra.mxu0 %v328_v20  ;;  %v344_v52 = vld.sshfl [vmem:[#allocation1] sm:$0xff pattern:$0x73625140] }
  0x2d   : > { %993 = vmatpush.bf16.msrb.mxu0 %v1514_v32  ;;  %975 = vmatmul.bf16.vlgmr.msra.gmra.mxu2 %v340_v44  ;;  %348 = vst [vmem:[#allocation1] ss:$4 sm:$0xff] %v329_v38  ;;  %v345_v11 = vshrl.u32 %v344_v52, 16  ;;  %v1539_v20 = vld [vmem:[%s1898_s3 + $0x200] sm:$0xff] }
  0x2e   : > { %1019 = vmatpush.bf16.msrb.mxu2 %v1530_v33  ;;  %988 = vmatmul.bf16.vlgmr.msra.gmra.mxu3 %v329_v38 }
  0x2f   : > { %1032 = vmatpush.bf16.msrb.mxu3 %v1538_v36  ;;  %962 = vmatmul.bf16.vlgmr.msra.gmra.mxu1 %v334_v45 }
  0x30   : > { %1006 = vmatpush.bf16.msrb.mxu1 %v1522_v37 }
  0x31   : > { %994 = vmatpush.bf16.msrb.mxu0 %v1513_v39 }
  0x32   : > { %1020 = vmatpush.bf16.msrb.mxu2 %v1529_v40 }
  0x33   : > { %1033 = vmatpush.bf16.msrb.mxu3 %v1537_v42 }
  0x34   : > { %1007 = vmatpush.bf16.msrb.mxu1 %v1521_v43  ;;  %v349_v62 = vld.sshfl [vmem:[#allocation1] sm:$0xff pattern:$0x73625140] }
  0x35   : > { %995 = vmatpush.bf16.msrb.mxu0 %v1512_v46  ;;  %354 = vst [vmem:[#allocation1] ss:$4 sm:$0xff] %v330_v59  ;;  %v351_v14 = vrot.slane %v349_v62, 1 }
  0x36   : > { %1021 = vmatpush.bf16.msrb.mxu2 %v1528_v47 }
  0x37   : > { %1034 = vmatpush.bf16.msrb.mxu3 %v1536_v48 }
  0x38   : > { %1008 = vmatpush.bf16.msrb.mxu1 %v1520_v49 }
  0x39   : > { %996 = vmatpush.bf16.msrb.mxu0 %v1511_v50 }
  0x3a   : > { %1022 = vmatpush.bf16.msrb.mxu2 %v1527_v51  ;;  %v1063_v51 = vld [vmem:[%s327_s13] sm:$0x1] }
  0x3b   : > { %1035 = vmatpush.bf16.msrb.mxu3 %v1535_v53 }
  0x3c   : > { %1009 = vmatpush.bf16.msrb.mxu1 %v1519_v54  ;;  %v355_v8 = vld.sshfl [vmem:[#allocation1] sm:$0xff pattern:$0x73625140] }
  0x3d   : > { %997 = vmatpush.bf16.msrb.mxu0 %v1510_v55  ;;  %359 = vst [vmem:[#allocation1] ss:$4 sm:$0xff] %v330_v59  ;;  %v356_v13 = vshrl.u32 %v355_v8, 16 }
  0x3e   : > { %1023 = vmatpush.bf16.msrb.mxu2 %v1526_v56 }
  0x3f   : > { %1036 = vmatpush.bf16.msrb.mxu3 %v1534_v57 }
  0x40   : > { %1010 = vmatpush.bf16.msrb.mxu1 %v1518_v58 }
  0x41   : > { %998 = vmatpush.bf16.msrb.mxu0 %v1509_v60 }
  0x42   : > { %1024 = vmatpush.bf16.msrb.mxu2 %v1525_v61 }
  0x43   : > { %1037 = vmatpush.bf16.msrb.mxu3 %v1533_v63 }
  0x44   : > { %1011 = vmatpush.bf16.msrb.mxu1 %v1517_v0  ;;  %v360_v21 = vld.sshfl [vmem:[#allocation1] sm:$0xff pattern:$0x73625140] }
  0x45   : > { %999 = vmatpush.bf16.msrb.mxu0 %v1508_v1  ;;  %v362_v22 = vrot.slane %v360_v21, 1 }
  0x46   : > { %1025 = vmatpush.bf16.msrb.mxu2 %v1524_v2 }
  0x47   : > { %1038 = vmatpush.bf16.msrb.mxu3 %v1532_v3 }
  0x48   : > { %1012 = vmatpush.bf16.msrb.mxu1 %v1516_v4 }
  0x49   : > { %1000 = vmatpush.bf16.msrb.mxu0 %v1507_v5 }
  0x4a   : > { %1026 = vmatpush.bf16.msrb.mxu2 %v1523_v6 }
  0x4b   : > { %1039 = vmatpush.bf16.msrb.mxu3 %v1531_v9 }
  0x4c   : > { %1013 = vmatpush.bf16.msrb.mxu1 %v1515_v10  ;;  %1001 = vmatmul.bf16.vlgmr.msrb.gmra.mxu0 %v345_v11 }
  0x4d   : > { %1045 = vmatpush.bf16.msra.mxu0 %v1546_v7  ;;  %1027 = vmatmul.bf16.vlgmr.msrb.gmra.mxu2 %v330_v59 }
  0x4e   : > { %1040 = vmatmul.bf16.vlgmr.msrb.gmra.mxu3 %v356_v13 }
  0x4f   : > { %1014 = vmatmul.bf16.vlgmr.msrb.gmra.mxu1 %v351_v14 }
  0x51   : > { %1046 = vmatpush.bf16.msra.mxu0 %v1545_v12 }
  0x55   : > { %1047 = vmatpush.bf16.msra.mxu0 %v1544_v15 }
  0x59   : > { %1048 = vmatpush.bf16.msra.mxu0 %v1543_v16 }
  0x5d   : > { %1049 = vmatpush.bf16.msra.mxu0 %v1542_v17 }
  0x61   : > { %1050 = vmatpush.bf16.msra.mxu0 %v1541_v18 }
  0x65   : > { %1051 = vmatpush.bf16.msra.mxu0 %v1540_v19 }
  0x69   : > { %1052 = vmatpush.bf16.msra.mxu0 %v1539_v20 }
  0x6c   : > { %1053 = vmatmul.bf16.vlgmr.msra.gmra.mxu0 %v362_v22 }
  0xa9   : > { %v950_v23 = vpop.f32.mrf.mxu0 }
  0xaa   : > { %v951_v32 = vadd.f32 %v950_v23, %v508_v31 }
  0xac   : > { %v963_v24 = vpop.f32.mrf.mxu1 }
  0xad   : > { %v964_v35 = vadd.f32 %v963_v24, %v951_v32 }
  0xb0   : > { %v976_v25 = vpop.f32.mrf.mxu2 }
  0xb1   : > { %v989_v26 = vpop.f32.mrf.mxu3  ;;  %v952_v27 = vpop.f32.mrf.mxu0  ;;  %v977_v37 = vadd.f32 %v976_v25, %v964_v35 }
  0xb3   : > { %v990_v41 = vadd.f32 %v989_v26, %v977_v37 }
  0xb4   : > { %v965_v28 = vpop.f32.mrf.mxu1 }
  0xb8   : > { %v978_v29 = vpop.f32.mrf.mxu2 }
  0xb9   : > { %v991_v30 = vpop.f32.mrf.mxu3 }
  0xc9   : > { %v1002_v33 = vpop.f32.mrf.mxu0 }
  0xca   : > { %v1003_v43 = vadd.f32 %v1002_v33, %v990_v41 }
  0xcc   : > { %v1015_v34 = vpop.f32.mrf.mxu1 }
  0xcd   : > { %v1016_v45 = vadd.f32 %v1015_v34, %v1003_v43 }
  0xd0   : > { %v1028_v36 = vpop.f32.mrf.mxu2 }
  0xd1   : > { %v1041_v38 = vpop.f32.mrf.mxu3  ;;  %v1004_v39 = vpop.f32.mrf.mxu0  ;;  %v1029_v46 = vadd.f32 %v1028_v36, %v1016_v45 }
  0xd3   : > { %v1042_v47 = vadd.f32 %v1041_v38, %v1029_v46 }
  0xd4   : > { %v1017_v40 = vpop.f32.mrf.mxu1 }
  0xd8   : > { %v1030_v42 = vpop.f32.mrf.mxu2 }
  0xd9   : > { %v1043_v44 = vpop.f32.mrf.mxu3 }
  0xe9   : > { %v1054_v48 = vpop.f32.mrf.mxu0 }
  0xea   : > { %v1055_v49 = vadd.f32 %v1054_v48, %v1042_v47 }
  0xec   : > { %v1058_v50 = vmax.f32 %v1055_v49, 0.0 }
  0xee   : > { %v1059_v52 = vpack.c.bf16 %v1058_v50, %v1058_v50 }
  0xf0   : > { %v1064_v53 = vsel %vm1062_vm2, %v1059_v52, %v1063_v51 }
  0xf1   : > { %1065 = vst [vmem:[%s327_s13] sm:$0x1] %v1064_v53  ;;  %v1056_v54 = vpop.f32.mrf.mxu0 }
  0xf2 PF: > { %s15_s20 = sadd.s32 1, %s1596_s20   ;;  %s1901_s18 = smov %s1592_s19 }
  0xf3   : > { %p12_p5 = scmp.ge.s32.totalorder %s15_s20, 4   ;;  %s1902_s19 = smov %s1904_s21 }
  0xf5   :  { %14 = sbr.rel (!%p12_p5) target bundleno = 2 (0x2), region = 76 }

// kernel: edgepoint_forward.29
= control target key start
LH: loop header
LB: loop body
LE: loop exit
PB: predicated region body
PF: predicated region fallthrough
CT: control target
= control target key end

     0   :  { %s1700_s21 = smov 0   ;;  %s1702_s22 = smov 0   ;;  %s1971_s0 = inlined_call_operand.vmem [shape: bf16[2,3,3,128], index: 0, kind: input, shape index: {}, may-alias: {0,1,2}]   ;;  %s1972_s1 = inlined_call_operand.vmem [shape: bf16[2,3,3,128], index: 1, kind: input, shape index: {}, may-alias: {0,1,2}]   ;;  %s1973_s2 = inlined_call_operand.vmem [shape: bf16[2,3,3,128], index: 2, kind: input, shape index: {}, may-alias: {0,1,2}]   ;;  %s1974_s3 = inlined_call_operand.vmem [shape: bf16[1152,128], index: 3, kind: input, shape index: {}]   ;;  %s1975_s4 = inlined_call_operand.vmem [shape: f32[1,128], index: 4, kind: input, shape index: {}]   ;;  %s1976_s5 = inlined_call_operand.vmem [shape: bf16[2,1,1,128], index: 5, kind: input, shape index: {}]   ;;  %s1977_s6 = inlined_call_operand.vmem [shape: bf16[2,1,1,128], index: 6, kind: output, shape index: {}]  }
   0x1   :  { %s1704_s23 = smov 0  }
   0x2 LB: > { %s28_s24 = sadd.s32 1, %s1659_s22  ;;  %p1244_p0 = scmp.ge.s32.totalorder %s1663_s23, 1  ;;  %s1663_s23 = sphi %s1704_s23, %s16_s23   ;;  %s1659_s22 = sphi %s1702_s22, %s1979_s22   ;;  %s1655_s21 = sphi %s1700_s21, %s1978_s21  }
   0x3   : > { %p30_p1 = scmp.ge.s32.totalorder %s28_s24, 2  ;;  %p282_p2 = scmp.lt.s32.totalorder %s1663_s23, 3 }
   0x5   : > { %s1981_s24 = smov (%p30_p1, %s28_s24), 0  ;;  %p283_p3 = pnand %p1244_p0, %p282_p2 }
   0x6   : > { %p340_p4 = scmp.lt.s32.totalorder (!%p283_p3), %s1655_s21, 1 }
   0x7   : > { %286 = sbr.rel (%p283_p3) target bundleno = 244 (0xf4), region = 44 }
   0xc   : > { %v1549_v0 = vld [vmem:[%s1974_s3 + $0x38] sm:$0xff]  ;;  %v1548_v4 = vld [vmem:[%s1974_s3 + $0x30] sm:$0xff]  ;;  %s1983_s21 = smov (!%p340_p4, %s1655_s21), 1  ;;  %v1547_v8 = vld [vmem:[%s1974_s3 + $0x28] sm:$0xff]  ;;  %vm1115_vm0 = vcmask 1040384  }
   0xd   : > { %v1565_v1 = vld [vmem:[%s1974_s3 + $0xb8] sm:$0xff]  ;;  %993 = vmatpush.bf16.msra.mxu0 %v1549_v0  ;;  %v1564_v5 = vld [vmem:[%s1974_s3 + $0xb0] sm:$0xff]  ;;  %v1563_v9 = vld [vmem:[%s1974_s3 + $0xa8] sm:$0xff]  ;;  %s1757_s29 = smul.u32 6, %s1983_s21  ;;  %s379_s8 = scalar_lea.vmem %s1977_s6, %s1983_s21  ;;  %vm1116_vm1 = vsmask.f32 256 }
   0xe   : > { %v1573_v2 = vld [vmem:[%s1974_s3 + $0xf8] sm:$0xff]  ;;  %1019 = vmatpush.bf16.msra.mxu2 %v1565_v1  ;;  %v1572_v6 = vld [vmem:[%s1974_s3 + $0xf0] sm:$0xff]  ;;  %v1571_v10 = vld [vmem:[%s1974_s3 + $0xe8] sm:$0xff] }
   0xf   : > { %v1557_v3 = vld [vmem:[%s1974_s3 + $0x78] sm:$0xff]  ;;  %1032 = vmatpush.bf16.msra.mxu3 %v1573_v2  ;;  %v1556_v7 = vld [vmem:[%s1974_s3 + $0x70] sm:$0xff]  ;;  %v1555_v11 = vld [vmem:[%s1974_s3 + $0x68] sm:$0xff]  ;;  %s347_s16 = scalar_lea.vmem %s1971_s0, %s1757_s29  ;;  %s1539_s26 = sadd.s32 2, %s1757_s29 }
  0x10   : > { %1006 = vmatpush.bf16.msra.mxu1 %v1557_v3  ;;  %v1546_v12 = vld [vmem:[%s1974_s3 + $0x20] sm:$0xff]  ;;  %v1545_v16 = vld [vmem:[%s1974_s3 + $0x18] sm:$0xff]  ;;  %v1544_v21 = vld [vmem:[%s1974_s3 + $0x10] sm:$0xff]  ;;  %s356_s14 = scalar_lea.vmem %s1972_s1, %s1539_s26  ;;  %s1541_s28 = sadd.s32 4, %s1757_s29 }
  0x11   : > { %994 = vmatpush.bf16.msra.mxu0 %v1548_v4  ;;  %v1562_v13 = vld [vmem:[%s1974_s3 + $0xa0] sm:$0xff]  ;;  %v1561_v17 = vld [vmem:[%s1974_s3 + $0x98] sm:$0xff]  ;;  %v1560_v22 = vld [vmem:[%s1974_s3 + $0x90] sm:$0xff]  ;;  %s366_s15 = scalar_lea.vmem %s1973_s2, %s1541_s28  ;;  %s373_s28 = scalar_lea.vmem %s1976_s5, %s1983_s21 }
  0x12   : > { %1020 = vmatpush.bf16.msra.mxu2 %v1564_v5  ;;  %v1570_v14 = vld [vmem:[%s1974_s3 + $0xe0] sm:$0xff]  ;;  %v1569_v18 = vld [vmem:[%s1974_s3 + $0xd8] sm:$0xff]  ;;  %v1568_v23 = vld [vmem:[%s1974_s3 + $0xd0] sm:$0xff] }
  0x13   : > { %1033 = vmatpush.bf16.msra.mxu3 %v1572_v6  ;;  %v1554_v15 = vld [vmem:[%s1974_s3 + $0x60] sm:$0xff]  ;;  %v1553_v19 = vld [vmem:[%s1974_s3 + $0x58] sm:$0xff]  ;;  %v1552_v24 = vld [vmem:[%s1974_s3 + $0x50] sm:$0xff] }
  0x14   : > { %1007 = vmatpush.bf16.msra.mxu1 %v1556_v7  ;;  %v380_v20 = vld [vmem:[%s347_s16] sm:$0x3]  ;;  %v1543_v25 = vld [vmem:[%s1974_s3 + $0x8] sm:$0xff]  ;;  %v1581_v32 = vld [vmem:[%s1974_s3 + $0x138] sm:$0xff] }
  0x15   : > { %995 = vmatpush.bf16.msra.mxu0 %v1547_v8  ;;  %384 = vst [vmem:[#allocation1] ss:$4 sm:$0xff] %v380_v20  ;;  %v1559_v26 = vld [vmem:[%s1974_s3 + $0x88] sm:$0xff]  ;;  %v1542_v30 = vld [vmem:[%s1974_s3] sm:$0xff]  ;;  %v1597_v33 = vld [vmem:[%s1974_s3 + $0x1b8] sm:$0xff] }
  0x16   : > { %1021 = vmatpush.bf16.msra.mxu2 %v1563_v9  ;;  %v1567_v27 = vld [vmem:[%s1974_s3 + $0xc8] sm:$0xff]  ;;  %v1558_v31 = vld [vmem:[%s1974_s3 + $0x80] sm:$0xff]  ;;  %v1605_v36 = vld [vmem:[%s1974_s3 + $0x1f8] sm:$0xff] }
  0x17   : > { %1034 = vmatpush.bf16.msra.mxu3 %v1571_v10  ;;  %v1551_v28 = vld [vmem:[%s1974_s3 + $0x48] sm:$0xff]  ;;  %v1566_v34 = vld [vmem:[%s1974_s3 + $0xc0] sm:$0xff]  ;;  %v1589_v37 = vld [vmem:[%s1974_s3 + $0x178] sm:$0xff] }
  0x18   : > { %1008 = vmatpush.bf16.msra.mxu1 %v1555_v11  ;;  %v1550_v35 = vld [vmem:[%s1974_s3 + $0x40] sm:$0xff]  ;;  %v1580_v39 = vld [vmem:[%s1974_s3 + $0x130] sm:$0xff]  ;;  %v1579_v46 = vld [vmem:[%s1974_s3 + $0x128] sm:$0xff] }
  0x19   : > { %996 = vmatpush.bf16.msra.mxu0 %v1546_v12  ;;  %v381_v38 = vld [vmem:[%s356_s14] sm:$0x3]  ;;  %v1596_v40 = vld [vmem:[%s1974_s3 + $0x1b0] sm:$0xff]  ;;  %v1595_v47 = vld [vmem:[%s1974_s3 + $0x1a8] sm:$0xff] }
  0x1a   : > { %1022 = vmatpush.bf16.msra.mxu2 %v1562_v13  ;;  %v1604_v42 = vld [vmem:[%s1974_s3 + $0x1f0] sm:$0xff]  ;;  %v1603_v48 = vld [vmem:[%s1974_s3 + $0x1e8] sm:$0xff]  ;;  %v1578_v50 = vld [vmem:[%s1974_s3 + $0x120] sm:$0xff] }
  0x1b   : > { %1035 = vmatpush.bf16.msra.mxu3 %v1570_v14  ;;  %v1588_v43 = vld [vmem:[%s1974_s3 + $0x170] sm:$0xff]  ;;  %v1587_v49 = vld [vmem:[%s1974_s3 + $0x168] sm:$0xff]  ;;  %v1594_v51 = vld [vmem:[%s1974_s3 + $0x1a0] sm:$0xff] }
  0x1c   : > { %1009 = vmatpush.bf16.msra.mxu1 %v1554_v15  ;;  %v385_v29 = vld.sshfl [vmem:[#allocation1] sm:$0xff pattern:$0x73625140]  ;;  %v1577_v55 = vld [vmem:[%s1974_s3 + $0x118] sm:$0xff]  ;;  %v1576_v60 = vld [vmem:[%s1974_s3 + $0x110] sm:$0xff] }
  0x1d   : > { %997 = vmatpush.bf16.msra.mxu0 %v1545_v16  ;;  %389 = vst [vmem:[#allocation1] ss:$4 sm:$0xff] %v380_v20  ;;  %v386_v45 = vshrl.u32 %v385_v29, 16  ;;  %v1602_v53 = vld [vmem:[%s1974_s3 + $0x1e0] sm:$0xff]  ;;  %v1593_v56 = vld [vmem:[%s1974_s3 + $0x198] sm:$0xff]  ;;  %v1592_v61 = vld [vmem:[%s1974_s3 + $0x190] sm:$0xff] }
  0x1e   : > { %1023 = vmatpush.bf16.msra.mxu2 %v1561_v17  ;;  %v1586_v54 = vld [vmem:[%s1974_s3 + $0x160] sm:$0xff]  ;;  %v1601_v57 = vld [vmem:[%s1974_s3 + $0x1d8] sm:$0xff]  ;;  %v1600_v63 = vld [vmem:[%s1974_s3 + $0x1d0] sm:$0xff] }
  0x1f   : > { %1036 = vmatpush.bf16.msra.mxu3 %v1569_v18  ;;  %v1585_v58 = vld [vmem:[%s1974_s3 + $0x158] sm:$0xff]  ;;  %v382_v59 = vld [vmem:[%s366_s15] sm:$0x3]  ;;  %v1584_v0 = vld [vmem:[%s1974_s3 + $0x150] sm:$0xff] }
  0x20   : > { %1010 = vmatpush.bf16.msra.mxu1 %v1553_v19  ;;  %v1575_v1 = vld [vmem:[%s1974_s3 + $0x108] sm:$0xff]  ;;  %v1574_v5 = vld [vmem:[%s1974_s3 + $0x100] sm:$0xff]  ;;  %v1613_v7 = vld [vmem:[%s1974_s3 + $0x238] sm:$0xff] }
  0x21   : > { %998 = vmatpush.bf16.msra.mxu0 %v1544_v21  ;;  %v1591_v2 = vld [vmem:[%s1974_s3 + $0x188] sm:$0xff]  ;;  %v1590_v6 = vld [vmem:[%s1974_s3 + $0x180] sm:$0xff]  ;;  %v1612_v12 = vld [vmem:[%s1974_s3 + $0x230] sm:$0xff] }
  0x22   : > { %1024 = vmatpush.bf16.msra.mxu2 %v1560_v22  ;;  %v1599_v3 = vld [vmem:[%s1974_s3 + $0x1c8] sm:$0xff]  ;;  %v1598_v9 = vld [vmem:[%s1974_s3 + $0x1c0] sm:$0xff]  ;;  %v1609_v17 = vld [vmem:[%s1974_s3 + $0x218] sm:$0xff] }
  0x23   : > { %1037 = vmatpush.bf16.msra.mxu3 %v1568_v23  ;;  %v1583_v4 = vld [vmem:[%s1974_s3 + $0x148] sm:$0xff]  ;;  %v1582_v10 = vld [vmem:[%s1974_s3 + $0x140] sm:$0xff]  ;;  %v1608_v18 = vld [vmem:[%s1974_s3 + $0x210] sm:$0xff] }
  0x24   : > { %1011 = vmatpush.bf16.msra.mxu1 %v1552_v24  ;;  %v390_v41 = vld.sshfl [vmem:[#allocation1] sm:$0xff pattern:$0x73625140]  ;;  %v1611_v15 = vld [vmem:[%s1974_s3 + $0x228] sm:$0xff]  ;;  %vm1117_vm2 = vmand %vm1115_vm0, %vm1116_vm1 }
  0x25   : > { %999 = vmatpush.bf16.msra.mxu0 %v1543_v25  ;;  %v392_v44 = vrot.slane %v390_v41, 1  ;;  %395 = vst [vmem:[#allocation1] ss:$4 sm:$0xff] %v381_v38  ;;  %v1610_v16 = vld [vmem:[%s1974_s3 + $0x220] sm:$0xff]  ;;  %v1607_v19 = vld [vmem:[%s1974_s3 + $0x208] sm:$0xff] }
  0x26   : > { %1025 = vmatpush.bf16.msra.mxu2 %v1559_v26 }
  0x27   : > { %1038 = vmatpush.bf16.msra.mxu3 %v1567_v27 }
  0x28   : > { %1012 = vmatpush.bf16.msra.mxu1 %v1551_v28 }
  0x29   : > { %1000 = vmatpush.bf16.msra.mxu0 %v1542_v30 }
  0x2a   : > { %1026 = vmatpush.bf16.msra.mxu2 %v1558_v31  ;;  %v560_v31 = vld [vmem:[%s1975_s4] sm:$0x1] }
  0x2b   : > { %1039 = vmatpush.bf16.msra.mxu3 %v1566_v34 }
  0x2c   : > { %1013 = vmatpush.bf16.msra.mxu1 %v1550_v35  ;;  %1001 = vmatmul.bf16.vlgmr.msra.gmra.mxu0 %v380_v20  ;;  %v396_v52 = vld.sshfl [vmem:[#allocation1] sm:$0xff pattern:$0x73625140] }
  0x2d   : > { %1045 = vmatpush.bf16.msrb.mxu0 %v1581_v32  ;;  %1027 = vmatmul.bf16.vlgmr.msra.gmra.mxu2 %v392_v44  ;;  %400 = vst [vmem:[#allocation1] ss:$4 sm:$0xff] %v381_v38  ;;  %v397_v11 = vshrl.u32 %v396_v52, 16  ;;  %v1606_v20 = vld [vmem:[%s1974_s3 + $0x200] sm:$0xff] }
  0x2e   : > { %1071 = vmatpush.bf16.msrb.mxu2 %v1597_v33  ;;  %1040 = vmatmul.bf16.vlgmr.msra.gmra.mxu3 %v381_v38 }
  0x2f   : > { %1084 = vmatpush.bf16.msrb.mxu3 %v1605_v36  ;;  %1014 = vmatmul.bf16.vlgmr.msra.gmra.mxu1 %v386_v45 }
  0x30   : > { %1058 = vmatpush.bf16.msrb.mxu1 %v1589_v37 }
  0x31   : > { %1046 = vmatpush.bf16.msrb.mxu0 %v1580_v39 }
  0x32   : > { %1072 = vmatpush.bf16.msrb.mxu2 %v1596_v40 }
  0x33   : > { %1085 = vmatpush.bf16.msrb.mxu3 %v1604_v42 }
  0x34   : > { %1059 = vmatpush.bf16.msrb.mxu1 %v1588_v43  ;;  %v401_v62 = vld.sshfl [vmem:[#allocation1] sm:$0xff pattern:$0x73625140] }
  0x35   : > { %1047 = vmatpush.bf16.msrb.mxu0 %v1579_v46  ;;  %406 = vst [vmem:[#allocation1] ss:$4 sm:$0xff] %v382_v59  ;;  %v403_v14 = vrot.slane %v401_v62, 1 }
  0x36   : > { %1073 = vmatpush.bf16.msrb.mxu2 %v1595_v47  ;;  %v1110_v47 = vld [vmem:[%s373_s28] sm:$0x1] }
  0x37   : > { %1086 = vmatpush.bf16.msrb.mxu3 %v1603_v48 }
  0x38   : > { %1060 = vmatpush.bf16.msrb.mxu1 %v1587_v49  ;;  %v1111_v49 = vunpack.c.l.bf16 %v1110_v47 }
  0x39   : > { %1048 = vmatpush.bf16.msrb.mxu0 %v1578_v50 }
  0x3a   : > { %1074 = vmatpush.bf16.msrb.mxu2 %v1594_v51 }
  0x3b   : > { %1087 = vmatpush.bf16.msrb.mxu3 %v1602_v53 }
  0x3c   : > { %1061 = vmatpush.bf16.msrb.mxu1 %v1586_v54  ;;  %v407_v8 = vld.sshfl [vmem:[#allocation1] sm:$0xff pattern:$0x73625140] }
  0x3d   : > { %1049 = vmatpush.bf16.msrb.mxu0 %v1577_v55  ;;  %411 = vst [vmem:[#allocation1] ss:$4 sm:$0xff] %v382_v59  ;;  %v408_v13 = vshrl.u32 %v407_v8, 16  ;;  %v1118_v54 = vld [vmem:[%s379_s8] sm:$0x1] }
  0x3e   : > { %1075 = vmatpush.bf16.msrb.mxu2 %v1593_v56 }
  0x3f   : > { %1088 = vmatpush.bf16.msrb.mxu3 %v1601_v57 }
  0x40   : > { %1062 = vmatpush.bf16.msrb.mxu1 %v1585_v58 }
  0x41   : > { %1050 = vmatpush.bf16.msrb.mxu0 %v1576_v60 }
  0x42   : > { %1076 = vmatpush.bf16.msrb.mxu2 %v1592_v61 }
  0x43   : > { %1089 = vmatpush.bf16.msrb.mxu3 %v1600_v63 }
  0x44   : > { %1063 = vmatpush.bf16.msrb.mxu1 %v1584_v0  ;;  %v412_v21 = vld.sshfl [vmem:[#allocation1] sm:$0xff pattern:$0x73625140] }
  0x45   : > { %1051 = vmatpush.bf16.msrb.mxu0 %v1575_v1  ;;  %v414_v22 = vrot.slane %v412_v21, 1 }
  0x46   : > { %1077 = vmatpush.bf16.msrb.mxu2 %v1591_v2 }
  0x47   : > { %1090 = vmatpush.bf16.msrb.mxu3 %v1599_v3 }
  0x48   : > { %1064 = vmatpush.bf16.msrb.mxu1 %v1583_v4 }
  0x49   : > { %1052 = vmatpush.bf16.msrb.mxu0 %v1574_v5 }
  0x4a   : > { %1078 = vmatpush.bf16.msrb.mxu2 %v1590_v6 }
  0x4b   : > { %1091 = vmatpush.bf16.msrb.mxu3 %v1598_v9 }
  0x4c   : > { %1065 = vmatpush.bf16.msrb.mxu1 %v1582_v10  ;;  %1053 = vmatmul.bf16.vlgmr.msrb.gmra.mxu0 %v397_v11 }
  0x4d   : > { %1097 = vmatpush.bf16.msra.mxu0 %v1613_v7  ;;  %1079 = vmatmul.bf16.vlgmr.msrb.gmra.mxu2 %v382_v59 }
  0x4e   : > { %1092 = vmatmul.bf16.vlgmr.msrb.gmra.mxu3 %v408_v13 }
  0x4f   : > { %1066 = vmatmul.bf16.vlgmr.msrb.gmra.mxu1 %v403_v14 }
  0x51   : > { %1098 = vmatpush.bf16.msra.mxu0 %v1612_v12 }
  0x55   : > { %1099 = vmatpush.bf16.msra.mxu0 %v1611_v15 }
  0x59   : > { %1100 = vmatpush.bf16.msra.mxu0 %v1610_v16 }
  0x5d   : > { %1101 = vmatpush.bf16.msra.mxu0 %v1609_v17 }
  0x61   : > { %1102 = vmatpush.bf16.msra.mxu0 %v1608_v18 }
  0x65   : > { %1103 = vmatpush.bf16.msra.mxu0 %v1607_v19 }
  0x69   : > { %1104 = vmatpush.bf16.msra.mxu0 %v1606_v20 }
  0x6c   : > { %1105 = vmatmul.bf16.vlgmr.msra.gmra.mxu0 %v414_v22 }
  0xa9   : > { %v1002_v23 = vpop.f32.mrf.mxu0 }
  0xaa   : > { %v1003_v32 = vadd.f32 %v1002_v23, %v560_v31 }
  0xac   : > { %v1015_v24 = vpop.f32.mrf.mxu1 }
  0xad   : > { %v1016_v35 = vadd.f32 %v1015_v24, %v1003_v32 }
  0xb0   : > { %v1028_v25 = vpop.f32.mrf.mxu2 }
  0xb1   : > { %v1041_v26 = vpop.f32.mrf.mxu3  ;;  %v1004_v27 = vpop.f32.mrf.mxu0  ;;  %v1029_v37 = vadd.f32 %v1028_v25, %v1016_v35 }
  0xb3   : > { %v1042_v41 = vadd.f32 %v1041_v26, %v1029_v37 }
  0xb4   : > { %v1017_v28 = vpop.f32.mrf.mxu1 }
  0xb8   : > { %v1030_v29 = vpop.f32.mrf.mxu2 }
  0xb9   : > { %v1043_v30 = vpop.f32.mrf.mxu3 }
  0xc9   : > { %v1054_v33 = vpop.f32.mrf.mxu0 }
  0xca   : > { %v1055_v43 = vadd.f32 %v1054_v33, %v1042_v41 }
  0xcc   : > { %v1067_v34 = vpop.f32.mrf.mxu1 }
  0xcd   : > { %v1068_v45 = vadd.f32 %v1067_v34, %v1055_v43 }
  0xd0   : > { %v1080_v36 = vpop.f32.mrf.mxu2 }
  0xd1   : > { %v1093_v38 = vpop.f32.mrf.mxu3  ;;  %v1056_v39 = vpop.f32.mrf.mxu0  ;;  %v1081_v46 = vadd.f32 %v1080_v36, %v1068_v45 }
  0xd3   : > { %v1094_v48 = vadd.f32 %v1093_v38, %v1081_v46 }
  0xd4   : > { %v1069_v40 = vpop.f32.mrf.mxu1 }
  0xd8   : > { %v1082_v42 = vpop.f32.mrf.mxu2 }
  0xd9   : > { %v1095_v44 = vpop.f32.mrf.mxu3 }
  0xe9   : > { %v1106_v50 = vpop.f32.mrf.mxu0 }
  0xea   : > { %v1107_v51 = vadd.f32 %v1106_v50, %v1094_v48 }
  0xec   : > { %v1112_v52 = vadd.f32 %v1111_v49, %v1107_v51 }
  0xee   : > { %v1113_v53 = vmax.f32 %v1112_v52, 0.0 }
  0xf0   : > { %v1114_v55 = vpack.c.bf16 %v1113_v53, %v1113_v53 }
  0xf1   : > { %v1108_v56 = vpop.f32.mrf.mxu0 }
  0xf2   : > { %v1119_v57 = vsel %vm1117_vm2, %v1114_v55, %v1118_v54 }
  0xf3   : > { %1120 = vst [vmem:[%s379_s8] sm:$0x1] %v1119_v57 }
  0xf4 PF: > { %s16_s23 = sadd.s32 1, %s1663_s23   ;;  %s1978_s21 = smov %s1659_s22 }
  0xf5   : > { %p13_p5 = scmp.ge.s32.totalorder %s16_s23, 4   ;;  %s1979_s22 = smov %s1981_s24 }
  0xf7   :  { %15 = sbr.rel (!%p13_p5) target bundleno = 2 (0x2), region = 83 }

// kernel: edgepoint_forward.33
= control target key start
LH: loop header
LB: loop body
LE: loop exit
PB: predicated region body
PF: predicated region fallthrough
CT: control target
= control target key end

     0   :  { %vm98_vm0 = vcmask 253952   ;;  %s198_s1 = inlined_call_operand.vmem [shape: bf16[128,32], index: 1, kind: input, shape index: {}]   ;;  %s199_s2 = inlined_call_operand.vmem [shape: f32[1,32], index: 2, kind: input, shape index: {}]   ;;  %s200_s0 = inlined_call_operand.vmem [shape: bf16[2,128], index: 0, kind: input, shape index: {}]   ;;  %s201_s3 = inlined_call_operand.vmem [shape: bf16[2,32], index: 3, kind: output, shape index: {}]  }
   0x1   :  { %v143_v0 = vld [vmem:[%s198_s1 + $0x38] sm:$0xff]  ;;  %v142_v1 = vld [vmem:[%s198_s1 + $0x30] sm:$0xff]  ;;  %v141_v2 = vld [vmem:[%s198_s1 + $0x28] sm:$0xff] }
   0x2   :  { %83 = vmatpush.bf16.msra.mxu0 %v143_v0  ;;  %v140_v3 = vld [vmem:[%s198_s1 + $0x20] sm:$0xff]  ;;  %v139_v4 = vld [vmem:[%s198_s1 + $0x18] sm:$0xff]  ;;  %v138_v5 = vld [vmem:[%s198_s1 + $0x10] sm:$0xff] }
   0x3   :  { %v137_v6 = vld [vmem:[%s198_s1 + $0x8] sm:$0xff]  ;;  %v136_v7 = vld [vmem:[%s198_s1] sm:$0xff] }
   0x4   :  { %v14_v8 = vld [vmem:[%s200_s0] sm:$0x1] }
   0x5   :  { %v144_v9 = vld [vmem:[%s199_s2] ss:$0 sm:$0xff] }
   0x6   :  { %84 = vmatpush.bf16.msra.mxu0 %v142_v1 }
   0xa   :  { %85 = vmatpush.bf16.msra.mxu0 %v141_v2 }
   0xe   :  { %86 = vmatpush.bf16.msra.mxu0 %v140_v3 }
  0x12   :  { %87 = vmatpush.bf16.msra.mxu0 %v139_v4 }
  0x16   :  { %88 = vmatpush.bf16.msra.mxu0 %v138_v5 }
  0x1a   :  { %89 = vmatpush.bf16.msra.mxu0 %v137_v6 }
  0x1e   :  { %90 = vmatpush.bf16.msra.mxu0 %v136_v7 }
  0x21   :  { %91 = vmatmul.bf16.vlgmr.msra.gmra.mxu0 %v14_v8 }
  0x9e   :  { %v92_v10 = vpop.f32.mrf.mxu0 }
  0x9f   :  { %v93_v11 = vadd.f32 %v144_v9, %v92_v10 }
  0xa1   :  { %v96_v12 = vmax.f32 %v93_v11, 0.0 }
  0xa3   :  { %v97_v13 = vpack.c.bf16 %v96_v12, %v96_v12 }
  0xa5   :  { %99 = vst.msk [vmem:[%s201_s3] sm:$0x1] %vm98_vm0, %v97_v13 }
  0xa6   :  { %v94_v14 = vpop.f32.mrf.mxu0 }

// kernel: tile.8
= control target key start
LH: loop header
LB: loop body
LE: loop exit
PB: predicated region body
PF: predicated region fallthrough
CT: control target
= control target key end

     0   :  { %s28_s0 = inlined_call_operand.vmem [shape: f32[32], index: 0, kind: input, shape index: {}]   ;;  %s29_s1 = inlined_call_operand.vmem [shape: f32[16,32], index: 1, kind: output, shape index: {}]  }
   0x1   :  { %v4_v0 = vld [vmem:[%s28_s0] ss:$0 sm:$0xff] }
   0x2   :  { %5 = vst [vmem:[%s29_s1] sm:$0xff] %v4_v0 }
   0x3   :  { %8 = vst [vmem:[%s29_s1 + $0x8] sm:$0xff] %v4_v0 }

// kernel: tile.9
= control target key start
LH: loop header
LB: loop body
LE: loop exit
PB: predicated region body
PF: predicated region fallthrough
CT: control target
= control target key end

     0   :  { %s56_s8 = smov 96   ;;  %s57_s11 = smov 32   ;;  %vm3_vm0 = vcmask 261120   ;;  %vm9_vm1 = vcmask 1048320   ;;  %vm15_vm2 = vcmask 785920   ;;  %vm21_vm3 = vcmask 523520   ;;  %s93_s0 = inlined_call_operand.vmem [shape: f32[16,32], index: 0, kind: input, shape index: {}]   ;;  %s94_s1 = inlined_call_operand.vmem [shape: f32[1,512], index: 1, kind: output, shape index: {}]  }
   0x1   :  { %v47_v0 = vld [vmem:[%s93_s0 + $0x3] ss:$4 sm:$0xf]   ;;  %v49_v1 = vld [vmem:[%s93_s0 + $0x1] ss:$4 sm:$0xf]  }
   0x2   :  { %7 = vrot.lane.b32.xlu0 %v47_v0, %s56_s8  ;;  %19 = vrot.lane.b32.xlu1 %v49_v1, %s57_s11  ;;  %v48_v2 = vld [vmem:[%s93_s0 + $0x2] ss:$4 sm:$0xf]   ;;  %s58_s14 = smov 64  }
   0x3   :  { %v2_v3 = vld [vmem:[%s93_s0] ss:$4 sm:$0xf]  }
   0x4   :  { %4 = vst.msk [vmem:[#allocation0] ss:$8 sm:$0xf] %vm3_vm0, %v2_v3  }
   0xa   :  { %13 = vrot.lane.b32.xlu0 %v48_v2, %s58_s14 }
  0x74   :  { %v8_v4 = vpop.permute.xlu0 %7   ;;  %v20_v5 = vpop.permute.xlu1 %19  }
  0x75   :  { %10 = vst.msk [vmem:[#allocation0] ss:$8 sm:$0xf] %vm9_vm1, %v8_v4  }
  0x7c   :  { %v14_v6 = vpop.permute.xlu0 %13  }
  0x7d   :  { %16 = vst.msk [vmem:[#allocation0] ss:$8 sm:$0xf] %vm15_vm2, %v14_v6  }
  0x7e   :  { %22 = vst.msk [vmem:[#allocation0] ss:$8 sm:$0xf] %vm21_vm3, %v20_v5  }
  0x85   :  { %v25_v7 = vld [vmem:[#allocation0] sm:$0x1]  ;;  %v30_v8 = vld [vmem:[#allocation0 + $0x8] sm:$0x1]  ;;  %v36_v9 = vld [vmem:[#allocation0 + $0x10] sm:$0x1] }
  0x86   :  { %28 = vst [vmem:[%s94_s1] sm:$0x1] %v25_v7  ;;  %v42_v10 = vld [vmem:[#allocation0 + $0x18] sm:$0x1] }
  0x87   :  { %50 = vst [vmem:[%s94_s1 + $0x1] sm:$0x1] %v30_v8 }
  0x88   :  { %51 = vst [vmem:[%s94_s1 + $0x2] sm:$0x1] %v36_v9 }
  0x89   :  { %52 = vst [vmem:[%s94_s1 + $0x3] sm:$0x1] %v42_v10 }

// kernel: edgepoint_forward.36
= control target key start
LH: loop header
LB: loop body
LE: loop exit
PB: predicated region body
PF: predicated region fallthrough
CT: control target
= control target key end

     0   :  { %vm74_vm0 = vcmask 261120   ;;  %vm137_vm1 = vcmask 1040384   ;;  %vm141_vm2 = vcmask 1042434   ;;  %vm145_vm3 = vcmask 1041408   ;;  %s274_s1 = inlined_call_operand.vmem [shape: bf16[32,512], index: 1, kind: input, shape index: {}]   ;;  %s275_s0 = inlined_call_operand.vmem [shape: bf16[2,32], index: 0, kind: input, shape index: {}]   ;;  %s276_s2 = inlined_call_operand.vmem [shape: f32[1,512], index: 2, kind: input, shape index: {}]   ;;  %s277_s3 = inlined_call_operand.vmem [shape: bf16[2,512], index: 3, kind: output, shape index: {}]  }
   0x1   :  { %v171_v0 = vld [vmem:[%s274_s1 + $0x20] sm:$0xf]  ;;  %v195_v1 = vld [vmem:[%s274_s1 + $0x2c] sm:$0xf0]  ;;  %v193_v2 = vld [vmem:[%s274_s1 + $0x24] sm:$0xf] }
   0x2   :  { %v172_v3 = vor.u32 %v195_v1, %v171_v0  ;;  %v173_v4 = vld [vmem:[%s274_s1 + $0x30] sm:$0xf0]  ;;  %v179_v5 = vld [vmem:[%s274_s1 + $0x28] sm:$0xf]  ;;  %v196_v6 = vld [vmem:[%s274_s1 + $0x34] sm:$0xf0] }
   0x3   :  { %v176_v7 = vor.u32 %v193_v2, %v173_v4  ;;  %v180_v8 = vor.u32 %v196_v6, %v179_v5  ;;  %v194_v9 = vld [vmem:[%s274_s1 + $0x2c] sm:$0xf]  ;;  %v181_v10 = vld [vmem:[%s274_s1 + $0x38] sm:$0xf0]  ;;  %v155_v11 = vld [vmem:[%s274_s1] sm:$0xf] }
   0x4   :  { %84 = vmatpush.bf16.msra.mxu0 %v172_v3  ;;  %v184_v12 = vor.u32 %v194_v9, %v181_v10  ;;  %v191_v13 = vld [vmem:[%s274_s1 + $0xc] sm:$0xf0]  ;;  %v189_v14 = vld [vmem:[%s274_s1 + $0x4] sm:$0xf]  ;;  %v157_v15 = vld [vmem:[%s274_s1 + $0x10] sm:$0xf0] }
   0x5   :  { %97 = vmatpush.bf16.msra.mxu1 %v176_v7  ;;  %110 = vmatpush.bf16.msra.mxu2 %v180_v8  ;;  %v156_v16 = vor.u32 %v191_v13, %v155_v11  ;;  %v160_v17 = vor.u32 %v189_v14, %v157_v15  ;;  %v163_v18 = vld [vmem:[%s274_s1 + $0x8] sm:$0xf]  ;;  %v192_v19 = vld [vmem:[%s274_s1 + $0x14] sm:$0xf0]  ;;  %v190_v20 = vld [vmem:[%s274_s1 + $0xc] sm:$0xf] }
   0x6   :  { %123 = vmatpush.bf16.msra.mxu3 %v184_v12  ;;  %v164_v21 = vor.u32 %v192_v19, %v163_v18  ;;  %v165_v22 = vld [vmem:[%s274_s1 + $0x18] sm:$0xf0]  ;;  %v15_v24 = vld [vmem:[%s275_s0] sm:$0x1] }
   0x7   :  { %v168_v23 = vor.u32 %v190_v20, %v165_v22  ;;  %v24_v25 = vld [vmem:[%s276_s2] sm:$0xf] }
   0x8   :  { %85 = vmatpush.bf16.msra.mxu0 %v156_v16  ;;  %v26_v26 = vperm.slane %v24_v25, 0  ;;  %v27_v27 = vperm.slane %v24_v25, 1  ;;  %v28_v32 = vperm.slane %v24_v25, 2  ;;  %v29_v33 = vperm.slane %v24_v25, 3 }
   0x9   :  { %98 = vmatpush.bf16.msra.mxu1 %v160_v17  ;;  %111 = vmatpush.bf16.msra.mxu2 %v164_v21 }
   0xa   :  { %124 = vmatpush.bf16.msra.mxu3 %v168_v23 }
   0xb   :  { %185 = vmatmul.msk.bf16.vlgmr.msra.gmra.mxu0 %vm74_vm0, %v15_v24 }
   0xc   :  { %186 = vmatmul.msk.bf16.vlgmr.msra.gmra.mxu1 %vm74_vm0, %v15_v24  ;;  %187 = vmatmul.msk.bf16.vlgmr.msra.gmra.mxu2 %vm74_vm0, %v15_v24 }
   0xd   :  { %188 = vmatmul.msk.bf16.vlgmr.msra.gmra.mxu3 %vm74_vm0, %v15_v24 }
  0x88   :  { %v87_v28 = vpop.f32.mrf.mxu0 }
  0x89   :  { %v100_v29 = vpop.f32.mrf.mxu1  ;;  %v88_v30 = vadd.f32 %v87_v28, %v26_v26 }
  0x8a   :  { %v101_v31 = vadd.f32 %v100_v29, %v27_v27 }
  0x8c   :  { %v130_v34 = vpack.c.bf16 %v101_v31, %v88_v30 }
  0x8e   :  { %v134_v41 = vrot.slane %v130_v34, 3 }
  0x8f   :  { %v113_v35 = vpop.f32.mrf.mxu2 }
  0x90   :  { %v114_v36 = vadd.f32 %v113_v35, %v28_v32  ;;  %v126_v37 = vpop.f32.mrf.mxu3  ;;  %v89_v38 = vpop.f32.mrf.mxu0  ;;  %v140_v45 = vsel %vm137_vm1, %v130_v34, %v134_v41 }
  0x91   :  { %v127_v39 = vadd.f32 %v126_v37, %v29_v33  ;;  %v102_v40 = vpop.f32.mrf.mxu1 }
  0x93   :  { %v131_v42 = vpack.c.bf16 %v127_v39, %v114_v36 }
  0x95   :  { %v135_v43 = vrot.slane %v131_v42, 6  ;;  %v136_v44 = vrot.slane %v131_v42, 1 }
  0x97   :  { %v144_v46 = vsel %vm141_vm2, %v135_v43, %v136_v44  ;;  %v115_v47 = vpop.f32.mrf.mxu2 }
  0x98   :  { %v146_v48 = vsel %vm145_vm3, %v140_v45, %v144_v46  ;;  %v128_v49 = vpop.f32.mrf.mxu3 }
  0x99   :  { %148 = vst [vmem:[%s277_s3] sm:$0xf] %v146_v48 }

// kernel: edgepoint_forward.32
= control target key start
LH: loop header
LB: loop body
LE: loop exit
PB: predicated region body
PF: predicated region fallthrough
CT: control target
= control target key end

     0   :  { %vm125_vm0 = vcmask 257024   ;;  %s258_s1 = inlined_call_operand.vmem [shape: bf16[128,32], index: 1, kind: input, shape index: {}]   ;;  %s259_s2 = inlined_call_operand.vmem [shape: f32[1,32], index: 2, kind: input, shape index: {}]   ;;  %s260_s0 = inlined_call_operand.vmem [shape: bf16[32,128], index: 0, kind: input, shape index: {}]   ;;  %s261_s3 = inlined_call_operand.vmem [shape: bf16[32,32], index: 3, kind: output, shape index: {}]  }
   0x1   :  { %v183_v0 = vld [vmem:[%s258_s1 + $0x38] sm:$0xff]  ;;  %v182_v1 = vld [vmem:[%s258_s1 + $0x30] sm:$0xff]  ;;  %v181_v2 = vld [vmem:[%s258_s1 + $0x28] sm:$0xff] }
   0x2   :  { %98 = vmatpush.bf16.msra.mxu0 %v183_v0  ;;  %184 = vmatpush.bf16.msra.mxu1 %v183_v0  ;;  %v180_v3 = vld [vmem:[%s258_s1 + $0x20] sm:$0xff]  ;;  %v179_v4 = vld [vmem:[%s258_s1 + $0x18] sm:$0xff]  ;;  %v178_v5 = vld [vmem:[%s258_s1 + $0x10] sm:$0xff] }
   0x3   :  { %v177_v6 = vld [vmem:[%s258_s1 + $0x8] sm:$0xff]  ;;  %v176_v7 = vld [vmem:[%s258_s1] sm:$0xff] }
   0x4   :  { %v174_v8 = vld [vmem:[%s260_s0] sm:$0xff]  ;;  %v175_v9 = vld [vmem:[%s260_s0 + $0x8] sm:$0xff] }
   0x5   :  { %v192_v10 = vld [vmem:[%s259_s2] ss:$0 sm:$0xff] }
   0x6   :  { %99 = vmatpush.bf16.msra.mxu0 %v182_v1  ;;  %185 = vmatpush.bf16.msra.mxu1 %v182_v1 }
   0xa   :  { %100 = vmatpush.bf16.msra.mxu0 %v181_v2  ;;  %186 = vmatpush.bf16.msra.mxu1 %v181_v2 }
   0xe   :  { %101 = vmatpush.bf16.msra.mxu0 %v180_v3  ;;  %187 = vmatpush.bf16.msra.mxu1 %v180_v3 }
  0x12   :  { %102 = vmatpush.bf16.msra.mxu0 %v179_v4  ;;  %188 = vmatpush.bf16.msra.mxu1 %v179_v4 }
  0x16   :  { %103 = vmatpush.bf16.msra.mxu0 %v178_v5  ;;  %189 = vmatpush.bf16.msra.mxu1 %v178_v5 }
  0x1a   :  { %104 = vmatpush.bf16.msra.mxu0 %v177_v6  ;;  %190 = vmatpush.bf16.msra.mxu1 %v177_v6 }
  0x1e   :  { %105 = vmatpush.bf16.msra.mxu0 %v176_v7  ;;  %191 = vmatpush.bf16.msra.mxu1 %v176_v7 }
  0x21   :  { %106 = vmatmul.bf16.vlgmr.msra.gmra.mxu0 %v174_v8  ;;  %111 = vmatmul.bf16.vlgmr.msra.gmra.mxu1 %v175_v9 }
  0x9e   :  { %v107_v11 = vpop.f32.mrf.mxu0  ;;  %v112_v12 = vpop.f32.mrf.mxu1 }
  0x9f   :  { %v108_v13 = vadd.f32 %v192_v10, %v107_v11  ;;  %v113_v14 = vadd.f32 %v192_v10, %v112_v12 }
  0xa1   :  { %v117_v15 = vmax.f32 %v108_v13, 0.0  ;;  %v119_v16 = vmax.f32 %v113_v14, 0.0 }
  0xa3   :  { %v121_v17 = vpack.c.bf16 %v117_v15, %v117_v15  ;;  %v123_v18 = vpack.c.bf16 %v119_v16, %v119_v16 }
  0xa5   :  { %126 = vst.msk [vmem:[%s261_s3] sm:$0xf] %vm125_vm0, %v121_v17 }
  0xa6   :  { %128 = vst.msk [vmem:[%s261_s3 + $0x8] sm:$0xf] %vm125_vm0, %v123_v18  ;;  %v109_v19 = vpop.f32.mrf.mxu0  ;;  %v114_v20 = vpop.f32.mrf.mxu1 }
  0xa7   :  { %v110_v21 = vadd.f32 %v192_v10, %v109_v19  ;;  %v115_v22 = vadd.f32 %v192_v10, %v114_v20 }
  0xa9   :  { %v118_v23 = vmax.f32 %v110_v21, 0.0  ;;  %v120_v24 = vmax.f32 %v115_v22, 0.0 }
  0xab   :  { %v122_v25 = vpack.c.bf16 %v118_v23, %v118_v23  ;;  %v124_v26 = vpack.c.bf16 %v120_v24, %v120_v24 }
  0xad   :  { %127 = vst.msk [vmem:[%s261_s3 + $0x4] sm:$0xf] %vm125_vm0, %v122_v25 }
  0xae   :  { %129 = vst.msk [vmem:[%s261_s3 + $0xc] sm:$0xf] %vm125_vm0, %v124_v26 }

// kernel: edgepoint_forward.31
= control target key start
LH: loop header
LB: loop body
LE: loop exit
PB: predicated region body
PF: predicated region fallthrough
CT: control target
= control target key end

     0   :  { %s574_s12 = smov 0   ;;  %s673_s0 = inlined_call_operand.vmem [shape: bf16[512,64], index: 0, kind: input, shape index: {}]   ;;  %s674_s1 = inlined_call_operand.vmem [shape: bf16[64,32], index: 1, kind: input, shape index: {}]   ;;  %s675_s2 = inlined_call_operand.vmem [shape: f32[1,32], index: 2, kind: input, shape index: {}]   ;;  %s676_s3 = inlined_call_operand.vmem [shape: bf16[512,32], index: 3, kind: output, shape index: {}]  }
   0x1 LB: > { %s446_s13 = sadd.s32 4294967295, %s552_s12   ;;  %p450_p0 = scmp.ge.s32.totalorder %s552_s12, 1  ;;  %s552_s12 = sphi %s574_s12, %s13_s12  }
   0x2   : > { %p138_p1 = scmp.lt.s32.totalorder %s552_s12, 5 }
   0x4   : > { %p139_p2 = pnand %p450_p0, %p138_p1 }
   0x5   : > { %s451_s16 = sshll.u32 (!%p139_p2), %s446_s13, 4 }
   0x6   : > { %142 = sbr.rel (%p139_p2) target bundleno = 192 (0xc0), region = 32  ;;  %p163_p3 = scmp.lt.s32.totalorder (!%p139_p2), %s451_s16, 63 }
   0xb   : > { %v524_v0 = vld [vmem:[%s674_s1 + $0x18] sm:$0xff]  ;;  %v523_v1 = vld [vmem:[%s674_s1 + $0x10] sm:$0xff]  ;;  %s678_s16 = smov (!%p163_p3, %s451_s16), 63  ;;  %v522_v2 = vld [vmem:[%s674_s1 + $0x8] sm:$0xff]  ;;  %vm267_vm0 = vcmask 523264   ;;  %vm373_vm1 = vcmask 257024  }
   0xc   : > { %296 = vmatpush.bf16.msra.mxu0 %v524_v0  ;;  %525 = vmatpush.bf16.msra.mxu1 %v524_v0  ;;  %s452_s21 = sshll.u32 %s678_s16, 2  ;;  %v521_v3 = vld [vmem:[%s674_s1] sm:$0xff] }
   0xd   : > { %526 = vmatpush.bf16.msra.mxu2 %v524_v0  ;;  %527 = vmatpush.bf16.msra.mxu3 %v524_v0  ;;  %s166_s26 = scalar_lea.vmem %s673_s0, %s452_s21  ;;  %v613_v12 = vld [vmem:[%s675_s2] ss:$0 sm:$0xff]  ;;  %s622_s4 = scalar_lea.vmem %s676_s3, %s452_s21 }
   0xe   : > { %v513_v4 = vld [vmem:[%s166_s26] sm:$0xff]  ;;  %v515_v5 = vld [vmem:[%s166_s26 + $0x10] sm:$0xff]  ;;  %v514_v8 = vld [vmem:[%s166_s26 + $0x8] sm:$0xff] }
   0xf   : > { %v517_v6 = vld [vmem:[%s166_s26 + $0x20] sm:$0xff]  ;;  %v519_v7 = vld [vmem:[%s166_s26 + $0x30] sm:$0xff]  ;;  %v516_v9 = vld [vmem:[%s166_s26 + $0x18] sm:$0xff] }
  0x10   : > { %297 = vmatpush.bf16.msra.mxu0 %v523_v1  ;;  %528 = vmatpush.bf16.msra.mxu1 %v523_v1  ;;  %v518_v10 = vld [vmem:[%s166_s26 + $0x28] sm:$0xff]  ;;  %v520_v11 = vld [vmem:[%s166_s26 + $0x38] sm:$0xff] }
  0x11   : > { %529 = vmatpush.bf16.msra.mxu2 %v523_v1  ;;  %530 = vmatpush.bf16.msra.mxu3 %v523_v1 }
  0x14   : > { %298 = vmatpush.bf16.msra.mxu0 %v522_v2  ;;  %531 = vmatpush.bf16.msra.mxu1 %v522_v2 }
  0x15   : > { %532 = vmatpush.bf16.msra.mxu2 %v522_v2  ;;  %533 = vmatpush.bf16.msra.mxu3 %v522_v2 }
  0x18   : > { %299 = vmatpush.bf16.msra.mxu0 %v521_v3  ;;  %534 = vmatpush.bf16.msra.mxu1 %v521_v3 }
  0x19   : > { %535 = vmatpush.bf16.msra.mxu2 %v521_v3  ;;  %536 = vmatpush.bf16.msra.mxu3 %v521_v3 }
  0x1b   : > { %503 = vmatmul.msk.bf16.vlgmr.msra.gmra.mxu0 %vm267_vm0, %v513_v4  ;;  %505 = vmatmul.msk.bf16.vlgmr.msra.gmra.mxu1 %vm267_vm0, %v515_v5 }
  0x1c   : > { %507 = vmatmul.msk.bf16.vlgmr.msra.gmra.mxu2 %vm267_vm0, %v517_v6  ;;  %509 = vmatmul.msk.bf16.vlgmr.msra.gmra.mxu3 %vm267_vm0, %v519_v7 }
  0x2b   : > { %504 = vmatmul.msk.bf16.gmra.mxu0 %vm267_vm0, %v514_v8  ;;  %506 = vmatmul.msk.bf16.gmra.mxu1 %vm267_vm0, %v516_v9 }
  0x2c   : > { %508 = vmatmul.msk.bf16.gmra.mxu2 %vm267_vm0, %v518_v10  ;;  %510 = vmatmul.msk.bf16.gmra.mxu3 %vm267_vm0, %v520_v11 }
  0x98   : > { %v301_v13 = vpop.f32.mrf.mxu0  ;;  %v311_v14 = vpop.f32.mrf.mxu1 }
  0x99   : > { %v302_v15 = vadd.f32 %v613_v12, %v301_v13  ;;  %v312_v16 = vadd.f32 %v613_v12, %v311_v14 }
  0x9b   : > { %v341_v17 = vmax.f32 %v302_v15, 0.0  ;;  %v345_v18 = vmax.f32 %v312_v16, 0.0 }
  0x9d   : > { %v357_v19 = vpack.c.bf16 %v341_v17, %v341_v17  ;;  %v361_v20 = vpack.c.bf16 %v345_v18, %v345_v18 }
  0x9f   : > { %374 = vst.msk [vmem:[%s622_s4] sm:$0xf] %vm373_vm1, %v357_v19  ;;  %v321_v21 = vpop.f32.mrf.mxu2  ;;  %v331_v22 = vpop.f32.mrf.mxu3 }
  0xa0   : > { %378 = vst.msk [vmem:[%s622_s4 + $0x10] sm:$0xf] %vm373_vm1, %v361_v20  ;;  %v322_v23 = vadd.f32 %v613_v12, %v321_v21  ;;  %v332_v24 = vadd.f32 %v613_v12, %v331_v22  ;;  %v303_v25 = vpop.f32.mrf.mxu0  ;;  %v313_v26 = vpop.f32.mrf.mxu1 }
  0xa1   : > { %v304_v27 = vadd.f32 %v613_v12, %v303_v25  ;;  %v314_v28 = vadd.f32 %v613_v12, %v313_v26 }
  0xa2   : > { %v349_v29 = vmax.f32 %v322_v23, 0.0  ;;  %v353_v30 = vmax.f32 %v332_v24, 0.0 }
  0xa3   : > { %v342_v31 = vmax.f32 %v304_v27, 0.0  ;;  %v346_v32 = vmax.f32 %v314_v28, 0.0 }
  0xa4   : > { %v365_v33 = vpack.c.bf16 %v349_v29, %v349_v29  ;;  %v369_v34 = vpack.c.bf16 %v353_v30, %v353_v30 }
  0xa5   : > { %v358_v35 = vpack.c.bf16 %v342_v31, %v342_v31  ;;  %v362_v36 = vpack.c.bf16 %v346_v32, %v346_v32 }
  0xa6   : > { %382 = vst.msk [vmem:[%s622_s4 + $0x20] sm:$0xf] %vm373_vm1, %v365_v33 }
  0xa7   : > { %386 = vst.msk [vmem:[%s622_s4 + $0x30] sm:$0xf] %vm373_vm1, %v369_v34  ;;  %v323_v37 = vpop.f32.mrf.mxu2  ;;  %v333_v38 = vpop.f32.mrf.mxu3 }
  0xa8   : > { %375 = vst.msk [vmem:[%s622_s4 + $0x4] sm:$0xf] %vm373_vm1, %v358_v35  ;;  %v324_v39 = vadd.f32 %v613_v12, %v323_v37  ;;  %v334_v40 = vadd.f32 %v613_v12, %v333_v38  ;;  %v306_v41 = vpop.f32.mrf.mxu0  ;;  %v316_v42 = vpop.f32.mrf.mxu1 }
  0xa9   : > { %379 = vst.msk [vmem:[%s622_s4 + $0x14] sm:$0xf] %vm373_vm1, %v362_v36  ;;  %v307_v43 = vadd.f32 %v613_v12, %v306_v41  ;;  %v317_v44 = vadd.f32 %v613_v12, %v316_v42 }
  0xaa   : > { %v350_v45 = vmax.f32 %v324_v39, 0.0  ;;  %v354_v46 = vmax.f32 %v334_v40, 0.0 }
  0xab   : > { %v343_v47 = vmax.f32 %v307_v43, 0.0  ;;  %v347_v48 = vmax.f32 %v317_v44, 0.0 }
  0xac   : > { %v366_v49 = vpack.c.bf16 %v350_v45, %v350_v45  ;;  %v370_v50 = vpack.c.bf16 %v354_v46, %v354_v46 }
  0xad   : > { %v359_v51 = vpack.c.bf16 %v343_v47, %v343_v47  ;;  %v363_v52 = vpack.c.bf16 %v347_v48, %v347_v48 }
  0xae   : > { %383 = vst.msk [vmem:[%s622_s4 + $0x24] sm:$0xf] %vm373_vm1, %v366_v49 }
  0xaf   : > { %387 = vst.msk [vmem:[%s622_s4 + $0x34] sm:$0xf] %vm373_vm1, %v370_v50  ;;  %v326_v53 = vpop.f32.mrf.mxu2  ;;  %v336_v54 = vpop.f32.mrf.mxu3 }
  0xb0   : > { %376 = vst.msk [vmem:[%s622_s4 + $0x8] sm:$0xf] %vm373_vm1, %v359_v51  ;;  %v327_v55 = vadd.f32 %v613_v12, %v326_v53  ;;  %v337_v56 = vadd.f32 %v613_v12, %v336_v54  ;;  %v308_v57 = vpop.f32.mrf.mxu0  ;;  %v318_v58 = vpop.f32.mrf.mxu1 }
  0xb1   : > { %380 = vst.msk [vmem:[%s622_s4 + $0x18] sm:$0xf] %vm373_vm1, %v363_v52  ;;  %v309_v59 = vadd.f32 %v613_v12, %v308_v57  ;;  %v319_v60 = vadd.f32 %v613_v12, %v318_v58 }
  0xb2   : > { %v351_v61 = vmax.f32 %v327_v55, 0.0  ;;  %v355_v62 = vmax.f32 %v337_v56, 0.0 }
  0xb3   : > { %v344_v63 = vmax.f32 %v309_v59, 0.0  ;;  %v348_v0 = vmax.f32 %v319_v60, 0.0 }
  0xb4   : > { %v367_v1 = vpack.c.bf16 %v351_v61, %v351_v61  ;;  %v371_v2 = vpack.c.bf16 %v355_v62, %v355_v62 }
  0xb5   : > { %v360_v3 = vpack.c.bf16 %v344_v63, %v344_v63  ;;  %v364_v4 = vpack.c.bf16 %v348_v0, %v348_v0 }
  0xb6   : > { %384 = vst.msk [vmem:[%s622_s4 + $0x28] sm:$0xf] %vm373_vm1, %v367_v1 }
  0xb7   : > { %388 = vst.msk [vmem:[%s622_s4 + $0x38] sm:$0xf] %vm373_vm1, %v371_v2  ;;  %v328_v5 = vpop.f32.mrf.mxu2  ;;  %v338_v6 = vpop.f32.mrf.mxu3 }
  0xb8   : > { %377 = vst.msk [vmem:[%s622_s4 + $0xc] sm:$0xf] %vm373_vm1, %v360_v3  ;;  %v329_v7 = vadd.f32 %v613_v12, %v328_v5  ;;  %v339_v8 = vadd.f32 %v613_v12, %v338_v6 }
  0xb9   : > { %381 = vst.msk [vmem:[%s622_s4 + $0x1c] sm:$0xf] %vm373_vm1, %v364_v4 }
  0xba   : > { %v352_v9 = vmax.f32 %v329_v7, 0.0  ;;  %v356_v10 = vmax.f32 %v339_v8, 0.0 }
  0xbc   : > { %v368_v11 = vpack.c.bf16 %v352_v9, %v352_v9  ;;  %v372_v13 = vpack.c.bf16 %v356_v10, %v356_v10 }
  0xbe   : > { %385 = vst.msk [vmem:[%s622_s4 + $0x2c] sm:$0xf] %vm373_vm1, %v368_v11 }
  0xbf   : > { %389 = vst.msk [vmem:[%s622_s4 + $0x3c] sm:$0xf] %vm373_vm1, %v372_v13 }
  0xc0 PF: > { %s13_s12 = sadd.s32 1, %s552_s12  }
  0xc1   : > { %p10_p4 = scmp.ge.s32.totalorder %s13_s12, 6  }
  0xc3   :  { %12 = sbr.rel (!%p10_p4) target bundleno = 1 (0x1), region = 62 }

// kernel: edgepoint_forward.35
= control target key start
LH: loop header
LB: loop body
LE: loop exit
PB: predicated region body
PF: predicated region fallthrough
CT: control target
= control target key end

     0   :  { %s518_s12 = smov 0   ;;  %s520_s13 = smov 0   ;;  %s587_s0 = inlined_call_operand.vmem [shape: bf16[2,16,16,32], index: 0, kind: input, shape index: {}]   ;;  %s588_s1 = inlined_call_operand.vmem [shape: bf16[32,32], index: 1, kind: input, shape index: {}]   ;;  %s589_s2 = inlined_call_operand.vmem [shape: f32[1,32], index: 2, kind: input, shape index: {}]   ;;  %s590_s3 = inlined_call_operand.vmem [shape: bf16[2,4,4,32], index: 3, kind: output, shape index: {}]  }
   0x1   :  { %s522_s14 = smov 0   ;;  %s524_s15 = smov 0  }
   0x2   :  { %s526_s16 = smov 0  }
   0x3 LB: > { %s22_s17 = sadd.s32 1, %s488_s14  ;;  %s25_s18 = sadd.s32 1, %s492_s15  ;;  %s496_s16 = sphi %s526_s16, %s13_s16   ;;  %s492_s15 = sphi %s524_s15, %s594_s15   ;;  %s488_s14 = sphi %s522_s14, %s593_s14   ;;  %s484_s13 = sphi %s520_s13, %s592_s13   ;;  %s480_s12 = sphi %s518_s12, %s591_s12  }
   0x4   : > { %p23_p0 = scmp.ge.s32.totalorder %s22_s17, 4  ;;  %p397_p1 = scmp.ge.s32.totalorder %s496_s16, 1 }
   0x5   : > { %p161_p2 = scmp.lt.s32.totalorder %s496_s16, 9 }
   0x6   : > { %s596_s17 = smov (%p23_p0, %s22_s17), 0  ;;  %s598_s18 = smov (!%p23_p0, %s25_s18), %s492_s15 }
   0x7   : > { %p162_p3 = pnand %p397_p1, %p161_p2  ;;  %p27_p4 = scmp.ge.s32.totalorder %s598_s18, 2 }
   0x8   : > { %s398_s21 = sshll.u32 (!%p162_p3), %s480_s12, 2  ;;  %p194_p5 = scmp.lt.s32.totalorder (!%p162_p3), %s484_s13, 1 }
   0x9   : > { %s600_s18 = smov (%p27_p4, %s598_s18), 0  ;;  %165 = sbr.rel (%p162_p3) target bundleno = 182 (0xb6), region = 32 }
   0xa   : > { %p196_p6 = scmp.lt.s32.totalorder (!%p162_p3), %s398_s21, 15  ;;  %p206_p7 = scmp.lt.s32.totalorder (!%p162_p3), %s480_s12, 3 }
   0xe   : > { %v416_v0 = vld [vmem:[%s588_s1 + $0x8] sm:$0xff]  ;;  %v415_v1 = vld [vmem:[%s588_s1] sm:$0xff]  ;;  %s602_s13 = smov (!%p194_p5, %s484_s13), 1  ;;  %s604_s21 = smov (!%p196_p6, %s398_s21), 15  ;;  %vm219_vm0 = vcmask 1041408   ;;  %vm223_vm1 = vcmask 1043458  }
   0xf   : > { %292 = vmatpush.bf16.msra.mxu0 %v416_v0  ;;  %s400_s24 = sshll.u32 %s602_s13, 5  ;;  %s399_s25 = sshll.u32 %s604_s21, 1  ;;  %vm261_vm2 = vcmask 1041409   ;;  %vm264_vm3 = vcmask 1042434   ;;  %vm267_vm4 = vcmask 1043459   ;;  %vm282_vm5 = vcmask 261120  }
  0x10   : > { %s200_s26 = sadd.s32 %s400_s24, %s399_s25  ;;  %s606_s12 = smov (!%p206_p7, %s480_s12), 3  ;;  %v457_v27 = vld [vmem:[%s589_s2] ss:$0 sm:$0xff]  ;;  %vm300_vm6 = vcmask 254976  }
  0x11   : > { %s401_s27 = sshll.u32 %s200_s26, 2  ;;  %s402_s4 = sshll.u32 %s602_s13, 2 }
  0x12   : > { %s202_s30 = scalar_lea.vmem %s587_s0, %s401_s27  ;;  %s209_s5 = sadd.s32 %s402_s4, %s606_s12 }
  0x13   : > { %293 = vmatpush.bf16.msra.mxu0 %v415_v1  ;;  %v213_v2 = vld [vmem:[%s202_s30] sm:$0xf]  ;;  %v214_v3 = vld [vmem:[%s202_s30 + $0x4] sm:$0xf]  ;;  %s403_s8 = sshll.u32 %s209_s5, 1 }
  0x14   : > { %v217_v4 = vrot.slane %v213_v2, 2  ;;  %v218_v5 = vrot.slane %v214_v3, 2  ;;  %s211_s11 = scalar_lea.vmem %s590_s3, %s403_s8 }
  0x16   : > { %v222_v6 = vsel %vm219_vm0, %v213_v2, %v217_v4  ;;  %v224_v7 = vsel %vm223_vm1, %v213_v2, %v217_v4  ;;  %v230_v9 = vsel %vm223_vm1, %v214_v3, %v218_v5  ;;  %v229_v10 = vsel %vm219_vm0, %v214_v3, %v218_v5 }
  0x17   : > { %v226_v8 = vrot.slane %v224_v7, 2  ;;  %241 = vst [vmem:[#allocation1] ss:$4 sm:$0xff] %v222_v6  ;;  %v232_v11 = vrot.slane %v230_v9, 2 }
  0x19   : > { %246 = vst [vmem:[#allocation1 + $0x20] ss:$4 sm:$0xff] %v226_v8 }
  0x1e   : > { %v242_v12 = vld.sshfl [vmem:[#allocation1] sm:$0xff pattern:$0x73625140] }
  0x1f   : > { %249 = vst [vmem:[#allocation1] ss:$4 sm:$0xff] %v229_v10  ;;  %v256_v15 = vunpack.c.l.b16 %v242_v12 }
  0x20   : > { %v247_v13 = vld.sshfl [vmem:[#allocation1 + $0x20] sm:$0xff pattern:$0x73625140] }
  0x21   : > { %253 = vst [vmem:[#allocation1 + $0x20] ss:$4 sm:$0xff] %v232_v11  ;;  %v257_v14 = vunpack.c.l.b16 %v247_v13 }
  0x23   : > { %v260_v16 = vrot.slane %v257_v14, 7 }
  0x25   : > { %v262_v20 = vsel %vm261_vm2, %v260_v16, %v256_v15 }
  0x26   : > { %v250_v17 = vld.sshfl [vmem:[#allocation1] sm:$0xff pattern:$0x73625140] }
  0x27   : > { %v258_v18 = vunpack.c.l.b16 %v250_v17 }
  0x28   : > { %v254_v19 = vld.sshfl [vmem:[#allocation1 + $0x20] sm:$0xff pattern:$0x73625140] }
  0x29   : > { %v259_v21 = vunpack.c.l.b16 %v254_v19  ;;  %v263_v22 = vrot.slane %v258_v18, 6 }
  0x2b   : > { %v265_v23 = vsel %vm264_vm3, %v263_v22, %v262_v20  ;;  %v266_v24 = vrot.slane %v259_v21, 5 }
  0x2d   : > { %v268_v25 = vsel %vm267_vm4, %v266_v24, %v265_v23 }
  0x2e   : > { %v269_v26 = vpack.c.b16 %v268_v25, %v268_v25 }
  0x30   : > { %412 = vmatmul.msk.bf16.vlgmr.msra.gmra.mxu0 %vm282_vm5, %v269_v26 }
  0xad   : > { %v295_v28 = vpop.f32.mrf.mxu0 }
  0xae   : > { %v296_v29 = vadd.f32 %v457_v27, %v295_v28 }
  0xb0   : > { %v299_v30 = vpack.c.bf16 %v296_v29, %v296_v29 }
  0xb2   : > { %301 = vst.msk [vmem:[%s211_s11] sm:$0x3] %vm300_vm6, %v299_v30 }
  0xb5   : > { %v297_v31 = vpop.f32.mrf.mxu0 }
  0xb6 PF: > { %s13_s16 = sadd.s32 1, %s496_s16   ;;  %s591_s12 = smov %s488_s14 }
  0xb7   : > { %p10_p8 = scmp.ge.s32.totalorder %s13_s16, 10   ;;  %s592_s13 = smov %s492_s15 }
  0xb8   : > { %s593_s14 = smov %s596_s17  ;;  %s594_s15 = smov %s600_s18 }
  0xb9   :  { %12 = sbr.rel (!%p10_p8) target bundleno = 3 (0x3), region = 63 }

// kernel: edgepoint_forward.34
= control target key start
LH: loop header
LB: loop body
LE: loop exit
PB: predicated region body
PF: predicated region fallthrough
CT: control target
= control target key end

     0   :  { %s512_s12 = smov 0   ;;  %s514_s13 = smov 0   ;;  %s581_s0 = inlined_call_operand.vmem [shape: bf16[2,32,32,32], index: 0, kind: input, shape index: {}]   ;;  %s582_s1 = inlined_call_operand.vmem [shape: bf16[32,32], index: 1, kind: input, shape index: {}]   ;;  %s583_s2 = inlined_call_operand.vmem [shape: f32[1,32], index: 2, kind: input, shape index: {}]   ;;  %s584_s3 = inlined_call_operand.vmem [shape: bf16[2,4,4,32], index: 3, kind: output, shape index: {}]  }
   0x1   :  { %s516_s14 = smov 0   ;;  %s518_s15 = smov 0  }
   0x2   :  { %s520_s16 = smov 0  }
   0x3 LB: > { %s22_s17 = sadd.s32 1, %s482_s14  ;;  %s25_s18 = sadd.s32 1, %s486_s15  ;;  %s490_s16 = sphi %s520_s16, %s13_s16   ;;  %s486_s15 = sphi %s518_s15, %s588_s15   ;;  %s482_s14 = sphi %s516_s14, %s587_s14   ;;  %s478_s13 = sphi %s514_s13, %s586_s13   ;;  %s474_s12 = sphi %s512_s12, %s585_s12  }
   0x4   : > { %p23_p0 = scmp.ge.s32.totalorder %s22_s17, 4  ;;  %p378_p1 = scmp.ge.s32.totalorder %s490_s16, 1 }
   0x5   : > { %p161_p2 = scmp.lt.s32.totalorder %s490_s16, 9 }
   0x6   : > { %s590_s17 = smov (%p23_p0, %s22_s17), 0  ;;  %s592_s18 = smov (!%p23_p0, %s25_s18), %s486_s15 }
   0x7   : > { %p162_p3 = pnand %p378_p1, %p161_p2  ;;  %p27_p4 = scmp.ge.s32.totalorder %s592_s18, 2 }
   0x8   : > { %s379_s21 = sshll.u32 (!%p162_p3), %s474_s12, 3  ;;  %p194_p5 = scmp.lt.s32.totalorder (!%p162_p3), %s478_s13, 1 }
   0x9   : > { %s594_s18 = smov (%p27_p4, %s592_s18), 0  ;;  %165 = sbr.rel (%p162_p3) target bundleno = 165 (0xa5), region = 32 }
   0xa   : > { %p196_p6 = scmp.lt.s32.totalorder (!%p162_p3), %s379_s21, 31  ;;  %p206_p7 = scmp.lt.s32.totalorder (!%p162_p3), %s474_s12, 3 }
   0xe   : > { %v401_v0 = vld [vmem:[%s582_s1 + $0x8] sm:$0xff]  ;;  %v400_v1 = vld [vmem:[%s582_s1] sm:$0xff]  ;;  %s596_s13 = smov (!%p194_p5, %s478_s13), 1  ;;  %s598_s21 = smov (!%p196_p6, %s379_s21), 31  ;;  %vm242_vm0 = vcmask 1041409   ;;  %vm245_vm1 = vcmask 1042434  }
   0xf   : > { %273 = vmatpush.bf16.msra.mxu0 %v401_v0  ;;  %s381_s24 = sshll.u32 %s596_s13, 7  ;;  %s380_s25 = sshll.u32 %s598_s21, 2  ;;  %vm248_vm2 = vcmask 1043459   ;;  %vm263_vm3 = vcmask 261120   ;;  %v451_v19 = vld [vmem:[%s583_s2] ss:$0 sm:$0xff] }
  0x10   : > { %s200_s26 = sadd.s32 %s381_s24, %s380_s25  ;;  %s600_s12 = smov (!%p206_p7, %s474_s12), 3  ;;  %vm281_vm4 = vcmask 254976  }
  0x11   : > { %s382_s27 = sshll.u32 %s200_s26, 2  ;;  %s383_s4 = sshll.u32 %s596_s13, 2 }
  0x12   : > { %s202_s30 = scalar_lea.vmem %s581_s0, %s382_s27  ;;  %s209_s5 = sadd.s32 %s383_s4, %s600_s12 }
  0x13   : > { %274 = vmatpush.bf16.msra.mxu0 %v400_v1  ;;  %v403_v2 = vld [vmem:[%s202_s30] sm:$0xff]   ;;  %v410_v3 = vld [vmem:[%s202_s30 + $0x8] sm:$0xff]   ;;  %s384_s8 = sshll.u32 %s209_s5, 1 }
  0x14   : > { %v404_v4 = vunpack.c.l.b16 %v403_v2  ;;  %v405_v5 = vunpack.c.h.b16 %v403_v2  ;;  %v408_v6 = vunpack.c.l.b16 %v410_v3  ;;  %v409_v7 = vunpack.c.h.b16 %v410_v3  ;;  %s211_s11 = scalar_lea.vmem %s584_s3, %s384_s8 }
  0x16   : > { %v385_v8 = vunpack.i.l.s16 %v404_v4  ;;  %v386_v9 = vunpack.i.l.s16 %v405_v5  ;;  %v387_v10 = vunpack.i.l.s16 %v408_v6  ;;  %v388_v11 = vunpack.i.l.s16 %v409_v7 }
  0x18   : > { %v241_v12 = vrot.slane %v386_v9, 7  ;;  %v244_v13 = vrot.slane %v387_v10, 6  ;;  %v247_v14 = vrot.slane %v388_v11, 5 }
  0x1a   : > { %v243_v15 = vsel %vm242_vm0, %v241_v12, %v385_v8 }
  0x1b   : > { %v246_v16 = vsel %vm245_vm1, %v244_v13, %v243_v15 }
  0x1c   : > { %v249_v17 = vsel %vm248_vm2, %v247_v14, %v246_v16 }
  0x1d   : > { %v250_v18 = vpack.c.b16 %v249_v17, %v249_v17 }
  0x1f   : > { %397 = vmatmul.msk.bf16.vlgmr.msra.gmra.mxu0 %vm263_vm3, %v250_v18 }
  0x9c   : > { %v276_v20 = vpop.f32.mrf.mxu0 }
  0x9d   : > { %v277_v21 = vadd.f32 %v451_v19, %v276_v20 }
  0x9f   : > { %v280_v22 = vpack.c.bf16 %v277_v21, %v277_v21 }
  0xa1   : > { %282 = vst.msk [vmem:[%s211_s11] sm:$0x3] %vm281_vm4, %v280_v22 }
  0xa4   : > { %v278_v23 = vpop.f32.mrf.mxu0 }
  0xa5 PF: > { %s13_s16 = sadd.s32 1, %s490_s16   ;;  %s585_s12 = smov %s482_s14 }
  0xa6   : > { %p10_p8 = scmp.ge.s32.totalorder %s13_s16, 10   ;;  %s586_s13 = smov %s486_s15 }
  0xa7   : > { %s587_s14 = smov %s590_s17  ;;  %s588_s15 = smov %s594_s18 }
  0xa8   :  { %12 = sbr.rel (!%p10_p8) target bundleno = 3 (0x3), region = 62 }

// kernel: edgepoint_forward.37
= control target key start
LH: loop header
LB: loop body
LE: loop exit
PB: predicated region body
PF: predicated region fallthrough
CT: control target
= control target key end

     0   :  { %s287_s0 = inlined_call_operand.vmem [shape: bf16[32,128], index: 0, kind: input, shape index: {}]   ;;  %s288_s1 = inlined_call_operand.vmem [shape: bf16[128,128], index: 1, kind: input, shape index: {}]   ;;  %s289_s2 = inlined_call_operand.vmem [shape: f32[1,128], index: 2, kind: input, shape index: {}]   ;;  %s290_s3 = inlined_call_operand.hbm [shape: f32[32,128], index: 3, kind: output, shape index: {}]  }
   0x1   :  { %v189_v0 = vld [vmem:[%s288_s1 + $0x38] sm:$0xff]  ;;  %v188_v1 = vld [vmem:[%s288_s1 + $0x30] sm:$0xff] }
   0x2   :  { %99 = vmatpush.bf16.msra.mxu0 %v189_v0  ;;  %190 = vmatpush.bf16.msra.mxu1 %v189_v0 }
   0x3   :  { %8 = vsyncpa [#allocation3], 0  ;;  %v187_v2 = vld [vmem:[%s288_s1 + $0x28] sm:$0xff]  ;;  %v186_v3 = vld [vmem:[%s288_s1 + $0x20] sm:$0xff]  ;;  %s230_s10 = smov 8  }
   0x4   :  { %v185_v4 = vld [vmem:[%s288_s1 + $0x18] sm:$0xff]  ;;  %v184_v5 = vld [vmem:[%s288_s1 + $0x10] sm:$0xff]  ;;  %v183_v6 = vld [vmem:[%s288_s1 + $0x8] sm:$0xff] }
   0x5   :  { %v182_v7 = vld [vmem:[%s288_s1] sm:$0xff]  ;;  %v181_v9 = vld [vmem:[%s287_s0 + $0x8] sm:$0xff]  ;;  %s228_s1 = smov [#allocation2]  }
   0x6   :  { %100 = vmatpush.bf16.msra.mxu0 %v188_v1  ;;  %191 = vmatpush.bf16.msra.mxu1 %v188_v1  ;;  %v180_v8 = vld [vmem:[%s287_s0] sm:$0xff]  ;;  %s126_s7 = sshll.u32 %s228_s1, 4  ;;  %s128_s0 = sshll.u32 %s290_s3, 4  ;;  %s127_s7 = int_to_ptr.vmem [resolvable:$true] %s126_s7  ;;  %s129_s0 = int_to_ptr.hbm [resolvable:$true] %s128_s0 }
   0x7   :  { %v201_v10 = vld [vmem:[%s289_s2] ss:$0 sm:$0xff]  ;;  %s229_s2 = smov 128  }
   0xa   :  { %101 = vmatpush.bf16.msra.mxu0 %v187_v2  ;;  %192 = vmatpush.bf16.msra.mxu1 %v187_v2 }
   0xe   :  { %102 = vmatpush.bf16.msra.mxu0 %v186_v3  ;;  %193 = vmatpush.bf16.msra.mxu1 %v186_v3 }
  0x12   :  { %103 = vmatpush.bf16.msra.mxu0 %v185_v4  ;;  %194 = vmatpush.bf16.msra.mxu1 %v185_v4 }
  0x16   :  { %104 = vmatpush.bf16.msra.mxu0 %v184_v5  ;;  %195 = vmatpush.bf16.msra.mxu1 %v184_v5 }
  0x1a   :  { %105 = vmatpush.bf16.msra.mxu0 %v183_v6  ;;  %196 = vmatpush.bf16.msra.mxu1 %v183_v6 }
  0x1e   :  { %106 = vmatpush.bf16.msra.mxu0 %v182_v7  ;;  %197 = vmatpush.bf16.msra.mxu1 %v182_v7 }
  0x21   :  { %107 = vmatmul.bf16.vlgmr.msra.gmra.mxu0 %v180_v8  ;;  %112 = vmatmul.bf16.vlgmr.msra.gmra.mxu1 %v181_v9 }
  0x9e   :  { %v108_v11 = vpop.f32.mrf.mxu0  ;;  %v113_v12 = vpop.f32.mrf.mxu1 }
  0x9f   :  { %v109_v13 = vadd.f32 %v201_v10, %v108_v11  ;;  %v114_v14 = vadd.f32 %v201_v10, %v113_v12 }
  0xa1   :  { %118 = vst [vmem:[#allocation2] sm:$0xff] %v109_v13 }
  0xa2   :  { %120 = vst [vmem:[#allocation2 + $0x10] sm:$0xff] %v114_v14 }
  0xa6   :  { %v110_v15 = vpop.f32.mrf.mxu0  ;;  %v115_v16 = vpop.f32.mrf.mxu1 }
  0xa7   :  { %v111_v17 = vadd.f32 %v201_v10, %v110_v15  ;;  %v116_v18 = vadd.f32 %v201_v10, %v115_v16 }
  0xa9   :  { %119 = vst [vmem:[#allocation2 + $0x8] sm:$0xff] %v111_v17 }
  0xaa   :  { %121 = vst [vmem:[#allocation2 + $0x18] sm:$0xff] %v116_v18 }
  0xab   :  { %134 = dma.vmem_to_hbm [thread:$0]  %s127_s7, 512, %s129_s0, [#allocation3], %s229_s2, %s229_s2, %s230_s10  }
  0xac   :  { %226 = dma.done.wait [#allocation3], 512  }
  0xad   :  { %227 = vsyncadd [#allocation3], 4294966784 }
  0xae   :  { %139 = vsyncpa [#allocation3], 1 }

</bundles_post_ra>
